<compile_context>
chip_gen: v5e
topology: v5e:2x2
jax: 0.10.0
libtpu: 0.0.40
codegen_flags: <defaults>
</compile_context>

<pallas_src>
import jax
import jax.numpy as jnp
from jax import lax
from jax.experimental import pallas as pl
from jax.experimental.pallas import tpu as pltpu


# ------------------------------- kernel -------------------------------------


def _gateloop_block_kernel(gamma_ref, wq_ref, wkva_ref, x_ref,
                           o_ref, a_last_ref, h_last_ref,
                           h_state):
    """One (batch_tile, seq_chunk) grid step: run every layer on this chunk.

    gamma_ref : (depth, D)        RMSNorm gains              (resident, f32)
    wq_ref    : (depth, D, D)     q projection weights       (resident, bf16)
    wkva_ref  : (depth, D, 2D)    kv/a projection weights    (resident, bf16)
    x_ref     : (TB, TN, D)       input chunk
    o_ref     : (TB, TN, D)       output chunk (x + residual layer outputs)
    a_last_ref: (TB, depth, D)    per-layer last gate  (cache, written on last chunk)
    h_last_ref: (TB, depth, D)    per-layer last state (cache, written on last chunk)
    h_state   : (depth, TB, D)    VMEM scratch: recurrent state carried across seq chunks
    """
    s = pl.program_id(1)
    num_chunks = pl.num_programs(1)

    @pl.when(s == 0)
    def _init():
        h_state[...] = jnp.zeros_like(h_state)

    y = x_ref[...].astype(jnp.float32)                      # (TB, TN, D)
    TB, TN, D = y.shape
    R = TB * TN
    depth = wq_ref.shape[0]
    rms_scale = float(D) ** 0.5

    # Row-within-chunk index for every merged row; hoisted once, reused by every scan
    # stage of every layer (cheap compare per stage instead of rebuilding pad tensors).
    pos = lax.broadcasted_iota(jnp.int32, (TB, TN, D), 1).reshape(R, D)

    # depth is small here; static unroll is fine.
    # TODO(synk): switch to lax.fori_loop with dynamic w/gamma/h_state indexing if depth >= 4.
    for l in range(depth):
        # ---- RMSNorm prenorm: F.normalize(y, dim=-1) * sqrt(D) * gamma ----
        x2 = y.reshape(R, D)                                 # leading-dim merge: free relayout
        ss = jnp.sum(x2 * x2, axis=-1, keepdims=True)        # (R, 1), XLU reduce
        inv = lax.rsqrt(jnp.maximum(ss, 1e-24))              # EUP; (1e-12)^2 norm clamp
        g = rms_scale * gamma_ref[l:l + 1, :]                # (1, D)
        xn = (x2 * inv * g).astype(jnp.bfloat16)             # bf16 MXU inputs

        # ---- kv / a projection on the MXU (q deferred until after the scan) ----
        kva = jnp.dot(xn, wkva_ref[l], preferred_element_type=jnp.float32)   # (R, 2D) f32
        kv = kva[:, :D]
        a = jax.nn.sigmoid(kva[:, D:])

        # ---- within-chunk inclusive scan of h_t = a_t * h_{t-1} + kv_t ----
        # Hillis-Steele prefix scan on the merged (R, D) view. Shifted operands come from
        # pltpu.roll (sublane rotate, XLU); rows whose source falls before the start of
        # their batch chunk are replaced by the identity (A=1, H=0) via a masked select.
        A, H = a, kv
        off = 1
        while off < TN:
            m = pos < off
            A_prev = jnp.where(m, 1.0, pltpu.roll(A, off, 0))
            H_prev = jnp.where(m, 0.0, pltpu.roll(H, off, 0))
            H = H + A * H_prev          # uses pre-update A
            A = A * A_prev
            off *= 2

        # Fold in the state carried from the previous sequence chunk.
        A3 = A.reshape(TB, TN, D)
        H3 = H.reshape(TB, TN, D)
        h3 = H3 + A3 * h_state[l][:, None, :]                # (TB, TN, D)
        h_last_row = h3[:, TN - 1, :]                        # (TB, D)
        h_state[l] = h_last_row

        # ---- deferred q projection, gating and residual ----
        q = jnp.dot(xn, wq_ref[l],
                    preferred_element_type=jnp.float32).reshape(TB, TN, D)
        y = y + q * h3                                       # GateLoopBlock residual

        @pl.when(s == num_chunks - 1)
        def _store_cache(l=l, a=a, h_last_row=h_last_row):
            a3_last = a.reshape(TB, TN, D)[:, TN - 1:TN, :]
            a_last_ref[:, l:l + 1, :] = a3_last
            h_last_ref[:, l:l + 1, :] = h_last_row[:, None, :]

    o_ref[...] = y.astype(o_ref.dtype)


# ------------------------------- wrapper ------------------------------------


def gateloop_block(x, gammas, ws, *, batch_tile=None, seq_tile=None):
    """GateLoopBlock forward (cache=None path).

    x      : (B, N, D) float32
    gammas : (depth, D)      per-layer RMSNorm gain
    ws     : (depth, D, 3D)  per-layer qkva weight (transposed nn.Linear weight)
    Returns (y, new_caches): y (B, N, D); new_caches = [(a_last, h_last)] per layer, each (B, D).
    """
    B, N, D = x.shape
    depth = ws.shape[0]
    # Default to >= 2 batch grid steps so v7x's two TensorCores are both used.
    TB = batch_tile if batch_tile is not None else max(1, B // 2)
    TN = seq_tile if seq_tile is not None else min(N, 128)
    assert B % TB == 0 and N % TN == 0
    assert TN % 8 == 0 and D % 128 == 0, "keep blocks (8,128)-aligned / lane-dense"

    # bf16 weights: native single-pass MXU matmul (f32 accumulation), half the VMEM footprint.
    wq = ws[:, :, :D].astype(jnp.bfloat16)                   # (depth, D, D)
    wkva = ws[:, :, D:].astype(jnp.bfloat16)                 # (depth, D, 2D)
    gammas = gammas.astype(jnp.float32)

    grid = (B // TB, N // TN)
    stages = max(1, (TN - 1).bit_length())

    cost = pl.CostEstimate(
        flops=depth * B * N * (2 * D * 3 * D + 4 * D * stages + 12 * D),
        transcendentals=depth * B * N * (D + 1),
        bytes_accessed=(4 * 2 * B * N * D            # x in + y out
                        + 2 * depth * D * 3 * D      # bf16 weights
                        + 4 * depth * D              # gammas
                        + 4 * 2 * B * depth * D),    # caches
    )

    y, a_last, h_last = pl.pallas_call(
        _gateloop_block_kernel,
        out_shape=(
            jax.ShapeDtypeStruct((B, N, D), x.dtype),
            jax.ShapeDtypeStruct((B, depth, D), jnp.float32),
            jax.ShapeDtypeStruct((B, depth, D), jnp.float32),
        ),
        grid_spec=pltpu.PrefetchScalarGridSpec(
            num_scalar_prefetch=0,
            grid=grid,
            in_specs=[
                pl.BlockSpec((depth, D), lambda b, s: (0, 0)),              # gammas
                pl.BlockSpec((depth, D, D), lambda b, s: (0, 0, 0)),        # wq
                pl.BlockSpec((depth, D, 2 * D), lambda b, s: (0, 0, 0)),    # wkva
                pl.BlockSpec((TB, TN, D), lambda b, s: (b, s, 0)),          # x
            ],
            out_specs=(
                pl.BlockSpec((TB, TN, D), lambda b, s: (b, s, 0)),          # y
                pl.BlockSpec((TB, depth, D), lambda b, s: (b, 0, 0)),       # a_last cache
                pl.BlockSpec((TB, depth, D), lambda b, s: (b, 0, 0)),       # h_last cache
            ),
            scratch_shapes=[pltpu.VMEM((depth, TB, D), jnp.float32)],
        ),
        compiler_params=pltpu.CompilerParams(
            dimension_semantics=("parallel", "arbitrary"),
            vmem_limit_bytes=32 * 1024 * 1024,
        ),
        cost_estimate=cost,
    )(gammas, wq, wkva, x)

    new_caches = [(a_last[:, l, :], h_last[:, l, :]) for l in range(depth)]
    return y, new_caches


# ---------------------------- JAX reference ----------------------------------


def _rmsnorm_ref(x, gamma):
    ss = jnp.sum(x * x, axis=-1, keepdims=True)
    inv = lax.rsqrt(jnp.maximum(ss, 1e-24))
    return x * inv * (float(x.shape[-1]) ** 0.5) * gamma


def gateloop_block_ref(x, gammas, ws):
    B, N, D = x.shape
    depth = ws.shape[0]
    caches = []
    for l in range(depth):
        xn = _rmsnorm_ref(x, gammas[l])
        qkva = jnp.einsum("bnd,df->bnf", xn, ws[l],
                          precision=lax.Precision.HIGHEST)
        q = qkva[..., :D]
        kv = qkva[..., D:2 * D]
        a = jax.nn.sigmoid(qkva[..., 2 * D:])

        def step(h, inp):
            a_t, kv_t = inp
            h = a_t * h + kv_t
            return h, h

        _, hs = lax.scan(step, jnp.zeros((B, D), jnp.float32),
                         (jnp.swapaxes(a, 0, 1), jnp.swapaxes(kv, 0, 1)))
        hs = jnp.swapaxes(hs, 0, 1)                          # (B, N, D)
        out = q * hs
        caches.append((a[:, -1, :], hs[:, -1, :]))
        x = x + out
    return x, caches


# --------------------------------- main --------------------------------------


if __name__ == "__main__":
    B, N, D, depth = 4, 256, 128, 2
    key = jax.random.PRNGKey(0)
    kx, kg, kw = jax.random.split(key, 3)

    x = jax.random.normal(kx, (B, N, D), dtype=jnp.float32)
    gammas = 1.0 + 0.1 * jax.random.normal(kg, (depth, D), dtype=jnp.float32)
    lim = 1.0 / (D ** 0.5)                                   # nn.Linear(D, 3D) init bound
    ws = jax.random.uniform(kw, (depth, D, 3 * D), jnp.float32,
                            minval=-lim, maxval=lim)

    # grid = (B/TB, N/TN) = (2, 2): parallel batch axis (megacore/dual-TC) + carried seq chunks.
    y, caches = gateloop_block(x, gammas, ws, batch_tile=2, seq_tile=128)
    y = jax.block_until_ready(y)

    y_ref, caches_ref = gateloop_block_ref(x, gammas, ws)

    # Tolerances: the kernel uses bf16 MXU inputs (f32 accumulation) for the projection,
    # and the gated recurrence amplifies per-element rounding by up to ~1/(1-a); the
    # L2-relative error is the meaningful check, max-abs is a loose tail bound.
    def _close(got, want, atol=1e-1, rel_tol=2e-2):
        rel = jnp.linalg.norm(got - want) / (jnp.linalg.norm(want) + 1e-12)
        return bool(jnp.max(jnp.abs(got - want)) < atol) and bool(rel < rel_tol)

    assert _close(y, y_ref), "GateLoopBlock output mismatch vs JAX reference"
    for (a_k, h_k), (a_r, h_r) in zip(caches, caches_ref):
        assert _close(a_k, a_r) and _close(h_k, h_r), "cache mismatch vs JAX reference"

    print("KERNEL_OK")
</pallas_src>

<mosaic_0001>
module attributes {stable_mosaic.version = 11 : i64} {
  func.func @_gateloop_block_kernel(%arg0: i32, %arg1: i32, %arg2: memref<2x128xf32, #tpu.memory_space<vmem>>, %arg3: memref<2x128x128xbf16, #tpu.memory_space<vmem>>, %arg4: memref<2x128x256xbf16, #tpu.memory_space<vmem>>, %arg5: memref<2x128x128xf32, #tpu.memory_space<vmem>>, %arg6: memref<2x128x128xf32, #tpu.memory_space<vmem>>, %arg7: memref<2x2x128xf32, #tpu.memory_space<vmem>>, %arg8: memref<2x2x128xf32, #tpu.memory_space<vmem>>, %arg9: memref<2x2x128xf32, #tpu.memory_space<vmem>>) attributes {dimension_semantics = [#tpu.dimension_semantics<parallel>, #tpu.dimension_semantics<arbitrary>], iteration_bounds = array<i64: 2, 2>, scalar_prefetch = 0 : i64, scratch_operands = 1 : i64, tpu.core_type = #tpu.core_type<tc>, window_params = [{pipeline_mode = #tpu.pipeline_mode<synchronous>, transform_indices = @transform_0, window_bounds = array<i64: 2, 128>}, {pipeline_mode = #tpu.pipeline_mode<synchronous>, transform_indices = @transform_1, window_bounds = array<i64: 2, 128, 128>}, {pipeline_mode = #tpu.pipeline_mode<synchronous>, transform_indices = @transform_2, window_bounds = array<i64: 2, 128, 256>}, {transform_indices = @transform_3, window_bounds = array<i64: 2, 128, 128>}, {transform_indices = @transform_4, window_bounds = array<i64: 2, 128, 128>}, {transform_indices = @transform_5, window_bounds = array<i64: 2, 2, 128>}, {transform_indices = @transform_6, window_bounds = array<i64: 2, 2, 128>}]} {
    %c0_i32 = arith.constant 0 : i32
    %0 = arith.cmpi eq, %arg1, %c0_i32 : i32
    %1 = arith.extui %0 : i1 to i32
    %c0_i32_0 = arith.constant 0 : i32
    %2 = arith.cmpi ne, %1, %c0_i32_0 : i32
    scf.if %2 {
      %cst_111 = arith.constant 0.000000e+00 : f32
      %255 = vector.broadcast %cst_111 : f32 to vector<2x2x128xf32>
      %c0_112 = arith.constant 0 : index
      %c0_113 = arith.constant 0 : index
      %c0_114 = arith.constant 0 : index
      %256 = vector.load %arg9[%c0_112, %c0_113, %c0_114] : memref<2x2x128xf32, #tpu.memory_space<vmem>>, vector<2x2x128xf32>
      tpu.vector_store %arg9[%c0_112, %c0_113, %c0_114], %255 {strides = array<i32>} : memref<2x2x128xf32, #tpu.memory_space<vmem>>, vector<2x2x128xf32>,
    } else {
    }
    %c0 = arith.constant 0 : index
    %c0_1 = arith.constant 0 : index
    %c0_2 = arith.constant 0 : index
    %3 = vector.load %arg5[%c0, %c0_1, %c0_2] : memref<2x128x128xf32, #tpu.memory_space<vmem>>, vector<2x128x128xf32>
    %4 = tpu.iota {dimensions = array<i32: 1>} : vector<2x128x128xi32>
    %5 = vector.shape_cast %4 : vector<2x128x128xi32> to vector<256x128xi32>
    %6 = vector.shape_cast %3 : vector<2x128x128xf32> to vector<256x128xf32>
    %7 = arith.mulf %6, %6 : vector<256x128xf32>
    %cst = arith.constant dense<0.000000e+00> : vector<256xf32>
    %8 = vector.multi_reduction <add>, %7, %cst [1] : vector<256x128xf32> to vector<256xf32>
    %9 = vector.shape_cast %8 : vector<256xf32> to vector<256x1xf32>
    %cst_3 = arith.constant 1.000000e-24 : f32
    %10 = vector.broadcast %cst_3 : f32 to vector<256x1xf32>
    %11 = arith.maximumf %9, %10 : vector<256x1xf32>
    %12 = math.rsqrt %11 : vector<256x1xf32>
    %c0_4 = arith.constant 0 : index
    %c0_5 = arith.constant 0 : index
    %13 = vector.load %arg2[%c0_4, %c0_5] : memref<2x128xf32, #tpu.memory_space<vmem>>, vector<1x128xf32>
    %cst_6 = arith.constant 11.3137083 : f32
    %14 = vector.broadcast %cst_6 : f32 to vector<1x128xf32>
    %15 = arith.mulf %14, %13 : vector<1x128xf32>
    %16 = vector.broadcast %12 : vector<256x1xf32> to vector<256x128xf32>
    %17 = arith.mulf %6, %16 : vector<256x128xf32>
    %18 = vector.broadcast %15 : vector<1x128xf32> to vector<256x128xf32>
    %19 = arith.mulf %17, %18 : vector<256x128xf32>
    %20 = arith.truncf %19 : vector<256x128xf32> to vector<256x128xbf16>
    %c0_7 = arith.constant 0 : index
    %c0_8 = arith.constant 0 : index
    %c0_9 = arith.constant 0 : index
    %21 = vector.load %arg4[%c0_7, %c0_8, %c0_9] : memref<2x128x256xbf16, #tpu.memory_space<vmem>>, vector<1x128x256xbf16>
    %22 = vector.shape_cast %21 : vector<1x128x256xbf16> to vector<128x256xbf16>
    %cst_10 = arith.constant dense<0.000000e+00> : vector<256x256xf32>
    %23 = tpu.matmul %20, %22, %cst_10 {dimension_numbers = #tpu.dot_dimension_numbers<[1], [0], [0], [1], [0, 0, 1, 1], [], []>} : vector<256x128xbf16>, vector<128x256xbf16>, vector<256x256xf32> -> vector<256x256xf32>
    %24 = vector.extract_strided_slice %23 {offsets = [0, 0], sizes = [256, 128], strides = [1, 1]} : vector<256x256xf32> to vector<256x128xf32>
    %25 = vector.extract_strided_slice %23 {offsets = [0, 128], sizes = [256, 128], strides = [1, 1]} : vector<256x256xf32> to vector<256x128xf32>
    %26 = arith.negf %25 : vector<256x128xf32>
    %27 = math.exp %26 : vector<256x128xf32>
    %cst_11 = arith.constant 1.000000e+00 : f32
    %28 = vector.broadcast %cst_11 : f32 to vector<256x128xf32>
    %29 = arith.addf %28, %27 : vector<256x128xf32>
    %30 = arith.divf %28, %29 : vector<256x128xf32>
    %c1_i32 = arith.constant 1 : i32
    %31 = vector.broadcast %c1_i32 : i32 to vector<256x128xi32>
    %32 = arith.cmpi slt, %5, %31 : vector<256x128xi32>
    %c1_i32_12 = arith.constant 1 : i32
    %33 = tpu.dynamic_rotate %30 by %c1_i32_12 dim 0 : vector<256x128xf32>, i32 -> vector<256x128xf32>
    %cst_13 = arith.constant 1.000000e+00 : f32
    %34 = vector.broadcast %cst_13 : f32 to vector<256x128xf32>
    %35 = arith.select %32, %34, %33 : vector<256x128xi1>, vector<256x128xf32>
    %c1_i32_14 = arith.constant 1 : i32
    %36 = tpu.dynamic_rotate %24 by %c1_i32_14 dim 0 : vector<256x128xf32>, i32 -> vector<256x128xf32>
    %cst_15 = arith.constant 0.000000e+00 : f32
    %37 = vector.broadcast %cst_15 : f32 to vector<256x128xf32>
    %38 = arith.select %32, %37, %36 : vector<256x128xi1>, vector<256x128xf32>
    %39 = arith.mulf %30, %38 : vector<256x128xf32>
    %40 = arith.addf %24, %39 : vector<256x128xf32>
    %41 = arith.mulf %30, %35 : vector<256x128xf32>
    %c2_i32 = arith.constant 2 : i32
    %42 = vector.broadcast %c2_i32 : i32 to vector<256x128xi32>
    %43 = arith.cmpi slt, %5, %42 : vector<256x128xi32>
    %c2_i32_16 = arith.constant 2 : i32
    %44 = tpu.dynamic_rotate %41 by %c2_i32_16 dim 0 : vector<256x128xf32>, i32 -> vector<256x128xf32>
    %cst_17 = arith.constant 1.000000e+00 : f32
    %45 = vector.broadcast %cst_17 : f32 to vector<256x128xf32>
    %46 = arith.select %43, %45, %44 : vector<256x128xi1>, vector<256x128xf32>
    %c2_i32_18 = arith.constant 2 : i32
    %47 = tpu.dynamic_rotate %40 by %c2_i32_18 dim 0 : vector<256x128xf32>, i32 -> vector<256x128xf32>
    %cst_19 = arith.constant 0.000000e+00 : f32
    %48 = vector.broadcast %cst_19 : f32 to vector<256x128xf32>
    %49 = arith.select %43, %48, %47 : vector<256x128xi1>, vector<256x128xf32>
    %50 = arith.mulf %41, %49 : vector<256x128xf32>
    %51 = arith.addf %40, %50 : vector<256x128xf32>
    %52 = arith.mulf %41, %46 : vector<256x128xf32>
    %c4_i32 = arith.constant 4 : i32
    %53 = vector.broadcast %c4_i32 : i32 to vector<256x128xi32>
    %54 = arith.cmpi slt, %5, %53 : vector<256x128xi32>
    %c4_i32_20 = arith.constant 4 : i32
    %55 = tpu.dynamic_rotate %52 by %c4_i32_20 dim 0 : vector<256x128xf32>, i32 -> vector<256x128xf32>
    %cst_21 = arith.constant 1.000000e+00 : f32
    %56 = vector.broadcast %cst_21 : f32 to vector<256x128xf32>
    %57 = arith.select %54, %56, %55 : vector<256x128xi1>, vector<256x128xf32>
    %c4_i32_22 = arith.constant 4 : i32
    %58 = tpu.dynamic_rotate %51 by %c4_i32_22 dim 0 : vector<256x128xf32>, i32 -> vector<256x128xf32>
    %cst_23 = arith.constant 0.000000e+00 : f32
    %59 = vector.broadcast %cst_23 : f32 to vector<256x128xf32>
    %60 = arith.select %54, %59, %58 : vector<256x128xi1>, vector<256x128xf32>
    %61 = arith.mulf %52, %60 : vector<256x128xf32>
    %62 = arith.addf %51, %61 : vector<256x128xf32>
    %63 = arith.mulf %52, %57 : vector<256x128xf32>
    %c8_i32 = arith.constant 8 : i32
    %64 = vector.broadcast %c8_i32 : i32 to vector<256x128xi32>
    %65 = arith.cmpi slt, %5, %64 : vector<256x128xi32>
    %c8_i32_24 = arith.constant 8 : i32
    %66 = tpu.dynamic_rotate %63 by %c8_i32_24 dim 0 : vector<256x128xf32>, i32 -> vector<256x128xf32>
    %cst_25 = arith.constant 1.000000e+00 : f32
    %67 = vector.broadcast %cst_25 : f32 to vector<256x128xf32>
    %68 = arith.select %65, %67, %66 : vector<256x128xi1>, vector<256x128xf32>
    %c8_i32_26 = arith.constant 8 : i32
    %69 = tpu.dynamic_rotate %62 by %c8_i32_26 dim 0 : vector<256x128xf32>, i32 -> vector<256x128xf32>
    %cst_27 = arith.constant 0.000000e+00 : f32
    %70 = vector.broadcast %cst_27 : f32 to vector<256x128xf32>
    %71 = arith.select %65, %70, %69 : vector<256x128xi1>, vector<256x128xf32>
    %72 = arith.mulf %63, %71 : vector<256x128xf32>
    %73 = arith.addf %62, %72 : vector<256x128xf32>
    %74 = arith.mulf %63, %68 : vector<256x128xf32>
    %c16_i32 = arith.constant 16 : i32
    %75 = vector.broadcast %c16_i32 : i32 to vector<256x128xi32>
    %76 = arith.cmpi slt, %5, %75 : vector<256x128xi32>
    %c16_i32_28 = arith.constant 16 : i32
    %77 = tpu.dynamic_rotate %74 by %c16_i32_28 dim 0 : vector<256x128xf32>, i32 -> vector<256x128xf32>
    %cst_29 = arith.constant 1.000000e+00 : f32
    %78 = vector.broadcast %cst_29 : f32 to vector<256x128xf32>
    %79 = arith.select %76, %78, %77 : vector<256x128xi1>, vector<256x128xf32>
    %c16_i32_30 = arith.constant 16 : i32
    %80 = tpu.dynamic_rotate %73 by %c16_i32_30 dim 0 : vector<256x128xf32>, i32 -> vector<256x128xf32>
    %cst_31 = arith.constant 0.000000e+00 : f32
    %81 = vector.broadcast %cst_31 : f32 to vector<256x128xf32>
    %82 = arith.select %76, %81, %80 : vector<256x128xi1>, vector<256x128xf32>
    %83 = arith.mulf %74, %82 : vector<256x128xf32>
    %84 = arith.addf %73, %83 : vector<256x128xf32>
    %85 = arith.mulf %74, %79 : vector<256x128xf32>
    %c32_i32 = arith.constant 32 : i32
    %86 = vector.broadcast %c32_i32 : i32 to vector<256x128xi32>
    %87 = arith.cmpi slt, %5, %86 : vector<256x128xi32>
    %c32_i32_32 = arith.constant 32 : i32
    %88 = tpu.dynamic_rotate %85 by %c32_i32_32 dim 0 : vector<256x128xf32>, i32 -> vector<256x128xf32>
    %cst_33 = arith.constant 1.000000e+00 : f32
    %89 = vector.broadcast %cst_33 : f32 to vector<256x128xf32>
    %90 = arith.select %87, %89, %88 : vector<256x128xi1>, vector<256x128xf32>
    %c32_i32_34 = arith.constant 32 : i32
    %91 = tpu.dynamic_rotate %84 by %c32_i32_34 dim 0 : vector<256x128xf32>, i32 -> vector<256x128xf32>
    %cst_35 = arith.constant 0.000000e+00 : f32
    %92 = vector.broadcast %cst_35 : f32 to vector<256x128xf32>
    %93 = arith.select %87, %92, %91 : vector<256x128xi1>, vector<256x128xf32>
    %94 = arith.mulf %85, %93 : vector<256x128xf32>
    %95 = arith.addf %84, %94 : vector<256x128xf32>
    %96 = arith.mulf %85, %90 : vector<256x128xf32>
    %c64_i32 = arith.constant 64 : i32
    %97 = vector.broadcast %c64_i32 : i32 to vector<256x128xi32>
    %98 = arith.cmpi slt, %5, %97 : vector<256x128xi32>
    %c64_i32_36 = arith.constant 64 : i32
    %99 = tpu.dynamic_rotate %96 by %c64_i32_36 dim 0 : vector<256x128xf32>, i32 -> vector<256x128xf32>
    %cst_37 = arith.constant 1.000000e+00 : f32
    %100 = vector.broadcast %cst_37 : f32 to vector<256x128xf32>
    %101 = arith.select %98, %100, %99 : vector<256x128xi1>, vector<256x128xf32>
    %c64_i32_38 = arith.constant 64 : i32
    %102 = tpu.dynamic_rotate %95 by %c64_i32_38 dim 0 : vector<256x128xf32>, i32 -> vector<256x128xf32>
    %cst_39 = arith.constant 0.000000e+00 : f32
    %103 = vector.broadcast %cst_39 : f32 to vector<256x128xf32>
    %104 = arith.select %98, %103, %102 : vector<256x128xi1>, vector<256x128xf32>
    %105 = arith.mulf %96, %104 : vector<256x128xf32>
    %106 = arith.addf %95, %105 : vector<256x128xf32>
    %107 = arith.mulf %96, %101 : vector<256x128xf32>
    %108 = vector.shape_cast %107 : vector<256x128xf32> to vector<2x128x128xf32>
    %109 = vector.shape_cast %106 : vector<256x128xf32> to vector<2x128x128xf32>
    %c0_40 = arith.constant 0 : index
    %c0_41 = arith.constant 0 : index
    %c0_42 = arith.constant 0 : index
    %110 = vector.load %arg9[%c0_40, %c0_41, %c0_42] : memref<2x2x128xf32, #tpu.memory_space<vmem>>, vector<1x2x128xf32>
    %111 = vector.shape_cast %110 : vector<1x2x128xf32> to vector<2x128xf32>
    %112 = vector.shape_cast %111 : vector<2x128xf32> to vector<2x1x128xf32>
    %113 = vector.broadcast %112 : vector<2x1x128xf32> to vector<2x128x128xf32>
    %114 = arith.mulf %108, %113 : vector<2x128x128xf32>
    %115 = arith.addf %109, %114 : vector<2x128x128xf32>
    %116 = vector.extract_strided_slice %115 {offsets = [0, 127, 0], sizes = [2, 1, 128], strides = [1, 1, 1]} : vector<2x128x128xf32> to vector<2x1x128xf32>
    %117 = vector.shape_cast %116 : vector<2x1x128xf32> to vector<2x128xf32>
    %c0_43 = arith.constant 0 : index
    %c0_44 = arith.constant 0 : index
    %c0_45 = arith.constant 0 : index
    %118 = vector.load %arg9[%c0_43, %c0_44, %c0_45] : memref<2x2x128xf32, #tpu.memory_space<vmem>>, vector<1x2x128xf32>
    %119 = vector.shape_cast %118 : vector<1x2x128xf32> to vector<2x128xf32>
    %120 = vector.shape_cast %117 : vector<2x128xf32> to vector<1x2x128xf32>
    tpu.vector_store %arg9[%c0_43, %c0_44, %c0_45], %120 {strides = array<i32>} : memref<2x2x128xf32, #tpu.memory_space<vmem>>, vector<1x2x128xf32>,
    %c0_46 = arith.constant 0 : index
    %c0_47 = arith.constant 0 : index
    %c0_48 = arith.constant 0 : index
    %121 = vector.load %arg3[%c0_46, %c0_47, %c0_48] : memref<2x128x128xbf16, #tpu.memory_space<vmem>>, vector<1x128x128xbf16>
    %122 = vector.shape_cast %121 : vector<1x128x128xbf16> to vector<128x128xbf16>
    %cst_49 = arith.constant dense<0.000000e+00> : vector<256x128xf32>
    %123 = tpu.matmul %20, %122, %cst_49 {dimension_numbers = #tpu.dot_dimension_numbers<[1], [0], [0], [1], [0, 0, 1, 1], [], []>} : vector<256x128xbf16>, vector<128x128xbf16>, vector<256x128xf32> -> vector<256x128xf32>
    %124 = vector.shape_cast %123 : vector<256x128xf32> to vector<2x128x128xf32>
    %125 = arith.mulf %124, %115 : vector<2x128x128xf32>
    %126 = arith.addf %3, %125 : vector<2x128x128xf32>
    %c1_i32_50 = arith.constant 1 : i32
    %127 = arith.cmpi eq, %arg1, %c1_i32_50 : i32
    %128 = arith.extui %127 : i1 to i32
    %c0_i32_51 = arith.constant 0 : i32
    %129 = arith.cmpi ne, %128, %c0_i32_51 : i32
    scf.if %129 {
      %255 = vector.shape_cast %30 : vector<256x128xf32> to vector<2x128x128xf32>
      %256 = vector.extract_strided_slice %255 {offsets = [0, 127, 0], sizes = [2, 1, 128], strides = [1, 1, 1]} : vector<2x128x128xf32> to vector<2x1x128xf32>
      %c0_111 = arith.constant 0 : index
      %c0_112 = arith.constant 0 : index
      %c0_113 = arith.constant 0 : index
      %257 = vector.load %arg7[%c0_111, %c0_112, %c0_113] : memref<2x2x128xf32, #tpu.memory_space<vmem>>, vector<2x1x128xf32>
      tpu.vector_store %arg7[%c0_111, %c0_112, %c0_113], %256 {strides = array<i32>} : memref<2x2x128xf32, #tpu.memory_space<vmem>>, vector<2x1x128xf32>,
      %258 = vector.shape_cast %117 : vector<2x128xf32> to vector<2x1x128xf32>
      %c0_114 = arith.constant 0 : index
      %c0_115 = arith.constant 0 : index
      %c0_116 = arith.constant 0 : index
      %259 = vector.load %arg8[%c0_114, %c0_115, %c0_116] : memref<2x2x128xf32, #tpu.memory_space<vmem>>, vector<2x1x128xf32>
      tpu.vector_store %arg8[%c0_114, %c0_115, %c0_116], %258 {strides = array<i32>} : memref<2x2x128xf32, #tpu.memory_space<vmem>>, vector<2x1x128xf32>,
    } else {
    }
    %130 = vector.shape_cast %126 : vector<2x128x128xf32> to vector<256x128xf32>
    %131 = arith.mulf %130, %130 : vector<256x128xf32>
    %cst_52 = arith.constant dense<0.000000e+00> : vector<256xf32>
    %132 = vector.multi_reduction <add>, %131, %cst_52 [1] : vector<256x128xf32> to vector<256xf32>
    %133 = vector.shape_cast %132 : vector<256xf32> to vector<256x1xf32>
    %cst_53 = arith.constant 1.000000e-24 : f32
    %134 = vector.broadcast %cst_53 : f32 to vector<256x1xf32>
    %135 = arith.maximumf %133, %134 : vector<256x1xf32>
    %136 = math.rsqrt %135 : vector<256x1xf32>
    %c1 = arith.constant 1 : index
    %c0_54 = arith.constant 0 : index
    %137 = vector.load %arg2[%c1, %c0_54] : memref<2x128xf32, #tpu.memory_space<vmem>>, vector<1x128xf32>
    %cst_55 = arith.constant 11.3137083 : f32
    %138 = vector.broadcast %cst_55 : f32 to vector<1x128xf32>
    %139 = arith.mulf %138, %137 : vector<1x128xf32>
    %140 = vector.broadcast %136 : vector<256x1xf32> to vector<256x128xf32>
    %141 = arith.mulf %130, %140 : vector<256x128xf32>
    %142 = vector.broadcast %139 : vector<1x128xf32> to vector<256x128xf32>
    %143 = arith.mulf %141, %142 : vector<256x128xf32>
    %144 = arith.truncf %143 : vector<256x128xf32> to vector<256x128xbf16>
    %c1_56 = arith.constant 1 : index
    %c0_57 = arith.constant 0 : index
    %c0_58 = arith.constant 0 : index
    %145 = vector.load %arg4[%c1_56, %c0_57, %c0_58] : memref<2x128x256xbf16, #tpu.memory_space<vmem>>, vector<1x128x256xbf16>
    %146 = vector.shape_cast %145 : vector<1x128x256xbf16> to vector<128x256xbf16>
    %cst_59 = arith.constant dense<0.000000e+00> : vector<256x256xf32>
    %147 = tpu.matmul %144, %146, %cst_59 {dimension_numbers = #tpu.dot_dimension_numbers<[1], [0], [0], [1], [0, 0, 1, 1], [], []>} : vector<256x128xbf16>, vector<128x256xbf16>, vector<256x256xf32> -> vector<256x256xf32>
    %148 = vector.extract_strided_slice %147 {offsets = [0, 0], sizes = [256, 128], strides = [1, 1]} : vector<256x256xf32> to vector<256x128xf32>
    %149 = vector.extract_strided_slice %147 {offsets = [0, 128], sizes = [256, 128], strides = [1, 1]} : vector<256x256xf32> to vector<256x128xf32>
    %150 = arith.negf %149 : vector<256x128xf32>
    %151 = math.exp %150 : vector<256x128xf32>
    %cst_60 = arith.constant 1.000000e+00 : f32
    %152 = vector.broadcast %cst_60 : f32 to vector<256x128xf32>
    %153 = arith.addf %152, %151 : vector<256x128xf32>
    %154 = arith.divf %152, %153 : vector<256x128xf32>
    %c1_i32_61 = arith.constant 1 : i32
    %155 = vector.broadcast %c1_i32_61 : i32 to vector<256x128xi32>
    %156 = arith.cmpi slt, %5, %155 : vector<256x128xi32>
    %c1_i32_62 = arith.constant 1 : i32
    %157 = tpu.dynamic_rotate %154 by %c1_i32_62 dim 0 : vector<256x128xf32>, i32 -> vector<256x128xf32>
    %cst_63 = arith.constant 1.000000e+00 : f32
    %158 = vector.broadcast %cst_63 : f32 to vector<256x128xf32>
    %159 = arith.select %156, %158, %157 : vector<256x128xi1>, vector<256x128xf32>
    %c1_i32_64 = arith.constant 1 : i32
    %160 = tpu.dynamic_rotate %148 by %c1_i32_64 dim 0 : vector<256x128xf32>, i32 -> vector<256x128xf32>
    %cst_65 = arith.constant 0.000000e+00 : f32
    %161 = vector.broadcast %cst_65 : f32 to vector<256x128xf32>
    %162 = arith.select %156, %161, %160 : vector<256x128xi1>, vector<256x128xf32>
    %163 = arith.mulf %154, %162 : vector<256x128xf32>
    %164 = arith.addf %148, %163 : vector<256x128xf32>
    %165 = arith.mulf %154, %159 : vector<256x128xf32>
    %c2_i32_66 = arith.constant 2 : i32
    %166 = vector.broadcast %c2_i32_66 : i32 to vector<256x128xi32>
    %167 = arith.cmpi slt, %5, %166 : vector<256x128xi32>
    %c2_i32_67 = arith.constant 2 : i32
    %168 = tpu.dynamic_rotate %165 by %c2_i32_67 dim 0 : vector<256x128xf32>, i32 -> vector<256x128xf32>
    %cst_68 = arith.constant 1.000000e+00 : f32
    %169 = vector.broadcast %cst_68 : f32 to vector<256x128xf32>
    %170 = arith.select %167, %169, %168 : vector<256x128xi1>, vector<256x128xf32>
    %c2_i32_69 = arith.constant 2 : i32
    %171 = tpu.dynamic_rotate %164 by %c2_i32_69 dim 0 : vector<256x128xf32>, i32 -> vector<256x128xf32>
    %cst_70 = arith.constant 0.000000e+00 : f32
    %172 = vector.broadcast %cst_70 : f32 to vector<256x128xf32>
    %173 = arith.select %167, %172, %171 : vector<256x128xi1>, vector<256x128xf32>
    %174 = arith.mulf %165, %173 : vector<256x128xf32>
    %175 = arith.addf %164, %174 : vector<256x128xf32>
    %176 = arith.mulf %165, %170 : vector<256x128xf32>
    %c4_i32_71 = arith.constant 4 : i32
    %177 = vector.broadcast %c4_i32_71 : i32 to vector<256x128xi32>
    %178 = arith.cmpi slt, %5, %177 : vector<256x128xi32>
    %c4_i32_72 = arith.constant 4 : i32
    %179 = tpu.dynamic_rotate %176 by %c4_i32_72 dim 0 : vector<256x128xf32>, i32 -> vector<256x128xf32>
    %cst_73 = arith.constant 1.000000e+00 : f32
    %180 = vector.broadcast %cst_73 : f32 to vector<256x128xf32>
    %181 = arith.select %178, %180, %179 : vector<256x128xi1>, vector<256x128xf32>
    %c4_i32_74 = arith.constant 4 : i32
    %182 = tpu.dynamic_rotate %175 by %c4_i32_74 dim 0 : vector<256x128xf32>, i32 -> vector<256x128xf32>
    %cst_75 = arith.constant 0.000000e+00 : f32
    %183 = vector.broadcast %cst_75 : f32 to vector<256x128xf32>
    %184 = arith.select %178, %183, %182 : vector<256x128xi1>, vector<256x128xf32>
    %185 = arith.mulf %176, %184 : vector<256x128xf32>
    %186 = arith.addf %175, %185 : vector<256x128xf32>
    %187 = arith.mulf %176, %181 : vector<256x128xf32>
    %c8_i32_76 = arith.constant 8 : i32
    %188 = vector.broadcast %c8_i32_76 : i32 to vector<256x128xi32>
    %189 = arith.cmpi slt, %5, %188 : vector<256x128xi32>
    %c8_i32_77 = arith.constant 8 : i32
    %190 = tpu.dynamic_rotate %187 by %c8_i32_77 dim 0 : vector<256x128xf32>, i32 -> vector<256x128xf32>
    %cst_78 = arith.constant 1.000000e+00 : f32
    %191 = vector.broadcast %cst_78 : f32 to vector<256x128xf32>
    %192 = arith.select %189, %191, %190 : vector<256x128xi1>, vector<256x128xf32>
    %c8_i32_79 = arith.constant 8 : i32
    %193 = tpu.dynamic_rotate %186 by %c8_i32_79 dim 0 : vector<256x128xf32>, i32 -> vector<256x128xf32>
    %cst_80 = arith.constant 0.000000e+00 : f32
    %194 = vector.broadcast %cst_80 : f32 to vector<256x128xf32>
    %195 = arith.select %189, %194, %193 : vector<256x128xi1>, vector<256x128xf32>
    %196 = arith.mulf %187, %195 : vector<256x128xf32>
    %197 = arith.addf %186, %196 : vector<256x128xf32>
    %198 = arith.mulf %187, %192 : vector<256x128xf32>
    %c16_i32_81 = arith.constant 16 : i32
    %199 = vector.broadcast %c16_i32_81 : i32 to vector<256x128xi32>
    %200 = arith.cmpi slt, %5, %199 : vector<256x128xi32>
    %c16_i32_82 = arith.constant 16 : i32
    %201 = tpu.dynamic_rotate %198 by %c16_i32_82 dim 0 : vector<256x128xf32>, i32 -> vector<256x128xf32>
    %cst_83 = arith.constant 1.000000e+00 : f32
    %202 = vector.broadcast %cst_83 : f32 to vector<256x128xf32>
    %203 = arith.select %200, %202, %201 : vector<256x128xi1>, vector<256x128xf32>
    %c16_i32_84 = arith.constant 16 : i32
    %204 = tpu.dynamic_rotate %197 by %c16_i32_84 dim 0 : vector<256x128xf32>, i32 -> vector<256x128xf32>
    %cst_85 = arith.constant 0.000000e+00 : f32
    %205 = vector.broadcast %cst_85 : f32 to vector<256x128xf32>
    %206 = arith.select %200, %205, %204 : vector<256x128xi1>, vector<256x128xf32>
    %207 = arith.mulf %198, %206 : vector<256x128xf32>
    %208 = arith.addf %197, %207 : vector<256x128xf32>
    %209 = arith.mulf %198, %203 : vector<256x128xf32>
    %c32_i32_86 = arith.constant 32 : i32
    %210 = vector.broadcast %c32_i32_86 : i32 to vector<256x128xi32>
    %211 = arith.cmpi slt, %5, %210 : vector<256x128xi32>
    %c32_i32_87 = arith.constant 32 : i32
    %212 = tpu.dynamic_rotate %209 by %c32_i32_87 dim 0 : vector<256x128xf32>, i32 -> vector<256x128xf32>
    %cst_88 = arith.constant 1.000000e+00 : f32
    %213 = vector.broadcast %cst_88 : f32 to vector<256x128xf32>
    %214 = arith.select %211, %213, %212 : vector<256x128xi1>, vector<256x128xf32>
    %c32_i32_89 = arith.constant 32 : i32
    %215 = tpu.dynamic_rotate %208 by %c32_i32_89 dim 0 : vector<256x128xf32>, i32 -> vector<256x128xf32>
    %cst_90 = arith.constant 0.000000e+00 : f32
    %216 = vector.broadcast %cst_90 : f32 to vector<256x128xf32>
    %217 = arith.select %211, %216, %215 : vector<256x128xi1>, vector<256x128xf32>
    %218 = arith.mulf %209, %217 : vector<256x128xf32>
    %219 = arith.addf %208, %218 : vector<256x128xf32>
    %220 = arith.mulf %209, %214 : vector<256x128xf32>
    %c64_i32_91 = arith.constant 64 : i32
    %221 = vector.broadcast %c64_i32_91 : i32 to vector<256x128xi32>
    %222 = arith.cmpi slt, %5, %221 : vector<256x128xi32>
    %c64_i32_92 = arith.constant 64 : i32
    %223 = tpu.dynamic_rotate %220 by %c64_i32_92 dim 0 : vector<256x128xf32>, i32 -> vector<256x128xf32>
    %cst_93 = arith.constant 1.000000e+00 : f32
    %224 = vector.broadcast %cst_93 : f32 to vector<256x128xf32>
    %225 = arith.select %222, %224, %223 : vector<256x128xi1>, vector<256x128xf32>
    %c64_i32_94 = arith.constant 64 : i32
    %226 = tpu.dynamic_rotate %219 by %c64_i32_94 dim 0 : vector<256x128xf32>, i32 -> vector<256x128xf32>
    %cst_95 = arith.constant 0.000000e+00 : f32
    %227 = vector.broadcast %cst_95 : f32 to vector<256x128xf32>
    %228 = arith.select %222, %227, %226 : vector<256x128xi1>, vector<256x128xf32>
    %229 = arith.mulf %220, %228 : vector<256x128xf32>
    %230 = arith.addf %219, %229 : vector<256x128xf32>
    %231 = arith.mulf %220, %225 : vector<256x128xf32>
    %232 = vector.shape_cast %231 : vector<256x128xf32> to vector<2x128x128xf32>
    %233 = vector.shape_cast %230 : vector<256x128xf32> to vector<2x128x128xf32>
    %c1_96 = arith.constant 1 : index
    %c0_97 = arith.constant 0 : index
    %c0_98 = arith.constant 0 : index
    %234 = vector.load %arg9[%c1_96, %c0_97, %c0_98] : memref<2x2x128xf32, #tpu.memory_space<vmem>>, vector<1x2x128xf32>
    %235 = vector.shape_cast %234 : vector<1x2x128xf32> to vector<2x128xf32>
    %236 = vector.shape_cast %235 : vector<2x128xf32> to vector<2x1x128xf32>
    %237 = vector.broadcast %236 : vector<2x1x128xf32> to vector<2x128x128xf32>
    %238 = arith.mulf %232, %237 : vector<2x128x128xf32>
    %239 = arith.addf %233, %238 : vector<2x128x128xf32>
    %240 = vector.extract_strided_slice %239 {offsets = [0, 127, 0], sizes = [2, 1, 128], strides = [1, 1, 1]} : vector<2x128x128xf32> to vector<2x1x128xf32>
    %241 = vector.shape_cast %240 : vector<2x1x128xf32> to vector<2x128xf32>
    %c1_99 = arith.constant 1 : index
    %c0_100 = arith.constant 0 : index
    %c0_101 = arith.constant 0 : index
    %242 = vector.load %arg9[%c1_99, %c0_100, %c0_101] : memref<2x2x128xf32, #tpu.memory_space<vmem>>, vector<1x2x128xf32>
    %243 = vector.shape_cast %242 : vector<1x2x128xf32> to vector<2x128xf32>
    %244 = vector.shape_cast %241 : vector<2x128xf32> to vector<1x2x128xf32>
    tpu.vector_store %arg9[%c1_99, %c0_100, %c0_101], %244 {strides = array<i32>} : memref<2x2x128xf32, #tpu.memory_space<vmem>>, vector<1x2x128xf32>,
    %c1_102 = arith.constant 1 : index
    %c0_103 = arith.constant 0 : index
    %c0_104 = arith.constant 0 : index
    %245 = vector.load %arg3[%c1_102, %c0_103, %c0_104] : memref<2x128x128xbf16, #tpu.memory_space<vmem>>, vector<1x128x128xbf16>
    %246 = vector.shape_cast %245 : vector<1x128x128xbf16> to vector<128x128xbf16>
    %cst_105 = arith.constant dense<0.000000e+00> : vector<256x128xf32>
    %247 = tpu.matmul %144, %246, %cst_105 {dimension_numbers = #tpu.dot_dimension_numbers<[1], [0], [0], [1], [0, 0, 1, 1], [], []>} : vector<256x128xbf16>, vector<128x128xbf16>, vector<256x128xf32> -> vector<256x128xf32>
    %248 = vector.shape_cast %247 : vector<256x128xf32> to vector<2x128x128xf32>
    %249 = arith.mulf %248, %239 : vector<2x128x128xf32>
    %250 = arith.addf %126, %249 : vector<2x128x128xf32>
    %c1_i32_106 = arith.constant 1 : i32
    %251 = arith.cmpi eq, %arg1, %c1_i32_106 : i32
    %252 = arith.extui %251 : i1 to i32
    %c0_i32_107 = arith.constant 0 : i32
    %253 = arith.cmpi ne, %252, %c0_i32_107 : i32
    scf.if %253 {
      %255 = vector.shape_cast %154 : vector<256x128xf32> to vector<2x128x128xf32>
      %256 = vector.extract_strided_slice %255 {offsets = [0, 127, 0], sizes = [2, 1, 128], strides = [1, 1, 1]} : vector<2x128x128xf32> to vector<2x1x128xf32>
      %c0_111 = arith.constant 0 : index
      %c1_112 = arith.constant 1 : index
      %c0_113 = arith.constant 0 : index
      %257 = vector.load %arg7[%c0_111, %c1_112, %c0_113] : memref<2x2x128xf32, #tpu.memory_space<vmem>>, vector<2x1x128xf32>
      tpu.vector_store %arg7[%c0_111, %c1_112, %c0_113], %256 {strides = array<i32>} : memref<2x2x128xf32, #tpu.memory_space<vmem>>, vector<2x1x128xf32>,
      %258 = vector.shape_cast %241 : vector<2x128xf32> to vector<2x1x128xf32>
      %c0_114 = arith.constant 0 : index
      %c1_115 = arith.constant 1 : index
      %c0_116 = arith.constant 0 : index
      %259 = vector.load %arg8[%c0_114, %c1_115, %c0_116] : memref<2x2x128xf32, #tpu.memory_space<vmem>>, vector<2x1x128xf32>
      tpu.vector_store %arg8[%c0_114, %c1_115, %c0_116], %258 {strides = array<i32>} : memref<2x2x128xf32, #tpu.memory_space<vmem>>, vector<2x1x128xf32>,
    } else {
    }
    %c0_108 = arith.constant 0 : index
    %c0_109 = arith.constant 0 : index
    %c0_110 = arith.constant 0 : index
    %254 = vector.load %arg6[%c0_108, %c0_109, %c0_110] : memref<2x128x128xf32, #tpu.memory_space<vmem>>, vector<2x128x128xf32>
    tpu.vector_store %arg6[%c0_108, %c0_109, %c0_110], %250 {strides = array<i32>} : memref<2x128x128xf32, #tpu.memory_space<vmem>>, vector<2x128x128xf32>,
    return
  }
  func.func @transform_0(%arg0: i32, %arg1: i32) -> (i32, i32) {
    %c0_i32 = arith.constant 0 : i32
    %c0_i32_0 = arith.constant 0 : i32
    %c0_i32_1 = arith.constant 0 : i32
    return %c0_i32, %c0_i32_0 : i32, i32
  }
  func.func @transform_1(%arg0: i32, %arg1: i32) -> (i32, i32, i32) {
    %c0_i32 = arith.constant 0 : i32
    %c0_i32_0 = arith.constant 0 : i32
    %c0_i32_1 = arith.constant 0 : i32
    %c0_i32_2 = arith.constant 0 : i32
    return %c0_i32, %c0_i32_0, %c0_i32_1 : i32, i32, i32
  }
  func.func @transform_2(%arg0: i32, %arg1: i32) -> (i32, i32, i32) {
    %c0_i32 = arith.constant 0 : i32
    %c0_i32_0 = arith.constant 0 : i32
    %c0_i32_1 = arith.constant 0 : i32
    %c0_i32_2 = arith.constant 0 : i32
    return %c0_i32, %c0_i32_0, %c0_i32_1 : i32, i32, i32
  }
  func.func @transform_3(%arg0: i32, %arg1: i32) -> (i32, i32, i32) {
    %c0_i32 = arith.constant 0 : i32
    %c0_i32_0 = arith.constant 0 : i32
    return %arg0, %arg1, %c0_i32 : i32, i32, i32
  }
  func.func @transform_4(%arg0: i32, %arg1: i32) -> (i32, i32, i32) {
    %c0_i32 = arith.constant 0 : i32
    %c0_i32_0 = arith.constant 0 : i32
    return %arg0, %arg1, %c0_i32 : i32, i32, i32
  }
  func.func @transform_5(%arg0: i32, %arg1: i32) -> (i32, i32, i32) {
    %c0_i32 = arith.constant 0 : i32
    %c0_i32_0 = arith.constant 0 : i32
    %c0_i32_1 = arith.constant 0 : i32
    return %arg0, %c0_i32, %c0_i32_0 : i32, i32, i32
  }
  func.func @transform_6(%arg0: i32, %arg1: i32) -> (i32, i32, i32) {
    %c0_i32 = arith.constant 0 : i32
    %c0_i32_0 = arith.constant 0 : i32
    %c0_i32_1 = arith.constant 0 : i32
    return %arg0, %c0_i32, %c0_i32_0 : i32, i32, i32
  }
}

</mosaic_0001>

<bundles_post_ra>
// kernel: tpu_custom_call.1
= control target key start
LH: loop header
LB: loop body
LE: loop exit
PB: predicated region body
PF: predicated region fallthrough
CT: control target
= control target key end

     0   :  { %s15547_s0 = inlined_call_operand.hbm [shape: f32[2,128], index: 0, kind: input, shape index: {}]   ;;  %s15548_s1 = inlined_call_operand.hbm [shape: bf16[2,128,128], index: 1, kind: input, shape index: {}]   ;;  %s15549_s2 = inlined_call_operand.hbm [shape: bf16[2,128,256], index: 2, kind: input, shape index: {}]   ;;  %s15550_s3 = inlined_call_operand.hbm [shape: f32[4,256,128], index: 3, kind: input, shape index: {}]   ;;  %s15551_s4 = inlined_call_operand.hbm [shape: f32[4,256,128], index: 4, kind: output, shape index: {0}]   ;;  %s15552_s5 = inlined_call_operand.hbm [shape: f32[4,2,128], index: 5, kind: output, shape index: {1}]   ;;  %s15553_s6 = inlined_call_operand.hbm [shape: f32[4,2,128], index: 6, kind: output, shape index: {2}]  }
   0x1   :  { %15839 = sst [smem:[#allocation130_spill]] %s15548_s1 }
   0x2   :  { %15840 = sst [smem:[#allocation131_spill]] %s15551_s4 }
   0x3   :  { %15841 = sst [smem:[#allocation132_spill]] %s15552_s5 }
   0x4   :  { %15842 = sst [smem:[#allocation133_spill]] %s15553_s6 }
   0x5   :  { %12 = vsyncpa [#allocation4], 0 }
   0x6   :  { %13 = vsyncpa [#allocation7], 0 }
   0x7   :  { %14 = vsyncpa [#allocation10], 0 }
   0x8   :  { %16 = vsyncpa [#allocation10 + $0x1], 0 }
   0x9   :  { %17 = vsyncpa [#allocation5], 0 }
   0xa   :  { %19 = vsyncpa [#allocation5 + $0x1], 0 }
   0xb   :  { %20 = vsyncpa [#allocation13], 0 }
   0xc   :  { %22 = vsyncpa [#allocation13 + $0x1], 0  ;;  %s8576_s21 = smov 0   ;;  %s8578_s22 = smov 0  }
   0xd   :  { %s8580_s23 = smov 0   ;;  %s8582_s24 = smov 0  }
   0xe   :  { %s8584_s25 = smov 0   ;;  %s8586_s26 = smov 0  }
   0xf   :  { %s8588_s27 = smov 0   ;;  %s8590_s28 = smov 0  }
  0x10   :  { %s8592_s29 = smov 0   ;;  %s8594_s30 = smov 0  }
  0x11   :  { %s8596_s7 = smov 0  }
  0x12 LB: > { %15843 = sst [smem:[#allocation25_spill]] %s8484_s23  ;;  %s8632_s8 = sadd.s32 4294967295, %s8516_s7   ;;  %s8516_s7 = sphi %s8596_s7, %s28_s7   ;;  %s8512_s30 = sphi %s8594_s30, %s16709_s30   ;;  %s8508_s29 = sphi %s8592_s29, %s16708_s29   ;;  %s8504_s28 = sphi %s8590_s28, %s16707_s28   ;;  %s8500_s27 = sphi %s8588_s27, %s16706_s27   ;;  %s8496_s26 = sphi %s8586_s26, %s16705_s26   ;;  %s8492_s25 = sphi %s8584_s25, %s16704_s25   ;;  %s8488_s24 = sphi %s8582_s24, %s16703_s24   ;;  %s8484_s23 = sphi %s8580_s23, %s16697_s23   ;;  %s8480_s22 = sphi %s8578_s22, %s16702_s22   ;;  %s8476_s21 = sphi %s8576_s21, %s16701_s21  }
  0x13   : > { %15844 = sst [smem:[#allocation26_spill]] %s8488_s24  ;;  %s15557_s9 = sadd.s32 4294967294, %s8516_s7  }
  0x14   : > { %s37_s10 = sadd.s32 1, %s8508_s29  ;;  %s40_s11 = sadd.s32 1, %s8512_s30 }
  0x15   : > { %p38_p0 = scmp.ge.s32.totalorder %s37_s10, 2  ;;  %s112_s12 = sadd.s32 1, %s8496_s26 }
  0x16   : > { %p119_p1 = scmp.ne.s32.totalorder %s8496_s26, %s8492_s25  ;;  %p120_p2 = scmp.eq.s32.totalorder %s8516_s7, 0 }
  0x17   : > { %s16711_s10 = smov (%p38_p0, %s37_s10), 0  ;;  %s16713_s11 = smov (!%p38_p0, %s40_s11), %s8512_s30 }
  0x18   : > { %15845 = sst [smem:[#allocation27_spill]] %s16711_s10  ;;  %s108_s13 = ssub.s32 %s8508_s29, %s16711_s10 }
  0x19   : > { %p8646_p3 = por %p120_p2, %p119_p1  ;;  %p42_p4 = scmp.ge.s32.totalorder %s16713_s11, 2 }
  0x1a   : > { %p125_p5 = scmp.ne.s32.totalorder %s8492_s25, %s8488_s24  ;;  %p15558_p6 = scmp.eq.s32.totalorder %s8632_s8, 0 }
  0x1b   : > { %p151_p7 = scmp.eq.s32.totalorder %s8632_s8, 3  ;;  %s16715_s11 = smov (%p42_p4, %s16713_s11), 0 }
  0x1c   : > { %15847 = sst [smem:[#allocation28_spill]] %s16715_s11  ;;  %p8658_p8 = por %p15558_p6, %p125_p5 }
  0x1d   : > { %p8664_p9 = por %p151_p7, %p119_p1  ;;  %s107_s17 = ssub.s32 %s8512_s30, %s16715_s11 }
  0x1e   : > { %p8672_p10 = scmp.eq.s32.totalorder %s15557_s9, 3  ;;  %s109_s19 = sor.u32 %s108_s13, %s107_s17 }
  0x1f   : > { %s15849_s16 = scalar_select %p8664_p9, 1, 0 }
  0x20   : > { %p164_p11 = scmp.eq.s32.totalorder %s107_s17, 0  ;;  %p110_p12 = scmp.eq.s32.totalorder %s109_s19, 0 }
  0x21   : > { %15850 = sst [smem:[#allocation29_spill]] %s15849_s16  ;;  %p8678_p13 = por %p8672_p10, %p125_p5 }
  0x22   : > { %s166_s10 = sadd.s32 1, %s8484_s23  ;;  %p176_p0 = scmp.ne.s32.totalorder %s8484_s23, %s8480_s22 }
  0x23   : > { %s15852_s20 = scalar_select %p8678_p13, 1, 0 }
  0x24   : > { %s8686_s24 = scalar_select %p110_p12, %s8496_s26, %s112_s12  }
  0x25   : > { %15853 = sst [smem:[#allocation30_spill]] %s15852_s20  ;;  %p8693_p1 = por %p176_p0, %p151_p7 }
  0x26   : > { %15854 = sst [smem:[#allocation31_spill]] %s8686_s24  ;;  %p182_p2 = scmp.ne.s32.totalorder %s8480_s22, %s8476_s21 }
  0x27   : > { %s8689_s11 = scalar_select %p164_p11, %s8484_s23, %s166_s10  }
  0x28   : > { %s15856_s9 = scalar_select %p8693_p1, 1, 0 }
  0x29   : > { %15855 = sst [smem:[#allocation32_spill]] %s8689_s11  ;;  %p7301_p4 = scmp.ge.s32.totalorder %s8516_s7, 1 }
  0x2a   : > { %15857 = sst [smem:[#allocation33_spill]] %s15856_s9  ;;  %p216_p6 = scmp.lt.s32.totalorder %s8516_s7, 5 }
  0x2b   : > { %p8703_p5 = por %p182_p2, %p8672_p10  ;;  %s15861_s1 = sld [smem:[#allocation130_spill]] }
  0x2c   : > { %p8707_p13 = pnand %p7301_p4, %p216_p6  ;;  %s8518_s21 = smov [#allocation6]  }
  0x2d   : > { %s15858_s13 = scalar_select %p8703_p5, 1, 0 }
  0x2e   : > { %p7694_p7 = pneg %p8707_p13  ;;  %s241_s24 = sshll.u32 %s8518_s21, 4  ;;  %s242_s24 = int_to_ptr.vmem [resolvable:$true] %s241_s24 }
  0x2f   : > { %15859 = sst [smem:[#allocation34_spill]] %s15858_s13  ;;  %p15862_p11 = scmp.eq.s32.totalorder %s8632_s8, 0 }
  0x30   : > { %s8519_s11 = smov 64   ;;  %s8520_s23 = smov 4  }
  0x31   : > { %s239_s19 = sshll.u32 %s15861_s1, 4  ;;  %p8718_p10 = pnand %p7694_p7, %p15862_p11  ;;  %s240_s19 = int_to_ptr.hbm [resolvable:$true] %s239_s19 }
  0x32   : > { %s228_s1 = sshll.u32 %s15547_s0, 4  ;;  %s8521_s13 = smov [#allocation3]   ;;  %s229_s1 = int_to_ptr.hbm [resolvable:$true] %s228_s1 }
  0x33   : > { %7700 = dma.hbm_to_vmem [thread:$0]  (!%p8718_p10), %s240_s19, 2048, %s242_s24, [#allocation7], %s8519_s11, %s8519_s11, %s8520_s23  }
  0x34   : > { %s230_s21 = sshll.u32 %s8521_s13, 4  ;;  %s253_s5 = sshll.u32 %s15549_s2, 4  ;;  %s231_s21 = int_to_ptr.vmem [resolvable:$true] %s230_s21  ;;  %s254_s5 = int_to_ptr.hbm [resolvable:$true] %s253_s5 }
  0x35   : > { %7697 = dma.hbm_to_vmem [thread:$0]  (!%p8718_p10), %s229_s1, 32, %s231_s21, [#allocation4]  }
  0x36   : > { %s8522_s9 = smov [#allocation8]   ;;  %s8523_s16 = smov 128  }
  0x37   : > { %s255_s4 = sshll.u32 %s8522_s9, 4  ;;  %s8524_s23 = smov 8   ;;  %s256_s4 = int_to_ptr.vmem [resolvable:$true] %s255_s4 }
  0x38   : > { %7703 = dma.hbm_to_vmem [thread:$0]  (!%p8718_p10), %s254_s5, 4096, %s256_s4, [#allocation7], %s8523_s16, %s8523_s16, %s8524_s23  }
  0x39   : > { %p7305_p6 = scmp.ge.s32.totalorder %s8516_s7, 4 }
  0x3b   : > { %265 = sbr.rel (%p7305_p6) target bundleno = 80 (0x50), region = 28 }
  0x40   : > { %s269_s6 = sand.u32 1, %s8496_s26   ;;  %s7308_s24 = sshll.u32 %s8508_s29, 4 }
  0x41   : > { %s7306_s11 = sshll.u32 %s269_s6, 8  ;;  %s7593_s1 = sshll.u32 %s8512_s30, 6 }
  0x42   : > { %s279_s9 = sadd.s32 %s7593_s1, %s7308_s24  ;;  %s273_s13 = scalar_lea.vmem [#allocation9], %s7306_s11 }
  0x43   : > { %s7310_s20 = sshll.u32 %s279_s9, 3  ;;  %s296_s4 = sshll.u32 %s273_s13, 4  ;;  %s297_s4 = int_to_ptr.vmem [resolvable:$true] %s296_s4 }
  0x44   : > { %s281_s19 = scalar_lea.hbm %s15550_s3, %s7310_s20  ;;  %s8525_s12 = smov 4096  }
  0x45   : > { %s7667_s18 = scalar_select %p8646_p3, [#allocation0], [#allocation19] }
  0x46   : > { %7668 = sst [smem:[#allocation16]] (%p8646_p3), %s8525_s12  ;;  %s294_s21 = sshll.u32 %s281_s19, 4  ;;  %s295_s21 = int_to_ptr.hbm [resolvable:$true] %s294_s21 }
  0x47   : > { %s286_s10 = sld [smem:[%s7667_s18]]   ;;  %s8526_s23 = smov 2048  }
  0x48   : > { %7669 = sst [smem:[#allocation16 + $0x1]] (%p8646_p3), %s8526_s23  ;;  %s8527_s24 = smov 16  }
  0x49   : > { %7670 = sst [smem:[#allocation16 + $0x2]] (%p8646_p3), %s8527_s24  ;;  %s8528_s11 = smov 128  }
  0x4a   : > { %7671 = sst [smem:[#allocation16 + $0x3]] (%p8646_p3), %s8528_s11  ;;  %s8529_s9 = smov 8  }
  0x4b   : > { %7672 = sst [smem:[#allocation16 + $0x4]] (%p8646_p3), %s8528_s11  ;;  %s270_s13 = scalar_lea.sflag [#allocation10], %s269_s6 }
  0x4c   : > { %7673 = sst [smem:[#allocation16 + $0x5]] (%p8646_p3), %s8529_s9  ;;  %s8530_s5 = smov [#allocation15]  }
  0x4d   : > { %s7311_s1 = sshll.u32 %s286_s10, 26 }
  0x4e   : > { %s7312_s20 = sadd.s32 134217728, %s7311_s1 }
  0x4f   : > { %7674 = dma.general (%p8646_p3), %s295_s21, 4096, %s297_s4, %s270_s13, %s8530_s5, [#allocation16], %s7312_s20, 0  }
  0x50 PF: > { %321 = sbr.rel (%p8707_p13) target bundleno = 1713 (0x6b1), region = 36 }
  0x55   : > { %p15864_p12 = scmp.eq.s32.totalorder %s8632_s8, 0 }
  0x57   : > { %8455 = dma.done.wait (%p15864_p12), [#allocation4], 32   ;;  %p15865_p0 = pmov %p15864_p12 }
  0x59   : > { %8457 = vsyncadd (%p15865_p0), [#allocation4], 4294967264  ;;  %p15866_p2 = pmov %p15865_p0 }
  0x5a   : > { %p15867_p4 = pmov %p15865_p0 }
  0x5b   : > { %8459 = dma.done.wait (%p15866_p2), [#allocation7], 6144  }
  0x5c   : > { %8461 = vsyncadd (%p15867_p4), [#allocation7], 4294961152  ;;  %s8768_s14 = sand.u32 1, %s8492_s25  }
  0x5d   : > { %s7317_s17 = sshll.u32 %s8768_s14, 8  ;;  %s339_s6 = scalar_lea.sflag [#allocation10], %s8768_s14 }
  0x5e   : > { %s8772_s4 = scalar_lea.vmem [#allocation9], %s7317_s17 }
  0x5f   : > { %8463 = dma.done.wait (%p8658_p8), %s339_s6, 4096  }
  0x60   : > { %8465 = vsyncadd (%p8658_p8), %s339_s6, 4294963200  ;;  %s372_s16 = sand.u32 1, %s8480_s22   ;;  %s8779_s18 = scalar_lea.vmem [#allocation11], %s7317_s17 }
  0x61   : > { %s7319_s19 = sshll.u32 %s372_s16, 2  ;;  %p7321_p3 = scmp.ne.s32.totalorder %s8500_s27, 0 }
  0x62   : > { %s8781_s12 = scalar_lea.vmem [#allocation12], %s7319_s19  ;;  %s8783_s10 = scalar_lea.vmem [#allocation14], %s7319_s19 }
  0x63   : > { %391 = sbr.rel (%p7321_p3) target bundleno = 107 (0x6b), region = 56 }
  0x68   : > { %v8531_v0 = vmov 0.0  }
  0x69   : > { %392 = vst [vmem:[#allocation2] sm:$0x3] %v8531_v0 }
  0x6a   : > { %393 = vst [vmem:[#allocation2 + $0x2] sm:$0x3] %v8531_v0 }
  0x6b PF: > { %v8787_v1 = vld [vmem:[%s8772_s4 + $0xa0] sm:$0xff]  ;;  %v8790_v2 = vld [vmem:[%s8772_s4 + $0x90] sm:$0xff]  ;;  %v8802_v7 = vld [vmem:[%s8772_s4 + $0xa8] sm:$0xff]  ;;  %p7450_p8 = scmp.ne.s32.totalorder %s8500_s27, 1 }
  0x6c   : > { %v8793_v3 = vld [vmem:[%s8772_s4 + $0x80] sm:$0xff]  ;;  %v463_v4 = vmul.f32 %v8787_v1, %v8787_v1  ;;  %v461_v5 = vmul.f32 %v8790_v2, %v8790_v2  ;;  %v8805_v8 = vld [vmem:[%s8772_s4 + $0x98] sm:$0xff]  ;;  %v8808_v9 = vld [vmem:[%s8772_s4 + $0x88] sm:$0xff]  ;;  %v464_v10 = vmul.f32 %v8802_v7, %v8802_v7 }
  0x6d   : > { %v459_v6 = vmul.f32 %v8793_v3, %v8793_v3  ;;  %v462_v11 = vmul.f32 %v8805_v8, %v8805_v8  ;;  %v460_v12 = vmul.f32 %v8808_v9, %v8808_v9  ;;  %v418_v13 = vld [vmem:[%s8772_s4 + $0xc0] sm:$0xff]  ;;  %v8818_v14 = vld [vmem:[%s8772_s4 + $0xb8] sm:$0xff]  ;;  %v8821_v15 = vld [vmem:[%s8772_s4 + $0xb0] sm:$0xff] }
  0x6e   : > { %515 = vadd.xlane.f32.xlu2 %v463_v4  ;;  %511 = vadd.xlane.f32.xlu1 %v461_v5  ;;  %v467_v16 = vmul.f32 %v418_v13, %v418_v13  ;;  %v466_v17 = vmul.f32 %v8818_v14, %v8818_v14  ;;  %v465_v18 = vmul.f32 %v8821_v15, %v8821_v15  ;;  %v8828_v19 = vld [vmem:[%s8772_s4 + $0xd8] sm:$0xff]  ;;  %v8831_v20 = vld [vmem:[%s8772_s4 + $0xd0] sm:$0xff]  ;;  %v419_v21 = vld [vmem:[%s8772_s4 + $0xc8] sm:$0xff] }
  0x6f   : > { %507 = vadd.xlane.f32.xlu0 %v459_v6  ;;  %v470_v22 = vmul.f32 %v8828_v19, %v8828_v19  ;;  %v469_v23 = vmul.f32 %v8831_v20, %v8831_v20  ;;  %v468_v24 = vmul.f32 %v419_v21, %v419_v21  ;;  %v424_v25 = vld [vmem:[%s8772_s4 + $0xf0] sm:$0xff]  ;;  %v8840_v26 = vld [vmem:[%s8772_s4 + $0xe8] sm:$0xff]  ;;  %v8843_v27 = vld [vmem:[%s8772_s4 + $0xe0] sm:$0xff] }
  0x70   : > { %v473_v28 = vmul.f32 %v424_v25, %v424_v25  ;;  %v472_v29 = vmul.f32 %v8840_v26, %v8840_v26  ;;  %v471_v30 = vmul.f32 %v8843_v27, %v8843_v27  ;;  %v8850_v31 = vld [vmem:[%s8772_s4 + $0x8] sm:$0xff]  ;;  %v8853_v32 = vld [vmem:[%s8772_s4] sm:$0xff]  ;;  %v425_v33 = vld [vmem:[%s8772_s4 + $0xf8] sm:$0xff] }
  0x71   : > { %v444_v34 = vmul.f32 %v8850_v31, %v8850_v31  ;;  %v443_v35 = vmul.f32 %v8853_v32, %v8853_v32  ;;  %v474_v36 = vmul.f32 %v425_v33, %v425_v33  ;;  %v8861_v37 = vld [vmem:[%s8772_s4 + $0x18] sm:$0xff]  ;;  %v8864_v38 = vld [vmem:[%s8772_s4 + $0x20] sm:$0xff]  ;;  %v8867_v39 = vld [vmem:[%s8772_s4 + $0x10] sm:$0xff] }
  0x72   : > { %v446_v40 = vmul.f32 %v8861_v37, %v8861_v37  ;;  %v447_v41 = vmul.f32 %v8864_v38, %v8864_v38  ;;  %v445_v42 = vmul.f32 %v8867_v39, %v8867_v39  ;;  %v401_v43 = vld [vmem:[%s8772_s4 + $0x38] sm:$0xff]  ;;  %v400_v44 = vld [vmem:[%s8772_s4 + $0x30] sm:$0xff]  ;;  %v8878_v45 = vld [vmem:[%s8772_s4 + $0x28] sm:$0xff] }
  0x73   : > { %v450_v46 = vmul.f32 %v401_v43, %v401_v43  ;;  %v449_v47 = vmul.f32 %v400_v44, %v400_v44  ;;  %v448_v48 = vmul.f32 %v8878_v45, %v8878_v45  ;;  %v403_v49 = vld [vmem:[%s8772_s4 + $0x48] sm:$0xff]  ;;  %v402_v50 = vld [vmem:[%s8772_s4 + $0x40] sm:$0xff]  ;;  %v7380_v53 = vld [vmem:[#allocation8 + $0x70] sm:$0xf] }
  0x74   : > { %v452_v51 = vmul.f32 %v403_v49, %v403_v49  ;;  %v451_v52 = vmul.f32 %v402_v50, %v402_v50  ;;  %v7609_v54 = vld [vmem:[#allocation8 + $0x74] sm:$0xf0]  ;;  %v7608_v55 = vld [vmem:[#allocation8 + $0x74] sm:$0xf]  ;;  %v7382_v57 = vld [vmem:[#allocation8 + $0x78] sm:$0xf0] }
  0x75   : > { %v7381_v56 = vor.u32 %v7609_v54, %v7380_v53  ;;  %v405_v58 = vld [vmem:[%s8772_s4 + $0x58] sm:$0xff]  ;;  %v404_v59 = vld [vmem:[%s8772_s4 + $0x50] sm:$0xff]  ;;  %v7385_v60 = vor.u32 %v7608_v55, %v7382_v57  ;;  %v7372_v63 = vld [vmem:[#allocation8 + $0x60] sm:$0xf] }
  0x76   : > { %517 = vadd.xlane.f32.xlu2 %v464_v10  ;;  %513 = vadd.xlane.f32.xlu1 %v462_v11  ;;  %v454_v61 = vmul.f32 %v405_v58, %v405_v58  ;;  %v453_v62 = vmul.f32 %v404_v59, %v404_v59  ;;  %v7607_v0 = vld [vmem:[#allocation8 + $0x64] sm:$0xf0]  ;;  %v7606_v4 = vld [vmem:[#allocation8 + $0x64] sm:$0xf]  ;;  %v7374_v6 = vld [vmem:[#allocation8 + $0x68] sm:$0xf0] }
  0x77   : > { %509 = vadd.xlane.f32.xlu0 %v460_v12  ;;  %7645 = vmatpush.bf16.msra.mxu2 %v7381_v56  ;;  %v7373_v5 = vor.u32 %v7607_v0, %v7372_v63  ;;  %v7377_v10 = vor.u32 %v7606_v4, %v7374_v6  ;;  %v7364_v11 = vld [vmem:[#allocation8 + $0x50] sm:$0xf]  ;;  %v7605_v12 = vld [vmem:[#allocation8 + $0x54] sm:$0xf0]  ;;  %v7604_v13 = vld [vmem:[#allocation8 + $0x54] sm:$0xf] }
  0x78   : > { %1070 = vmatpush.bf16.msra.mxu0 %v7381_v56  ;;  %7653 = vmatpush.bf16.msra.mxu3 %v7385_v60  ;;  %v7356_v21 = vld [vmem:[#allocation8 + $0x40] sm:$0xf]  ;;  %v7358_v25 = vld [vmem:[#allocation8 + $0x48] sm:$0xf0]  ;;  %v7600_v33 = vld [vmem:[#allocation8 + $0x34] sm:$0xf] }
  0x79   : > { %1159 = vmatpush.bf16.msra.mxu1 %v7385_v60  ;;  %v7340_v44 = vld [vmem:[#allocation8 + $0x20] sm:$0xf]  ;;  %v7342_v49 = vld [vmem:[#allocation8 + $0x28] sm:$0xf0]  ;;  %v7596_v53 = vld [vmem:[#allocation8 + $0x14] sm:$0xf] }
  0x7a   : > { %v7334_v55 = vld [vmem:[#allocation8 + $0x18] sm:$0xf0]  ;;  %v7324_v59 = vld [vmem:[#allocation8] sm:$0xf]  ;;  %v7595_v60 = vld [vmem:[#allocation8 + $0x4] sm:$0xf0] }
  0x7b   : > { %7646 = vmatpush.bf16.msra.mxu2 %v7373_v5  ;;  %v7337_v56 = vor.u32 %v7596_v53, %v7334_v55  ;;  %v7325_v63 = vor.u32 %v7595_v60, %v7324_v59  ;;  %v7326_v0 = vld [vmem:[#allocation8 + $0x8] sm:$0xf0]  ;;  %v891_v55 = vld [vmem:[#allocation3] sm:$0x1] }
  0x7c   : > { %1071 = vmatpush.bf16.msra.mxu0 %v7373_v5  ;;  %7654 = vmatpush.bf16.msra.mxu3 %v7377_v10 }
  0x7d   : > { %1160 = vmatpush.bf16.msra.mxu1 %v7377_v10 }
  0x7e   : > { %523 = vadd.xlane.f32.xlu2 %v467_v16  ;;  %521 = vadd.xlane.f32.xlu1 %v466_v17  ;;  %v7365_v16 = vor.u32 %v7605_v12, %v7364_v11  ;;  %v7366_v17 = vld [vmem:[#allocation8 + $0x58] sm:$0xf0]  ;;  %v408_v12 = vld [vmem:[%s8772_s4 + $0x70] sm:$0xff] }
  0x7f   : > { %519 = vadd.xlane.f32.xlu0 %v465_v18  ;;  %v7369_v18 = vor.u32 %v7604_v13, %v7366_v17 }
  0x80   : > { %7647 = vmatpush.bf16.msra.mxu2 %v7365_v16  ;;  %1072 = vmatpush.bf16.msra.mxu0 %v7365_v16  ;;  %v457_v16 = vmul.f32 %v408_v12, %v408_v12 }
  0x81   : > { %7655 = vmatpush.bf16.msra.mxu3 %v7369_v18  ;;  %1161 = vmatpush.bf16.msra.mxu1 %v7369_v18 }
  0x86   : > { %529 = vadd.xlane.f32.xlu2 %v470_v22  ;;  %527 = vadd.xlane.f32.xlu1 %v469_v23  ;;  %v7603_v22 = vld [vmem:[#allocation8 + $0x44] sm:$0xf0]  ;;  %v7602_v23 = vld [vmem:[#allocation8 + $0x44] sm:$0xf] }
  0x87   : > { %525 = vadd.xlane.f32.xlu0 %v468_v24  ;;  %v7357_v24 = vor.u32 %v7603_v22, %v7356_v21  ;;  %v409_v21 = vld [vmem:[%s8772_s4 + $0x78] sm:$0xff] }
  0x89   : > { %7648 = vmatpush.bf16.msra.mxu2 %v7357_v24  ;;  %1073 = vmatpush.bf16.msra.mxu0 %v7357_v24 }
  0x8e   : > { %535 = vadd.xlane.f32.xlu2 %v473_v28  ;;  %533 = vadd.xlane.f32.xlu1 %v472_v29  ;;  %v7361_v28 = vor.u32 %v7602_v23, %v7358_v25  ;;  %v7348_v29 = vld [vmem:[#allocation8 + $0x30] sm:$0xf]  ;;  %v458_v25 = vmul.f32 %v409_v21, %v409_v21 }
  0x8f   : > { %531 = vadd.xlane.f32.xlu0 %v471_v30  ;;  %v7601_v30 = vld [vmem:[#allocation8 + $0x34] sm:$0xf0] }
  0x90   : > { %7656 = vmatpush.bf16.msra.mxu3 %v7361_v28  ;;  %1162 = vmatpush.bf16.msra.mxu1 %v7361_v28 }
  0x96   : > { %477 = vadd.xlane.f32.xlu2 %v444_v34  ;;  %475 = vadd.xlane.f32.xlu1 %v443_v35  ;;  %v7349_v34 = vor.u32 %v7601_v30, %v7348_v29  ;;  %v7350_v35 = vld [vmem:[#allocation8 + $0x38] sm:$0xf0] }
  0x97   : > { %537 = vadd.xlane.f32.xlu0 %v474_v36  ;;  %v407_v36 = vld [vmem:[%s8772_s4 + $0x68] sm:$0xff] }
  0x98   : > { %7649 = vmatpush.bf16.msra.mxu2 %v7349_v34  ;;  %1074 = vmatpush.bf16.msra.mxu0 %v7349_v34 }
  0x9e   : > { %481 = vadd.xlane.f32.xlu1 %v446_v40  ;;  %483 = vadd.xlane.f32.xlu2 %v447_v41  ;;  %v406_v40 = vld [vmem:[%s8772_s4 + $0x60] sm:$0xff]  ;;  %v7353_v41 = vor.u32 %v7600_v33, %v7350_v35 }
  0x9f   : > { %479 = vadd.xlane.f32.xlu0 %v445_v42  ;;  %v456_v42 = vmul.f32 %v407_v36, %v407_v36  ;;  %v455_v43 = vmul.f32 %v406_v40, %v406_v40 }
  0xa0   : > { %7657 = vmatpush.bf16.msra.mxu3 %v7353_v41  ;;  %1163 = vmatpush.bf16.msra.mxu1 %v7353_v41 }
  0xa6   : > { %489 = vadd.xlane.f32.xlu2 %v450_v46  ;;  %487 = vadd.xlane.f32.xlu1 %v449_v47  ;;  %v7599_v46 = vld [vmem:[#allocation8 + $0x24] sm:$0xf0]  ;;  %v7598_v47 = vld [vmem:[#allocation8 + $0x24] sm:$0xf] }
  0xa7   : > { %485 = vadd.xlane.f32.xlu0 %v448_v48  ;;  %v7341_v48 = vor.u32 %v7599_v46, %v7340_v44  ;;  %v7345_v50 = vor.u32 %v7598_v47, %v7342_v49  ;;  %v7617_v44 = vld [vmem:[#allocation6 + $0x38] sm:$0xff] }
  0xa9   : > { %7650 = vmatpush.bf16.msra.mxu2 %v7341_v48  ;;  %1075 = vmatpush.bf16.msra.mxu0 %v7341_v48 }
  0xaa   : > { %7658 = vmatpush.bf16.msra.mxu3 %v7345_v50  ;;  %1164 = vmatpush.bf16.msra.mxu1 %v7345_v50 }
  0xae   : > { %493 = vadd.xlane.f32.xlu1 %v452_v51  ;;  %495 = vadd.xlane.f32.xlu2 %v453_v62  ;;  %v7332_v51 = vld [vmem:[#allocation8 + $0x10] sm:$0xf] }
  0xaf   : > { %491 = vadd.xlane.f32.xlu0 %v451_v52  ;;  %v7597_v52 = vld [vmem:[#allocation8 + $0x14] sm:$0xf0]  ;;  %7659 = vmatpush.bf16.msra.mxu3 %v7337_v56 }
  0xb0   : > { %v7333_v54 = vor.u32 %v7597_v52, %v7332_v51  ;;  %1165 = vmatpush.bf16.msra.mxu1 %v7337_v56 }
  0xb2   : > { %7651 = vmatpush.bf16.msra.mxu2 %v7333_v54  ;;  %1076 = vmatpush.bf16.msra.mxu0 %v7333_v54 }
  0xb6   : > { %501 = vadd.xlane.f32.xlu2 %v456_v42  ;;  %499 = vadd.xlane.f32.xlu1 %v455_v43 }
  0xb7   : > { %497 = vadd.xlane.f32.xlu0 %v454_v61  ;;  %v7594_v61 = vld [vmem:[#allocation8 + $0x4] sm:$0xf]  ;;  %7652 = vmatpush.bf16.msra.mxu2 %v7325_v63 }
  0xb8   : > { %v7329_v5 = vor.u32 %v7594_v61, %v7326_v0  ;;  %1077 = vmatpush.bf16.msra.mxu0 %v7325_v63  ;;  %v892_v63 = vmul.f32 11.313708, %v891_v55 }
  0xba   : > { %7660 = vmatpush.bf16.msra.mxu3 %v7329_v5  ;;  %1166 = vmatpush.bf16.msra.mxu1 %v7329_v5  ;;  %v8944_v21 = vperm.slane %v892_v63, 0 }
  0xbb   : > { %3614 = vmatpush.bf16.msrb.mxu2 %v7617_v44 }
  0xbe   : > { %505 = vadd.xlane.f32.xlu1 %v458_v25  ;;  %v7616_v25 = vld [vmem:[#allocation6 + $0x30] sm:$0xff] }
  0xbf   : > { %503 = vadd.xlane.f32.xlu0 %v457_v16  ;;  %3615 = vmatpush.bf16.msrb.mxu2 %v7616_v25 }
  0xe1   : > { %v516_v57 = vpop.xlane.xlu2 %515  ;;  %v512_v58 = vpop.xlane.xlu1 %511 }
  0xe2   : > { %v508_v62 = vpop.xlane.xlu0 %507  ;;  %v8891_v18 = vmax.f32 %v512_v58, 1e-24  ;;  %v8897_v24 = vmax.f32 %v516_v57, 1e-24 }
  0xe3   : > { %v555_v4 = vmax.f32 %v508_v62, 1e-24 }
  0xe4   : > { %vm757_vm8 = vweird.f32 %v8891_v18  ;;  %vm777_vm10 = vweird.f32 %v8897_v24 }
  0xe5   : > { %7832 = vrsqrt.f32 %v555_v4  ;;  %vm737_vm2 = vweird.f32 %v555_v4 }
  0xe9   : > { %v518_v6 = vpop.xlane.xlu2 %517  ;;  %v514_v10 = vpop.xlane.xlu1 %513 }
  0xea   : > { %v510_v11 = vpop.xlane.xlu0 %509  ;;  %v8895_v23 = vmax.f32 %v514_v10, 1e-24  ;;  %v8902_v33 = vmax.f32 %v518_v6, 1e-24 }
  0xeb   : > { %v556_v13 = vmax.f32 %v510_v11, 1e-24  ;;  %v8889_v17 = vpop.eup %7832 }
  0xec   : > { %v732_v22 = vmul.f32 %v8889_v17, %v555_v4  ;;  %vm738_vm0 = vweird.f32 %v8889_v17  ;;  %vm767_vm6 = vweird.f32 %v8895_v23  ;;  %vm787_vm15 = vweird.f32 %v8902_v33 }
  0xed   : > { %7834 = vrsqrt.f32 %v556_v13  ;;  %vm8927_vm3 = vmor %vm737_vm2, %vm738_vm0  ;;  %vm747_vm4 = vweird.f32 %v556_v13 }
  0xee   : > { %7836 = vrsqrt.f32 %v8891_v18  ;;  %v733_v28 = vmul.f32 %v8889_v17, %v732_v22 }
  0xef   : > { %7838 = vrsqrt.f32 %v8895_v23 }
  0xf0   : > { %7840 = vrsqrt.f32 %v8897_v24  ;;  %v734_v36 = vmul.f32 0.5, %v733_v28 }
  0xf1   : > { %v524_v29 = vpop.xlane.xlu2 %523  ;;  %v522_v30 = vpop.xlane.xlu1 %521  ;;  %7842 = vrsqrt.f32 %v8902_v33 }
  0xf2   : > { %v520_v34 = vpop.xlane.xlu0 %519  ;;  %v735_v46 = vsub.f32 1.5, %v734_v36  ;;  %v8934_v5 = vmax.f32 %v524_v29, 1e-24  ;;  %v8952_v36 = vmax.f32 %v522_v30, 1e-24 }
  0xf3   : > { %v7835_v35 = vpop.eup %7834 }
  0xf4   : > { %v742_v40 = vmul.f32 %v7835_v35, %v556_v13  ;;  %v8905_v41 = vpop.eup %7836  ;;  %v736_v58 = vmul.f32 %v8889_v17, %v735_v46  ;;  %vm748_vm1 = vweird.f32 %v7835_v35  ;;  %7844 = vrsqrt.f32 %v8934_v5 }
  0xf5   : > { %v8908_v42 = vpop.eup %7838  ;;  %v752_v51 = vmul.f32 %v8905_v41, %v8891_v18  ;;  %vm749_vm5 = vmor %vm747_vm4, %vm748_vm1  ;;  %v8954_v46 = vmax.f32 %v520_v34, 1e-24  ;;  %7846 = vrsqrt.f32 %v8952_v36  ;;  %vm758_vm9 = vweird.f32 %v8905_v41 }
  0xf6   : > { %v743_v43 = vmul.f32 %v7835_v35, %v742_v40  ;;  %v8910_v47 = vpop.eup %7840  ;;  %v762_v52 = vmul.f32 %v8908_v42, %v8895_v23  ;;  %v740_v4 = vsel %vm8927_vm3, %v8889_v17, %v736_v58  ;;  %vm768_vm7 = vweird.f32 %v8908_v42  ;;  %vm8996_vm13 = vmor %vm757_vm8, %vm758_vm9 }
  0xf7   : > { %v8921_v56 = vpop.eup %7842  ;;  %v772_v57 = vmul.f32 %v8910_v47, %v8897_v24  ;;  %v753_v60 = vmul.f32 %v8905_v41, %v752_v51  ;;  %v909_v29 = vmul.f32 %v740_v4, %v8793_v3  ;;  %vm778_vm11 = vweird.f32 %v8910_v47  ;;  %vm8981_vm12 = vmor %vm767_vm6, %vm768_vm7 }
  0xf8   : > { %v744_v48 = vmul.f32 0.5, %v743_v43  ;;  %v763_v62 = vmul.f32 %v8908_v42, %v762_v52  ;;  %v782_v0 = vmul.f32 %v8921_v56, %v8902_v33  ;;  %7848 = vrsqrt.f32 %v8954_v46  ;;  %vm9007_vm14 = vmor %vm777_vm10, %vm778_vm11 }
  0xf9   : > { %v530_v49 = vpop.xlane.xlu2 %529  ;;  %v8912_v50 = vpop.xlane.xlu1 %527  ;;  %v773_v6 = vmul.f32 %v8910_v47, %v772_v57  ;;  %v754_v16 = vmul.f32 0.5, %v753_v60  ;;  %vm788_vm0 = vweird.f32 %v8921_v56  ;;  %vm797_vm7 = vweird.f32 %v8954_v46 }
  0xfa   : > { %v8918_v53 = vpop.xlane.xlu0 %525  ;;  %v745_v54 = vsub.f32 1.5, %v744_v48  ;;  %v764_v13 = vmul.f32 0.5, %v763_v62  ;;  %v783_v28 = vmul.f32 %v8921_v56, %v782_v0  ;;  %v942_v48 = vmul.f32 %v8944_v21, %v909_v29  ;;  %v8961_v3 = vpop.eup %7844  ;;  %v7615_v62 = vld [vmem:[#allocation6 + $0x28] sm:$0xff]  ;;  %vm9031_vm1 = vmor %vm787_vm15, %vm788_vm0 }
  0xfb   : > { %v755_v40 = vsub.f32 1.5, %v754_v16  ;;  %v8986_v61 = vmax.f32 %v8912_v50, 1e-24  ;;  %v812_v50 = vmul.f32 %v8961_v3, %v8934_v5  ;;  %3616 = vmatpush.bf16.msrb.mxu2 %v7615_v62  ;;  %v9014_v18 = vpop.eup %7846  ;;  %vm807_vm8 = vweird.f32 %v8952_v36 }
  0xfc   : > { %v746_v59 = vmul.f32 %v7835_v35, %v745_v54  ;;  %v765_v43 = vsub.f32 1.5, %v764_v13  ;;  %v784_v44 = vmul.f32 0.5, %v783_v28  ;;  %vm808_vm9 = vweird.f32 %v9014_v18 }
  0xfe   : > { %v750_v10 = vsel %vm749_vm5, %v7835_v35, %v746_v59  ;;  %v774_v35 = vmul.f32 0.5, %v773_v6  ;;  %v766_v55 = vmul.f32 %v8908_v42, %v765_v43  ;;  %v756_v59 = vmul.f32 %v8905_v41, %v755_v40  ;;  %v9037_v13 = vpop.eup %7848 }
  0xff   : > { %v910_v17 = vmul.f32 %v750_v10, %v8808_v9  ;;  %v8965_v9 = vmax.f32 %v530_v49, 1e-24  ;;  %v785_v60 = vsub.f32 1.5, %v784_v44  ;;  %vm798_vm10 = vweird.f32 %v9037_v13 }
 0x100   : > { %v775_v52 = vsub.f32 1.5, %v774_v35  ;;  %v770_v6 = vsel %vm8981_vm12, %v8908_v42, %v766_v55  ;;  %v760_v24 = vsel %vm8996_vm13, %v8905_v41, %v756_v59  ;;  %v813_v42 = vmul.f32 %v8961_v3, %v812_v50 }
 0x101   : > { %v8940_v11 = vpop.xlane.xlu2 %535  ;;  %v8942_v12 = vpop.xlane.xlu1 %533  ;;  %v943_v51 = vmul.f32 %v8944_v21, %v910_v17  ;;  %v9025_v10 = vmul.f32 %v8921_v56, %v785_v60  ;;  %v802_v41 = vmul.f32 %v9014_v18, %v8952_v36  ;;  %v912_v25 = vmul.f32 %v770_v6, %v8805_v8 }
 0x102   : > { %v8946_v22 = vpop.xlane.xlu0 %531  ;;  %v776_v63 = vmul.f32 %v8910_v47, %v775_v52  ;;  %v9056_v8 = vmul.f32 0.5, %v813_v42  ;;  %v9077_v49 = vmax.f32 %v8942_v12, 1e-24  ;;  %vm847_vm12 = vweird.f32 %v8965_v9 }
 0x103   : > { %v8967_v30 = vpack.c.bf16 %v943_v51, %v942_v48  ;;  %v790_v40 = vsel %vm9031_vm1, %v8921_v56, %v9025_v10  ;;  %v792_v48 = vmul.f32 %v9037_v13, %v8954_v46  ;;  %v9089_v12 = vmax.f32 %v8946_v22, 1e-24 }
 0x104   : > { %v780_v33 = vsel %vm9007_vm14, %v8910_v47, %v776_v63  ;;  %v911_v47 = vmul.f32 %v760_v24, %v8790_v2  ;;  %vm837_vm14 = vweird.f32 %v8986_v61 }
 0x105   : > { %1118 = vmatmul.bf16.vlgmr.msra.gmra.mxu2 %v8967_v30  ;;  %1207 = vmatmul.bf16.vlgmr.msra.gmra.mxu3 %v8967_v30  ;;  %v9054_v44 = vmul.f32 %v780_v33, %v8787_v1  ;;  %v945_v1 = vmul.f32 %v8944_v21, %v912_v25  ;;  %v793_v0 = vmul.f32 %v9037_v13, %v792_v48 }
 0x106   : > { %v944_v62 = vmul.f32 %v8944_v21, %v911_v47 }
 0x107   : > { %v946_v16 = vmul.f32 %v8944_v21, %v9054_v44 }
 0x108   : > { %v9093_v33 = vpack.c.bf16 %v945_v1, %v944_v62 }
 0x109   : > { %v478_v34 = vpop.xlane.xlu2 %477  ;;  %v476_v54 = vpop.xlane.xlu1 %475 }
 0x10a   : > { %v8972_v57 = vmax.f32 %v478_v34, 1e-24  ;;  %v8974_v58 = vpop.xlane.xlu0 %537  ;;  %v9019_v4 = vmax.f32 %v476_v54, 1e-24  ;;  %v803_v34 = vmul.f32 %v9014_v18, %v802_v41  ;;  %v9068_v54 = vmax.f32 %v8918_v53, 1e-24 }
 0x10c   : > { %7850 = vrsqrt.f32 %v8972_v57  ;;  %vm587_vm2 = vweird.f32 %v8972_v57  ;;  %v9097_v42 = vmul.f32 0.5, %v803_v34  ;;  %vm577_vm5 = vweird.f32 %v9019_v4 }
 0x10d   : > { %7852 = vrsqrt.f32 %v8965_v9 }
 0x10e   : > { %7854 = vrsqrt.f32 %v8986_v61 }
 0x10f   : > { %7856 = vrsqrt.f32 %v9019_v4 }
 0x111   : > { %v482_v28 = vpop.xlane.xlu1 %481  ;;  %v484_v63 = vpop.xlane.xlu2 %483 }
 0x112   : > { %v9042_v29 = vpop.eup %7850  ;;  %v480_v17 = vpop.xlane.xlu0 %479  ;;  %v9062_v51 = vmax.f32 %v482_v28, 1e-24 }
 0x113   : > { %v9045_v35 = vpop.eup %7852  ;;  %v582_v43 = vmul.f32 %v9042_v29, %v8972_v57  ;;  %v9060_v2 = vmax.f32 %v480_v17, 1e-24  ;;  %vm588_vm3 = vweird.f32 %v9042_v29  ;;  %v9095_v57 = vmax.f32 %v484_v63, 1e-24  ;;  %v7614_v17 = vld [vmem:[#allocation6 + $0x20] sm:$0xff] }
 0x114   : > { %v9064_v52 = vpop.eup %7854  ;;  %v842_v60 = vmul.f32 %v9045_v35, %v8965_v9  ;;  %vm9100_vm4 = vmor %vm587_vm2, %vm588_vm3  ;;  %3617 = vmatpush.bf16.msrb.mxu2 %v7614_v17  ;;  %vm848_vm13 = vweird.f32 %v9045_v35  ;;  %vm607_vm2 = vweird.f32 %v9062_v51 }
 0x115   : > { %v583_v55 = vmul.f32 %v9042_v29, %v582_v43  ;;  %v9072_v59 = vpop.eup %7856  ;;  %7858 = vrsqrt.f32 %v9060_v2  ;;  %v832_v50 = vmul.f32 %v9064_v52, %v8986_v61  ;;  %1123 = vmatmul.bf16.gmra.mxu2 %v9093_v33  ;;  %1212 = vmatmul.bf16.gmra.mxu3 %v9093_v33  ;;  %vm597_vm15 = vweird.f32 %v9060_v2 }
 0x116   : > { %v572_v53 = vmul.f32 %v9072_v59, %v9019_v4  ;;  %7860 = vrsqrt.f32 %v9062_v51  ;;  %vm578_vm6 = vweird.f32 %v9072_v59  ;;  %v843_v48 = vmul.f32 %v9045_v35, %v842_v60 }
 0x117   : > { %v584_v23 = vmul.f32 0.5, %v583_v55  ;;  %7862 = vrsqrt.f32 %v9068_v54  ;;  %v833_v34 = vmul.f32 %v9064_v52, %v832_v50  ;;  %v794_v55 = vmul.f32 0.5, %v793_v0  ;;  %vm9136_vm11 = vmor %vm577_vm5, %vm578_vm6 }
 0x118   : > { %v573_v24 = vmul.f32 %v9072_v59, %v572_v53  ;;  %7864 = vrsqrt.f32 %v9095_v57  ;;  %v9130_v60 = vmax.f32 %v8940_v11, 1e-24  ;;  %vm838_vm5 = vweird.f32 %v9064_v52  ;;  %vm9219_vm6 = vmor %vm797_vm7, %vm798_vm10 }
 0x119   : > { %v585_v6 = vsub.f32 1.5, %v584_v23  ;;  %7866 = vrsqrt.f32 %v9077_v49  ;;  %v834_v41 = vmul.f32 0.5, %v833_v34  ;;  %vm9250_vm7 = vmor %vm847_vm12, %vm848_vm13  ;;  %vm818_vm10 = vweird.f32 %v8961_v3 }
 0x11a   : > { %v486_v22 = vpop.xlane.xlu0 %485  ;;  %v574_v28 = vmul.f32 0.5, %v573_v24  ;;  %7868 = vrsqrt.f32 %v9089_v12  ;;  %v844_v24 = vmul.f32 0.5, %v843_v48  ;;  %vm827_vm12 = vweird.f32 %v9068_v54 }
 0x11b   : > { %v586_v25 = vmul.f32 %v9042_v29, %v585_v6  ;;  %v9109_v47 = vmax.f32 %v486_v22, 1e-24  ;;  %v9112_v43 = vpop.eup %7858  ;;  %v805_v6 = vsub.f32 1.5, %v9097_v42  ;;  %v914_v42 = vmul.f32 %v790_v40, %v8802_v7  ;;  %v490_v40 = vpop.xlane.xlu2 %489 }
 0x11c   : > { %v575_v62 = vsub.f32 1.5, %v574_v28  ;;  %v592_v63 = vmul.f32 %v9112_v43, %v9060_v2  ;;  %v9124_v23 = vpop.eup %7860  ;;  %vm598_vm0 = vweird.f32 %v9112_v43  ;;  %v845_v7 = vsub.f32 1.5, %v844_v24 }
 0x11d   : > { %v590_v1 = vsel %vm9100_vm4, %v9042_v29, %v586_v25  ;;  %7870 = vrsqrt.f32 %v9109_v47  ;;  %v602_v0 = vmul.f32 %v9124_v23, %v9062_v51  ;;  %v9148_v4 = vpop.eup %7862  ;;  %vm608_vm3 = vweird.f32 %v9124_v23  ;;  %vm9186_vm1 = vmor %vm597_vm15, %vm598_vm0 }
 0x11e   : > { %v894_v53 = vmul.f32 %v590_v1, %v8850_v31  ;;  %v576_v50 = vmul.f32 %v9072_v59, %v575_v62  ;;  %v593_v11 = vmul.f32 %v9112_v43, %v592_v63  ;;  %v795_v31 = vsub.f32 1.5, %v794_v55  ;;  %v9152_v22 = vpop.eup %7864  ;;  %vm9201_vm4 = vmor %vm607_vm2, %vm608_vm3 }
 0x11f   : > { %v603_v17 = vmul.f32 %v9124_v23, %v602_v0  ;;  %v9164_v48 = vpop.eup %7866  ;;  %v835_v0 = vsub.f32 1.5, %v834_v41  ;;  %v822_v41 = vmul.f32 %v9148_v4, %v9068_v54  ;;  %vm617_vm13 = vweird.f32 %v9095_v57 }
 0x120   : > { %v580_v25 = vsel %vm9136_vm11, %v9072_v59, %v576_v50  ;;  %v594_v28 = vmul.f32 0.5, %v593_v11  ;;  %v927_v59 = vmul.f32 %v8944_v21, %v894_v53  ;;  %v9170_v55 = vpop.eup %7868  ;;  %v947_v50 = vmul.f32 %v8944_v21, %v914_v42  ;;  %v488_v11 = vpop.xlane.xlu1 %487  ;;  %vm9232_vm11 = vmor %vm807_vm8, %vm808_vm9 }
 0x121   : > { %v893_v34 = vmul.f32 %v580_v25, %v8853_v32  ;;  %v604_v62 = vmul.f32 0.5, %v603_v17  ;;  %v612_v32 = vmul.f32 %v9152_v22, %v9095_v57  ;;  %v862_v24 = vmul.f32 %v9164_v48, %v9077_v49  ;;  %vm9262_vm8 = vmor %vm837_vm14, %vm838_vm5 }
 0x122   : > { %v595_v1 = vsub.f32 1.5, %v594_v28  ;;  %v852_v25 = vmul.f32 %v9170_v55, %v9089_v12  ;;  %v796_v17 = vmul.f32 %v9037_v13, %v795_v31  ;;  %v823_v29 = vmul.f32 %v9148_v4, %v822_v41 }
 0x123   : > { %v9174_v56 = vpop.eup %7870  ;;  %v926_v10 = vmul.f32 %v8944_v21, %v893_v34  ;;  %v605_v53 = vsub.f32 1.5, %v604_v62  ;;  %v9211_v34 = vmax.f32 %v490_v40, 1e-24  ;;  %v613_v31 = vmul.f32 %v9152_v22, %v612_v32 }
 0x124   : > { %v596_v63 = vmul.f32 %v9112_v43, %v595_v1  ;;  %v622_v44 = vmul.f32 %v9174_v56, %v9109_v47  ;;  %v806_v1 = vmul.f32 %v9014_v18, %v805_v6  ;;  %v846_v40 = vmul.f32 %v9045_v35, %v845_v7 }
 0x125   : > { %v9205_v28 = vpack.c.bf16 %v927_v59, %v926_v10  ;;  %v606_v42 = vmul.f32 %v9124_v23, %v605_v53  ;;  %v9226_v59 = vmax.f32 %v488_v11, 1e-24  ;;  %v9242_v10 = vpack.c.bf16 %v947_v50, %v946_v16 }
 0x126   : > { %v600_v46 = vsel %vm9186_vm1, %v9112_v43, %v596_v63  ;;  %v623_v32 = vmul.f32 %v9174_v56, %v622_v44  ;;  %v836_v43 = vmul.f32 %v9064_v52, %v835_v0  ;;  %v863_v63 = vmul.f32 %v9164_v48, %v862_v24 }
 0x127   : > { %1078 = vmatmul.bf16.vlgmr.msra.gmra.mxu0 %v9205_v28  ;;  %1167 = vmatmul.bf16.vlgmr.msra.gmra.mxu1 %v9205_v28  ;;  %v610_v62 = vsel %vm9201_vm4, %v9124_v23, %v606_v42  ;;  %v853_v23 = vmul.f32 %v9170_v55, %v852_v25  ;;  %v815_v16 = vsub.f32 1.5, %v9056_v8  ;;  %v800_v9 = vsel %vm9219_vm6, %v9037_v13, %v796_v17  ;;  %v7613_v8 = vld [vmem:[#allocation6 + $0x18] sm:$0xff] }
 0x128   : > { %1128 = vmatmul.bf16.gmra.mxu2 %v9242_v10  ;;  %1217 = vmatmul.bf16.gmra.mxu3 %v9242_v10  ;;  %7872 = vrsqrt.f32 %v9211_v34  ;;  %v614_v53 = vmul.f32 0.5, %v613_v31  ;;  %v895_v61 = vmul.f32 %v600_v46, %v8867_v39  ;;  %v896_v50 = vmul.f32 %v610_v62, %v8861_v37 }
 0x129   : > { %7874 = vrsqrt.f32 %v9226_v59  ;;  %vm817_vm9 = vweird.f32 %v8934_v5  ;;  %v810_v13 = vsel %vm9232_vm11, %v9014_v18, %v806_v1  ;;  %v9282_v44 = vmax.f32 %v8974_v58, 1e-24  ;;  %3618 = vmatpush.bf16.msrb.mxu2 %v7613_v8 }
 0x12a   : > { %7876 = vrsqrt.f32 %v9130_v60  ;;  %v624_v11 = vmul.f32 0.5, %v623_v32  ;;  %v850_v39 = vsel %vm9250_vm7, %v9045_v35, %v846_v40  ;;  %v840_v37 = vsel %vm9262_vm8, %v9064_v52, %v836_v43  ;;  %v492_v40 = vpop.xlane.xlu0 %491  ;;  %vm9353_vm7 = vmor %vm817_vm9, %vm818_vm10 }
 0x12b   : > { %v864_v0 = vmul.f32 0.5, %v863_v63  ;;  %v854_v24 = vmul.f32 0.5, %v853_v23  ;;  %v9291_v25 = vmul.f32 %v8961_v3, %v815_v16  ;;  %v824_v18 = vmul.f32 0.5, %v823_v29  ;;  %v494_v16 = vpop.xlane.xlu1 %493 }
 0x12c   : > { %v915_v58 = vmul.f32 %v800_v9, %v8821_v15  ;;  %v615_v2 = vsub.f32 1.5, %v614_v53  ;;  %v928_v17 = vmul.f32 %v8944_v21, %v895_v61  ;;  %v929_v35 = vmul.f32 %v8944_v21, %v896_v50 }
 0x12d   : > { %v916_v41 = vmul.f32 %v810_v13, %v8818_v14  ;;  %7878 = vrsqrt.f32 %v9282_v44  ;;  %v625_v42 = vsub.f32 1.5, %v624_v11  ;;  %v919_v1 = vmul.f32 %v840_v37, %v8831_v20 }
 0x12e   : > { %v9299_v52 = vpop.eup %7872  ;;  %v920_v51 = vmul.f32 %v850_v39, %v8828_v19  ;;  %v865_v15 = vsub.f32 1.5, %v864_v0  ;;  %v855_v6 = vsub.f32 1.5, %v854_v24  ;;  %vm618_vm14 = vweird.f32 %v9152_v22 }
 0x12f   : > { %v9304_v31 = vpop.eup %7874  ;;  %vm627_vm15 = vweird.f32 %v9109_v47  ;;  %vm628_vm0 = vweird.f32 %v9174_v56  ;;  %v952_v14 = vmul.f32 %v8944_v21, %v919_v1  ;;  %v616_v19 = vmul.f32 %v9152_v22, %v615_v2  ;;  %vm9320_vm2 = vmor %vm617_vm13, %vm618_vm14 }
 0x130   : > { %v9308_v46 = vpop.eup %7876  ;;  %v953_v20 = vmul.f32 %v8944_v21, %v920_v51  ;;  %v9315_v62 = vpack.c.bf16 %v929_v35, %v928_v17  ;;  %v948_v32 = vmul.f32 %v8944_v21, %v915_v58  ;;  %v949_v57 = vmul.f32 %v8944_v21, %v916_v41  ;;  %vm9337_vm5 = vmor %vm627_vm15, %vm628_vm0 }
 0x131   : > { %v626_v36 = vmul.f32 %v9174_v56, %v625_v42  ;;  %v642_v63 = vmul.f32 %v9299_v52, %v9211_v34  ;;  %v632_v23 = vmul.f32 %v9304_v31, %v9226_v59  ;;  %vm867_vm3 = vweird.f32 %v9077_v49  ;;  %v7612_v49 = vld [vmem:[#allocation6 + $0x10] sm:$0xff] }
 0x132   : > { %v9328_v7 = vpack.c.bf16 %v953_v20, %v952_v14  ;;  %v825_v9 = vsub.f32 1.5, %v824_v18  ;;  %vm857_vm1 = vweird.f32 %v9089_v12  ;;  %vm858_vm4 = vweird.f32 %v9170_v55  ;;  %3619 = vmatpush.bf16.msrb.mxu2 %v7612_v49 }
 0x133   : > { %v9341_v8 = vpop.eup %7878  ;;  %v872_v53 = vmul.f32 %v9308_v46, %v9130_v60  ;;  %vm868_vm6 = vweird.f32 %v9164_v48  ;;  %vm828_vm11 = vweird.f32 %v9148_v4  ;;  %v9347_v61 = vmax.f32 %v492_v40, 1e-24  ;;  %vm9367_vm8 = vmor %vm857_vm1, %vm858_vm4 }
 0x134   : > { %15896 = vst [vmem:[#allocation35_spill] sm:$0xff] %v9328_v7  ;;  %v866_v50 = vmul.f32 %v9164_v48, %v865_v15  ;;  %v856_v13 = vmul.f32 %v9170_v55, %v855_v6  ;;  %v9360_v11 = vpack.c.bf16 %v949_v57, %v948_v32  ;;  %v9363_v39 = vmax.f32 %v494_v16, 1e-24  ;;  %vm9383_vm9 = vmor %vm867_vm3, %vm868_vm6 }
 0x135   : > { %v630_v37 = vsel %vm9337_vm5, %v9174_v56, %v626_v36  ;;  %v620_v0 = vsel %vm9320_vm2, %v9152_v22, %v616_v19  ;;  %v643_v24 = vmul.f32 %v9299_v52, %v642_v63  ;;  %v633_v18 = vmul.f32 %v9304_v31, %v632_v23  ;;  %vm9395_vm10 = vmor %vm827_vm12, %vm828_vm11 }
 0x136   : > { %v826_v58 = vmul.f32 %v9148_v4, %v825_v9  ;;  %v882_v56 = vmul.f32 %v9341_v8, %v9282_v44  ;;  %v873_v2 = vmul.f32 %v9308_v46, %v872_v53  ;;  %7880 = vrsqrt.f32 %v9347_v61  ;;  %v498_v9 = vpop.xlane.xlu0 %497 }
 0x137   : > { %1083 = vmatmul.bf16.gmra.mxu0 %v9315_v62  ;;  %1172 = vmatmul.bf16.gmra.mxu1 %v9315_v62  ;;  %v860_v17 = vsel %vm9367_vm8, %v9170_v55, %v856_v13  ;;  %v897_v35 = vmul.f32 %v620_v0, %v8864_v38  ;;  %v898_v54 = vmul.f32 %v630_v37, %v8878_v45  ;;  %7882 = vrsqrt.f32 %v9363_v39  ;;  %v496_v13 = vpop.xlane.xlu2 %495  ;;  %v8031_v37 = vld [vmem:[%s8772_s4 + $0x48] sm:$0xff] }
 0x138   : > { %1133 = vmatmul.bf16.gmra.mxu2 %v9360_v11  ;;  %1222 = vmatmul.bf16.gmra.mxu3 %v9360_v11  ;;  %v820_v41 = vsel %vm9353_vm7, %v8961_v3, %v9291_v25  ;;  %v870_v42 = vsel %vm9383_vm9, %v9164_v48, %v866_v50  ;;  %v644_v1 = vmul.f32 0.5, %v643_v24  ;;  %v634_v51 = vmul.f32 0.5, %v633_v18  ;;  %v8024_v48 = vld [vmem:[%s8772_s4 + $0xc0] sm:$0xff] }
 0x139   : > { %v830_v38 = vsel %vm9395_vm10, %v9148_v4, %v826_v58  ;;  %v883_v45 = vmul.f32 %v9341_v8, %v882_v56  ;;  %v874_v55 = vmul.f32 0.5, %v873_v2  ;;  %vm877_vm12 = vweird.f32 %v9130_v60  ;;  %v8025_v4 = vld [vmem:[%s8772_s4 + $0xc8] sm:$0xff] }
 0x13a   : > { %v921_v15 = vmul.f32 %v860_v17, %v8843_v27  ;;  %v930_v3 = vmul.f32 %v8944_v21, %v897_v35  ;;  %v931_v25 = vmul.f32 %v8944_v21, %v898_v54  ;;  %v917_v6 = vmul.f32 %v8024_v48, %v820_v41  ;;  %v8026_v35 = vld [vmem:[%s8772_s4 + $0x30] sm:$0xff]  ;;  %v8027_v41 = vld [vmem:[%s8772_s4 + $0x38] sm:$0xff] }
 0x13b   : > { %v922_v14 = vmul.f32 %v870_v42, %v8840_v26  ;;  %v645_v19 = vsub.f32 1.5, %v644_v1  ;;  %v635_v32 = vsub.f32 1.5, %v634_v51  ;;  %v918_v57 = vmul.f32 %v8025_v4, %v830_v38  ;;  %v8028_v51 = vld [vmem:[%s8772_s4 + $0xf0] sm:$0xff]  ;;  %v8029_v48 = vld [vmem:[%s8772_s4 + $0xf8] sm:$0xff] }
 0x13c   : > { %v9425_v20 = vpop.eup %7880  ;;  %v954_v40 = vmul.f32 %v8944_v21, %v921_v15  ;;  %v884_v43 = vmul.f32 0.5, %v883_v45  ;;  %vm647_vm13 = vweird.f32 %v9211_v34  ;;  %vm648_vm14 = vweird.f32 %v9299_v52 }
 0x13d   : > { %v9429_v36 = vpop.eup %7882  ;;  %v955_v27 = vmul.f32 %v8944_v21, %v922_v14  ;;  %v875_v63 = vsub.f32 1.5, %v874_v55  ;;  %vm878_vm15 = vweird.f32 %v9308_v46  ;;  %vm637_vm0 = vweird.f32 %v9226_v59  ;;  %vm9445_vm3 = vmor %vm647_vm13, %vm648_vm14 }
 0x13e   : > { %vm638_vm2 = vweird.f32 %v9304_v31  ;;  %v9437_v26 = vpack.c.bf16 %v931_v25, %v930_v3  ;;  %v950_v23 = vmul.f32 %v8944_v21, %v917_v6  ;;  %v652_v16 = vmul.f32 %v9425_v20, %v9347_v61  ;;  %vm9464_vm4 = vmor %vm877_vm12, %vm878_vm15  ;;  %v504_v17 = vpop.xlane.xlu0 %503 }
 0x13f   : > { %v9442_v34 = vpack.c.bf16 %v955_v27, %v954_v40  ;;  %v646_v29 = vmul.f32 %v9299_v52, %v645_v19  ;;  %v636_v59 = vmul.f32 %v9304_v31, %v635_v32  ;;  %v951_v47 = vmul.f32 %v8944_v21, %v918_v57  ;;  %vm9453_vm1 = vmor %vm637_vm0, %vm638_vm2  ;;  %v502_v57 = vpop.xlane.xlu2 %501  ;;  %v500_v27 = vpop.xlane.xlu1 %499 }
 0x140   : > { %v662_v50 = vmul.f32 %v9429_v36, %v9363_v39  ;;  %v885_v5 = vsub.f32 1.5, %v884_v43  ;;  %v876_v0 = vmul.f32 %v9308_v46, %v875_v63  ;;  %v9458_v24 = vmax.f32 %v498_v9, 1e-24 }
 0x141   : > { %15907 = vst [vmem:[#allocation36_spill] sm:$0xff] %v9442_v34  ;;  %vm887_vm5 = vweird.f32 %v9282_v44  ;;  %vm888_vm6 = vweird.f32 %v9341_v8  ;;  %v653_v12 = vmul.f32 %v9425_v20, %v652_v16  ;;  %v9473_v58 = vmax.f32 %v496_v13, 1e-24  ;;  %v8030_v13 = vld [vmem:[%s8772_s4 + $0x40] sm:$0xff] }
 0x142   : > { %v650_v60 = vsel %vm9445_vm3, %v9299_v52, %v646_v29  ;;  %v640_v44 = vsel %vm9453_vm1, %v9304_v31, %v636_v59  ;;  %v9481_v56 = vpack.c.bf16 %v951_v47, %v950_v23  ;;  %v663_v2 = vmul.f32 %v9429_v36, %v662_v50  ;;  %vm9488_vm11 = vmor %vm887_vm5, %vm888_vm6  ;;  %v7611_v52 = vld [vmem:[#allocation6 + $0x8] sm:$0xff]  ;;  %v7610_v50 = vld [vmem:[#allocation6] sm:$0xff] }
 0x143   : > { %v886_v22 = vmul.f32 %v9341_v8, %v885_v5  ;;  %v880_v49 = vsel %vm9464_vm4, %v9308_v46, %v876_v0  ;;  %7884 = vrsqrt.f32 %v9458_v24  ;;  %v654_v31 = vmul.f32 0.5, %v653_v12  ;;  %3620 = vmatpush.bf16.msrb.mxu2 %v7611_v52 }
 0x144   : > { %v899_v54 = vmul.f32 %v8026_v35, %v640_v44  ;;  %v900_v42 = vmul.f32 %v8027_v41, %v650_v60  ;;  %7886 = vrsqrt.f32 %v9473_v58  ;;  %v664_v46 = vmul.f32 0.5, %v663_v2 }
 0x145   : > { %v890_v1 = vsel %vm9488_vm11, %v9341_v8, %v886_v22  ;;  %v923_v38 = vmul.f32 %v8028_v51, %v880_v49  ;;  %v655_v45 = vsub.f32 1.5, %v654_v31  ;;  %vm657_vm7 = vweird.f32 %v9347_v61  ;;  %v8037_v31 = vld [vmem:[%s8772_s4 + $0x78] sm:$0xff] }
 0x146   : > { %v932_v55 = vmul.f32 %v8944_v21, %v899_v54  ;;  %v933_v15 = vmul.f32 %v8944_v21, %v900_v42  ;;  %v665_v25 = vsub.f32 1.5, %v664_v46  ;;  %v924_v6 = vmul.f32 %v8029_v48, %v890_v1 }
 0x147   : > { %1088 = vmatmul.bf16.gmra.mxu0 %v9437_v26  ;;  %1177 = vmatmul.bf16.gmra.mxu1 %v9437_v26  ;;  %v956_v14 = vmul.f32 %v8944_v21, %v923_v38  ;;  %vm658_vm8 = vweird.f32 %v9425_v20  ;;  %vm667_vm9 = vweird.f32 %v9363_v39  ;;  %vm668_vm10 = vweird.f32 %v9429_v36 }
 0x148   : > { %1138 = vmatmul.bf16.gmra.mxu2 %v9481_v56  ;;  %1227 = vmatmul.bf16.gmra.mxu3 %v9481_v56  ;;  %v957_v8 = vmul.f32 %v8944_v21, %v924_v6  ;;  %v656_v32 = vmul.f32 %v9425_v20, %v655_v45  ;;  %v9516_v4 = vpack.c.bf16 %v933_v15, %v932_v55  ;;  %vm9518_vm12 = vmor %vm657_vm7, %vm658_vm8  ;;  %v9533_v16 = vmax.f32 %v502_v57, 1e-24  ;;  %v8032_v45 = vld [vmem:[%s8772_s4 + $0x50] sm:$0xff]  ;;  %v8033_v15 = vld [vmem:[%s8772_s4 + $0x58] sm:$0xff] }
 0x149   : > { %v9504_v3 = vpop.eup %7884  ;;  %v666_v43 = vmul.f32 %v9429_v36, %v665_v25  ;;  %vm9529_vm13 = vmor %vm667_vm9, %vm668_vm10  ;;  %v9537_v9 = vmax.f32 %v500_v27, 1e-24  ;;  %3621 = vmatpush.bf16.msrb.mxu2 %v7610_v50  ;;  %vm687_vm14 = vweird.f32 %v9458_v24  ;;  %vm677_vm0 = vweird.f32 %v9473_v58  ;;  %v8035_v50 = vld [vmem:[%s8772_s4 + $0x68] sm:$0xff] }
 0x14a   : > { %v9508_v19 = vpop.eup %7886  ;;  %v682_v61 = vmul.f32 %v9504_v3, %v9458_v24  ;;  %v9527_v63 = vpack.c.bf16 %v957_v8, %v956_v14  ;;  %v660_v29 = vsel %vm9518_vm12, %v9425_v20, %v656_v32  ;;  %7888 = vrsqrt.f32 %v9533_v16 }
 0x14b   : > { %v672_v39 = vmul.f32 %v9508_v19, %v9473_v58  ;;  %v670_v53 = vsel %vm9529_vm13, %v9429_v36, %v666_v43  ;;  %v901_v5 = vmul.f32 %v8030_v13, %v660_v29  ;;  %7890 = vrsqrt.f32 %v9537_v9  ;;  %v506_v58 = vpop.xlane.xlu1 %505 }
 0x14c   : > { %15918 = vst [vmem:[#allocation37_spill] sm:$0xff] %v9527_v63  ;;  %v683_v59 = vmul.f32 %v9504_v3, %v682_v61  ;;  %v902_v0 = vmul.f32 %v8031_v37, %v670_v53  ;;  %vm688_vm15 = vweird.f32 %v9504_v3  ;;  %vm678_vm2 = vweird.f32 %v9508_v19 }
 0x14d   : > { %v673_v47 = vmul.f32 %v9508_v19, %v672_v39  ;;  %v934_v36 = vmul.f32 %v8944_v21, %v901_v5  ;;  %vm9564_vm3 = vmor %vm687_vm14, %vm688_vm15  ;;  %v553_v41 = vmax.f32 %v504_v17, 1e-24  ;;  %v554_v42 = vmax.f32 %v506_v58, 1e-24  ;;  %v8036_v17 = vld [vmem:[%s8772_s4 + $0x70] sm:$0xff] }
 0x14e   : > { %v684_v20 = vmul.f32 0.5, %v683_v59  ;;  %v935_v12 = vmul.f32 %v8944_v21, %v902_v0  ;;  %vm679_vm1 = vmor %vm677_vm0, %vm678_vm2  ;;  %vm707_vm4 = vweird.f32 %v9533_v16  ;;  %vm697_vm6 = vweird.f32 %v9537_v9  ;;  %v8034_v59 = vld [vmem:[%s8772_s4 + $0x60] sm:$0xff] }
 0x14f   : > { %v674_v18 = vmul.f32 0.5, %v673_v47  ;;  %7892 = vrsqrt.f32 %v553_v41  ;;  %vm717_vm9 = vweird.f32 %v553_v41  ;;  %vm727_vm12 = vweird.f32 %v554_v42 }
 0x150   : > { %v9555_v60 = vpop.eup %7888  ;;  %v685_v44 = vsub.f32 1.5, %v684_v20  ;;  %v9561_v49 = vpack.c.bf16 %v935_v12, %v934_v36  ;;  %7894 = vrsqrt.f32 %v554_v42 }
 0x151   : > { %v675_v2 = vsub.f32 1.5, %v674_v18  ;;  %v7891_v22 = vpop.eup %7890  ;;  %v702_v24 = vmul.f32 %v9555_v60, %v9533_v16  ;;  %vm708_vm5 = vweird.f32 %v9555_v60 }
 0x152   : > { %v686_v52 = vmul.f32 %v9504_v3, %v685_v44  ;;  %v692_v54 = vmul.f32 %v7891_v22, %v9537_v9  ;;  %vm698_vm11 = vweird.f32 %v7891_v22  ;;  %vm9591_vm7 = vmor %vm707_vm4, %vm708_vm5 }
 0x153   : > { %v676_v35 = vmul.f32 %v9508_v19, %v675_v2  ;;  %v703_v51 = vmul.f32 %v9555_v60, %v702_v24  ;;  %vm699_vm8 = vmor %vm697_vm6, %vm698_vm11 }
 0x154   : > { %v690_v46 = vsel %vm9564_vm3, %v9504_v3, %v686_v52  ;;  %v693_v38 = vmul.f32 %v7891_v22, %v692_v54 }
 0x155   : > { %v680_v1 = vsel %vm679_vm1, %v9508_v19, %v676_v35  ;;  %v904_v25 = vmul.f32 %v8033_v15, %v690_v46  ;;  %v704_v48 = vmul.f32 0.5, %v703_v51  ;;  %v7893_v19 = vpop.eup %7892 }
 0x156   : > { %v903_v55 = vmul.f32 %v8032_v45, %v680_v1  ;;  %v694_v6 = vmul.f32 0.5, %v693_v38  ;;  %v7895_v57 = vpop.eup %7894  ;;  %v712_v27 = vmul.f32 %v7893_v19, %v553_v41  ;;  %vm718_vm10 = vweird.f32 %v7893_v19 }
 0x157   : > { %1093 = vmatmul.bf16.gmra.mxu0 %v9516_v4  ;;  %1182 = vmatmul.bf16.gmra.mxu1 %v9516_v4  ;;  %v937_v3 = vmul.f32 %v8944_v21, %v904_v25  ;;  %v705_v8 = vsub.f32 1.5, %v704_v48  ;;  %v722_v23 = vmul.f32 %v7895_v57, %v554_v42  ;;  %vm728_vm13 = vweird.f32 %v7895_v57  ;;  %vm719_vm14 = vmor %vm717_vm9, %vm718_vm10 }
 0x158   : > { %1143 = vmatmul.bf16.gmra.mxu2 %v9328_v7  ;;  %1232 = vmatmul.bf16.gmra.mxu3 %v9328_v7  ;;  %v936_v14 = vmul.f32 %v8944_v21, %v903_v55  ;;  %v695_v32 = vsub.f32 1.5, %v694_v6  ;;  %v713_v29 = vmul.f32 %v7893_v19, %v712_v27  ;;  %vm729_vm15 = vmor %vm727_vm12, %vm728_vm13 }
 0x159   : > { %v706_v43 = vmul.f32 %v9555_v60, %v705_v8  ;;  %v723_v53 = vmul.f32 %v7895_v57, %v722_v23 }
 0x15a   : > { %v9588_v40 = vpack.c.bf16 %v937_v3, %v936_v14  ;;  %v696_v39 = vmul.f32 %v7891_v22, %v695_v32  ;;  %v714_v5 = vmul.f32 0.5, %v713_v29 }
 0x15b   : > { %v710_v16 = vsel %vm9591_vm7, %v9555_v60, %v706_v43  ;;  %v724_v37 = vmul.f32 0.5, %v723_v53 }
 0x15c   : > { %v700_v9 = vsel %vm699_vm8, %v7891_v22, %v696_v39  ;;  %v906_v13 = vmul.f32 %v8035_v50, %v710_v16  ;;  %v715_v18 = vsub.f32 1.5, %v714_v5 }
 0x15d   : > { %v905_v47 = vmul.f32 %v8034_v59, %v700_v9  ;;  %v725_v36 = vsub.f32 1.5, %v724_v37  ;;  %v426_v59 = vlaneseq }
 0x15e   : > { %v939_v20 = vmul.f32 %v8944_v21, %v906_v13  ;;  %v716_v60 = vmul.f32 %v7893_v19, %v715_v18 }
 0x15f   : > { %v938_v0 = vmul.f32 %v8944_v21, %v905_v47  ;;  %v726_v44 = vmul.f32 %v7895_v57, %v725_v36 }
 0x160   : > { %v720_v2 = vsel %vm719_vm14, %v7893_v19, %v716_v60 }
 0x161   : > { %v9606_v12 = vpack.c.bf16 %v939_v20, %v938_v0  ;;  %v730_v22 = vsel %vm729_vm15, %v7895_v57, %v726_v44  ;;  %v907_v52 = vmul.f32 %v8036_v17, %v720_v2  ;;  %v9640_v2 = vshrl.u32 %v426_v59, 7 }
 0x162   : > { %v908_v35 = vmul.f32 %v8037_v31, %v730_v22 }
 0x163   : > { %v940_v41 = vmul.f32 %v8944_v21, %v907_v52  ;;  %vm1856_vm7 = vcmp.lt.s32.totalorder %v9640_v2, 1 }
 0x164   : > { %v941_v42 = vmul.f32 %v8944_v21, %v908_v35 }
 0x166   : > { %v9617_v46 = vpack.c.bf16 %v941_v42, %v940_v41 }
 0x167   : > { %1098 = vmatmul.bf16.gmra.mxu0 %v9561_v49  ;;  %1187 = vmatmul.bf16.gmra.mxu1 %v9561_v49 }
 0x168   : > { %1148 = vmatmul.bf16.gmra.mxu2 %v9442_v34  ;;  %1237 = vmatmul.bf16.gmra.mxu3 %v9442_v34 }
 0x177   : > { %1103 = vmatmul.bf16.gmra.mxu0 %v9588_v40  ;;  %1192 = vmatmul.bf16.gmra.mxu1 %v9588_v40 }
 0x178   : > { %1153 = vmatmul.bf16.gmra.mxu2 %v9527_v63  ;;  %1242 = vmatmul.bf16.gmra.mxu3 %v9527_v63 }
 0x187   : > { %1108 = vmatmul.bf16.gmra.mxu0 %v9606_v12  ;;  %1197 = vmatmul.bf16.gmra.mxu1 %v9606_v12 }
 0x188   : > { %3622 = vmatmul.bf16.vlgmr.msrb.gmra.mxu2 %v9205_v28  ;;  %v9613_v24 = vpop.f32.mrf.mxu2  ;;  %v1208_v54 = vpop.f32.mrf.mxu3 }
 0x189   : > { %v7402_v58 = vmul.f32 -1.442695, %v1208_v54 }
 0x18b   : > { %7896 = vpow2.f32 %v7402_v58 }
 0x190   : > { %v9619_v1 = vpop.f32.mrf.mxu2  ;;  %v1210_v51 = vpop.f32.mrf.mxu3 }
 0x191   : > { %v7897_v38 = vpop.eup %7896  ;;  %v7403_v28 = vmul.f32 -1.442695, %v1210_v51 }
 0x192   : > { %v1360_v45 = vadd.f32 1.0, %v7897_v38 }
 0x193   : > { %7898 = vpow2.f32 %v7403_v28 }
 0x194   : > { %7900 = vrcp.f32 %v1360_v45  ;;  %v1627_v16 = vand.u32 2147483648, %v1360_v45  ;;  %vm1621_vm2 = vweird.f32 %v1360_v45  ;;  %v1625_v9 = vand.u32 2147483647, %v1360_v45 }
 0x196   : > { %v1628_v0 = vor.u32 1.1754944e-38, %v1627_v16  ;;  %vm1626_vm4 = vcmp.eq.f32.partialorder %v1625_v9, 8.507059e+37 }
 0x197   : > { %1113 = vmatmul.bf16.gmra.mxu0 %v9617_v46  ;;  %1202 = vmatmul.bf16.gmra.mxu1 %v9617_v46 }
 0x198   : > { %3627 = vmatmul.bf16.gmra.mxu2 %v9315_v62  ;;  %v9624_v55 = vpop.f32.mrf.mxu2  ;;  %v1213_v21 = vpop.f32.mrf.mxu3 }
 0x199   : > { %15925 = vst [vmem:[#allocation38_spill] sm:$0xff] %v9624_v55  ;;  %v7899_v15 = vpop.eup %7898  ;;  %v7404_v25 = vmul.f32 -1.442695, %v1213_v21 }
 0x19a   : > { %v7901_v48 = vpop.eup %7900  ;;  %v1361_v6 = vadd.f32 1.0, %v7899_v15 }
 0x19b   : > { %v1617_v14 = vmul.f32 %v7901_v48, %v1360_v45  ;;  %7902 = vpow2.f32 %v7404_v25  ;;  %vm1622_vm0 = vweird.f32 %v7901_v48 }
 0x19c   : > { %7904 = vrcp.f32 %v1361_v6  ;;  %vm9632_vm3 = vmor %vm1621_vm2, %vm1622_vm0  ;;  %v1642_v47 = vand.u32 2147483648, %v1361_v6  ;;  %v1640_v37 = vand.u32 2147483647, %v1361_v6  ;;  %vm1636_vm5 = vweird.f32 %v1361_v6 }
 0x19d   : > { %v1618_v3 = vsub.f32 1.0, %v1617_v14  ;;  %v15569_v14 = vrot.slane %v9613_v24, 7 }
 0x19e   : > { %v1643_v22 = vor.u32 1.1754944e-38, %v1642_v47  ;;  %vm1641_vm11 = vcmp.eq.f32.partialorder %v1640_v37, 8.507059e+37 }
 0x19f   : > { %v1619_v19 = vmul.f32 %v7901_v48, %v1618_v3  ;;  %v1985_v3 = vrot.slane %v9619_v1, 7 }
 0x1a0   : > { %v1215_v32 = vpop.f32.mrf.mxu3  ;;  %v9628_v62 = vpop.f32.mrf.mxu2 }
 0x1a1   : > { %v7903_v57 = vpop.eup %7902  ;;  %v7405_v43 = vmul.f32 -1.442695, %v1215_v32  ;;  %15926 = vst [vmem:[#allocation39_spill] sm:$0xff] %v9628_v62  ;;  %v1620_v27 = vadd.f32 %v7901_v48, %v1619_v19  ;;  %v1986_v32 = vrot.slane %v9624_v55, 7 }
 0x1a2   : > { %v7905_v61 = vpop.eup %7904  ;;  %v9626_v39 = vadd.f32 1.0, %v7903_v57 }
 0x1a3   : > { %v1632_v23 = vmul.f32 %v7905_v61, %v1361_v6  ;;  %v1624_v13 = vsel %vm9632_vm3, %v7901_v48, %v1620_v27  ;;  %vm1637_vm1 = vweird.f32 %v7905_v61  ;;  %v1987_v27 = vrot.slane %v9628_v62, 7 }
 0x1a4   : > { %v1168_v8 = vpop.f32.mrf.mxu1  ;;  %7906 = vrcp.f32 %v9626_v39  ;;  %v9638_v44 = vsel %vm1626_vm4, %v1628_v0, %v1624_v13  ;;  %vm1638_vm6 = vmor %vm1636_vm5, %vm1637_vm1  ;;  %v9643_v35 = vpop.f32.mrf.mxu0  ;;  %v1655_v21 = vand.u32 2147483647, %v9626_v39  ;;  %v1657_v15 = vand.u32 2147483648, %v9626_v39 }
 0x1a5   : > { %v1633_v29 = vsub.f32 1.0, %v1632_v23  ;;  %7908 = vpow2.f32 %v7405_v43  ;;  %v7386_v50 = vmul.f32 -1.442695, %v1168_v8  ;;  %15929 = vst [vmem:[#allocation40_spill] sm:$0xff] %v9638_v44  ;;  %v15568_v42 = vrot.slane %v9638_v44, 7 }
 0x1a6   : > { %vm1651_vm9 = vweird.f32 %v9626_v39  ;;  %vm1656_vm12 = vcmp.eq.f32.partialorder %v1655_v21, 8.507059e+37 }
 0x1a7   : > { %v1634_v5 = vmul.f32 %v7905_v61, %v1633_v29  ;;  %7910 = vpow2.f32 %v7386_v50  ;;  %v9685_v50 = vsel %vm1856_vm7, %v1985_v3, %v1986_v32 }
 0x1a8   : > { %3632 = vmatmul.bf16.gmra.mxu2 %v9437_v26 }
 0x1a9   : > { %v1635_v18 = vadd.f32 %v7905_v61, %v1634_v5 }
 0x1aa   : > { %v7907_v60 = vpop.eup %7906 }
 0x1ab   : > { %v1218_v20 = vpop.f32.mrf.mxu3  ;;  %v7909_v17 = vpop.eup %7908  ;;  %v1639_v52 = vsel %vm1638_vm6, %v7905_v61, %v1635_v18  ;;  %v1647_v31 = vmul.f32 %v7907_v60, %v9626_v39  ;;  %vm1652_vm8 = vweird.f32 %v7907_v60  ;;  %v1658_v61 = vor.u32 1.1754944e-38, %v1657_v15 }
 0x1ac   : > { %v7406_v26 = vmul.f32 -1.442695, %v1218_v20  ;;  %v1170_v36 = vpop.f32.mrf.mxu1  ;;  %v9645_v54 = vsel %vm1641_vm11, %v1643_v22, %v1639_v52  ;;  %v9647_v58 = vadd.f32 1.0, %v7909_v17  ;;  %v9649_v41 = vpop.f32.mrf.mxu2  ;;  %vm1653_vm10 = vmor %vm1651_vm9, %vm1652_vm8  ;;  %v9679_v39 = vsel %vm1856_vm7, %v15569_v14, %v1985_v3 }
 0x1ad   : > { %15930 = vst [vmem:[#allocation41_spill] sm:$0xff] %v9649_v41  ;;  %v1889_v51 = vrot.slane %v9645_v54, 7  ;;  %v1648_v38 = vsub.f32 1.0, %v1647_v31  ;;  %v7387_v28 = vmul.f32 -1.442695, %v1170_v36  ;;  %v7911_v45 = vpop.eup %7910  ;;  %v15570_v23 = vrot.slane %v9649_v41, 7  ;;  %v9690_v37 = vpop.f32.mrf.mxu0 }
 0x1ae   : > { %7912 = vpow2.f32 %v7406_v26  ;;  %v9661_v6 = vadd.f32 1.0, %v7911_v45  ;;  %v9695_v20 = vsel %vm1856_vm7, %v1986_v32, %v1987_v27  ;;  %v1670_v18 = vand.u32 2147483647, %v9647_v58 }
 0x1af   : > { %7914 = vrcp.f32 %v9647_v58  ;;  %v1918_v25 = vsel %vm1856_vm7, %v15568_v42, %v1889_v51  ;;  %v1649_v48 = vmul.f32 %v7907_v60, %v1648_v38  ;;  %15932 = vst [vmem:[#allocation43_spill] sm:$0xff] %v9695_v20  ;;  %v9703_v36 = vsel %vm1856_vm7, %v1987_v27, %v15570_v23 }
 0x1b0   : > { %v9666_v19 = vmul.f32 %v1918_v25, %v9645_v54  ;;  %7916 = vpow2.f32 %v7387_v28  ;;  %15933 = vst [vmem:[#allocation44_spill] sm:$0xff] %v9703_v36  ;;  %v1672_v28 = vand.u32 2147483648, %v9647_v58  ;;  %v1385_v21 = vand.u32 2147483647, %v9661_v6 }
 0x1b1   : > { %v1650_v57 = vadd.f32 %v7907_v60, %v1649_v48  ;;  %7918 = vrcp.f32 %v9661_v6  ;;  %v1387_v48 = vand.u32 2147483648, %v9661_v6  ;;  %vm1666_vm14 = vweird.f32 %v9647_v58 }
 0x1b2   : > { %15931 = vst [vmem:[#allocation42_spill] sm:$0xff] %v9666_v19  ;;  %vm1381_vm15 = vweird.f32 %v9661_v6  ;;  %vm1671_vm3 = vcmp.eq.f32.partialorder %v1670_v18, 8.507059e+37  ;;  %vm9732_vm1 = vcmp.eq.f32.partialorder %v1385_v21, 8.507059e+37 }
 0x1b3   : > { %v1220_v8 = vpop.f32.mrf.mxu3  ;;  %v1654_v9 = vsel %vm1653_vm10, %v7907_v60, %v1650_v57 }
 0x1b4   : > { %v7913_v43 = vpop.eup %7912  ;;  %v7407_v16 = vmul.f32 -1.442695, %v1220_v8  ;;  %v1173_v53 = vpop.f32.mrf.mxu1  ;;  %v9681_v47 = vsel %vm1656_vm12, %v1658_v61, %v1654_v9  ;;  %v1673_v61 = vor.u32 1.1754944e-38, %v1672_v28 }
 0x1b5   : > { %v9673_v29 = vadd.f32 1.0, %v7913_v43  ;;  %v7915_v59 = vpop.eup %7914  ;;  %v1890_v13 = vrot.slane %v9681_v47, 7  ;;  %v9705_v60 = vpop.f32.mrf.mxu2  ;;  %v7388_v31 = vmul.f32 -1.442695, %v1173_v53  ;;  %v1388_v53 = vor.u32 1.1754944e-38, %v1387_v48 }
 0x1b6   : > { %7920 = vpow2.f32 %v7407_v16  ;;  %v1662_v5 = vmul.f32 %v7915_v59, %v9647_v58  ;;  %v7917_v0 = vpop.eup %7916  ;;  %15934 = vst [vmem:[#allocation45_spill] sm:$0xff] %v9705_v60  ;;  %vm1667_vm13 = vweird.f32 %v7915_v59  ;;  %v9755_v21 = vpop.f32.mrf.mxu0 }
 0x1b7   : > { %7922 = vrcp.f32 %v9673_v29  ;;  %v9707_v22 = vpop.eup %7918  ;;  %v9713_v52 = vadd.f32 1.0, %v7917_v0  ;;  %v1685_v8 = vand.u32 2147483647, %v9673_v29  ;;  %vm1668_vm2 = vmor %vm1666_vm14, %vm1667_vm13  ;;  %vm1681_vm5 = vweird.f32 %v9673_v29 }
 0x1b8   : > { %3637 = vmatmul.bf16.gmra.mxu2 %v9516_v4  ;;  %v1917_v4 = vsel %vm1856_vm7, %v1889_v51, %v1890_v13  ;;  %v1663_v17 = vsub.f32 1.0, %v1662_v5  ;;  %v1377_v45 = vmul.f32 %v9707_v22, %v9661_v6  ;;  %vm1382_vm0 = vweird.f32 %v9707_v22 }
 0x1b9   : > { %v9716_v38 = vmul.f32 %v1917_v4, %v9681_v47  ;;  %7924 = vrcp.f32 %v9713_v52  ;;  %vm9744_vm4 = vmor %vm1381_vm15, %vm1382_vm0  ;;  %vm9750_vm6 = vcmp.eq.f32.partialorder %v1685_v8, 8.507059e+37  ;;  %vm1396_vm8 = vweird.f32 %v9713_v52 }
 0x1ba   : > { %v1664_v25 = vmul.f32 %v7915_v59, %v1663_v17  ;;  %v1378_v3 = vsub.f32 1.0, %v1377_v45  ;;  %7926 = vpow2.f32 %v7388_v31  ;;  %v1687_v45 = vand.u32 2147483648, %v9673_v29 }
 0x1bb   : > { %15935 = vst [vmem:[#allocation46_spill] sm:$0xff] %v9716_v38  ;;  %v1223_v15 = vpop.f32.mrf.mxu3 }
 0x1bc   : > { %v7921_v51 = vpop.eup %7920  ;;  %v1665_v57 = vadd.f32 %v7915_v59, %v1664_v25  ;;  %v1379_v27 = vmul.f32 %v9707_v22, %v1378_v3  ;;  %v1175_v5 = vpop.f32.mrf.mxu1  ;;  %v7408_v25 = vmul.f32 -1.442695, %v1223_v15  ;;  %v1400_v15 = vand.u32 2147483647, %v9713_v52 }
 0x1bd   : > { %v7923_v32 = vpop.eup %7922  ;;  %v9728_v43 = vadd.f32 1.0, %v7921_v51  ;;  %v9759_v51 = vpop.f32.mrf.mxu2 }
 0x1be   : > { %v1677_v16 = vmul.f32 %v7923_v32, %v9673_v29  ;;  %v1669_v58 = vsel %vm1668_vm2, %v7915_v59, %v1665_v57  ;;  %v1380_v4 = vadd.f32 %v9707_v22, %v1379_v27  ;;  %vm1682_vm11 = vweird.f32 %v7923_v32  ;;  %15943 = vst [vmem:[#allocation48_spill] sm:$0xff] %v9759_v51 }
 0x1bf   : > { %7928 = vrcp.f32 %v9728_v43  ;;  %v9737_v0 = vsel %vm1671_vm3, %v1673_v61, %v1669_v58  ;;  %v7925_v17 = vpop.eup %7924  ;;  %v1402_v27 = vand.u32 2147483648, %v9713_v52  ;;  %vm1683_vm10 = vmor %vm1681_vm5, %vm1682_vm11  ;;  %v1969_v29 = vrot.slane %v9690_v37, 7 }
 0x1c0   : > { %15938 = vst [vmem:[#allocation47_spill] sm:$0xff] %v9737_v0  ;;  %v1678_v59 = vsub.f32 1.0, %v1677_v16  ;;  %v1891_v31 = vrot.slane %v9737_v0, 7  ;;  %v1392_v48 = vmul.f32 %v7925_v17, %v9713_v52  ;;  %v7927_v57 = vpop.eup %7926  ;;  %v1384_v61 = vsel %vm9744_vm4, %v9707_v22, %v1380_v4 }
 0x1c1   : > { %vm1397_vm9 = vweird.f32 %v7925_v17  ;;  %v9776_v14 = vadd.f32 1.0, %v7927_v57  ;;  %7930 = vpow2.f32 %v7408_v25  ;;  %v7389_v22 = vmul.f32 -1.442695, %v1175_v5 }
 0x1c2   : > { %v1679_v6 = vmul.f32 %v7923_v32, %v1678_v59  ;;  %v1916_v8 = vsel %vm1856_vm7, %v1890_v13, %v1891_v31  ;;  %v1393_v59 = vsub.f32 1.0, %v1392_v48  ;;  %v1688_v13 = vor.u32 1.1754944e-38, %v1687_v45  ;;  %vm9790_vm12 = vmor %vm1396_vm8, %vm1397_vm9 }
 0x1c3   : > { %v1225_v3 = vpop.f32.mrf.mxu3  ;;  %v9771_v16 = vmul.f32 %v1916_v8, %v9737_v0  ;;  %v9780_v4 = vsel %vm9732_vm1, %v1388_v53, %v1384_v61  ;;  %v1403_v5 = vor.u32 1.1754944e-38, %v1402_v27  ;;  %7932 = vrcp.f32 %v9776_v14 }
 0x1c4   : > { %v1680_v58 = vadd.f32 %v7923_v32, %v1679_v6  ;;  %v1394_v8 = vmul.f32 %v7925_v17, %v1393_v59  ;;  %vm1401_vm13 = vcmp.eq.f32.partialorder %v1400_v15, 8.507059e+37  ;;  %v15571_v28 = vrot.slane %v9780_v4, 7  ;;  %v1178_v57 = vpop.f32.mrf.mxu1 }
 0x1c5   : > { %15944 = vst [vmem:[#allocation49_spill] sm:$0xff] %v9771_v16  ;;  %v7929_v42 = vpop.eup %7928  ;;  %v1700_v25 = vand.u32 2147483647, %v9728_v43  ;;  %v1702_v52 = vand.u32 2147483648, %v9728_v43  ;;  %7934 = vpow2.f32 %v7389_v22  ;;  %vm1696_vm15 = vweird.f32 %v9728_v43  ;;  %v9817_v45 = vpop.f32.mrf.mxu2 }
 0x1c6   : > { %v1684_v18 = vsel %vm1683_vm10, %v7923_v32, %v1680_v58  ;;  %v1692_v6 = vmul.f32 %v7929_v42, %v9728_v43  ;;  %v1395_v9 = vadd.f32 %v7925_v17, %v1394_v8  ;;  %vm1697_vm14 = vweird.f32 %v7929_v42  ;;  %15950 = vst [vmem:[#allocation53_spill] sm:$0xff] %v9817_v45 }
 0x1c7   : > { %v9785_v48 = vsel %vm9750_vm6, %v1688_v13, %v1684_v18  ;;  %v7931_v58 = vpop.eup %7930  ;;  %v1989_v13 = vrot.slane %v9705_v60, 7  ;;  %v1970_v18 = vrot.slane %v9755_v21, 7  ;;  %vm1698_vm0 = vmor %vm1696_vm15, %vm1697_vm14  ;;  %vm1701_vm2 = vcmp.eq.f32.partialorder %v1700_v25, 8.507059e+37 }
 0x1c8   : > { %15945 = vst [vmem:[#allocation50_spill] sm:$0xff] %v9785_v48  ;;  %3642 = vmatmul.bf16.gmra.mxu2 %v9561_v49  ;;  %v1892_v32 = vrot.slane %v9785_v48, 7  ;;  %v1693_v53 = vsub.f32 1.0, %v1692_v6  ;;  %v1399_v27 = vsel %vm9790_vm12, %v7925_v17, %v1395_v9  ;;  %v9815_v17 = vpop.f32.mrf.mxu0  ;;  %vm1411_vm3 = vweird.f32 %v9776_v14 }
 0x1c9   : > { %v9807_v59 = vsel %vm1401_vm13, %v1403_v5, %v1399_v27  ;;  %15949 = vst [vmem:[#allocation52_spill] sm:$0xff] %v9815_v17  ;;  %v7933_v9 = vpop.eup %7932  ;;  %v1703_v5 = vor.u32 1.1754944e-38, %v1702_v52 }
 0x1ca   : > { %v1915_v61 = vsel %vm1856_vm7, %v1891_v31, %v1892_v32  ;;  %v1694_v49 = vmul.f32 %v7929_v42, %v1693_v53  ;;  %v15572_v8 = vrot.slane %v9807_v59, 7  ;;  %v9813_v31 = vadd.f32 1.0, %v7931_v58 }
 0x1cb   : > { %v9805_v15 = vmul.f32 %v1915_v61, %v9785_v48  ;;  %v1228_v22 = vpop.f32.mrf.mxu3  ;;  %v7409_v53 = vmul.f32 -1.442695, %v1225_v3  ;;  %v1407_v27 = vmul.f32 %v7933_v9, %v9776_v14  ;;  %v7935_v58 = vpop.eup %7934  ;;  %v1417_v3 = vand.u32 2147483648, %v9776_v14 }
 0x1cc   : > { %v1695_v6 = vadd.f32 %v7929_v42, %v1694_v49  ;;  %v1934_v43 = vsel %vm1856_vm7, %v15571_v28, %v15572_v8  ;;  %v1415_v49 = vand.u32 2147483647, %v9776_v14  ;;  %7936 = vrcp.f32 %v9813_v31 }
 0x1cd   : > { %15948 = vst [vmem:[#allocation51_spill] sm:$0xff] %v9805_v15  ;;  %v9829_v23 = vmul.f32 %v1934_v43, %v9807_v59  ;;  %v1408_v26 = vsub.f32 1.0, %v1407_v27  ;;  %vm1412_vm1 = vweird.f32 %v7933_v9  ;;  %v7390_v28 = vmul.f32 -1.442695, %v1178_v57  ;;  %v9894_v60 = vpop.f32.mrf.mxu2 }
 0x1ce   : > { %v1699_v61 = vsel %vm1698_vm0, %v7929_v42, %v1695_v6  ;;  %v9837_v6 = vadd.f32 1.0, %v7935_v58  ;;  %7938 = vpow2.f32 %v7409_v53  ;;  %v7410_v8 = vmul.f32 -1.442695, %v1228_v22  ;;  %vm9858_vm4 = vmor %vm1411_vm3, %vm1412_vm1  ;;  %v1180_v42 = vpop.f32.mrf.mxu1  ;;  %15963 = vst [vmem:[#allocation60_spill] sm:$0xff] %v9894_v60 }
 0x1cf   : > { %v9831_v25 = vsel %vm1701_vm2, %v1703_v5, %v1699_v61  ;;  %v15952_v5 = vrot.slane %v9643_v35, 7  ;;  %v1409_v57 = vmul.f32 %v7933_v9, %v1408_v26  ;;  %vm1416_vm5 = vcmp.eq.f32.partialorder %v1415_v49, 8.507059e+37 }
 0x1d0   : > { %15951 = vst [vmem:[#allocation54_spill] sm:$0xff] %v9831_v25  ;;  %v15573_v52 = vrot.slane %v9831_v25, 7  ;;  %7940 = vrcp.f32 %v9837_v6  ;;  %v15960_v14 = vrot.slane %v9815_v17, 7  ;;  %vm1711_vm6 = vweird.f32 %v9813_v31 }
 0x1d1   : > { %v9845_v43 = vsel %vm1856_vm7, %v15952_v5, %v1969_v29  ;;  %v1418_v5 = vor.u32 1.1754944e-38, %v1417_v3  ;;  %v1410_v58 = vadd.f32 %v7933_v9, %v1409_v57  ;;  %7942 = vpow2.f32 %v7390_v28 }
 0x1d2   : > { %v1914_v61 = vsel %vm1856_vm7, %v1892_v32, %v15573_v52  ;;  %v15956_v32 = vrot.slane %v9649_v41, 7  ;;  %v9874_v3 = vsel %vm1856_vm7, %v1969_v29, %v1970_v18  ;;  %v15958_v52 = vrot.slane %v9759_v51, 7 }
 0x1d3   : > { %v9854_v22 = vmul.f32 %v1914_v61, %v9831_v25  ;;  %v7937_v61 = vpop.eup %7936  ;;  %7944 = vpow2.f32 %v7410_v8  ;;  %v1414_v28 = vsel %vm9858_vm4, %v7933_v9, %v1410_v58  ;;  %v9890_v29 = vsel %vm1856_vm7, %v1970_v18, %v15960_v14 }
 0x1d4   : > { %v9867_v26 = vsel %vm1856_vm7, %v15956_v32, %v1989_v13  ;;  %v9880_v27 = vsel %vm1856_vm7, %v1989_v13, %v15958_v52  ;;  %v1230_v32 = vpop.f32.mrf.mxu3  ;;  %v1707_v57 = vmul.f32 %v7937_v61, %v9813_v31  ;;  %15961 = vst [vmem:[#allocation58_spill] sm:$0xff] %v9890_v29  ;;  %v7939_v13 = vpop.eup %7938  ;;  %v9896_v8 = vsel %vm1416_vm5, %v1418_v5, %v1414_v28 }
 0x1d5   : > { %15953 = vst [vmem:[#allocation55_spill] sm:$0xff] %v9854_v22  ;;  %v9892_v22 = vpop.f32.mrf.mxu0  ;;  %v7391_v9 = vmul.f32 -1.442695, %v1180_v42  ;;  %v15579_v58 = vrot.slane %v9896_v8, 7  ;;  %v1715_v18 = vand.u32 2147483647, %v9813_v31  ;;  %vm1712_vm11 = vweird.f32 %v7937_v61 }
 0x1d6   : > { %15957 = vst [vmem:[#allocation56_spill] sm:$0xff] %v9867_v26  ;;  %v1708_v53 = vsub.f32 1.0, %v1707_v57  ;;  %v9903_v14 = vadd.f32 1.0, %v7939_v13  ;;  %v7941_v49 = vpop.eup %7940  ;;  %vm1426_vm8 = vweird.f32 %v9837_v6  ;;  %v7411_v5 = vmul.f32 -1.442695, %v1230_v32  ;;  %vm1713_vm10 = vmor %vm1711_vm6, %vm1712_vm11 }
 0x1d7   : > { %15959 = vst [vmem:[#allocation57_spill] sm:$0xff] %v9880_v27  ;;  %v1717_v27 = vand.u32 2147483648, %v9813_v31  ;;  %v7943_v28 = vpop.eup %7942  ;;  %v15964_v42 = vrot.slane %v9807_v59, 7  ;;  %v1422_v52 = vmul.f32 %v7941_v49, %v9837_v6  ;;  %7946 = vpow2.f32 %v7391_v9 }
 0x1d8   : > { %15962 = vst [vmem:[#allocation59_spill] sm:$0xff] %v9892_v22  ;;  %3647 = vmatmul.bf16.gmra.mxu2 %v9588_v40  ;;  %v1709_v57 = vmul.f32 %v7937_v61, %v1708_v53  ;;  %v1430_v41 = vand.u32 2147483647, %v9837_v6  ;;  %v1432_v32 = vand.u32 2147483648, %v9837_v6  ;;  %7948 = vrcp.f32 %v9903_v14 }
 0x1d9   : > { %v1933_v40 = vsel %vm1856_vm7, %v15964_v42, %v15579_v58  ;;  %v7945_v13 = vpop.eup %7944  ;;  %v1423_v48 = vsub.f32 1.0, %v1422_v52  ;;  %vm1427_vm9 = vweird.f32 %v7941_v49  ;;  %v9920_v62 = vadd.f32 1.0, %v7943_v28  ;;  %v1183_v42 = vpop.f32.mrf.mxu1 }
 0x1da   : > { %v9915_v26 = vmul.f32 %v1933_v40, %v9896_v8  ;;  %v1710_v36 = vadd.f32 %v7937_v61, %v1709_v57  ;;  %vm1716_vm12 = vcmp.eq.f32.partialorder %v1715_v18, 8.507059e+37  ;;  %v1718_v9 = vor.u32 1.1754944e-38, %v1717_v27  ;;  %vm9933_vm13 = vmor %vm1426_vm8, %vm1427_vm9 }
 0x1db   : > { %v9925_v53 = vadd.f32 1.0, %v7945_v13  ;;  %7950 = vpow2.f32 %v7411_v5  ;;  %v1424_v58 = vmul.f32 %v7941_v49, %v1423_v48  ;;  %v1730_v16 = vand.u32 2147483647, %v9903_v14 }
 0x1dc   : > { %v1714_v40 = vsel %vm1713_vm10, %v7937_v61, %v1710_v36  ;;  %7952 = vrcp.f32 %v9920_v62  ;;  %v1433_v31 = vor.u32 1.1754944e-38, %v1432_v32  ;;  %v15968_v27 = vrot.slane %v9817_v45, 7  ;;  %v9946_v61 = vpop.f32.mrf.mxu3 }
 0x1dd   : > { %v9929_v52 = vsel %vm1716_vm12, %v1718_v9, %v1714_v40  ;;  %v15969_v18 = vrot.slane %v9759_v51, 7  ;;  %v7947_v5 = vpop.eup %7946  ;;  %v1425_v57 = vadd.f32 %v7941_v49, %v1424_v58  ;;  %vm9949_vm14 = vcmp.eq.f32.partialorder %v1430_v41, 8.507059e+37  ;;  %v9954_v32 = vpop.f32.mrf.mxu0 }
 0x1de   : > { %15965 = vst [vmem:[#allocation61_spill] sm:$0xff] %v9929_v52  ;;  %v15584_v6 = vrot.slane %v9929_v52, 7  ;;  %7954 = vrcp.f32 %v9925_v53  ;;  %v9956_v9 = vpop.f32.mrf.mxu2  ;;  %v7949_v40 = vpop.eup %7948  ;;  %vm1726_vm15 = vweird.f32 %v9903_v14  ;;  %v7392_v48 = vmul.f32 -1.442695, %v1183_v42 }
 0x1df   : > { %v9943_v36 = vsel %vm1856_vm7, %v15969_v18, %v15968_v27  ;;  %15973 = vst [vmem:[#allocation63_spill] sm:$0xff] %v9954_v32  ;;  %v1732_v27 = vand.u32 2147483648, %v9903_v14  ;;  %v15975_v41 = vrot.slane %v9831_v25, 7  ;;  %v1722_v51 = vmul.f32 %v7949_v40, %v9903_v14 }
 0x1e0   : > { %15970 = vst [vmem:[#allocation62_spill] sm:$0xff] %v9943_v36  ;;  %v1429_v36 = vsel %vm9933_vm13, %v7941_v49, %v1425_v57  ;;  %vm9970_vm0 = vcmp.eq.f32.partialorder %v1730_v16, 8.507059e+37  ;;  %vm1441_vm2 = vweird.f32 %v9920_v62  ;;  %v1447_v49 = vand.u32 2147483648, %v9920_v62 }
 0x1e1   : > { %15974 = vst [vmem:[#allocation64_spill] sm:$0xff] %v9956_v9  ;;  %v1913_v58 = vsel %vm1856_vm7, %v15975_v41, %v15584_v6  ;;  %v7951_v18 = vpop.eup %7950  ;;  %v9980_v25 = vsel %vm9949_vm14, %v1433_v31, %v1429_v36  ;;  %v1445_v41 = vand.u32 2147483647, %v9920_v62  ;;  %v1723_v57 = vsub.f32 1.0, %v1722_v51 }
 0x1e2   : > { %v9976_v42 = vmul.f32 %v1913_v58, %v9929_v52  ;;  %v7953_v28 = vpop.eup %7952  ;;  %v15593_v16 = vrot.slane %v9980_v25, 7  ;;  %v9985_v6 = vadd.f32 1.0, %v7947_v5  ;;  %v9987_v0 = vadd.f32 1.0, %v7951_v18 }
 0x1e3   : > { %v1437_v38 = vmul.f32 %v7953_v28, %v9920_v62  ;;  %v1745_v58 = vand.u32 2147483647, %v9925_v53  ;;  %v1747_v13 = vand.u32 2147483648, %v9925_v53  ;;  %7956 = vpow2.f32 %v7392_v48  ;;  %v10003_v48 = vpop.f32.mrf.mxu1 }
 0x1e4   : > { %15978 = vst [vmem:[#allocation65_spill] sm:$0xff] %v9976_v42  ;;  %v7955_v31 = vpop.eup %7954  ;;  %v15979_v36 = vrot.slane %v9896_v8, 7  ;;  %v1724_v51 = vmul.f32 %v7949_v40, %v1723_v57  ;;  %vm1727_vm3 = vweird.f32 %v7949_v40  ;;  %7958 = vrcp.f32 %v9985_v6 }
 0x1e5   : > { %v1438_v18 = vsub.f32 1.0, %v1437_v38  ;;  %vm1442_vm1 = vweird.f32 %v7953_v28  ;;  %v1737_v55 = vmul.f32 %v7955_v31, %v9925_v53  ;;  %v1733_v63 = vor.u32 1.1754944e-38, %v1732_v27  ;;  %vm1728_vm5 = vmor %vm1726_vm15, %vm1727_vm3 }
 0x1e6   : > { %v1932_v42 = vsel %vm1856_vm7, %v15979_v36, %v15593_v16  ;;  %v1725_v19 = vadd.f32 %v7949_v40, %v1724_v51  ;;  %vm1741_vm4 = vweird.f32 %v9925_v53  ;;  %7960 = vrcp.f32 %v9987_v0  ;;  %v10014_v16 = vpop.f32.mrf.mxu3  ;;  %vm10019_vm11 = vmor %vm1441_vm2, %vm1442_vm1 }
 0x1e7   : > { %v10000_v5 = vmul.f32 %v1932_v42, %v9980_v25  ;;  %v1439_v57 = vmul.f32 %v7953_v28, %v1438_v18  ;;  %vm10010_vm6 = vcmp.eq.f32.partialorder %v1445_v41, 8.507059e+37  ;;  %v1448_v38 = vor.u32 1.1754944e-38, %v1447_v49  ;;  %v10028_v41 = vpop.f32.mrf.mxu0 }
 0x1e8   : > { %3652 = vmatmul.bf16.gmra.mxu2 %v9606_v12  ;;  %v1738_v36 = vsub.f32 1.0, %v1737_v55  ;;  %v1729_v34 = vsel %vm1728_vm5, %v7949_v40, %v1725_v19  ;;  %vm10023_vm8 = vcmp.eq.f32.partialorder %v1745_v58, 8.507059e+37  ;;  %v1748_v27 = vor.u32 1.1754944e-38, %v1747_v13  ;;  %15987 = vst [vmem:[#allocation67_spill] sm:$0xff] %v10028_v41  ;;  %v10030_v55 = vpop.f32.mrf.mxu2 }
 0x1e9   : > { %15980 = vst [vmem:[#allocation66_spill] sm:$0xff] %v10000_v5  ;;  %vm1456_vm9 = vweird.f32 %v9985_v6  ;;  %v7957_v49 = vpop.eup %7956  ;;  %v10034_v19 = vsel %vm9970_vm0, %v1733_v63, %v1729_v34  ;;  %v1440_v62 = vadd.f32 %v7953_v28, %v1439_v57  ;;  %vm1742_vm10 = vweird.f32 %v7955_v31 }
 0x1ea   : > { %15988 = vst [vmem:[#allocation68_spill] sm:$0xff] %v10030_v55  ;;  %v1739_v40 = vmul.f32 %v7955_v31, %v1738_v36  ;;  %v7959_v51 = vpop.eup %7958  ;;  %v1895_v58 = vrot.slane %v10034_v19, 7  ;;  %v1460_v18 = vand.u32 2147483647, %v9985_v6  ;;  %v1462_v13 = vand.u32 2147483648, %v9985_v6  ;;  %vm1743_vm12 = vmor %vm1741_vm4, %vm1742_vm10 }
 0x1eb   : > { %15989 = vst [vmem:[#allocation69_spill] sm:$0xff] %v10034_v19  ;;  %v10039_v5 = vadd.f32 1.0, %v7957_v49  ;;  %v1444_v29 = vsel %vm10019_vm11, %v7953_v28, %v1440_v62  ;;  %v1452_v20 = vmul.f32 %v7959_v51, %v9985_v6  ;;  %v1762_v34 = vand.u32 2147483648, %v9987_v0 }
 0x1ec   : > { %v1740_v7 = vadd.f32 %v7955_v31, %v1739_v40  ;;  %v7961_v63 = vpop.eup %7960  ;;  %v15990_v57 = vrot.slane %v9929_v52, 7  ;;  %v10051_v44 = vsel %vm10010_vm6, %v1448_v38, %v1444_v29  ;;  %vm1457_vm13 = vweird.f32 %v7959_v51 }
 0x1ed   : > { %15991 = vst [vmem:[#allocation70_spill] sm:$0xff] %v10051_v44  ;;  %7962 = vrcp.f32 %v10039_v5  ;;  %v1876_v12 = vrot.slane %v10051_v44, 7  ;;  %v1453_v62 = vsub.f32 1.0, %v1452_v20  ;;  %v1752_v42 = vmul.f32 %v7961_v63, %v9987_v0  ;;  %vm10079_vm15 = vmor %vm1456_vm9, %vm1457_vm13 }
 0x1ee   : > { %v1912_v36 = vsel %vm1856_vm7, %v15990_v57, %v1895_v58  ;;  %v1744_v49 = vsel %vm1743_vm12, %v7955_v31, %v1740_v7  ;;  %vm1756_vm14 = vweird.f32 %v9987_v0  ;;  %v15994_v53 = vrot.slane %v9980_v25, 7  ;;  %v1188_v31 = vpop.f32.mrf.mxu1 }
 0x1ef   : > { %v10057_v28 = vmul.f32 %v1912_v36, %v10034_v19  ;;  %v10062_v40 = vsel %vm10023_vm8, %v1748_v27, %v1744_v49  ;;  %v1454_v36 = vmul.f32 %v7959_v51, %v1453_v62  ;;  %v1760_v7 = vand.u32 2147483647, %v9987_v0  ;;  %v1238_v19 = vpop.f32.mrf.mxu3 }
 0x1f0   : > { %15993 = vst [vmem:[#allocation72_spill] sm:$0xff] %v10062_v40  ;;  %v1931_v38 = vsel %vm1856_vm7, %v15994_v53, %v1876_v12  ;;  %v1896_v57 = vrot.slane %v10062_v40, 7  ;;  %vm10083_vm0 = vcmp.eq.f32.partialorder %v1460_v18, 8.507059e+37  ;;  %v1463_v49 = vor.u32 1.1754944e-38, %v1462_v13  ;;  %v10094_v18 = vpop.f32.mrf.mxu0  ;;  %v10096_v13 = vpop.f32.mrf.mxu2 }
 0x1f1   : > { %15992 = vst [vmem:[#allocation71_spill] sm:$0xff] %v10057_v28  ;;  %v10074_v14 = vmul.f32 %v1931_v38, %v10051_v44  ;;  %v1753_v53 = vsub.f32 1.0, %v1752_v42  ;;  %v1455_v29 = vadd.f32 %v7959_v51, %v1454_v36  ;;  %v1763_v28 = vor.u32 1.1754944e-38, %v1762_v34 }
 0x1f2   : > { %v1911_v62 = vsel %vm1856_vm7, %v1895_v58, %v1896_v57  ;;  %v7412_v38 = vmul.f32 -1.442695, %v9946_v61  ;;  %vm1757_vm2 = vweird.f32 %v7961_v63  ;;  %vm1471_vm3 = vweird.f32 %v10039_v5  ;;  %16001 = vst [vmem:[#allocation75_spill] sm:$0xff] %v10094_v18 }
 0x1f3   : > { %15995 = vst [vmem:[#allocation73_spill] sm:$0xff] %v10074_v14  ;;  %v7963_v52 = vpop.eup %7962  ;;  %v10091_v6 = vmul.f32 %v1911_v62, %v10062_v40  ;;  %v1754_v14 = vmul.f32 %v7961_v63, %v1753_v53  ;;  %v1459_v58 = vsel %vm10079_vm15, %v7959_v51, %v1455_v29  ;;  %v1475_v61 = vand.u32 2147483647, %v10039_v5  ;;  %vm1758_vm1 = vmor %vm1756_vm14, %vm1757_vm2 }
 0x1f4   : > { %16002 = vst [vmem:[#allocation76_spill] sm:$0xff] %v10096_v13  ;;  %v1467_v34 = vmul.f32 %v7963_v52, %v10039_v5  ;;  %7964 = vpow2.f32 %v7412_v38  ;;  %v10104_v42 = vsel %vm10083_vm0, %v1463_v49, %v1459_v58  ;;  %v1477_v53 = vand.u32 2147483648, %v10039_v5 }
 0x1f5   : > { %16000 = vst [vmem:[#allocation74_spill] sm:$0xff] %v10091_v6  ;;  %v1755_v36 = vadd.f32 %v7961_v63, %v1754_v14  ;;  %v7393_v62 = vmul.f32 -1.442695, %v10003_v48  ;;  %v1877_v6 = vrot.slane %v10104_v42, 7  ;;  %vm1472_vm4 = vweird.f32 %v7963_v52 }
 0x1f6   : > { %16003 = vst [vmem:[#allocation77_spill] sm:$0xff] %v10104_v42  ;;  %v1468_v51 = vsub.f32 1.0, %v1467_v34  ;;  %v7413_v29 = vmul.f32 -1.442695, %v10014_v16  ;;  %vm1761_vm5 = vcmp.eq.f32.partialorder %v1760_v7, 8.507059e+37  ;;  %v1993_v48 = vrot.slane %v9956_v9, 7  ;;  %vm10124_vm6 = vmor %vm1471_vm3, %vm1472_vm4 }
 0x1f7   : > { %v1759_v27 = vsel %vm1758_vm1, %v7961_v63, %v1755_v36  ;;  %7966 = vpow2.f32 %v7393_v62  ;;  %v7394_v20 = vmul.f32 -1.442695, %v1188_v31  ;;  %v1930_v14 = vsel %vm1856_vm7, %v1876_v12, %v1877_v6  ;;  %v1190_v31 = vpop.f32.mrf.mxu1 }
 0x1f8   : > { %3657 = vmatmul.bf16.gmra.mxu2 %v9617_v46  ;;  %v10116_v49 = vsel %vm1761_vm5, %v1763_v28, %v1759_v27  ;;  %v1469_v38 = vmul.f32 %v7963_v52, %v1468_v51  ;;  %v10119_v0 = vmul.f32 %v1930_v14, %v10104_v42  ;;  %v1478_v16 = vor.u32 1.1754944e-38, %v1477_v53  ;;  %v10166_v46 = vpop.f32.mrf.mxu0 }
 0x1f9   : > { %16004 = vst [vmem:[#allocation78_spill] sm:$0xff] %v10116_v49  ;;  %v15604_v58 = vrot.slane %v10116_v49, 7  ;;  %7968 = vpow2.f32 %v7413_v29  ;;  %vm10128_vm11 = vcmp.eq.f32.partialorder %v1475_v61, 8.507059e+37  ;;  %v7414_v28 = vmul.f32 -1.442695, %v1238_v19  ;;  %v1240_v19 = vpop.f32.mrf.mxu3 }
 0x1fa   : > { %v7965_v63 = vpop.eup %7964  ;;  %v1470_v12 = vadd.f32 %v7963_v52, %v1469_v38  ;;  %7970 = vpow2.f32 %v7394_v20  ;;  %v7395_v53 = vmul.f32 -1.442695, %v1190_v31  ;;  %v16010_v27 = vrot.slane %v9892_v22, 7 }
 0x1fb   : > { %v1910_v5 = vsel %vm1856_vm7, %v1896_v57, %v15604_v58  ;;  %v10137_v36 = vadd.f32 1.0, %v7965_v63  ;;  %7972 = vpow2.f32 %v7414_v28  ;;  %v16011_v20 = vrot.slane %v9815_v17, 7 }
 0x1fc   : > { %v10141_v61 = vmul.f32 %v1910_v5, %v10116_v49  ;;  %v1474_v51 = vsel %vm10124_vm6, %v7963_v52, %v1470_v12  ;;  %v16013_v14 = vrot.slane %v9894_v60, 7  ;;  %v16014_v38 = vrot.slane %v9817_v45, 7  ;;  %v10168_v12 = vpop.f32.mrf.mxu2 }
 0x1fd   : > { %v7967_v29 = vpop.eup %7966  ;;  %v10151_v57 = vsel %vm1856_vm7, %v16011_v20, %v16010_v27  ;;  %v10163_v52 = vsel %vm10128_vm11, %v1478_v16, %v1474_v51  ;;  %7974 = vrcp.f32 %v10137_v36  ;;  %16016 = vst [vmem:[#allocation82_spill] sm:$0xff] %v10168_v12  ;;  %v16017_v28 = vrot.slane %v9954_v32, 7 }
 0x1fe   : > { %16009 = vst [vmem:[#allocation79_spill] sm:$0xff] %v10141_v61  ;;  %v10159_v63 = vsel %vm1856_vm7, %v16014_v38, %v16013_v14  ;;  %v16018_v31 = vmov %v16010_v27  ;;  %v16020_v27 = vmov %v16013_v14  ;;  %v15607_v7 = vrot.slane %v10163_v52, 7 }
 0x1ff   : > { %16012 = vst [vmem:[#allocation80_spill] sm:$0xff] %v10151_v57  ;;  %v10176_v5 = vsel %vm1856_vm7, %v16018_v31, %v16017_v28  ;;  %v10182_v16 = vsel %vm1856_vm7, %v16020_v27, %v1993_v48  ;;  %v10185_v51 = vadd.f32 1.0, %v7967_v29  ;;  %v7969_v20 = vpop.eup %7968  ;;  %v1974_v14 = vrot.slane %v10028_v41, 7  ;;  %v10274_v41 = vpop.f32.mrf.mxu1 }
 0x200   : > { %16015 = vst [vmem:[#allocation81_spill] sm:$0xff] %v10159_v63  ;;  %v1994_v38 = vrot.slane %v10030_v55, 7  ;;  %7976 = vpow2.f32 %v7395_v53  ;;  %v7415_v34 = vmul.f32 -1.442695, %v1240_v19  ;;  %v7971_v62 = vpop.eup %7970  ;;  %v1929_v28 = vsel %vm1856_vm7, %v1877_v6, %v15607_v7 }
 0x201   : > { %16019 = vst [vmem:[#allocation83_spill] sm:$0xff] %v10176_v5  ;;  %v1975_v31 = vrot.slane %v10094_v18, 7  ;;  %7978 = vrcp.f32 %v10185_v51  ;;  %v10198_v58 = vmul.f32 %v1929_v28, %v10163_v52  ;;  %v10200_v55 = vadd.f32 1.0, %v7969_v20  ;;  %v7973_v19 = vpop.eup %7972 }
 0x202   : > { %16021 = vst [vmem:[#allocation84_spill] sm:$0xff] %v10182_v16  ;;  %v1775_v61 = vand.u32 2147483647, %v10137_v36  ;;  %v1777_v6 = vand.u32 2147483648, %v10137_v36  ;;  %v10205_v7 = vadd.f32 1.0, %v7971_v62  ;;  %7980 = vpow2.f32 %v7415_v34 }
 0x203   : > { %16022 = vst [vmem:[#allocation85_spill] sm:$0xff] %v10198_v58  ;;  %v7975_v9 = vpop.eup %7974  ;;  %v16023_v29 = vrot.slane %v9954_v32, 7  ;;  %v10215_v20 = vsel %vm1856_vm7, %v1993_v48, %v1994_v38  ;;  %v1492_v28 = vand.u32 2147483648, %v10185_v51  ;;  %7982 = vrcp.f32 %v10200_v55 }
 0x204   : > { %16025 = vst [vmem:[#allocation87_spill] sm:$0xff] %v10215_v20  ;;  %v1767_v53 = vmul.f32 %v7975_v9, %v10137_v36  ;;  %v10222_v34 = vsel %vm1856_vm7, %v1974_v14, %v1975_v31  ;;  %v1490_v62 = vand.u32 2147483647, %v10185_v51  ;;  %v16027_v16 = vrot.slane %v10096_v13, 7 }
 0x205   : > { %v10211_v27 = vsel %vm1856_vm7, %v16023_v29, %v1974_v14  ;;  %16026 = vst [vmem:[#allocation88_spill] sm:$0xff] %v10222_v34  ;;  %vm1771_vm8 = vweird.f32 %v10137_v36  ;;  %v16029_v20 = vrot.slane %v10166_v46, 7  ;;  %7984 = vrcp.f32 %v10205_v7 }
 0x206   : > { %16024 = vst [vmem:[#allocation86_spill] sm:$0xff] %v10211_v27  ;;  %v10229_v29 = vsel %vm1856_vm7, %v1994_v38, %v16027_v16  ;;  %v7977_v48 = vpop.eup %7976  ;;  %v1768_v40 = vsub.f32 1.0, %v1767_v53  ;;  %vm10242_vm9 = vcmp.eq.f32.partialorder %v1775_v61, 8.507059e+37  ;;  %v1778_v16 = vor.u32 1.1754944e-38, %v1777_v6  ;;  %v10257_v61 = vpop.f32.mrf.mxu2 }
 0x207   : > { %16028 = vst [vmem:[#allocation89_spill] sm:$0xff] %v10229_v29  ;;  %v10236_v60 = vsel %vm1856_vm7, %v1975_v31, %v16029_v20  ;;  %v10240_v63 = vpop.eup %7978  ;;  %v10246_v38 = vadd.f32 1.0, %v7973_v19  ;;  %vm1486_vm10 = vweird.f32 %v10185_v51  ;;  %v10252_v20 = vor.u32 1.1754944e-38, %v1492_v28  ;;  %v10255_v29 = vpop.f32.mrf.mxu0 }
 0x208   : > { %16030 = vst [vmem:[#allocation90_spill] sm:$0xff] %v10236_v60  ;;  %3662 = vmatmul.bf16.gmra.mxu2 %v8967_v30  ;;  %v1482_v31 = vmul.f32 %v10240_v63, %v10185_v51  ;;  %v1790_v14 = vand.u32 2147483647, %v10200_v55  ;;  %v7981_v53 = vpop.eup %7980  ;;  %v1769_v15 = vmul.f32 %v7975_v9, %v1768_v40  ;;  %vm1772_vm12 = vweird.f32 %v7975_v9  ;;  %v1195_v44 = vpop.f32.mrf.mxu1 }
 0x209   : > { %16033 = vst [vmem:[#allocation91_spill] sm:$0xff] %v10257_v61  ;;  %vm10259_vm13 = vcmp.eq.f32.partialorder %v1490_v62, 8.507059e+37  ;;  %v1792_v30 = vand.u32 2147483648, %v10200_v55  ;;  %7986 = vrcp.f32 %v10246_v38  ;;  %v7983_v6 = vpop.eup %7982  ;;  %vm1786_vm14 = vweird.f32 %v10200_v55  ;;  %vm1773_vm2 = vmor %vm1771_vm8, %vm1772_vm12 }
 0x20a   : > { %v1483_v28 = vsub.f32 1.0, %v1482_v31  ;;  %v1507_v60 = vand.u32 2147483648, %v10205_v7  ;;  %v10267_v18 = vadd.f32 1.0, %v7977_v48  ;;  %v1770_v34 = vadd.f32 %v7975_v9, %v1769_v15 }
 0x20b   : > { %vm1487_vm15 = vweird.f32 %v10240_v63  ;;  %v1782_v40 = vmul.f32 %v7983_v6, %v10200_v55  ;;  %vm1501_vm0 = vweird.f32 %v10205_v7  ;;  %v10272_v62 = vadd.f32 1.0, %v7981_v53  ;;  %v10276_v58 = vpop.eup %7984 }
 0x20c   : > { %v1484_v48 = vmul.f32 %v10240_v63, %v1483_v28  ;;  %vm10282_vm3 = vcmp.eq.f32.partialorder %v1790_v14, 8.507059e+37  ;;  %v1505_v31 = vand.u32 2147483647, %v10205_v7  ;;  %7988 = vrcp.f32 %v10267_v18  ;;  %vm10299_vm1 = vmor %vm1486_vm10, %vm1487_vm15 }
 0x20d   : > { %v1774_v53 = vsel %vm1773_vm2, %v7975_v9, %v1770_v34  ;;  %v1783_v27 = vsub.f32 1.0, %v1782_v40  ;;  %v1793_v32 = vor.u32 1.1754944e-38, %v1792_v30  ;;  %v1497_v5 = vmul.f32 %v10276_v58, %v10205_v7 }
 0x20e   : > { %v10292_v36 = vsel %vm10242_vm9, %v1778_v16, %v1774_v53  ;;  %v1485_v28 = vadd.f32 %v10240_v63, %v1484_v48  ;;  %vm1787_vm4 = vweird.f32 %v7983_v6  ;;  %v10303_v9 = vor.u32 1.1754944e-38, %v1507_v60 }
 0x20f   : > { %16038 = vst [vmem:[#allocation92_spill] sm:$0xff] %v10292_v36  ;;  %v7987_v34 = vpop.eup %7986  ;;  %v1898_v30 = vrot.slane %v10292_v36, 7  ;;  %v1784_v40 = vmul.f32 %v7983_v6, %v1783_v27  ;;  %v1498_v45 = vsub.f32 1.0, %v1497_v5  ;;  %7990 = vrcp.f32 %v10272_v62  ;;  %vm1788_vm11 = vmor %vm1786_vm14, %vm1787_vm4 }
 0x210   : > { %v1797_v16 = vmul.f32 %v7987_v34, %v10246_v38  ;;  %vm1801_vm5 = vweird.f32 %v10246_v38  ;;  %v1805_v51 = vand.u32 2147483647, %v10246_v38  ;;  %v1807_v48 = vand.u32 2147483648, %v10246_v38 }
 0x211   : > { %v16041_v53 = vrot.slane %v10116_v49, 7  ;;  %v1489_v27 = vsel %vm10299_vm1, %v10240_v63, %v1485_v28  ;;  %v1785_v5 = vadd.f32 %v7983_v6, %v1784_v40  ;;  %v1499_v42 = vmul.f32 %v10276_v58, %v1498_v45  ;;  %v10331_v63 = vpop.f32.mrf.mxu0  ;;  %v10333_v28 = vpop.f32.mrf.mxu2 }
 0x212   : > { %vm10319_vm6 = vcmp.eq.f32.partialorder %v1505_v31, 8.507059e+37  ;;  %v7989_v17 = vpop.eup %7988  ;;  %vm1502_vm8 = vweird.f32 %v10276_v58  ;;  %vm1516_vm9 = vweird.f32 %v10267_v18  ;;  %16045 = vst [vmem:[#allocation94_spill] sm:$0xff] %v10331_v63  ;;  %v1520_v40 = vand.u32 2147483647, %v10267_v18 }
 0x213   : > { %v1909_v60 = vsel %vm1856_vm7, %v16041_v53, %v1898_v30  ;;  %v1798_v53 = vsub.f32 1.0, %v1797_v16  ;;  %v1789_v31 = vsel %vm1788_vm11, %v7983_v6, %v1785_v5  ;;  %v1512_v14 = vmul.f32 %v7989_v17, %v10267_v18 }
 0x214   : > { %v10324_v57 = vmul.f32 %v1909_v60, %v10292_v36  ;;  %v1522_v45 = vand.u32 2147483648, %v10267_v18  ;;  %v10341_v55 = vsel %vm10259_vm13, %v10252_v20, %v1489_v27  ;;  %v10345_v16 = vsel %vm10282_vm3, %v1793_v32, %v1789_v31  ;;  %vm10353_vm13 = vmor %vm1501_vm0, %vm1502_vm8 }
 0x215   : > { %16046 = vst [vmem:[#allocation95_spill] sm:$0xff] %v10345_v16  ;;  %v1799_v60 = vmul.f32 %v7987_v34, %v1798_v53  ;;  %vm1802_vm10 = vweird.f32 %v7987_v34  ;;  %v7991_v36 = vpop.eup %7990  ;;  %v1899_v6 = vrot.slane %v10345_v16, 7  ;;  %v1500_v5 = vadd.f32 %v10276_v58, %v1499_v42 }
 0x216   : > { %16044 = vst [vmem:[#allocation93_spill] sm:$0xff] %v10324_v57  ;;  %v1243_v57 = vpop.f32.mrf.mxu3  ;;  %v1513_v49 = vsub.f32 1.0, %v1512_v14  ;;  %vm1517_vm12 = vweird.f32 %v7989_v17  ;;  %vm1806_vm14 = vcmp.eq.f32.partialorder %v1805_v51, 8.507059e+37  ;;  %v1808_v19 = vor.u32 1.1754944e-38, %v1807_v48  ;;  %vm1803_vm15 = vmor %vm1801_vm5, %vm1802_vm10 }
 0x217   : > { %v1800_v32 = vadd.f32 %v7987_v34, %v1799_v60  ;;  %v1812_v15 = vmul.f32 %v7991_v36, %v10272_v62  ;;  %v1879_v27 = vrot.slane %v10341_v55, 7  ;;  %v1908_v42 = vsel %vm1856_vm7, %v1898_v30, %v1899_v6  ;;  %vm10375_vm0 = vmor %vm1516_vm9, %vm1517_vm12 }
 0x218   : > { %v1514_v53 = vmul.f32 %v7989_v17, %v1513_v49  ;;  %vm10364_vm2 = vcmp.eq.f32.partialorder %v1520_v40, 8.507059e+37  ;;  %3667 = vmatmul.bf16.gmra.mxu2 %v9093_v33  ;;  %v10370_v51 = vmul.f32 %v1908_v42, %v10345_v16  ;;  %v1523_v38 = vor.u32 1.1754944e-38, %v1522_v45 }
 0x219   : > { %v1804_v48 = vsel %vm1803_vm15, %v7987_v34, %v1800_v32  ;;  %v1813_v31 = vsub.f32 1.0, %v1812_v15  ;;  %v1504_v49 = vsel %vm10353_vm13, %v10276_v58, %v1500_v5  ;;  %v1822_v40 = vand.u32 2147483648, %v10272_v62  ;;  %v10400_v42 = vpop.f32.mrf.mxu0 }
 0x21a   : > { %16051 = vst [vmem:[#allocation96_spill] sm:$0xff] %v10370_v51  ;;  %v10382_v14 = vsel %vm1806_vm14, %v1808_v19, %v1804_v48  ;;  %v1515_v33 = vadd.f32 %v7989_v17, %v1514_v53  ;;  %vm1817_vm3 = vweird.f32 %v7991_v36  ;;  %v1820_v18 = vand.u32 2147483647, %v10272_v62  ;;  %v10402_v53 = vpop.f32.mrf.mxu2 }
 0x21b   : > { %16054 = vst [vmem:[#allocation97_spill] sm:$0xff] %v10382_v14  ;;  %v1900_v34 = vrot.slane %v10382_v14, 7  ;;  %v1814_v60 = vmul.f32 %v7991_v36, %v1813_v31  ;;  %v1977_v32 = vrot.slane %v10255_v29, 7  ;;  %v1997_v15 = vrot.slane %v10257_v61, 7 }
 0x21c   : > { %v1519_v45 = vsel %vm10375_vm0, %v7989_v17, %v1515_v33  ;;  %v7396_v58 = vmul.f32 -1.442695, %v10274_v41  ;;  %v10395_v5 = vsel %vm10319_vm6, %v10303_v9, %v1504_v49  ;;  %vm1816_vm1 = vweird.f32 %v10272_v62  ;;  %16055 = vst [vmem:[#allocation98_spill] sm:$0xff] %v10400_v42 }
 0x21d   : > { %v1907_v20 = vsel %vm1856_vm7, %v1899_v6, %v1900_v34  ;;  %v1815_v19 = vadd.f32 %v7991_v36, %v1814_v60  ;;  %v10409_v41 = vsel %vm10364_vm2, %v1523_v38, %v1519_v45  ;;  %vm1818_vm4 = vmor %vm1816_vm1, %vm1817_vm3  ;;  %v1823_v22 = vor.u32 1.1754944e-38, %v1822_v40  ;;  %v1198_v38 = vpop.f32.mrf.mxu1 }
 0x21e   : > { %v10405_v17 = vmul.f32 %v1907_v20, %v10382_v14  ;;  %7992 = vpow2.f32 %v7396_v58  ;;  %v16057_v9 = vrot.slane %v10163_v52, 7  ;;  %vm1821_vm5 = vcmp.eq.f32.partialorder %v1820_v18, 8.507059e+37  ;;  %v1245_v30 = vpop.f32.mrf.mxu3 }
 0x21f   : > { %v1819_v62 = vsel %vm1818_vm4, %v7991_v36, %v1815_v19  ;;  %v7416_v48 = vmul.f32 -1.442695, %v1243_v57  ;;  %v1998_v49 = vrot.slane %v10333_v28, 7  ;;  %v7397_v33 = vmul.f32 -1.442695, %v1195_v44 }
 0x220   : > { %16056 = vst [vmem:[#allocation99_spill] sm:$0xff] %v10405_v17  ;;  %v1928_v6 = vsel %vm1856_vm7, %v16057_v9, %v1879_v27  ;;  %v10415_v31 = vsel %vm1821_vm5, %v1823_v22, %v1819_v62  ;;  %v1999_v7 = vrot.slane %v10402_v53, 7  ;;  %v1880_v40 = vrot.slane %v10395_v5, 7 }
 0x221   : > { %16058 = vst [vmem:[#allocation100_spill] sm:$0xff] %v10415_v31  ;;  %v15626_v60 = vrot.slane %v10409_v41, 7  ;;  %v15625_v45 = vrot.slane %v10415_v31, 7  ;;  %7994 = vpow2.f32 %v7416_v48  ;;  %v16059_v36 = vrot.slane %v9643_v35, 7  ;;  %v10478_v62 = vpop.f32.mrf.mxu0 }
 0x222   : > { %7996 = vpow2.f32 %v7397_v33  ;;  %v10424_v57 = vsel %vm1856_vm7, %v1998_v49, %v1999_v7  ;;  %v7417_v18 = vmul.f32 -1.442695, %v1245_v30  ;;  %v10431_v58 = vmul.f32 %v1928_v6, %v10341_v55  ;;  %16065 = vst [vmem:[#allocation103_spill] sm:$0xff] %v10478_v62 }
 0x223   : > { %v2031_v44 = vsel %vm1856_vm7, %v1999_v7, %v16059_v36  ;;  %v1906_v20 = vsel %vm1856_vm7, %v1900_v34, %v15625_v45  ;;  %v7398_v22 = vmul.f32 -1.442695, %v1198_v38  ;;  %v1978_v48 = vrot.slane %v10331_v63, 7 }
 0x224   : > { %v2032_v19 = vsel %vm1856_vm7, 0.0, %v2031_v44  ;;  %v7993_v9 = vpop.eup %7992  ;;  %7998 = vpow2.f32 %v7417_v18  ;;  %v1927_v6 = vsel %vm1856_vm7, %v1879_v27, %v1880_v40  ;;  %v1979_v7 = vrot.slane %v10400_v42, 7 }
 0x225   : > { %v2064_v33 = vmul.f32 %v2032_v19, %v9780_v4  ;;  %v10444_v30 = vadd.f32 1.0, %v7993_v9  ;;  %8000 = vpow2.f32 %v7398_v22  ;;  %v16060_v34 = vrot.slane %v10168_v12, 7 }
 0x226   : > { %v16061_v38 = vrot.slane %v10096_v13, 7  ;;  %v16063_v44 = vrot.slane %v10166_v46, 7  ;;  %v1926_v27 = vsel %vm1856_vm7, %v1880_v40, %v15626_v60  ;;  %v2081_v19 = vmul.f32 %v9679_v39, %v9645_v54 }
 0x227   : > { %v7995_v22 = vpop.eup %7994  ;;  %8002 = vrcp.f32 %v10444_v30  ;;  %v10481_v45 = vmul.f32 %v1927_v6, %v10395_v5  ;;  %v10485_v54 = vsel %vm1856_vm7, %v1977_v32, %v1978_v48  ;;  %v10492_v9 = vmul.f32 %v1926_v27, %v10409_v41 }
 0x228   : > { %v10453_v36 = vsel %vm1856_vm7, %v16061_v38, %v16060_v34  ;;  %v10459_v18 = vsel %vm1856_vm7, %v16063_v44, %v1977_v32  ;;  %v10472_v38 = vsel %vm1856_vm7, %v16060_v34, %v1997_v15  ;;  %v10476_v44 = vadd.f32 %v2064_v33, %v9643_v35  ;;  %v7997_v40 = vpop.eup %7996  ;;  %16066 = vst [vmem:[#allocation104_spill] sm:$0xff] %v10485_v54 }
 0x229   : > { %16062 = vst [vmem:[#allocation101_spill] sm:$0xff] %v10453_v36  ;;  %v10487_v39 = vadd.f32 1.0, %v7995_v22  ;;  %v15630_v34 = vrot.slane %v10478_v62, 7  ;;  %3672 = vmatmul.bf16.gmra.mxu2 %v9242_v10  ;;  %v10496_v35 = vsel %vm1856_vm7, %v1997_v15, %v1998_v49  ;;  %v10500_v33 = vsel %vm1856_vm7, %v1978_v48, %v1979_v7 }
 0x22a   : > { %16064 = vst [vmem:[#allocation102_spill] sm:$0xff] %v10472_v38  ;;  %v10502_v6 = vadd.f32 1.0, %v7997_v40  ;;  %v7999_v32 = vpop.eup %7998  ;;  %v10505_v22 = vmul.f32 %v1906_v20, %v10415_v31  ;;  %v1535_v60 = vand.u32 2147483647, %v10444_v30  ;;  %v10510_v10 = vadd.f32 %v2081_v19, %v9619_v1 }
 0x22b   : > { %16067 = vst [vmem:[#allocation105_spill] sm:$0xff] %v10500_v33  ;;  %8004 = vrcp.f32 %v10487_v39  ;;  %v8001_v27 = vpop.eup %8000  ;;  %vm1531_vm6 = vweird.f32 %v10444_v30  ;;  %v1537_v15 = vand.u32 2147483648, %v10444_v30  ;;  %v1835_v48 = vand.u32 2147483647, %v10487_v39 }
 0x22c   : > { %16068 = vst [vmem:[#allocation106_spill] sm:$0xff] %v10505_v22  ;;  %8006 = vrcp.f32 %v10502_v6  ;;  %v10517_v20 = vadd.f32 1.0, %v7999_v32  ;;  %v10523_v40 = vsel %vm1856_vm7, %v1979_v7, %v15630_v34  ;;  %v10525_v1 = vadd.f32 1.0, %v8001_v27 }
 0x22d   : > { %16069 = vst [vmem:[#allocation107_spill] sm:$0xff] %v10510_v10  ;;  %v8003_v19 = vpop.eup %8002  ;;  %v1837_v61 = vand.u32 2147483648, %v10487_v39  ;;  %v1550_v22 = vand.u32 2147483647, %v10502_v6  ;;  %v1552_v38 = vand.u32 2147483648, %v10502_v6  ;;  %v2065_v49 = vmul.f32 %v9845_v43, %v9807_v59 }
 0x22e   : > { %16070 = vst [vmem:[#allocation108_spill] sm:$0xff] %v10523_v40  ;;  %v1527_v32 = vmul.f32 %v8003_v19, %v10444_v30  ;;  %vm10533_vm11 = vcmp.eq.f32.partialorder %v1535_v60, 8.507059e+37  ;;  %8008 = vrcp.f32 %v10517_v20  ;;  %vm2160_vm8 = vcmp.lt.s32.totalorder %v9640_v2, 2 }
 0x22f   : > { %v1538_v27 = vor.u32 1.1754944e-38, %v1537_v15  ;;  %vm1831_vm9 = vweird.f32 %v10487_v39  ;;  %8010 = vrcp.f32 %v10525_v1  ;;  %v2066_v59 = vmul.f32 %v9874_v3, %v9896_v8 }
 0x230   : > { %v1528_v34 = vsub.f32 1.0, %v1527_v32  ;;  %vm1532_vm10 = vweird.f32 %v8003_v19  ;;  %vm1546_vm12 = vweird.f32 %v10502_v6  ;;  %v10546_v60 = vadd.f32 %v2065_v49, %v9690_v37 }
 0x231   : > { %v8005_v43 = vpop.eup %8004  ;;  %vm10549_vm13 = vcmp.eq.f32.partialorder %v1835_v48, 8.507059e+37  ;;  %v1838_v7 = vor.u32 1.1754944e-38, %v1837_v61  ;;  %vm10553_vm14 = vcmp.eq.f32.partialorder %v1550_v22, 8.507059e+37  ;;  %v1553_v3 = vor.u32 1.1754944e-38, %v1552_v38  ;;  %vm10562_vm2 = vmor %vm1531_vm6, %vm1532_vm10 }
 0x232   : > { %v8007_v12 = vpop.eup %8006  ;;  %v1827_v36 = vmul.f32 %v8005_v43, %v10487_v39  ;;  %v1529_v8 = vmul.f32 %v8003_v19, %v1528_v34  ;;  %v1850_v13 = vand.u32 2147483647, %v10517_v20  ;;  %vm1561_vm15 = vweird.f32 %v10525_v1 }
 0x233   : > { %v1542_v32 = vmul.f32 %v8007_v12, %v10502_v6  ;;  %v1565_v61 = vand.u32 2147483647, %v10525_v1  ;;  %v10569_v38 = vadd.f32 %v2066_v59, %v9755_v21  ;;  %vm1547_vm0 = vweird.f32 %v8007_v12 }
 0x234   : > { %v1828_v49 = vsub.f32 1.0, %v1827_v36  ;;  %v8009_v34 = vpop.eup %8008  ;;  %v1530_v48 = vadd.f32 %v8003_v19, %v1529_v8  ;;  %vm1846_vm3 = vweird.f32 %v10517_v20  ;;  %v1567_v30 = vand.u32 2147483648, %v10525_v1  ;;  %vm10584_vm5 = vmor %vm1546_vm12, %vm1547_vm0 }
 0x235   : > { %v1543_v51 = vsub.f32 1.0, %v1542_v32  ;;  %v8011_v16 = vpop.eup %8010  ;;  %vm1832_vm1 = vweird.f32 %v8005_v43  ;;  %v1842_v36 = vmul.f32 %v8009_v34, %v10517_v20  ;;  %v15639_v42 = vrot.slane %v10569_v38, 6 }
 0x236   : > { %v1829_v40 = vmul.f32 %v8005_v43, %v1828_v49  ;;  %v1534_v22 = vsel %vm10562_vm2, %v8003_v19, %v1530_v48  ;;  %v1557_v59 = vmul.f32 %v8011_v16, %v10525_v1  ;;  %vm1562_vm4 = vweird.f32 %v8011_v16  ;;  %vm1833_vm6 = vmor %vm1831_vm9, %vm1832_vm1  ;;  %v10634_v49 = vpop.f32.mrf.mxu2 }
 0x237   : > { %v1544_v21 = vmul.f32 %v8007_v12, %v1543_v51  ;;  %v10580_v8 = vsel %vm10533_vm11, %v1538_v27, %v1534_v22  ;;  %v1843_v33 = vsub.f32 1.0, %v1842_v36  ;;  %v16081_v19 = vrot.slane %v10546_v60, 6  ;;  %vm10616_vm10 = vmor %vm1561_vm15, %vm1562_vm4 }
 0x238   : > { %v1830_v32 = vadd.f32 %v8005_v43, %v1829_v40  ;;  %v1882_v37 = vrot.slane %v10580_v8, 7  ;;  %v1558_v40 = vsub.f32 1.0, %v1557_v59  ;;  %v1852_v48 = vand.u32 2147483648, %v10517_v20 }
 0x239   : > { %v2333_v51 = vsel %vm2160_vm8, %v16081_v19, %v15639_v42  ;;  %v1545_v17 = vadd.f32 %v8007_v12, %v1544_v21  ;;  %3677 = vmatmul.bf16.gmra.mxu2 %v9360_v11  ;;  %v1844_v22 = vmul.f32 %v8009_v34, %v1843_v33  ;;  %vm10600_vm11 = vcmp.eq.f32.partialorder %v1565_v61, 8.507059e+37 }
 0x23a   : > { %v2370_v6 = vmul.f32 %v2333_v51, %v9915_v26  ;;  %v1834_v27 = vsel %vm1833_vm6, %v8005_v43, %v1830_v32  ;;  %vm1847_vm9 = vweird.f32 %v8009_v34  ;;  %v1559_v21 = vmul.f32 %v8011_v16, %v1558_v40  ;;  %v3472_v32 = vld [vmem:[#allocation2] sm:$0x3] }
 0x23b   : > { %v1839_v19 = vsel %vm10549_vm13, %v1838_v7, %v1834_v27  ;;  %v1549_v39 = vsel %vm10584_vm5, %v8007_v12, %v1545_v17  ;;  %v1568_v7 = vor.u32 1.1754944e-38, %v1567_v30  ;;  %v16087_v43 = vrot.slane %v10409_v41, 7  ;;  %vm1848_vm12 = vmor %vm1846_vm3, %vm1847_vm9 }
 0x23c   : > { %v1902_v59 = vrot.slane %v1839_v19, 7  ;;  %v2094_v51 = vmul.f32 %v10496_v35, %v1839_v19  ;;  %v10611_v11 = vsel %vm10553_vm14, %v1553_v3, %v1549_v39  ;;  %v1845_v35 = vadd.f32 %v8009_v34, %v1844_v22 }
 0x23d   : > { %16084 = vst [vmem:[#allocation109_spill] sm:$0xff] %v10611_v11  ;;  %v1925_v12 = vsel %vm1856_vm7, %v16087_v43, %v1882_v37  ;;  %v1883_v15 = vrot.slane %v10611_v11, 7  ;;  %v1560_v61 = vadd.f32 %v8011_v16, %v1559_v21  ;;  %v16088_v14 = vrot.slane %v10415_v31, 7  ;;  %v1200_v21 = vpop.f32.mrf.mxu1 }
 0x23e   : > { %v10630_v1 = vadd.f32 %v2094_v51, %v10333_v28  ;;  %v1853_v30 = vor.u32 1.1754944e-38, %v1852_v48  ;;  %v10637_v17 = vadd.f32 %v2370_v6, %v10569_v38  ;;  %v1849_v27 = vsel %vm1848_vm12, %v8009_v34, %v1845_v35 }
 0x23f   : > { %v1905_v3 = vsel %vm1856_vm7, %v16088_v14, %v1902_v59  ;;  %v1924_v40 = vsel %vm1856_vm7, %v1882_v37, %v1883_v15  ;;  %vm1851_vm13 = vcmp.eq.f32.partialorder %v1850_v13, 8.507059e+37  ;;  %v1564_v22 = vsel %vm10616_vm10, %v8011_v16, %v1560_v61  ;;  %v10660_v16 = vpop.f32.mrf.mxu0 }
 0x240   : > { %16089 = vst [vmem:[#allocation110_spill] sm:$0xff] %v10630_v1  ;;  %v10644_v28 = vmul.f32 %v1925_v12, %v10580_v8  ;;  %v10646_v20 = vmul.f32 %v1905_v3, %v1839_v19  ;;  %v10648_v48 = vsel %vm1851_vm13, %v1853_v30, %v1849_v27  ;;  %v10652_v39 = vsel %vm10600_vm11, %v1568_v7, %v1564_v22 }
 0x241   : > { %16092 = vst [vmem:[#allocation113_spill] sm:$0xff] %v10648_v48  ;;  %v1903_v6 = vrot.slane %v10648_v48, 7  ;;  %v2095_v34 = vmul.f32 %v10424_v57, %v10648_v48  ;;  %v15640_v13 = vrot.slane %v10652_v39, 7  ;;  %v10658_v37 = vperm.slane %v3472_v32, 0 }
 0x242   : > { %16090 = vst [vmem:[#allocation111_spill] sm:$0xff] %v10644_v28  ;;  %v15637_v19 = vrot.slane %v10630_v1, 6  ;;  %v10664_v51 = vmul.f32 %v1924_v40, %v10611_v11  ;;  %v7399_v36 = vmul.f32 -1.442695, %v1200_v21  ;;  %v16096_v33 = vrot.slane %v10546_v60, 6  ;;  %v16121_v11 = vld [vmem:[#allocation35_spill] sm:$0xff] }
 0x243   : > { %16091 = vst [vmem:[#allocation112_spill] sm:$0xff] %v10646_v20  ;;  %v16097_v7 = vrot.slane %v10476_v44, 6  ;;  %v1904_v43 = vsel %vm1856_vm7, %v1902_v59, %v1903_v6  ;;  %v16098_v12 = vrot.slane %v9780_v4, 7  ;;  %v2127_v61 = vadd.f32 %v2095_v34, %v10402_v53 }
 0x244   : > { %16093 = vst [vmem:[#allocation114_spill] sm:$0xff] %v10652_v39  ;;  %v1923_v14 = vsel %vm1856_vm7, %v1883_v15, %v15640_v13  ;;  %v15638_v3 = vrot.slane %v10646_v20, 6  ;;  %v2159_v30 = vmul.f32 %v1904_v43, %v10648_v48  ;;  %v1981_v59 = vrot.slane %v10660_v16, 7 }
 0x245   : > { %16094 = vst [vmem:[#allocation115_spill] sm:$0xff] %v10660_v16  ;;  %v2334_v57 = vsel %vm2160_vm8, %v16097_v7, %v16096_v33  ;;  %v1935_v35 = vsel %vm1856_vm7, %v1903_v6, %v16098_v12  ;;  %v2303_v40 = vrot.slane %v2127_v61, 6  ;;  %8012 = vpow2.f32 %v7399_v36 }
 0x246   : > { %16095 = vst [vmem:[#allocation116_spill] sm:$0xff] %v10664_v51  ;;  %v1936_v32 = vsel %vm1856_vm7, 1.0, %v1935_v35  ;;  %v2369_v53 = vmul.f32 %v2334_v57, %v9829_v23  ;;  %v2207_v22 = vrot.slane %v2159_v30, 6  ;;  %v10691_v6 = vmul.f32 %v1923_v14, %v10652_v39 }
 0x247   : > { %v2128_v27 = vmul.f32 %v1936_v32, %v9780_v4  ;;  %vm2464_vm14 = vcmp.lt.s32.totalorder %v9640_v2, 4  ;;  %v16100_v15 = vrot.slane %v9915_v26, 6  ;;  %v16101_v34 = vrot.slane %v9829_v23, 6  ;;  %v10716_v32 = vpop.f32.mrf.mxu2 }
 0x248   : > { %16099 = vst [vmem:[#allocation117_spill] sm:$0xff] %v10691_v6  ;;  %v2304_v4 = vsel %vm2160_vm8, %v15637_v19, %v2303_v40  ;;  %v2335_v57 = vsel %vm2160_vm8, %v2303_v40, %v16097_v7  ;;  %v2401_v43 = vadd.f32 %v2369_v53, %v10546_v60  ;;  %v2208_v12 = vsel %vm2160_vm8, %v15638_v3, %v2207_v22 }
 0x249   : > { %v2237_v21 = vsel %vm2160_vm8, %v16101_v34, %v16100_v15  ;;  %v2176_v36 = vrot.slane %v2128_v27, 6  ;;  %v2399_v35 = vmul.f32 %v2304_v4, %v2159_v30  ;;  %v2336_v14 = vsel %vm2160_vm8, 0.0, %v2335_v57  ;;  %v10729_v4 = vpop.f32.mrf.mxu0  ;;  %3682 = vmatmul.bf16.gmra.mxu2 %v9481_v56 }
 0x24a   : > { %v10719_v15 = vmul.f32 %v2237_v21, %v9915_v26  ;;  %v10721_v34 = vmul.f32 %v2208_v12, %v2159_v30  ;;  %v2368_v60 = vmul.f32 %v2336_v14, %v2128_v27  ;;  %v16103_v53 = vrot.slane %v9829_v23, 6  ;;  %16104 = vst [vmem:[#allocation119_spill] sm:$0xff] %v10729_v4  ;;  %v1203_v14 = vpop.f32.mrf.mxu1 }
 0x24b   : > { %v2239_v40 = vsel %vm2160_vm8, %v2207_v22, %v2176_v36  ;;  %v10734_v21 = vadd.f32 %v2399_v35, %v2127_v61  ;;  %v16106_v30 = vrot.slane %v10478_v62, 7  ;;  %v8013_v19 = vpop.eup %8012  ;;  %v15642_v56 = vrot.slane %v10729_v4, 7 }
 0x24c   : > { %16102 = vst [vmem:[#allocation118_spill] sm:$0xff] %v10721_v34  ;;  %v2238_v7 = vsel %vm2160_vm8, %v2176_v36, %v16103_v53  ;;  %v2240_v57 = vsel %vm2160_vm8, 1.0, %v2239_v40  ;;  %v2400_v36 = vadd.f32 %v2368_v60, %v10476_v44  ;;  %v10747_v40 = vmul.f32 %v9685_v50, %v9681_v47 }
 0x24d   : > { %16105 = vst [vmem:[#allocation120_spill] sm:$0xff] %v10734_v21  ;;  %v10740_v22 = vsel %vm1856_vm7, %v16106_v30, %v1981_v59  ;;  %v2433_v12 = vmul.f32 %v2238_v7, %v9829_v23  ;;  %v2432_v53 = vmul.f32 %v2240_v57, %v2128_v27  ;;  %v15644_v61 = vrot.slane %v10734_v21, 4 }
 0x24e   : > { %16107 = vst [vmem:[#allocation121_spill] sm:$0xff] %v10740_v22  ;;  %v1357_v35 = vadd.f32 1.0, %v8013_v19  ;;  %v2577_v42 = vrot.slane %v2401_v43, 4  ;;  %v15641_v30 = vrot.slane %v10721_v34, 4  ;;  %v2576_v23 = vrot.slane %v2400_v36, 4 }
 0x24f   : > { %16108 = vst [vmem:[#allocation122_spill] sm:$0xff] %v10747_v40  ;;  %v2481_v3 = vrot.slane %v2433_v12, 4  ;;  %v2480_v13 = vrot.slane %v2432_v53, 4  ;;  %v7400_v7 = vmul.f32 -1.442695, %v1203_v14  ;;  %v10755_v44 = vsel %vm1856_vm7, %v1981_v59, %v15642_v56  ;;  %v10786_v21 = vpop.f32.mrf.mxu2 }
 0x250   : > { %8014 = vrcp.f32 %v1357_v35  ;;  %v1580_v33 = vand.u32 2147483647, %v1357_v35  ;;  %16109 = vst [vmem:[#allocation123_spill] sm:$0xff] %v10755_v44  ;;  %v2639_v19 = vsel %vm2464_vm14, %v15644_v61, %v2576_v23  ;;  %v2638_v60 = vsel %vm2464_vm14, %v2576_v23, %v2577_v42 }
 0x251   : > { %v2543_v50 = vsel %vm2464_vm14, %v15641_v30, %v2480_v13  ;;  %v2542_v27 = vsel %vm2464_vm14, %v2480_v13, %v2481_v3  ;;  %v2640_v57 = vsel %vm2464_vm14, 0.0, %v2639_v19  ;;  %vm1576_vm15 = vweird.f32 %v1357_v35  ;;  %v10776_v61 = vpop.f32.mrf.mxu0 }
 0x252   : > { %v2544_v59 = vsel %vm2464_vm14, 1.0, %v2543_v50  ;;  %v1582_v14 = vand.u32 2147483648, %v1357_v35  ;;  %v2672_v30 = vmul.f32 %v2640_v57, %v2432_v53  ;;  %v2673_v47 = vmul.f32 %v2638_v60, %v2433_v12  ;;  %16110 = vst [vmem:[#allocation124_spill] sm:$0xff] %v10776_v61  ;;  %v1205_v1 = vpop.f32.mrf.mxu1 }
 0x253   : > { %v10774_v56 = vmul.f32 %v2544_v59, %v2432_v53  ;;  %v2737_v48 = vmul.f32 %v2542_v27, %v2433_v12  ;;  %8016 = vpow2.f32 %v7400_v7  ;;  %v16111_v13 = vrot.slane %v10719_v15, 4 }
 0x254   : > { %v16112_v50 = vrot.slane %v10637_v17, 4  ;;  %v1983_v53 = vrot.slane %v10776_v61, 7  ;;  %v2704_v59 = vadd.f32 %v2672_v30, %v2400_v36  ;;  %vm10790_vm2 = vcmp.eq.f32.partialorder %v1580_v33, 8.507059e+37 }
 0x255   : > { %v2541_v23 = vsel %vm2464_vm14, %v2481_v3, %v16111_v13  ;;  %v2848_v12 = vmul.f32 0.0, %v10774_v56  ;;  %v2705_v7 = vadd.f32 %v2673_v47, %v2401_v43  ;;  %v1583_v57 = vor.u32 1.1754944e-38, %v1582_v14 }
 0x256   : > { %v2637_v19 = vsel %vm2464_vm14, %v2577_v42, %v16112_v50  ;;  %v8015_v60 = vpop.eup %8014  ;;  %v10795_v3 = vmul.f32 %v2737_v48, %v10774_v56  ;;  %v10799_v42 = vmul.f32 %v2541_v23, %v10719_v15  ;;  %v2849_v36 = vmul.f32 %v2737_v48, %v2704_v59 }
 0x257   : > { %v2674_v13 = vmul.f32 %v2637_v19, %v10719_v15  ;;  %v2880_v50 = vadd.f32 %v2848_v12, %v2704_v59  ;;  %v1572_v34 = vmul.f32 %v8015_v60, %v1357_v35  ;;  %v16115_v30 = vrot.slane %v9613_v24, 7  ;;  %v10851_v51 = vpop.f32.mrf.mxu2 }
 0x258   : > { %vm1577_vm0 = vweird.f32 %v8015_v60  ;;  %v3025_v43 = vmul.f32 0.0, %v10795_v3  ;;  %v2850_v14 = vmul.f32 %v10799_v42, %v2705_v7  ;;  %v10812_v20 = vadd.f32 %v2849_v36, %v2705_v7  ;;  %v16129_v36 = vld [vmem:[#allocation66_spill] sm:$0xff] }
 0x259   : > { %v2015_v33 = vsel %vm1856_vm7, %v1983_v53, %v16115_v30  ;;  %v10807_v47 = vadd.f32 %v2674_v13, %v10637_v17  ;;  %v10810_v19 = vadd.f32 %v2880_v50, %v2848_v12  ;;  %v1573_v23 = vsub.f32 1.0, %v1572_v34  ;;  %v8017_v31 = vpop.eup %8016  ;;  %vm10832_vm3 = vmor %vm1576_vm15, %vm1577_vm0  ;;  %3687 = vmatmul.bf16.gmra.mxu2 %v16121_v11 }
 0x25a   : > { %v10815_v59 = vmul.f32 %v10799_v42, %v2737_v48  ;;  %v3479_v30 = vmul.f32 %v10658_v37, %v10774_v56  ;;  %v2048_v13 = vsel %vm1856_vm7, 0.0, %v2015_v33  ;;  %v7401_v61 = vmul.f32 -1.442695, %v1205_v1  ;;  %v16119_v1 = vld [vmem:[#allocation40_spill] sm:$0xff] }
 0x25b   : > { %v10820_v40 = vadd.f32 %v2850_v14, %v10807_v47  ;;  %v10825_v44 = vadd.f32 %v10810_v19, %v2848_v12  ;;  %v1574_v34 = vmul.f32 %v8015_v60, %v1573_v23  ;;  %v10828_v7 = vadd.f32 %v3025_v43, %v10812_v20 }
 0x25c   : > { %v1358_v48 = vadd.f32 1.0, %v8017_v31  ;;  %v3026_v14 = vmul.f32 %v10815_v59, %v2880_v50  ;;  %v10839_v33 = vmul.f32 %v10815_v59, %v10774_v56  ;;  %v2080_v16 = vmul.f32 %v2048_v13, %v16119_v1 }
 0x25d   : > { %16116 = vst [vmem:[#allocation125_spill] sm:$0xff] %v10825_v44  ;;  %8018 = vpow2.f32 %v7401_v61  ;;  %v3408_v23 = vadd.f32 %v10825_v44, %v2848_v12  ;;  %v1575_v22 = vadd.f32 %v8015_v60, %v1574_v34  ;;  %v10844_v31 = vadd.f32 %v10828_v7, %v3025_v43 }
 0x25e   : > { %8020 = vrcp.f32 %v1358_v48  ;;  %v3480_v35 = vmul.f32 %v10658_v37, %v10795_v3  ;;  %v1595_v62 = vand.u32 2147483647, %v1358_v48  ;;  %v1597_v6 = vand.u32 2147483648, %v1358_v48 }
 0x25f   : > { %16120 = vst [vmem:[#allocation40_spill] sm:$0xff] %v10844_v31  ;;  %v10849_v50 = vadd.f32 %v3026_v14, %v10820_v40  ;;  %v3511_v61 = vadd.f32 %v3479_v30, %v3408_v23  ;;  %v1579_v12 = vsel %vm10832_vm3, %v8015_v60, %v1575_v22  ;;  %v3409_v13 = vadd.f32 %v10844_v31, %v3025_v43  ;;  %v16130_v23 = vld [vmem:[#allocation70_spill] sm:$0xff] }
 0x260   : > { %v3202_v34 = vmul.f32 0.0, %v10839_v33  ;;  %v10860_v28 = vsel %vm10790_vm2, %v1583_v57, %v1579_v12  ;;  %vm1591_vm1 = vweird.f32 %v1358_v48  ;;  %v1598_v14 = vor.u32 1.1754944e-38, %v1597_v6 }
 0x261   : > { %16122 = vst [vmem:[#allocation35_spill] sm:$0xff] %v10860_v28  ;;  %v16123_v44 = vrot.slane %v10729_v4, 7  ;;  %v3703_v30 = vmul.f32 %v10634_v49, %v3511_v61  ;;  %v3512_v60 = vadd.f32 %v3480_v35, %v3409_v13  ;;  %vm10873_vm4 = vcmp.eq.f32.partialorder %v1595_v62, 8.507059e+37  ;;  %v16131_v61 = vld [vmem:[#allocation80_spill] sm:$0xff]  ;;  %v8038_v13 = vld [vmem:[%s8772_s4] sm:$0xff] }
 0x262   : > { %v10871_v43 = vadd.f32 %v3202_v34, %v10849_v50  ;;  %v10878_v6 = vadd.f32 %v2080_v16, %v9613_v24  ;;  %v2179_v49 = vrot.slane %v16129_v36, 6  ;;  %v2068_v35 = vmul.f32 %v16131_v61, %v16130_v23 }
 0x263   : > { %v10866_v11 = vsel %vm1856_vm7, %v16123_v44, %v1983_v53  ;;  %v8019_v27 = vpop.eup %8018  ;;  %v16128_v44 = vld [vmem:[#allocation58_spill] sm:$0xff]  ;;  %v10886_v22 = vadd.f32 %v8038_v13, %v3703_v30  ;;  %v3704_v62 = vmul.f32 %v10716_v32, %v3512_v60  ;;  %v3481_v24 = vmul.f32 %v10658_v37, %v10839_v33 }
 0x264   : > { %16124 = vst [vmem:[#allocation126_spill] sm:$0xff] %v10871_v43  ;;  %v2067_v53 = vmul.f32 %v16128_v44, %v9980_v25  ;;  %v8021_v12 = vpop.eup %8020  ;;  %v3410_v4 = vadd.f32 %v10871_v43, %v3202_v34  ;;  %v16133_v16 = vrot.slane %v10860_v28, 7  ;;  %v16134_v25 = vrot.slane %v10652_v39, 7  ;;  %v8039_v30 = vld [vmem:[%s8772_s4 + $0x8] sm:$0xff]  ;;  %v16136_v34 = vld [vmem:[#allocation52_spill] sm:$0xff]  ;;  %v16162_v39 = vld [vmem:[#allocation85_spill] sm:$0xff] }
 0x265   : > { %16127 = vst [vmem:[#allocation127_spill] sm:$0xff] %v10878_v6  ;;  %v1587_v31 = vmul.f32 %v8021_v12, %v1358_v48  ;;  %vm1592_vm5 = vweird.f32 %v8021_v12  ;;  %v15666_v23 = vrot.slane %v10878_v6, 6  ;;  %v10900_v61 = vadd.f32 %v8039_v30, %v3704_v62  ;;  %v16140_v30 = vld [vmem:[#allocation59_spill] sm:$0xff] }
 0x266   : > { %16132 = vst [vmem:[#allocation58_spill] sm:$0xff] %v10886_v22  ;;  %v1922_v44 = vsel %vm1856_vm7, %v16134_v25, %v16133_v16  ;;  %v3513_v32 = vadd.f32 %v3481_v24, %v3410_v4  ;;  %v1359_v60 = vadd.f32 1.0, %v8019_v27  ;;  %v2099_v13 = vadd.f32 %v2067_v53, %v16136_v34  ;;  %v10918_v27 = vpop.f32.mrf.mxu2  ;;  %vm10927_vm6 = vmor %vm1591_vm1, %vm1592_vm5 }
 0x267   : > { %16135 = vst [vmem:[#allocation66_spill] sm:$0xff] %v10900_v61  ;;  %v1588_v22 = vsub.f32 1.0, %v1587_v31  ;;  %v16137_v43 = vrot.slane %v10510_v10, 6  ;;  %v16139_v25 = vrot.slane %v9915_v26, 6  ;;  %v10916_v4 = vadd.f32 %v2068_v35, %v16140_v30  ;;  %v8040_v35 = vld [vmem:[%s8772_s4 + $0x10] sm:$0xff] }
 0x268   : > { %v10921_v31 = vmul.f32 %v1922_v44, %v10860_v28  ;;  %v3705_v53 = vmul.f32 %v10786_v21, %v3513_v32  ;;  %8022 = vrcp.f32 %v1359_v60  ;;  %v1610_v24 = vand.u32 2147483647, %v1359_v60  ;;  %v16145_v44 = vld [vmem:[#allocation73_spill] sm:$0xff] }
 0x269   : > { %v10909_v16 = vsel %vm2160_vm8, %v15666_v23, %v16137_v43  ;;  %v2236_v62 = vsel %vm2160_vm8, %v16139_v25, %v2179_v49  ;;  %v1589_v34 = vmul.f32 %v8021_v12, %v1588_v22  ;;  %v1612_v43 = vand.u32 2147483648, %v1359_v60  ;;  %v16153_v25 = vld [vmem:[#allocation63_spill] sm:$0xff] }
 0x26a   : > { %16138 = vst [vmem:[#allocation70_spill] sm:$0xff] %v10909_v16  ;;  %v2275_v23 = vrot.slane %v2099_v13, 6  ;;  %v2435_v26 = vmul.f32 %v2236_v62, %v16129_v36  ;;  %v10932_v30 = vadd.f32 %v8040_v35, %v3705_v53  ;;  %vm1606_vm11 = vweird.f32 %v1359_v60  ;;  %v16147_v35 = vld [vmem:[#allocation77_spill] sm:$0xff] }
 0x26b   : > { %16141 = vst [vmem:[#allocation80_spill] sm:$0xff] %v10921_v31  ;;  %v2180_v61 = vrot.slane %v16145_v44, 6  ;;  %v2276_v21 = vrot.slane %v10916_v4, 6  ;;  %v1590_v32 = vadd.f32 %v8021_v12, %v1589_v34  ;;  %v1613_v22 = vor.u32 1.1754944e-38, %v1612_v43 }
 0x26c   : > { %16144 = vst [vmem:[#allocation52_spill] sm:$0xff] %v10932_v30  ;;  %v16146_v10 = vrot.slane %v10569_v38, 6  ;;  %v2483_v48 = vrot.slane %v2435_v26, 4  ;;  %v16148_v30 = vld [vmem:[#allocation83_spill] sm:$0xff]  ;;  %vm10949_vm9 = vcmp.eq.f32.partialorder %v1610_v24, 8.507059e+37  ;;  %v15680_v63 = vrot.slane %v16162_v39, 6 }
 0x26d   : > { %v2235_v6 = vsel %vm2160_vm8, %v2179_v49, %v2180_v61  ;;  %v2331_v53 = vsel %vm2160_vm8, %v2275_v23, %v2276_v21  ;;  %v2069_v31 = vmul.f32 %v16148_v30, %v16147_v35  ;;  %v1594_v34 = vsel %vm10927_vm6, %v8021_v12, %v1590_v32 }
 0x26e   : > { %v2332_v62 = vsel %vm2160_vm8, %v16146_v10, %v2275_v23  ;;  %v16151_v10 = vrot.slane %v10719_v15, 4  ;;  %v2372_v49 = vmul.f32 %v2331_v53, %v16145_v44  ;;  %v10959_v43 = vmul.f32 %v2235_v6, %v16145_v44  ;;  %v8023_v23 = vpop.eup %8022  ;;  %v10972_v53 = vpop.f32.mrf.mxu2  ;;  %v16154_v6 = vld [vmem:[#allocation36_spill] sm:$0xff] }
 0x26f   : > { %v2371_v16 = vmul.f32 %v2332_v62, %v16129_v36  ;;  %v10963_v30 = vsel %vm10873_vm4, %v1598_v14, %v1594_v34  ;;  %v10966_v32 = vadd.f32 %v2069_v31, %v16153_v25  ;;  %v1602_v62 = vmul.f32 %v8023_v23, %v1359_v60  ;;  %3692 = vmatmul.bf16.gmra.mxu2 %v16154_v6 }
 0x270   : > { %v2540_v36 = vsel %vm2464_vm14, %v16151_v10, %v2483_v48  ;;  %16152 = vst [vmem:[#allocation59_spill] sm:$0xff] %v10963_v30  ;;  %v1886_v15 = vrot.slane %v10963_v30, 7  ;;  %vm1607_vm10 = vweird.f32 %v8023_v23  ;;  %v10970_v35 = vadd.f32 %v2372_v49, %v10916_v4 }
 0x271   : > { %v2403_v12 = vadd.f32 %v2371_v16, %v2099_v13  ;;  %v2739_v24 = vmul.f32 %v2540_v36, %v2435_v26  ;;  %v2484_v13 = vrot.slane %v10959_v43, 4  ;;  %v16155_v16 = vrot.slane %v10860_v28, 7  ;;  %vm11008_vm12 = vmor %vm1606_vm11, %vm1607_vm10 }
 0x272   : > { %v1603_v34 = vsub.f32 1.0, %v1602_v62  ;;  %v2580_v4 = vrot.slane %v10970_v35, 4  ;;  %v16156_v10 = vrot.slane %v10119_v0, 6 }
 0x273   : > { %v2579_v44 = vrot.slane %v2403_v12, 4  ;;  %v2851_v14 = vmul.f32 %v2739_v24, %v10807_v47  ;;  %v10977_v57 = vmul.f32 %v2739_v24, %v10799_v42  ;;  %v1921_v31 = vsel %vm1856_vm7, %v16155_v16, %v1886_v15 }
 0x274   : > { %v2234_v36 = vsel %vm2160_vm8, %v2180_v61, %v16156_v10  ;;  %v10990_v47 = vmul.f32 %v1921_v31, %v10963_v30  ;;  %v16158_v42 = vrot.slane %v10637_v17, 4  ;;  %v1604_v6 = vmul.f32 %v8023_v23, %v1603_v34  ;;  %v16161_v30 = vld [vmem:[#allocation86_spill] sm:$0xff] }
 0x275   : > { %v3027_v25 = vmul.f32 %v10977_v57, %v10812_v20  ;;  %v11000_v62 = vmul.f32 %v10977_v57, %v10795_v3  ;;  %v2539_v61 = vsel %vm2464_vm14, %v2483_v48, %v2484_v13  ;;  %v2635_v31 = vsel %vm2464_vm14, %v2579_v44, %v2580_v4 }
 0x276   : > { %16157 = vst [vmem:[#allocation73_spill] sm:$0xff] %v10990_v47  ;;  %v2636_v49 = vsel %vm2464_vm14, %v16158_v42, %v2579_v44  ;;  %v2676_v34 = vmul.f32 %v2635_v31, %v10959_v43  ;;  %v1605_v42 = vadd.f32 %v8023_v23, %v1604_v6  ;;  %v2437_v44 = vmul.f32 %v2234_v36, %v10119_v0  ;;  %v11029_v6 = vpop.f32.mrf.mxu2 }
 0x277   : > { %v2675_v16 = vmul.f32 %v2636_v49, %v2435_v26  ;;  %v3203_v20 = vmul.f32 0.0, %v11000_v62  ;;  %v3482_v10 = vmul.f32 %v10658_v37, %v11000_v62  ;;  %v2740_v26 = vmul.f32 %v2539_v61, %v10959_v43 }
 0x278   : > { %v2277_v49 = vrot.slane %v10966_v32, 6  ;;  %v2708_v60 = vadd.f32 %v2676_v34, %v10970_v35  ;;  %v2070_v28 = vmul.f32 %v16161_v30, %v10163_v52  ;;  %v1609_v31 = vsel %vm11008_vm12, %v8023_v23, %v1605_v42 }
 0x279   : > { %v2707_v48 = vadd.f32 %v2675_v16, %v2403_v12  ;;  %v11020_v47 = vmul.f32 %v2740_v26, %v2739_v24  ;;  %v11033_v35 = vsel %vm10949_vm9, %v1613_v22, %v1609_v31  ;;  %v2485_v36 = vrot.slane %v2437_v44, 4 }
 0x27a   : > { %v2330_v12 = vsel %vm2160_vm8, %v2276_v21, %v2277_v49  ;;  %16163 = vst [vmem:[#allocation77_spill] sm:$0xff] %v11033_v35  ;;  %v1887_v30 = vrot.slane %v11033_v35, 7  ;;  %v11045_v21 = vmul.f32 %v10866_v11, %v11033_v35  ;;  %v16164_v16 = vrot.slane %v16119_v1, 7 }
 0x27b   : > { %v2883_v54 = vadd.f32 %v2851_v14, %v2707_v48  ;;  %v2852_v43 = vmul.f32 %v2740_v26, %v2707_v48  ;;  %v3028_v24 = vmul.f32 %v11020_v47, %v10820_v40  ;;  %v11039_v52 = vmul.f32 %v11020_v47, %v10815_v59 }
 0x27c   : > { %v2373_v23 = vmul.f32 %v2330_v12, %v10119_v0  ;;  %v1919_v11 = vsel %vm1856_vm7, %v1887_v30, %v16164_v16  ;;  %v2538_v31 = vsel %vm2464_vm14, %v2484_v13, %v2485_v36  ;;  %v16166_v16 = vrot.slane %v10119_v0, 6 }
 0x27d   : > { %v11047_v14 = vadd.f32 %v3027_v25, %v2883_v54  ;;  %v11049_v38 = vadd.f32 %v2852_v43, %v2708_v60  ;;  %v3204_v22 = vmul.f32 %v11039_v52, %v10810_v19  ;;  %v11055_v40 = vmul.f32 %v11039_v52, %v10774_v56 }
 0x27e   : > { %v11058_v59 = vadd.f32 %v2373_v23, %v10966_v32  ;;  %v1920_v25 = vsel %vm1856_vm7, %v1886_v15, %v1887_v30  ;;  %v11074_v17 = vsel %vm1856_vm7, 1.0, %v1919_v11  ;;  %v16165_v23 = vld [vmem:[#allocation67_spill] sm:$0xff]  ;;  %v11101_v12 = vpop.f32.mrf.mxu2 }
 0x27f   : > { %v11067_v61 = vadd.f32 %v3203_v20, %v11047_v14  ;;  %v11070_v19 = vadd.f32 %v3028_v24, %v11049_v38  ;;  %v11077_v32 = vmul.f32 %v1920_v25, %v11033_v35  ;;  %v3380_v34 = vmul.f32 0.0, %v11055_v40 }
 0x280   : > { %v3483_v42 = vmul.f32 %v10658_v37, %v11055_v40  ;;  %v2581_v43 = vrot.slane %v11058_v59, 4  ;;  %v2741_v24 = vmul.f32 %v2538_v31, %v2437_v44  ;;  %v2102_v30 = vadd.f32 %v2070_v28, %v16165_v23  ;;  %v16167_v31 = vld [vmem:[#allocation37_spill] sm:$0xff] }
 0x281   : > { %v3411_v15 = vadd.f32 %v11067_v61, %v3203_v20  ;;  %v11084_v48 = vadd.f32 %v3204_v22, %v11070_v19  ;;  %v2233_v20 = vsel %vm2160_vm8, %v16166_v16, %v15680_v63  ;;  %3697 = vmatmul.bf16.gmra.mxu2 %v16167_v31 }
 0x282   : > { %v2634_v13 = vsel %vm2464_vm14, %v2580_v4, %v2581_v43  ;;  %v2438_v25 = vmul.f32 %v2233_v20, %v16162_v39  ;;  %v2853_v23 = vmul.f32 %v2741_v24, %v2708_v60  ;;  %v11104_v35 = vmul.f32 %v2741_v24, %v2740_v26 }
 0x283   : > { %v3514_v11 = vadd.f32 %v3482_v10, %v3411_v15  ;;  %v3412_v22 = vadd.f32 %v3380_v34, %v11084_v48  ;;  %v2677_v28 = vmul.f32 %v2634_v13, %v2437_v44  ;;  %v2278_v0 = vrot.slane %v2102_v30, 6  ;;  %v16168_v15 = vld [vmem:[#allocation88_spill] sm:$0xff] }
 0x284   : > { %v2486_v34 = vrot.slane %v2438_v25, 4  ;;  %v2071_v4 = vmul.f32 %v16168_v15, %v10341_v55  ;;  %v3029_v20 = vmul.f32 %v11104_v35, %v2883_v54  ;;  %v11113_v31 = vmul.f32 %v11104_v35, %v10977_v57  ;;  %v8041_v44 = vld [vmem:[%s8772_s4 + $0x18] sm:$0xff] }
 0x285   : > { %v3706_v16 = vmul.f32 %v10851_v51, %v3514_v11  ;;  %v3515_v10 = vadd.f32 %v3483_v42, %v3412_v22  ;;  %v2709_v63 = vadd.f32 %v2677_v28, %v11058_v59  ;;  %v2329_v26 = vsel %vm2160_vm8, %v2277_v49, %v2278_v0  ;;  %v8042_v49 = vld [vmem:[%s8772_s4 + $0x20] sm:$0xff]  ;;  %v16171_v28 = vld [vmem:[#allocation75_spill] sm:$0xff] }
 0x286   : > { %v2374_v42 = vmul.f32 %v2329_v26, %v16162_v39  ;;  %v2537_v55 = vsel %vm2464_vm14, %v2485_v36, %v2486_v34  ;;  %v3205_v54 = vmul.f32 %v11113_v31, %v10828_v7  ;;  %v11128_v57 = vmul.f32 %v11113_v31, %v10795_v3 }
 0x287   : > { %v11118_v60 = vadd.f32 %v8041_v44, %v3706_v16  ;;  %v3707_v51 = vmul.f32 %v10918_v27, %v3515_v10  ;;  %v2885_v59 = vadd.f32 %v2853_v23, %v2709_v63  ;;  %v2742_v11 = vmul.f32 %v2537_v55, %v2438_v25 }
 0x288   : > { %v2406_v13 = vadd.f32 %v2374_v42, %v2102_v30  ;;  %v2103_v27 = vadd.f32 %v2071_v4, %v16171_v28  ;;  %v16172_v16 = vrot.slane %v10431_v58, 6  ;;  %v16173_v10 = vrot.slane %v16162_v39, 6  ;;  %v11148_v42 = vpop.f32.mrf.mxu2 }
 0x289   : > { %16169 = vst [vmem:[#allocation83_spill] sm:$0xff] %v11118_v60  ;;  %v11131_v22 = vadd.f32 %v8042_v49, %v3707_v51  ;;  %v11140_v23 = vadd.f32 %v3029_v20, %v2885_v59  ;;  %v3381_v7 = vmul.f32 0.0, %v11128_v57  ;;  %v3484_v15 = vmul.f32 %v10658_v37, %v11128_v57  ;;  %v16174_v20 = vld [vmem:[#allocation90_spill] sm:$0xff] }
 0x28a   : > { %v2232_v36 = vsel %vm2160_vm8, %v16173_v10, %v16172_v16  ;;  %v2854_v26 = vmul.f32 %v2742_v11, %v2709_v63  ;;  %v2582_v44 = vrot.slane %v2406_v13, 4  ;;  %v11145_v51 = vmul.f32 %v2742_v11, %v2741_v24 }
 0x28b   : > { %16170 = vst [vmem:[#allocation63_spill] sm:$0xff] %v11131_v22  ;;  %v2279_v30 = vrot.slane %v2103_v27, 6  ;;  %v2439_v4 = vmul.f32 %v2232_v36, %v10431_v58  ;;  %v11151_v39 = vadd.f32 %v3205_v54, %v11140_v23  ;;  %v2072_v55 = vmul.f32 %v16174_v20, %v10395_v5 }
 0x28c   : > { %v2184_v49 = vrot.slane %v10481_v45, 6  ;;  %v2073_v28 = vmul.f32 %v10459_v18, %v10409_v41  ;;  %v2633_v63 = vsel %vm2464_vm14, %v2581_v43, %v2582_v44  ;;  %v3030_v24 = vmul.f32 %v11145_v51, %v11049_v38 }
 0x28d   : > { %v11164_v16 = vmul.f32 %v11145_v51, %v11020_v47  ;;  %v2328_v54 = vsel %vm2160_vm8, %v2278_v0, %v2279_v30  ;;  %v3413_v5 = vadd.f32 %v3381_v7, %v11151_v39  ;;  %v2678_v10 = vmul.f32 %v2633_v63, %v2438_v25 }
 0x28e   : > { %v2375_v36 = vmul.f32 %v2328_v54, %v10431_v58  ;;  %v2487_v20 = vrot.slane %v2439_v4, 4  ;;  %v2104_v38 = vadd.f32 %v2072_v55, %v10166_v46  ;;  %v16175_v47 = vrot.slane %v10431_v58, 6 }
 0x28f   : > { %v3206_v41 = vmul.f32 %v11164_v16, %v10849_v50  ;;  %v11174_v18 = vmul.f32 %v11164_v16, %v10839_v33  ;;  %v3516_v0 = vadd.f32 %v3484_v15, %v3413_v5  ;;  %v2710_v7 = vadd.f32 %v2678_v10, %v2406_v13  ;;  %v8043_v10 = vld [vmem:[%s8772_s4 + $0x28] sm:$0xff] }
 0x290   : > { %v2231_v43 = vsel %vm2160_vm8, %v16175_v47, %v2184_v49  ;;  %v2407_v25 = vadd.f32 %v2375_v36, %v2103_v27  ;;  %v2536_v63 = vsel %vm2464_vm14, %v2486_v34, %v2487_v20  ;;  %v2280_v22 = vrot.slane %v2104_v38, 6  ;;  %v11195_v5 = vpop.f32.mrf.mxu2 }
 0x291   : > { %v3382_v50 = vmul.f32 0.0, %v11174_v18  ;;  %v3485_v54 = vmul.f32 %v10658_v37, %v11174_v18  ;;  %v2743_v60 = vmul.f32 %v2536_v63, %v2439_v4  ;;  %v3708_v46 = vmul.f32 %v10972_v53, %v3516_v0 }
 0x292   : > { %v2886_v58 = vadd.f32 %v2854_v26, %v2710_v7  ;;  %v2583_v55 = vrot.slane %v2407_v25, 4  ;;  %v2440_v47 = vmul.f32 %v2231_v43, %v10481_v45  ;;  %v2327_v27 = vsel %vm2160_vm8, %v2279_v30, %v2280_v22 }
 0x293   : > { %v2855_v15 = vmul.f32 %v2743_v60, %v2710_v7  ;;  %v11188_v13 = vmul.f32 %v2743_v60, %v2742_v11  ;;  %v11193_v34 = vadd.f32 %v2073_v28, %v10255_v29  ;;  %v11198_v36 = vadd.f32 %v8043_v10, %v3708_v46 }
 0x294   : > { %v11200_v63 = vadd.f32 %v3030_v24, %v2886_v58  ;;  %v2632_v53 = vsel %vm2464_vm14, %v2582_v44, %v2583_v55  ;;  %v2376_v26 = vmul.f32 %v2327_v27, %v10481_v45  ;;  %v2488_v29 = vrot.slane %v2440_v47, 4 }
 0x295   : > { %16176 = vst [vmem:[#allocation36_spill] sm:$0xff] %v11198_v36  ;;  %v2679_v11 = vmul.f32 %v2632_v53, %v2439_v4  ;;  %v3031_v43 = vmul.f32 %v11188_v13, %v2885_v59  ;;  %v11208_v30 = vmul.f32 %v11188_v13, %v11104_v35  ;;  %v2185_v24 = vrot.slane %v10492_v9, 6 }
 0x296   : > { %v11211_v28 = vadd.f32 %v3206_v41, %v11200_v63  ;;  %v2408_v0 = vadd.f32 %v2376_v26, %v2104_v38  ;;  %v2281_v7 = vrot.slane %v11193_v34, 6  ;;  %v2535_v35 = vsel %vm2464_vm14, %v2487_v20, %v2488_v29 }
 0x297   : > { %v2711_v46 = vadd.f32 %v2679_v11, %v2407_v25  ;;  %v3207_v45 = vmul.f32 %v11208_v30, %v11047_v14  ;;  %v11219_v59 = vmul.f32 %v11208_v30, %v11000_v62  ;;  %v2744_v41 = vmul.f32 %v2535_v35, %v2440_v47 }
 0x298   : > { %v3414_v44 = vadd.f32 %v3382_v50, %v11211_v28  ;;  %v2584_v4 = vrot.slane %v2408_v0, 4  ;;  %v2230_v38 = vsel %vm2160_vm8, %v2184_v49, %v2185_v24  ;;  %v2326_v10 = vsel %vm2160_vm8, %v2280_v22, %v2281_v7  ;;  %v11239_v36 = vpop.f32.mrf.mxu2 }
 0x299   : > { %16177 = vst [vmem:[#allocation86_spill] sm:$0xff] %v11219_v59  ;;  %v2887_v27 = vadd.f32 %v2855_v15, %v2711_v46  ;;  %v3383_v25 = vmul.f32 0.0, %v11219_v59  ;;  %v3486_v14 = vmul.f32 %v10658_v37, %v11219_v59  ;;  %v2856_v50 = vmul.f32 %v2744_v41, %v2711_v46 }
 0x29a   : > { %v3517_v53 = vadd.f32 %v3485_v54, %v3414_v44  ;;  %v2631_v20 = vsel %vm2464_vm14, %v2583_v55, %v2584_v4  ;;  %v11233_v26 = vmul.f32 %v2744_v41, %v2743_v60  ;;  %v2377_v15 = vmul.f32 %v2326_v10, %v10492_v9  ;;  %v16178_v60 = vld [vmem:[#allocation104_spill] sm:$0xff]  ;;  %v8044_v44 = vld [vmem:[%s8772_s4 + $0x30] sm:$0xff] }
 0x29b   : > { %v11235_v11 = vadd.f32 %v3031_v43, %v2887_v27  ;;  %v2680_v49 = vmul.f32 %v2631_v20, %v2440_v47  ;;  %v2441_v35 = vmul.f32 %v2230_v38, %v10492_v9  ;;  %v2074_v55 = vmul.f32 %v16178_v60, %v10580_v8 }
 0x29c   : > { %v3709_v59 = vmul.f32 %v11029_v6, %v3517_v53  ;;  %v3032_v22 = vmul.f32 %v11233_v26, %v2886_v58  ;;  %v11245_v54 = vmul.f32 %v11233_v26, %v11145_v51  ;;  %v2409_v46 = vadd.f32 %v2377_v15, %v11193_v34  ;;  %v16180_v58 = vld [vmem:[#allocation94_spill] sm:$0xff]  ;;  %v16182_v15 = vld [vmem:[#allocation111_spill] sm:$0xff] }
 0x29d   : > { %v11250_v43 = vadd.f32 %v3207_v45, %v11235_v11  ;;  %v2712_v47 = vadd.f32 %v2680_v49, %v2408_v0  ;;  %v2489_v9 = vrot.slane %v2441_v35, 4  ;;  %v2106_v10 = vadd.f32 %v2074_v55, %v16180_v58  ;;  %v16181_v45 = vld [vmem:[#allocation125_spill] sm:$0xff] }
 0x29e   : > { %v11254_v38 = vadd.f32 %v8044_v44, %v3709_v59  ;;  %v3208_v6 = vmul.f32 %v11245_v54, %v11070_v19  ;;  %v3272_v51 = vmul.f32 %v11245_v54, %v11039_v52  ;;  %v2585_v34 = vrot.slane %v2409_v46, 4 }
 0x29f   : > { %v3415_v8 = vadd.f32 %v3383_v25, %v11250_v43  ;;  %v11262_v53 = vadd.f32 %v2856_v50, %v2712_v47  ;;  %v2534_v0 = vsel %vm2464_vm14, %v2488_v29, %v2489_v9  ;;  %v2186_v19 = vrot.slane %v16182_v15, 6 }
 0x2a0   : > { %16179 = vst [vmem:[#allocation85_spill] sm:$0xff] %v11254_v38  ;;  %v3384_v20 = vmul.f32 %v3272_v51, %v16181_v45  ;;  %v3448_v59 = vmul.f32 %v3272_v51, %v10774_v56  ;;  %v2745_v49 = vmul.f32 %v2534_v0, %v2441_v35  ;;  %v2630_v25 = vsel %vm2464_vm14, %v2584_v4, %v2585_v34  ;;  %v16184_v45 = vld [vmem:[#allocation109_spill] sm:$0xff]  ;;  %v16191_v38 = vld [vmem:[#allocation108_spill] sm:$0xff] }
 0x2a1   : > { %v3518_v60 = vadd.f32 %v3486_v14, %v3415_v8  ;;  %v11270_v52 = vadd.f32 %v3032_v22, %v11262_v53  ;;  %v2282_v50 = vrot.slane %v2106_v10, 6  ;;  %v2681_v29 = vmul.f32 %v2630_v25, %v2441_v35  ;;  %v11283_v8 = vpop.f32.mrf.mxu2 }
 0x2a2   : > { %v3487_v55 = vmul.f32 %v10658_v37, %v3448_v59  ;;  %v2857_v44 = vmul.f32 %v2745_v49, %v2712_v47  ;;  %v11275_v58 = vmul.f32 %v2745_v49, %v2744_v41  ;;  %v2229_v14 = vsel %vm2160_vm8, %v2185_v24, %v2186_v19  ;;  %v16185_v59 = vld [vmem:[#allocation105_spill] sm:$0xff] }
 0x2a3   : > { %v3710_v56 = vmul.f32 %v11101_v12, %v3518_v60  ;;  %v3240_v51 = vadd.f32 %v3208_v6, %v11270_v52  ;;  %v2325_v22 = vsel %vm2160_vm8, %v2281_v7, %v2282_v50  ;;  %v2713_v4 = vadd.f32 %v2681_v29, %v2409_v46  ;;  %v8045_v12 = vld [vmem:[%s8772_s4 + $0x38] sm:$0xff] }
 0x2a4   : > { %v3033_v0 = vmul.f32 %v11275_v58, %v2887_v27  ;;  %v11288_v35 = vmul.f32 %v11275_v58, %v11188_v13  ;;  %v2378_v41 = vmul.f32 %v2325_v22, %v16182_v15  ;;  %v2442_v24 = vmul.f32 %v2229_v14, %v16182_v15  ;;  %v16188_v14 = vld [vmem:[#allocation40_spill] sm:$0xff] }
 0x2a5   : > { %v11292_v47 = vadd.f32 %v8045_v12, %v3710_v56  ;;  %v3416_v6 = vadd.f32 %v3384_v20, %v3240_v51  ;;  %v2075_v7 = vmul.f32 %v16185_v59, %v16184_v45  ;;  %v11297_v60 = vadd.f32 %v2857_v44, %v2713_v4  ;;  %v16186_v56 = vld [vmem:[#allocation98_spill] sm:$0xff]  ;;  %v16187_v20 = vld [vmem:[#allocation116_spill] sm:$0xff] }
 0x2a6   : > { %v3209_v27 = vmul.f32 %v11288_v35, %v11140_v23  ;;  %v3273_v13 = vmul.f32 %v11288_v35, %v11113_v31  ;;  %v2410_v46 = vadd.f32 %v2378_v41, %v2106_v10  ;;  %v2490_v29 = vrot.slane %v2442_v24, 4 }
 0x2a7   : > { %16183 = vst [vmem:[#allocation67_spill] sm:$0xff] %v11292_v47  ;;  %v3519_v25 = vadd.f32 %v3487_v55, %v3416_v6  ;;  %v2107_v22 = vadd.f32 %v2075_v7, %v16186_v56  ;;  %v2187_v51 = vrot.slane %v16187_v20, 6  ;;  %v11306_v15 = vadd.f32 %v3033_v0, %v11297_v60  ;;  %v8046_v7 = vld [vmem:[%s8772_s4 + $0x40] sm:$0xff] }
 0x2a8   : > { %v3385_v44 = vmul.f32 %v3273_v13, %v16188_v14  ;;  %v3449_v12 = vmul.f32 %v3273_v13, %v10795_v3  ;;  %v2586_v45 = vrot.slane %v2410_v46, 4  ;;  %v2533_v31 = vsel %vm2464_vm14, %v2489_v9, %v2490_v29 }
 0x2a9   : > { %v3711_v23 = vmul.f32 %v11148_v42, %v3519_v25  ;;  %v2228_v10 = vsel %vm2160_vm8, %v2186_v19, %v2187_v51  ;;  %v2283_v55 = vrot.slane %v2107_v22, 6  ;;  %v3241_v41 = vadd.f32 %v3209_v27, %v11306_v15  ;;  %v11325_v25 = vpop.f32.mrf.mxu2 }
 0x2aa   : > { %v3488_v6 = vmul.f32 %v10658_v37, %v3449_v12  ;;  %v2629_v0 = vsel %vm2464_vm14, %v2585_v34, %v2586_v45  ;;  %v2746_v59 = vmul.f32 %v2533_v31, %v2442_v24  ;;  %v2443_v9 = vmul.f32 %v2228_v10, %v16187_v20  ;;  %v16190_v31 = vld [vmem:[#allocation114_spill] sm:$0xff] }
 0x2ab   : > { %v11320_v3 = vadd.f32 %v8046_v7, %v3711_v23  ;;  %v2682_v13 = vmul.f32 %v2629_v0, %v2442_v24  ;;  %v2324_v42 = vsel %vm2160_vm8, %v2282_v50, %v2283_v55  ;;  %v3417_v19 = vadd.f32 %v3385_v44, %v3241_v41  ;;  %v16192_v7 = vld [vmem:[#allocation117_spill] sm:$0xff] }
 0x2ac   : > { %v2858_v56 = vmul.f32 %v2746_v59, %v2713_v4  ;;  %v11327_v27 = vmul.f32 %v2746_v59, %v2745_v49  ;;  %v2379_v14 = vmul.f32 %v2324_v42, %v16187_v20  ;;  %v2491_v34 = vrot.slane %v2443_v9, 4  ;;  %v16193_v20 = vld [vmem:[#allocation103_spill] sm:$0xff] }
 0x2ad   : > { %16189 = vst [vmem:[#allocation37_spill] sm:$0xff] %v11320_v3  ;;  %v2714_v12 = vadd.f32 %v2682_v13, %v2410_v46  ;;  %v2076_v23 = vmul.f32 %v16191_v38, %v16190_v31  ;;  %v2188_v24 = vrot.slane %v16192_v7, 6  ;;  %v3520_v0 = vadd.f32 %v3488_v6, %v3417_v19  ;;  %v8047_v19 = vld [vmem:[%s8772_s4 + $0x48] sm:$0xff] }
 0x2ae   : > { %v3034_v50 = vmul.f32 %v11327_v27, %v11262_v53  ;;  %v11337_v44 = vmul.f32 %v11327_v27, %v11233_v26  ;;  %v2411_v49 = vadd.f32 %v2379_v14, %v2107_v22  ;;  %v2532_v46 = vsel %vm2464_vm14, %v2490_v29, %v2491_v34 }
 0x2af   : > { %v2890_v4 = vadd.f32 %v2858_v56, %v2714_v12  ;;  %v2108_v10 = vadd.f32 %v2076_v23, %v16193_v20  ;;  %v2227_v38 = vsel %vm2160_vm8, %v2187_v51, %v2188_v24  ;;  %v3712_v41 = vmul.f32 %v11195_v5, %v3520_v0  ;;  %v16195_v51 = vld [vmem:[#allocation126_spill] sm:$0xff] }
 0x2b0   : > { %v3210_v6 = vmul.f32 %v11337_v44, %v11200_v63  ;;  %v3274_v53 = vmul.f32 %v11337_v44, %v11164_v16  ;;  %v2587_v26 = vrot.slane %v2411_v49, 4  ;;  %v2747_v22 = vmul.f32 %v2532_v46, %v2443_v9 }
 0x2b1   : > { %v11349_v13 = vadd.f32 %v3034_v50, %v2890_v4  ;;  %v2284_v42 = vrot.slane %v2108_v10, 6  ;;  %v11352_v29 = vmul.f32 %v2227_v38, %v16192_v7  ;;  %v11355_v56 = vadd.f32 %v8047_v19, %v3712_v41  ;;  %v11364_v50 = vpop.f32.mrf.mxu2  ;;  %v16196_v41 = vld [vmem:[#allocation35_spill] sm:$0xff] }
 0x2b2   : > { %v3386_v14 = vmul.f32 %v3274_v53, %v16195_v51  ;;  %v3450_v5 = vmul.f32 %v3274_v53, %v10839_v33  ;;  %v2628_v63 = vsel %vm2464_vm14, %v2586_v45, %v2587_v26  ;;  %v2859_v23 = vmul.f32 %v2747_v22, %v2714_v12  ;;  %v16197_v33 = vld [vmem:[#allocation121_spill] sm:$0xff] }
 0x2b3   : > { %16194 = vst [vmem:[#allocation88_spill] sm:$0xff] %v11355_v56  ;;  %v3242_v16 = vadd.f32 %v3210_v6, %v11349_v13  ;;  %v2683_v31 = vmul.f32 %v2628_v63, %v2443_v9  ;;  %v11362_v0 = vmul.f32 %v2747_v22, %v2746_v59  ;;  %v2323_v20 = vsel %vm2160_vm8, %v2283_v55, %v2284_v42  ;;  %v16198_v55 = vld [vmem:[#allocation115_spill] sm:$0xff] }
 0x2b4   : > { %v3489_v46 = vmul.f32 %v10658_v37, %v3450_v5  ;;  %v2492_v38 = vrot.slane %v11352_v29, 4  ;;  %v2077_v53 = vmul.f32 %v16197_v33, %v16196_v41  ;;  %v2380_v12 = vmul.f32 %v2323_v20, %v16192_v7  ;;  %v16199_v5 = vld [vmem:[#allocation80_spill] sm:$0xff] }
 0x2b5   : > { %v3418_v19 = vadd.f32 %v3386_v14, %v3242_v16  ;;  %v2715_v45 = vadd.f32 %v2683_v31, %v2411_v49  ;;  %v3035_v9 = vmul.f32 %v11362_v0, %v11297_v60  ;;  %v11376_v59 = vmul.f32 %v11362_v0, %v11275_v58 }
 0x2b6   : > { %v2531_v6 = vsel %vm2464_vm14, %v2491_v34, %v2492_v38  ;;  %v2109_v51 = vadd.f32 %v2077_v53, %v16198_v55  ;;  %v2189_v63 = vrot.slane %v16199_v5, 6  ;;  %v2412_v58 = vadd.f32 %v2380_v12, %v2108_v10  ;;  %v8048_v10 = vld [vmem:[%s8772_s4 + $0x50] sm:$0xff] }
 0x2b7   : > { %v3521_v56 = vadd.f32 %v3489_v46, %v3418_v19  ;;  %v2891_v14 = vadd.f32 %v2859_v23, %v2715_v45  ;;  %v3211_v49 = vmul.f32 %v11376_v59, %v11235_v11  ;;  %v3275_v60 = vmul.f32 %v11376_v59, %v11208_v30  ;;  %v16202_v55 = vld [vmem:[#allocation123_spill] sm:$0xff] }
 0x2b8   : > { %v2748_v16 = vmul.f32 %v2531_v6, %v11352_v29  ;;  %v2226_v7 = vsel %vm2160_vm8, %v2188_v24, %v2189_v63  ;;  %v2285_v34 = vrot.slane %v2109_v51, 6  ;;  %v2588_v41 = vrot.slane %v2412_v58, 4  ;;  %v16201_v6 = vld [vmem:[#allocation59_spill] sm:$0xff] }
 0x2b9   : > { %v3713_v31 = vmul.f32 %v11239_v36, %v3521_v56  ;;  %v11391_v20 = vadd.f32 %v3035_v9, %v2891_v14  ;;  %v3387_v46 = vmul.f32 %v3275_v60, %v11067_v61  ;;  %v3451_v23 = vmul.f32 %v3275_v60, %v11000_v62  ;;  %v11405_v19 = vpop.f32.mrf.mxu2 }
 0x2ba   : > { %v2860_v11 = vmul.f32 %v2748_v16, %v2715_v45  ;;  %v11395_v33 = vmul.f32 %v2748_v16, %v2747_v22  ;;  %v2322_v30 = vsel %vm2160_vm8, %v2284_v42, %v2285_v34  ;;  %v2627_v62 = vsel %vm2464_vm14, %v2587_v26, %v2588_v41  ;;  %v16203_v26 = vld [vmem:[#allocation73_spill] sm:$0xff] }
 0x2bb   : > { %v11400_v53 = vadd.f32 %v8048_v10, %v3713_v31  ;;  %v3243_v24 = vadd.f32 %v3211_v49, %v11391_v20  ;;  %v3490_v36 = vmul.f32 %v10658_v37, %v3451_v23  ;;  %v2381_v56 = vmul.f32 %v2322_v30, %v16199_v5 }
 0x2bc   : > { %v3036_v61 = vmul.f32 %v11395_v33, %v2890_v4  ;;  %v3100_v22 = vmul.f32 %v11395_v33, %v11327_v27  ;;  %v2445_v42 = vmul.f32 %v2226_v7, %v16199_v5  ;;  %v2684_v9 = vmul.f32 %v2627_v62, %v11352_v29 }
 0x2bd   : > { %16200 = vst [vmem:[#allocation75_spill] sm:$0xff] %v11400_v53  ;;  %v3419_v45 = vadd.f32 %v3387_v46, %v3243_v24  ;;  %v2413_v12 = vadd.f32 %v2381_v56, %v2109_v51  ;;  %v2078_v49 = vmul.f32 %v16202_v55, %v16201_v6  ;;  %v2190_v30 = vrot.slane %v16203_v26, 6  ;;  %v16204_v53 = vld [vmem:[#allocation119_spill] sm:$0xff] }
 0x2be   : > { %v3212_v60 = vmul.f32 %v3100_v22, %v11270_v52  ;;  %v3276_v31 = vmul.f32 %v3100_v22, %v11245_v54  ;;  %v2493_v23 = vrot.slane %v2445_v42, 4  ;;  %v2716_v10 = vadd.f32 %v2684_v9, %v2412_v58  ;;  %v16206_v9 = vld [vmem:[#allocation124_spill] sm:$0xff] }
 0x2bf   : > { %v3522_v4 = vadd.f32 %v3490_v36, %v3419_v45  ;;  %v2589_v27 = vrot.slane %v2413_v12, 4  ;;  %v2110_v5 = vadd.f32 %v2078_v49, %v16204_v53  ;;  %v2225_v52 = vsel %vm2160_vm8, %v2189_v63, %v2190_v30 }
 0x2c0   : > { %v3388_v7 = vmul.f32 %v3276_v31, %v11084_v48  ;;  %v3452_v29 = vmul.f32 %v3276_v31, %v11055_v40  ;;  %v2530_v51 = vsel %vm2464_vm14, %v2492_v38, %v2493_v23  ;;  %v2892_v46 = vadd.f32 %v2860_v11, %v2716_v10  ;;  %v8049_v40 = vld [vmem:[%s8772_s4 + $0x58] sm:$0xff] }
 0x2c1   : > { %v3714_v54 = vmul.f32 %v11283_v8, %v3522_v4  ;;  %v2626_v24 = vsel %vm2464_vm14, %v2588_v41, %v2589_v27  ;;  %v2749_v58 = vmul.f32 %v2530_v51, %v2445_v42  ;;  %v2286_v56 = vrot.slane %v2110_v5, 6  ;;  %v11436_v63 = vpop.f32.mrf.mxu2 }
 0x2c2   : > { %v3491_v36 = vmul.f32 %v10658_v37, %v3452_v29  ;;  %v2685_v53 = vmul.f32 %v2626_v24, %v2445_v42  ;;  %v2446_v48 = vmul.f32 %v2225_v52, %v16203_v26  ;;  %v3068_v38 = vadd.f32 %v3036_v61, %v2892_v46 }
 0x2c3   : > { %v11432_v62 = vadd.f32 %v8049_v40, %v3714_v54  ;;  %v2861_v22 = vmul.f32 %v2749_v58, %v2716_v10  ;;  %v11434_v45 = vmul.f32 %v2749_v58, %v2748_v16  ;;  %v2321_v41 = vsel %vm2160_vm8, %v2285_v34, %v2286_v56 }
 0x2c4   : > { %v2717_v8 = vadd.f32 %v2685_v53, %v2413_v12  ;;  %v2494_v11 = vrot.slane %v2446_v48, 4  ;;  %v2111_v42 = vadd.f32 %v11045_v21, %v16206_v9  ;;  %v3244_v6 = vadd.f32 %v3212_v60, %v3068_v38 }
 0x2c5   : > { %16205 = vst [vmem:[#allocation90_spill] sm:$0xff] %v11432_v62  ;;  %v3037_v55 = vmul.f32 %v11434_v45, %v2891_v14  ;;  %v3101_v49 = vmul.f32 %v11434_v45, %v11362_v0  ;;  %v2382_v61 = vmul.f32 %v2321_v41, %v16203_v26  ;;  %v16207_v12 = vrot.slane %v11077_v32, 6  ;;  %v16264_v62 = vld [vmem:[#allocation64_spill] sm:$0xff] }
 0x2c6   : > { %v2893_v16 = vadd.f32 %v2861_v22, %v2717_v8  ;;  %v2529_v31 = vsel %vm2464_vm14, %v2493_v23, %v2494_v11  ;;  %v2287_v4 = vrot.slane %v2111_v42, 6  ;;  %v3420_v10 = vadd.f32 %v3388_v7, %v3244_v6 }
 0x2c7   : > { %v2224_v34 = vsel %vm2160_vm8, %v2190_v30, %v16207_v12  ;;  %v3213_v21 = vmul.f32 %v3101_v49, %v11306_v15  ;;  %v3277_v14 = vmul.f32 %v3101_v49, %v11288_v35  ;;  %v2414_v60 = vadd.f32 %v2382_v61, %v2110_v5  ;;  %v16209_v61 = vld [vmem:[#allocation127_spill] sm:$0xff] }
 0x2c8   : > { %v3069_v29 = vadd.f32 %v3037_v55, %v2893_v16  ;;  %v2750_v0 = vmul.f32 %v2529_v31, %v2446_v48  ;;  %v2320_v26 = vsel %vm2160_vm8, %v2286_v56, %v2287_v4  ;;  %v11457_v51 = vmul.f32 %v2224_v34, %v11077_v32 }
 0x2c9   : > { %v3523_v23 = vadd.f32 %v3491_v36, %v3420_v10  ;;  %v3389_v52 = vmul.f32 %v3277_v14, %v11151_v39  ;;  %v3453_v30 = vmul.f32 %v3277_v14, %v11128_v57  ;;  %v2590_v7 = vrot.slane %v2414_v60, 4  ;;  %v11467_v40 = vpop.f32.mrf.mxu2  ;;  %v8051_v14 = vld [vmem:[%s8772_s4 + $0x68] sm:$0xff] }
 0x2ca   : > { %v3245_v54 = vadd.f32 %v3213_v21, %v3069_v29  ;;  %v2862_v15 = vmul.f32 %v2750_v0, %v2717_v8  ;;  %v2926_v24 = vmul.f32 %v2750_v0, %v2749_v58  ;;  %v2383_v35 = vmul.f32 %v2320_v26, %v11077_v32  ;;  %v8050_v8 = vld [vmem:[%s8772_s4 + $0x60] sm:$0xff] }
 0x2cb   : > { %v3715_v5 = vmul.f32 %v11325_v25, %v3523_v23  ;;  %v3492_v53 = vmul.f32 %v10658_v37, %v3453_v30  ;;  %v2625_v56 = vsel %vm2464_vm14, %v2589_v27, %v2590_v7  ;;  %v2495_v36 = vrot.slane %v11457_v51, 4 }
 0x2cc   : > { %v3421_v39 = vadd.f32 %v3389_v52, %v3245_v54  ;;  %v2686_v38 = vmul.f32 %v2625_v56, %v2446_v48  ;;  %v3038_v57 = vmul.f32 %v2926_v24, %v2892_v46  ;;  %v3102_v22 = vmul.f32 %v2926_v24, %v11395_v33  ;;  %v16213_v24 = vld [vmem:[#allocation42_spill] sm:$0xff] }
 0x2cd   : > { %v11471_v58 = vadd.f32 %v8050_v8, %v3715_v5  ;;  %v2415_v41 = vadd.f32 %v2383_v35, %v2111_v42  ;;  %v2528_v25 = vsel %vm2464_vm14, %v2494_v11, %v2495_v36  ;;  %v2144_v9 = vmul.f32 %v11074_v17, %v16119_v1 }
 0x2ce   : > { %v3524_v27 = vadd.f32 %v3492_v53, %v3421_v39  ;;  %v2718_v6 = vadd.f32 %v2686_v38, %v2414_v60  ;;  %v3214_v55 = vmul.f32 %v3102_v22, %v11349_v13  ;;  %v3278_v48 = vmul.f32 %v3102_v22, %v11337_v44 }
 0x2cf   : > { %16208 = vst [vmem:[#allocation104_spill] sm:$0xff] %v11471_v58  ;;  %v2591_v46 = vrot.slane %v2415_v41, 4  ;;  %v2751_v33 = vmul.f32 %v2528_v25, %v11457_v51  ;;  %v2192_v49 = vrot.slane %v2144_v9, 6  ;;  %v16210_v31 = vrot.slane %v16209_v61, 6 }
 0x2d0   : > { %v3716_v11 = vmul.f32 %v11364_v50, %v3524_v27  ;;  %v2894_v12 = vadd.f32 %v2862_v15, %v2718_v6  ;;  %v3390_v1 = vmul.f32 %v3278_v48, %v11211_v28  ;;  %v3454_v17 = vmul.f32 %v3278_v48, %v11174_v18 }
 0x2d1   : > { %v2319_v42 = vsel %vm2160_vm8, %v2287_v4, %v16210_v31  ;;  %v2624_v13 = vsel %vm2464_vm14, %v2590_v7, %v2591_v46  ;;  %v2863_v44 = vmul.f32 %v2751_v33, %v2718_v6  ;;  %v2927_v34 = vmul.f32 %v2751_v33, %v2750_v0  ;;  %v11503_v0 = vpop.f32.mrf.mxu2 }
 0x2d2   : > { %v16211_v10 = vrot.slane %v11077_v32, 6  ;;  %v11494_v60 = vadd.f32 %v8051_v14, %v3716_v11  ;;  %v3070_v4 = vadd.f32 %v3038_v57, %v2894_v12  ;;  %v3493_v50 = vmul.f32 %v10658_v37, %v3454_v17  ;;  %v16215_v57 = vld [vmem:[#allocation86_spill] sm:$0xff] }
 0x2d3   : > { %v2687_v28 = vmul.f32 %v2624_v13, %v11457_v51  ;;  %v3039_v29 = vmul.f32 %v2927_v34, %v2893_v16  ;;  %v3103_v18 = vmul.f32 %v2927_v34, %v11434_v45  ;;  %v2352_v32 = vsel %vm2160_vm8, 0.0, %v2319_v42  ;;  %v8052_v51 = vld [vmem:[#allocation2] sm:$0x3]  ;;  %v16218_v12 = vld [vmem:[#allocation38_spill] sm:$0xff] }
 0x2d4   : > { %v2223_v21 = vsel %vm2160_vm8, %v16211_v10, %v2192_v49  ;;  %16212 = vst [vmem:[#allocation94_spill] sm:$0xff] %v11494_v60  ;;  %v3246_v23 = vadd.f32 %v3214_v55, %v3070_v4  ;;  %v2384_v30 = vmul.f32 %v2352_v32, %v2144_v9  ;;  %v3474_v16 = vrot.slane %v8052_v51, 1 }
 0x2d5   : > { %v2256_v26 = vsel %vm2160_vm8, 1.0, %v2223_v21  ;;  %v2719_v52 = vadd.f32 %v2687_v28, %v2415_v41  ;;  %v3215_v54 = vmul.f32 %v3103_v18, %v11391_v20  ;;  %v3279_v15 = vmul.f32 %v3103_v18, %v11376_v59  ;;  %v16216_v59 = vld [vmem:[#allocation70_spill] sm:$0xff] }
 0x2d6   : > { %v2448_v7 = vmul.f32 %v2256_v26, %v2144_v9  ;;  %v16214_v45 = vrot.slane %v16213_v24, 6  ;;  %v3422_v5 = vadd.f32 %v3390_v1, %v3246_v23  ;;  %v2416_v56 = vadd.f32 %v2384_v30, %v16209_v61  ;;  %v16219_v1 = vld [vmem:[#allocation122_spill] sm:$0xff] }
 0x2d7   : > { %v2895_v53 = vadd.f32 %v2863_v44, %v2719_v52  ;;  %v3391_v38 = vmul.f32 %v3279_v15, %v11250_v43  ;;  %v3455_v22 = vmul.f32 %v3279_v15, %v16215_v57  ;;  %v11514_v8 = vperm.slane %v3474_v16, 0  ;;  %v16217_v43 = vld [vmem:[#allocation107_spill] sm:$0xff]  ;;  %v16226_v16 = vld [vmem:[#allocation49_spill] sm:$0xff] }
 0x2d8   : > { %v2222_v35 = vsel %vm2160_vm8, %v2192_v49, %v16214_v45  ;;  %v2496_v39 = vrot.slane %v2448_v7, 4  ;;  %v2385_v20 = vmul.f32 %v16216_v59, %v16213_v24  ;;  %v3525_v41 = vadd.f32 %v3493_v50, %v3422_v5  ;;  %v8053_v44 = vld [vmem:[%s8772_s4 + $0x70] sm:$0xff]  ;;  %v16221_v50 = vld [vmem:[#allocation46_spill] sm:$0xff] }
 0x2d9   : > { %v3071_v25 = vadd.f32 %v3039_v29, %v2895_v53  ;;  %v2592_v27 = vrot.slane %v2416_v56, 4  ;;  %v3494_v6 = vmul.f32 %v10658_v37, %v3455_v22  ;;  %v2449_v33 = vmul.f32 %v2222_v35, %v16213_v24  ;;  %v11537_v13 = vpop.f32.mrf.mxu2  ;;  %v16225_v15 = vld [vmem:[#allocation43_spill] sm:$0xff] }
 0x2da   : > { %v2527_v9 = vsel %vm2464_vm14, %v2495_v36, %v2496_v39  ;;  %v11524_v48 = vadd.f32 %v2385_v20, %v16217_v43  ;;  %v3717_v49 = vmul.f32 %v11405_v19, %v3525_v41  ;;  %v2114_v17 = vadd.f32 %v16219_v1, %v16218_v12  ;;  %v16230_v20 = vld [vmem:[#allocation39_spill] sm:$0xff] }
 0x2db   : > { %v2560_v55 = vsel %vm2464_vm14, 1.0, %v2527_v9  ;;  %v3247_v61 = vadd.f32 %v3215_v54, %v3071_v25  ;;  %v2623_v31 = vsel %vm2464_vm14, %v2591_v46, %v2592_v27  ;;  %v2497_v37 = vrot.slane %v2449_v33, 4  ;;  %v16224_v54 = vld [vmem:[#allocation47_spill] sm:$0xff]  ;;  %v8054_v25 = vld [vmem:[%s8772_s4 + $0x78] sm:$0xff] }
 0x2dc   : > { %v11530_v42 = vmul.f32 %v2560_v55, %v2448_v7  ;;  %v2656_v36 = vsel %vm2464_vm14, 0.0, %v2623_v31  ;;  %v2593_v11 = vrot.slane %v11524_v48, 4  ;;  %v11540_v34 = vadd.f32 %v8053_v44, %v3717_v49 }
 0x2dd   : > { %v3423_v19 = vadd.f32 %v3391_v38, %v3247_v61  ;;  %v2688_v10 = vmul.f32 %v2656_v36, %v2448_v7  ;;  %v2526_v14 = vsel %vm2464_vm14, %v2496_v39, %v2497_v37  ;;  %v16222_v28 = vrot.slane %v16221_v50, 6 }
 0x2de   : > { %16220 = vst [vmem:[#allocation125_spill] sm:$0xff] %v11540_v34  ;;  %v2864_v46 = vmul.f32 0.0, %v11530_v42  ;;  %v3495_v21 = vmul.f32 %v11514_v8, %v11530_v42  ;;  %v2622_v4 = vsel %vm2464_vm14, %v2592_v27, %v2593_v11  ;;  %v16223_v29 = vmov %v16214_v45 }
 0x2df   : > { %v2221_v18 = vsel %vm2160_vm8, %v16223_v29, %v16222_v28  ;;  %v11555_v26 = vadd.f32 %v3494_v6, %v3423_v19  ;;  %v2720_v32 = vadd.f32 %v2688_v10, %v2416_v56  ;;  %v2689_v23 = vmul.f32 %v2622_v4, %v2449_v33  ;;  %v16232_v19 = vld [vmem:[#allocation50_spill] sm:$0xff]  ;;  %v16233_v10 = vld [vmem:[#allocation44_spill] sm:$0xff]  ;;  %v16234_v4 = vld [vmem:[#allocation51_spill] sm:$0xff] }
 0x2e0   : > { %v2753_v52 = vmul.f32 %v2526_v14, %v2449_v33  ;;  %v2290_v30 = vrot.slane %v2114_v17, 6  ;;  %v2450_v7 = vmul.f32 %v2221_v18, %v16221_v50  ;;  %v2083_v51 = vmul.f32 %v16225_v15, %v16224_v54  ;;  %v16237_v15 = vld [vmem:[#allocation41_spill] sm:$0xff] }
 0x2e1   : > { %v16227_v45 = vrot.slane %v16226_v16, 6  ;;  %v16228_v35 = vmov %v16222_v28  ;;  %3548 = vst [vmem:[#allocation2 - $0x7] sm:$0x80] %v11555_v26  ;;  %v3718_v5 = vmul.f32 %v11436_v63, %v11555_v26  ;;  %v2896_v53 = vadd.f32 %v2864_v46, %v2720_v32  ;;  %v11589_v49 = vpop.f32.mrf.mxu2 }
 0x2e2   : > { %v2721_v56 = vadd.f32 %v2689_v23, %v11524_v48  ;;  %v2865_v39 = vmul.f32 %v2753_v52, %v2720_v32  ;;  %v11571_v38 = vmul.f32 %v2753_v52, %v11530_v42  ;;  %v16229_v57 = vrot.slane %v16217_v43, 6 }
 0x2e3   : > { %v2220_v24 = vsel %vm2160_vm8, %v16228_v35, %v16227_v45  ;;  %v2498_v59 = vrot.slane %v2450_v7, 4  ;;  %v2115_v41 = vadd.f32 %v2083_v51, %v16230_v20  ;;  %v11579_v9 = vadd.f32 %v8054_v25, %v3718_v5 }
 0x2e4   : > { %v2317_v22 = vsel %vm2160_vm8, %v16229_v57, %v2290_v30  ;;  %v11581_v27 = vadd.f32 %v2896_v53, %v2864_v46  ;;  %v2897_v63 = vadd.f32 %v2865_v39, %v2721_v56  ;;  %v3041_v55 = vmul.f32 0.0, %v11571_v38 }
 0x2e5   : > { %16231 = vst [vmem:[#allocation111_spill] sm:$0xff] %v11579_v9  ;;  %v2386_v6 = vmul.f32 %v2317_v22, %v16221_v50  ;;  %v3496_v48 = vmul.f32 %v11514_v8, %v11571_v38  ;;  %v2525_v43 = vsel %vm2464_vm14, %v2497_v37, %v2498_v59  ;;  %v2291_v33 = vrot.slane %v2115_v41, 6 }
 0x2e6   : > { %v11592_v61 = vadd.f32 %v11581_v27, %v2864_v46  ;;  %v2754_v36 = vmul.f32 %v2525_v43, %v2450_v7  ;;  %v2451_v12 = vmul.f32 %v2220_v24, %v16226_v16  ;;  %v11595_v1 = vadd.f32 %v3041_v55, %v2897_v63  ;;  %v16240_v43 = vld [vmem:[#allocation56_spill] sm:$0xff] }
 0x2e7   : > { %v2418_v31 = vadd.f32 %v2386_v6, %v2114_v17  ;;  %v2316_v44 = vsel %vm2160_vm8, %v2290_v30, %v2291_v33  ;;  %v2084_v14 = vmul.f32 %v16233_v10, %v16232_v19  ;;  %v16235_v37 = vrot.slane %v16234_v4, 6 }
 0x2e8   : > { %v16236_v50 = vmov %v16227_v45  ;;  %v3424_v17 = vadd.f32 %v11592_v61, %v2864_v46  ;;  %v2866_v18 = vmul.f32 %v2754_v36, %v2721_v56  ;;  %v11608_v32 = vmul.f32 %v2754_v36, %v2753_v52 }
 0x2e9   : > { %v2219_v28 = vsel %vm2160_vm8, %v16236_v50, %v16235_v37  ;;  %v2594_v29 = vrot.slane %v2418_v31, 4  ;;  %v11611_v23 = vadd.f32 %v11595_v1, %v3041_v55  ;;  %v2387_v30 = vmul.f32 %v2316_v44, %v16226_v16  ;;  %v11629_v6 = vpop.f32.mrf.mxu2 }
 0x2ea   : > { %v2499_v54 = vrot.slane %v2451_v12, 4  ;;  %v2116_v51 = vadd.f32 %v2084_v14, %v16237_v15  ;;  %v3527_v45 = vadd.f32 %v3495_v21, %v3424_v17  ;;  %v3042_v24 = vmul.f32 %v11608_v32, %v2896_v53  ;;  %v16242_v15 = vld [vmem:[#allocation45_spill] sm:$0xff] }
 0x2eb   : > { %v2621_v35 = vsel %vm2464_vm14, %v2593_v11, %v2594_v29  ;;  %v11620_v46 = vmul.f32 %v11608_v32, %v11530_v42  ;;  %v3425_v52 = vadd.f32 %v11611_v23, %v3041_v55  ;;  %v2419_v56 = vadd.f32 %v2387_v30, %v2115_v41 }
 0x2ec   : > { %v2690_v5 = vmul.f32 %v2621_v35, %v2450_v7  ;;  %v2524_v16 = vsel %vm2464_vm14, %v2498_v59, %v2499_v54  ;;  %v3719_v39 = vmul.f32 %v11467_v40, %v3527_v45  ;;  %v2292_v25 = vrot.slane %v2116_v51, 6  ;;  %v8055_v7 = vld [vmem:[%s8772_s4 + $0x80] sm:$0xff]  ;;  %v16239_v59 = vld [vmem:[#allocation54_spill] sm:$0xff] }
 0x2ed   : > { %v3218_v21 = vmul.f32 0.0, %v11620_v46  ;;  %v3497_v11 = vmul.f32 %v11514_v8, %v11620_v46  ;;  %v2755_v57 = vmul.f32 %v2524_v16, %v2451_v12  ;;  %v3528_v53 = vadd.f32 %v3496_v48, %v3425_v52 }
 0x2ee   : > { %v2722_v22 = vadd.f32 %v2690_v5, %v2418_v31  ;;  %v2595_v20 = vrot.slane %v2419_v56, 4  ;;  %v11632_v41 = vadd.f32 %v8055_v7, %v3719_v39  ;;  %v2452_v40 = vmul.f32 %v2219_v28, %v16234_v4  ;;  %v8056_v28 = vld [vmem:[%s8772_s4 + $0x88] sm:$0xff] }
 0x2ef   : > { %v11634_v55 = vmul.f32 %v2755_v57, %v2754_v36  ;;  %v2085_v44 = vmul.f32 %v16240_v43, %v16239_v59  ;;  %v3720_v19 = vmul.f32 %v11503_v0, %v3528_v53  ;;  %v2315_v36 = vsel %vm2160_vm8, %v2291_v33, %v2292_v25 }
 0x2f0   : > { %16238 = vst [vmem:[#allocation109_spill] sm:$0xff] %v11632_v41  ;;  %v2898_v10 = vadd.f32 %v2866_v18, %v2722_v22  ;;  %v2620_v48 = vsel %vm2464_vm14, %v2594_v29, %v2595_v20  ;;  %v2867_v31 = vmul.f32 %v2755_v57, %v2722_v22  ;;  %v2388_v0 = vmul.f32 %v2315_v36, %v16234_v4  ;;  %v16245_v22 = vld [vmem:[#allocation57_spill] sm:$0xff] }
 0x2f1   : > { %v2691_v14 = vmul.f32 %v2620_v48, %v2451_v12  ;;  %v3043_v37 = vmul.f32 %v11634_v55, %v2897_v63  ;;  %v11645_v50 = vmul.f32 %v11634_v55, %v11571_v38  ;;  %v11650_v17 = vadd.f32 %v8056_v28, %v3720_v19  ;;  %v16247_v48 = vld [vmem:[#allocation65_spill] sm:$0xff] }
 0x2f2   : > { %v11652_v30 = vadd.f32 %v3042_v24, %v2898_v10  ;;  %v2500_v18 = vrot.slane %v2452_v40, 4  ;;  %v2117_v45 = vadd.f32 %v2085_v44, %v16242_v15  ;;  %v2420_v33 = vadd.f32 %v2388_v0, %v2116_v51  ;;  %v16243_v24 = vld [vmem:[#allocation55_spill] sm:$0xff]  ;;  %v11672_v51 = vpop.f32.mrf.mxu2  ;;  %v16258_v41 = vld [vmem:[#allocation81_spill] sm:$0xff] }
 0x2f3   : > { %16241 = vst [vmem:[#allocation105_spill] sm:$0xff] %v11650_v17  ;;  %v2723_v29 = vadd.f32 %v2691_v14, %v2419_v56  ;;  %v3219_v12 = vmul.f32 0.0, %v11645_v50  ;;  %v3498_v63 = vmul.f32 %v11514_v8, %v11645_v50  ;;  %v2197_v5 = vrot.slane %v16243_v24, 6  ;;  %v16244_v56 = vld [vmem:[#allocation61_spill] sm:$0xff] }
 0x2f4   : > { %v11660_v35 = vadd.f32 %v3218_v21, %v11652_v30  ;;  %v2523_v52 = vsel %vm2464_vm14, %v2499_v54, %v2500_v18  ;;  %v2293_v53 = vrot.slane %v2117_v45, 6  ;;  %v2086_v7 = vmul.f32 %v16245_v22, %v16244_v56  ;;  %v16248_v22 = vld [vmem:[#allocation48_spill] sm:$0xff] }
 0x2f5   : > { %v2899_v16 = vadd.f32 %v2867_v31, %v2723_v29  ;;  %v2756_v39 = vmul.f32 %v2523_v52, %v2452_v40  ;;  %v2596_v43 = vrot.slane %v2420_v33, 4  ;;  %v16246_v44 = vrot.slane %v16234_v4, 6 }
 0x2f6   : > { %v3426_v59 = vadd.f32 %v11660_v35, %v3218_v21  ;;  %v15688_v54 = vrot.slane %v16247_v48, 6  ;;  %v2314_v28 = vsel %vm2160_vm8, %v2292_v25, %v2293_v53 }
 0x2f7   : > { %v2218_v19 = vsel %vm2160_vm8, %v16246_v44, %v2197_v5  ;;  %v11675_v14 = vadd.f32 %v3043_v37, %v2899_v16  ;;  %v2868_v31 = vmul.f32 %v2756_v39, %v2723_v29  ;;  %v11677_v36 = vmul.f32 %v2756_v39, %v2755_v57 }
 0x2f8   : > { %v3529_v0 = vadd.f32 %v3497_v11, %v3426_v59  ;;  %v2619_v4 = vsel %vm2464_vm14, %v2595_v20, %v2596_v43  ;;  %v2389_v21 = vmul.f32 %v2314_v28, %v16243_v24  ;;  %v2453_v15 = vmul.f32 %v2218_v19, %v16243_v24 }
 0x2f9   : > { %v11686_v52 = vadd.f32 %v3219_v12, %v11675_v14  ;;  %v2692_v37 = vmul.f32 %v2619_v4, %v2452_v40  ;;  %v3044_v29 = vmul.f32 %v11677_v36, %v2898_v10  ;;  %v11691_v57 = vmul.f32 %v11677_v36, %v11608_v32  ;;  %v8057_v10 = vld [vmem:[%s8772_s4 + $0x90] sm:$0xff] }
 0x2fa   : > { %v3721_v11 = vmul.f32 %v11537_v13, %v3529_v0  ;;  %v2421_v25 = vadd.f32 %v2389_v21, %v2117_v45  ;;  %v2501_v56 = vrot.slane %v2453_v15, 4  ;;  %v2118_v20 = vadd.f32 %v2086_v7, %v16248_v22  ;;  %v11719_v21 = vpop.f32.mrf.mxu2 }
 0x2fb   : > { %v3427_v59 = vadd.f32 %v11686_v52, %v3219_v12  ;;  %v2724_v44 = vadd.f32 %v2692_v37, %v2420_v33  ;;  %v3220_v24 = vmul.f32 %v11691_v57, %v11581_v27  ;;  %v11700_v40 = vmul.f32 %v11691_v57, %v11530_v42  ;;  %v16250_v37 = vld [vmem:[#allocation69_spill] sm:$0xff] }
 0x2fc   : > { %v11703_v19 = vadd.f32 %v8057_v10, %v3721_v11  ;;  %v2522_v13 = vsel %vm2464_vm14, %v2500_v18, %v2501_v56  ;;  %v2597_v32 = vrot.slane %v2421_v25, 4  ;;  %v2217_v12 = vsel %vm2160_vm8, %v2197_v5, %v15688_v54  ;;  %v16251_v11 = vld [vmem:[#allocation62_spill] sm:$0xff] }
 0x2fd   : > { %v3530_v45 = vadd.f32 %v3498_v63, %v3427_v59  ;;  %v2900_v33 = vadd.f32 %v2868_v31, %v2724_v44  ;;  %v3396_v27 = vmul.f32 0.0, %v11700_v40  ;;  %v3499_v7 = vmul.f32 %v11514_v8, %v11700_v40 }
 0x2fe   : > { %16249 = vst [vmem:[#allocation98_spill] sm:$0xff] %v11703_v19  ;;  %v2618_v28 = vsel %vm2464_vm14, %v2596_v43, %v2597_v32  ;;  %v2757_v0 = vmul.f32 %v2522_v13, %v2453_v15  ;;  %v2294_v4 = vrot.slane %v2118_v20, 6  ;;  %v11717_v18 = vmul.f32 %v2217_v12, %v16247_v48  ;;  %v8058_v12 = vld [vmem:[%s8772_s4 + $0x98] sm:$0xff] }
 0x2ff   : > { %v3722_v5 = vmul.f32 %v11589_v49, %v3530_v45  ;;  %v11722_v63 = vadd.f32 %v3044_v29, %v2900_v33  ;;  %v2693_v31 = vmul.f32 %v2618_v28, %v2453_v15  ;;  %v2087_v22 = vmul.f32 %v16251_v11, %v16250_v37 }
 0x300   : > { %v2869_v59 = vmul.f32 %v2757_v0, %v2724_v44  ;;  %v11726_v10 = vmul.f32 %v2757_v0, %v2756_v39  ;;  %v2313_v43 = vsel %vm2160_vm8, %v2293_v53, %v2294_v4  ;;  %v2502_v13 = vrot.slane %v11717_v18, 4  ;;  %v16253_v44 = vld [vmem:[#allocation53_spill] sm:$0xff] }
 0x301   : > { %v11732_v54 = vadd.f32 %v8058_v12, %v3722_v5  ;;  %v11735_v19 = vadd.f32 %v3220_v24, %v11722_v63  ;;  %v2725_v49 = vadd.f32 %v2693_v31, %v2421_v25  ;;  %v2390_v15 = vmul.f32 %v2313_v43, %v16247_v48 }
 0x302   : > { %v3045_v29 = vmul.f32 %v11726_v10, %v2899_v16  ;;  %v11741_v39 = vmul.f32 %v11726_v10, %v11634_v55  ;;  %v2521_v53 = vsel %vm2464_vm14, %v2501_v56, %v2502_v13  ;;  %v2119_v45 = vadd.f32 %v2087_v22, %v16253_v44  ;;  %v16254_v55 = vld [vmem:[#allocation71_spill] sm:$0xff] }
 0x303   : > { %16252 = vst [vmem:[#allocation116_spill] sm:$0xff] %v11732_v54  ;;  %v3428_v28 = vadd.f32 %v3396_v27, %v11735_v19  ;;  %v11747_v5 = vadd.f32 %v2869_v59, %v2725_v49  ;;  %v2422_v24 = vadd.f32 %v2390_v15, %v2118_v20  ;;  %v2758_v25 = vmul.f32 %v2521_v53, %v11717_v18  ;;  %v11769_v53 = vpop.f32.mrf.mxu2  ;;  %v16257_v54 = vld [vmem:[#allocation72_spill] sm:$0xff] }
 0x304   : > { %v3221_v31 = vmul.f32 %v11741_v39, %v11595_v1  ;;  %v11754_v16 = vmul.f32 %v11741_v39, %v11571_v38  ;;  %v2199_v37 = vrot.slane %v16254_v55, 6  ;;  %v2295_v11 = vrot.slane %v2119_v45, 6 }
 0x305   : > { %v3531_v56 = vadd.f32 %v3499_v7, %v3428_v28  ;;  %v11758_v22 = vadd.f32 %v3045_v29, %v11747_v5  ;;  %v2598_v27 = vrot.slane %v2422_v24, 4  ;;  %v2870_v59 = vmul.f32 %v2758_v25, %v2725_v49 }
 0x306   : > { %v3397_v20 = vmul.f32 0.0, %v11754_v16  ;;  %v3500_v43 = vmul.f32 %v11514_v8, %v11754_v16  ;;  %v11763_v1 = vmul.f32 %v2758_v25, %v2757_v0  ;;  %v16255_v12 = vrot.slane %v16247_v48, 6 }
 0x307   : > { %v3723_v7 = vmul.f32 %v11629_v6, %v3531_v56  ;;  %v11773_v29 = vadd.f32 %v3221_v31, %v11758_v22  ;;  %v2617_v49 = vsel %vm2464_vm14, %v2597_v32, %v2598_v27  ;;  %v2312_v44 = vsel %vm2160_vm8, %v2294_v4, %v2295_v11  ;;  %v8059_v6 = vld [vmem:[%s8772_s4 + $0xa0] sm:$0xff] }
 0x308   : > { %v2216_v15 = vsel %vm2160_vm8, %v16255_v12, %v2199_v37  ;;  %v2694_v0 = vmul.f32 %v2617_v49, %v11717_v18  ;;  %v3046_v48 = vmul.f32 %v11763_v1, %v2900_v33  ;;  %v11783_v28 = vmul.f32 %v11763_v1, %v11677_v36 }
 0x309   : > { %v2391_v12 = vmul.f32 %v2312_v44, %v16254_v55  ;;  %v11787_v56 = vadd.f32 %v8059_v6, %v3723_v7  ;;  %v3429_v31 = vadd.f32 %v3397_v20, %v11773_v29  ;;  %v2455_v32 = vmul.f32 %v2216_v15, %v16254_v55  ;;  %v16259_v7 = vld [vmem:[#allocation60_spill] sm:$0xff]  ;;  %v16260_v20 = vld [vmem:[#allocation74_spill] sm:$0xff] }
 0x30a   : > { %v2088_v4 = vmul.f32 %v16258_v41, %v16257_v54  ;;  %v2726_v17 = vadd.f32 %v2694_v0, %v2422_v24  ;;  %v3222_v33 = vmul.f32 %v11783_v28, %v11652_v30  ;;  %v11797_v36 = vmul.f32 %v11783_v28, %v11620_v46 }
 0x30b   : > { %16256 = vst [vmem:[#allocation40_spill] sm:$0xff] %v11787_v56  ;;  %v2423_v18 = vadd.f32 %v2391_v12, %v2119_v45  ;;  %v3532_v49 = vadd.f32 %v3500_v43, %v3429_v31  ;;  %v2503_v44 = vrot.slane %v2455_v32, 4  ;;  %v2200_v56 = vrot.slane %v16260_v20, 6 }
 0x30c   : > { %v2120_v6 = vadd.f32 %v2088_v4, %v16259_v7  ;;  %v2902_v55 = vadd.f32 %v2870_v59, %v2726_v17  ;;  %v3398_v15 = vmul.f32 0.0, %v11797_v36  ;;  %v3501_v41 = vmul.f32 %v11514_v8, %v11797_v36  ;;  %v11814_v4 = vpop.f32.mrf.mxu2  ;;  %v8060_v7 = vld [vmem:[%s8772_s4 + $0xa8] sm:$0xff] }
 0x30d   : > { %v2599_v54 = vrot.slane %v2423_v18, 4  ;;  %v3724_v30 = vmul.f32 %v11672_v51, %v3532_v49  ;;  %v2520_v24 = vsel %vm2464_vm14, %v2502_v13, %v2503_v44  ;;  %v2215_v45 = vsel %vm2160_vm8, %v2199_v37, %v2200_v56  ;;  %v16262_v49 = vld [vmem:[#allocation78_spill] sm:$0xff]  ;;  %v16263_v37 = vld [vmem:[#allocation84_spill] sm:$0xff] }
 0x30e   : > { %v2296_v43 = vrot.slane %v2120_v6, 6  ;;  %v11809_v0 = vadd.f32 %v3046_v48, %v2902_v55  ;;  %v2759_v12 = vmul.f32 %v2520_v24, %v2455_v32  ;;  %v2456_v31 = vmul.f32 %v2215_v45, %v16260_v20 }
 0x30f   : > { %v2616_v59 = vsel %vm2464_vm14, %v2598_v27, %v2599_v54  ;;  %v11817_v9 = vadd.f32 %v8060_v7, %v3724_v30  ;;  %v2089_v34 = vmul.f32 %v16263_v37, %v16262_v49  ;;  %v16265_v7 = vld [vmem:[#allocation79_spill] sm:$0xff] }
 0x310   : > { %v2695_v51 = vmul.f32 %v2616_v59, %v2455_v32  ;;  %v2311_v13 = vsel %vm2160_vm8, %v2295_v11, %v2296_v43  ;;  %v11824_v48 = vadd.f32 %v3222_v33, %v11809_v0  ;;  %v2871_v58 = vmul.f32 %v2759_v12, %v2726_v17 }
 0x311   : > { %16261 = vst [vmem:[#allocation114_spill] sm:$0xff] %v11817_v9  ;;  %v11826_v27 = vmul.f32 %v2759_v12, %v2758_v25  ;;  %v2392_v24 = vmul.f32 %v2311_v13, %v16260_v20  ;;  %v2504_v60 = vrot.slane %v2456_v31, 4  ;;  %v2121_v30 = vadd.f32 %v2089_v34, %v16264_v62  ;;  %v16268_v9 = vld [vmem:[#allocation87_spill] sm:$0xff] }
 0x312   : > { %v2727_v45 = vadd.f32 %v2695_v51, %v2423_v18  ;;  %v2201_v32 = vrot.slane %v16265_v7, 6  ;;  %v3430_v59 = vadd.f32 %v3398_v15, %v11824_v48 }
 0x313   : > { %v3047_v11 = vmul.f32 %v11826_v27, %v11747_v5  ;;  %v11836_v33 = vmul.f32 %v11826_v27, %v11726_v10  ;;  %v2424_v17 = vadd.f32 %v2392_v24, %v2120_v6  ;;  %v2519_v20 = vsel %vm2464_vm14, %v2503_v44, %v2504_v60 }
 0x314   : > { %v2903_v25 = vadd.f32 %v2871_v58, %v2727_v45  ;;  %v2214_v18 = vsel %vm2160_vm8, %v2200_v56, %v2201_v32  ;;  %v2297_v62 = vrot.slane %v2121_v30, 6  ;;  %v3533_v34 = vadd.f32 %v3501_v41, %v3430_v59 }
 0x315   : > { %v3223_v15 = vmul.f32 %v11836_v33, %v11675_v14  ;;  %v11846_v5 = vmul.f32 %v11836_v33, %v11645_v50  ;;  %v2600_v10 = vrot.slane %v2424_v17, 4  ;;  %v2760_v58 = vmul.f32 %v2519_v20, %v2456_v31 }
 0x316   : > { %v11848_v51 = vadd.f32 %v3047_v11, %v2903_v25  ;;  %v2310_v44 = vsel %vm2160_vm8, %v2296_v43, %v2297_v62  ;;  %v11853_v6 = vmul.f32 %v2214_v18, %v16265_v7  ;;  %v3725_v56 = vmul.f32 %v11719_v21, %v3533_v34  ;;  %v11866_v43 = vpop.f32.mrf.mxu2  ;;  %v8061_v11 = vld [vmem:[%s8772_s4 + $0xb0] sm:$0xff]  ;;  %v16267_v34 = vld [vmem:[#allocation92_spill] sm:$0xff] }
 0x317   : > { %v3399_v41 = vmul.f32 0.0, %v11846_v5  ;;  %v3502_v14 = vmul.f32 %v11514_v8, %v11846_v5  ;;  %v2615_v13 = vsel %vm2464_vm14, %v2599_v54, %v2600_v10  ;;  %v2872_v24 = vmul.f32 %v2760_v58, %v2727_v45 }
 0x318   : > { %v11862_v49 = vadd.f32 %v3223_v15, %v11848_v51  ;;  %v2696_v37 = vmul.f32 %v2615_v13, %v2456_v31  ;;  %v11864_v59 = vmul.f32 %v2760_v58, %v2759_v12  ;;  %v11869_v20 = vadd.f32 %v8061_v11, %v3725_v56  ;;  %v16269_v13 = vld [vmem:[#allocation68_spill] sm:$0xff] }
 0x319   : > { %v2393_v21 = vmul.f32 %v2310_v44, %v16265_v7  ;;  %v2505_v18 = vrot.slane %v11853_v6, 4  ;;  %v2090_v3 = vmul.f32 %v16268_v9, %v16267_v34  ;;  %v16270_v44 = vld [vmem:[#allocation93_spill] sm:$0xff] }
 0x31a   : > { %16266 = vst [vmem:[#allocation108_spill] sm:$0xff] %v11869_v20  ;;  %v3431_v54 = vadd.f32 %v3399_v41, %v11862_v49  ;;  %v2728_v15 = vadd.f32 %v2696_v37, %v2424_v17  ;;  %v3048_v31 = vmul.f32 %v11864_v59, %v2902_v55  ;;  %v11879_v12 = vmul.f32 %v11864_v59, %v11763_v1 }
 0x31b   : > { %v2425_v45 = vadd.f32 %v2393_v21, %v2121_v30  ;;  %v2518_v56 = vsel %vm2464_vm14, %v2504_v60, %v2505_v18  ;;  %v2122_v7 = vadd.f32 %v2090_v3, %v16269_v13  ;;  %v2202_v11 = vrot.slane %v16270_v44, 6  ;;  %v16272_v13 = vld [vmem:[#allocation95_spill] sm:$0xff] }
 0x31c   : > { %v3534_v20 = vadd.f32 %v3502_v14, %v3431_v54  ;;  %v2904_v9 = vadd.f32 %v2872_v24, %v2728_v15  ;;  %v3224_v17 = vmul.f32 %v11879_v12, %v11722_v63  ;;  %v3288_v55 = vmul.f32 %v11879_v12, %v11691_v57  ;;  %v8062_v54 = vld [vmem:[%s8772_s4 + $0xb8] sm:$0xff] }
 0x31d   : > { %v2601_v41 = vrot.slane %v2425_v45, 4  ;;  %v2761_v1 = vmul.f32 %v2518_v56, %v11853_v6  ;;  %v2213_v30 = vsel %vm2160_vm8, %v2201_v32, %v2202_v11  ;;  %v2298_v60 = vrot.slane %v2122_v7, 6 }
 0x31e   : > { %v3726_v3 = vmul.f32 %v11769_v53, %v3534_v20  ;;  %v11893_v37 = vadd.f32 %v3048_v31, %v2904_v9  ;;  %v3400_v14 = vmul.f32 %v3288_v55, %v11592_v61  ;;  %v3464_v24 = vmul.f32 %v3288_v55, %v11530_v42  ;;  %v11916_v56 = vpop.f32.mrf.mxu2 }
 0x31f   : > { %v2614_v63 = vsel %vm2464_vm14, %v2600_v10, %v2601_v41  ;;  %v2873_v21 = vmul.f32 %v2761_v1, %v2728_v15  ;;  %v11899_v57 = vmul.f32 %v2761_v1, %v2760_v58  ;;  %v2309_v34 = vsel %vm2160_vm8, %v2297_v62, %v2298_v60 }
 0x320   : > { %v11904_v32 = vadd.f32 %v8062_v54, %v3726_v3  ;;  %v3256_v53 = vadd.f32 %v3224_v17, %v11893_v37  ;;  %v3503_v20 = vmul.f32 %v11514_v8, %v3464_v24  ;;  %v2697_v61 = vmul.f32 %v2614_v63, %v11853_v6  ;;  %v16273_v17 = vld [vmem:[#allocation89_spill] sm:$0xff]  ;;  %v16274_v3 = vld [vmem:[#allocation96_spill] sm:$0xff] }
 0x321   : > { %v3049_v42 = vmul.f32 %v11899_v57, %v2903_v25  ;;  %v11912_v10 = vmul.f32 %v11899_v57, %v11826_v27  ;;  %v2394_v58 = vmul.f32 %v2309_v34, %v16270_v44  ;;  %v2458_v15 = vmul.f32 %v2213_v30, %v16270_v44  ;;  %v16275_v30 = vld [vmem:[#allocation76_spill] sm:$0xff] }
 0x322   : > { %16271 = vst [vmem:[#allocation117_spill] sm:$0xff] %v11904_v32  ;;  %v3432_v62 = vadd.f32 %v3400_v14, %v3256_v53  ;;  %v2729_v31 = vadd.f32 %v2697_v61, %v2425_v45  ;;  %v2091_v55 = vmul.f32 %v16273_v17, %v16272_v13  ;;  %v2203_v24 = vrot.slane %v16274_v3, 6  ;;  %v16277_v13 = vld [vmem:[#allocation101_spill] sm:$0xff] }
 0x323   : > { %v3225_v25 = vmul.f32 %v11912_v10, %v11758_v22  ;;  %v3289_v27 = vmul.f32 %v11912_v10, %v11741_v39  ;;  %v2426_v6 = vadd.f32 %v2394_v58, %v2122_v7  ;;  %v2506_v63 = vrot.slane %v2458_v15, 4  ;;  %v8063_v17 = vld [vmem:[%s8772_s4 + $0xc0] sm:$0xff] }
 0x324   : > { %v3535_v34 = vadd.f32 %v3503_v20, %v3432_v62  ;;  %v2905_v44 = vadd.f32 %v2873_v21, %v2729_v31  ;;  %v2123_v45 = vadd.f32 %v2091_v55, %v16275_v30  ;;  %v2212_v14 = vsel %vm2160_vm8, %v2202_v11, %v2203_v24 }
 0x325   : > { %v3401_v54 = vmul.f32 %v3289_v27, %v11611_v23  ;;  %v3465_v53 = vmul.f32 %v3289_v27, %v11571_v38  ;;  %v2517_v22 = vsel %vm2464_vm14, %v2505_v18, %v2506_v63  ;;  %v2602_v61 = vrot.slane %v2426_v6, 4  ;;  %v16276_v23 = vld [vmem:[#allocation97_spill] sm:$0xff] }
 0x326   : > { %v3727_v39 = vmul.f32 %v11814_v4, %v3535_v34  ;;  %v11933_v7 = vadd.f32 %v3049_v42, %v2905_v44  ;;  %v2762_v20 = vmul.f32 %v2517_v22, %v2458_v15  ;;  %v2299_v58 = vrot.slane %v2123_v45, 6 }
 0x327   : > { %v3504_v21 = vmul.f32 %v11514_v8, %v3465_v53  ;;  %v2613_v62 = vsel %vm2464_vm14, %v2601_v41, %v2602_v61  ;;  %v2459_v11 = vmul.f32 %v2212_v14, %v16274_v3  ;;  %v2092_v38 = vmul.f32 %v16277_v13, %v16276_v23  ;;  %v16279_v53 = vld [vmem:[#allocation82_spill] sm:$0xff]  ;;  %v16280_v13 = vld [vmem:[#allocation99_spill] sm:$0xff] }
 0x328   : > { %v11942_v55 = vadd.f32 %v8063_v17, %v3727_v39  ;;  %v3257_v18 = vadd.f32 %v3225_v25, %v11933_v7  ;;  %v2698_v4 = vmul.f32 %v2613_v62, %v2458_v15  ;;  %v2874_v42 = vmul.f32 %v2762_v20, %v2729_v31  ;;  %v11962_v62 = vpop.f32.mrf.mxu2 }
 0x329   : > { %v11945_v27 = vmul.f32 %v2762_v20, %v2761_v1  ;;  %v2308_v34 = vsel %vm2160_vm8, %v2298_v60, %v2299_v58  ;;  %v2507_v30 = vrot.slane %v2459_v11, 4  ;;  %v11950_v41 = vadd.f32 %v2092_v38, %v16279_v53 }
 0x32a   : > { %16278 = vst [vmem:[#allocation103_spill] sm:$0xff] %v11942_v55  ;;  %v3433_v14 = vadd.f32 %v3401_v54, %v3257_v18  ;;  %v2730_v22 = vadd.f32 %v2698_v4, %v2426_v6  ;;  %v2395_v23 = vmul.f32 %v2308_v34, %v16274_v3  ;;  %v2204_v39 = vrot.slane %v16280_v13, 6  ;;  %v8064_v34 = vld [vmem:[%s8772_s4 + $0xc8] sm:$0xff] }
 0x32b   : > { %v3050_v17 = vmul.f32 %v11945_v27, %v2904_v9  ;;  %v11957_v15 = vmul.f32 %v11945_v27, %v11864_v59  ;;  %v2516_v1 = vsel %vm2464_vm14, %v2506_v63, %v2507_v30  ;;  %v2300_v60 = vrot.slane %v11950_v41, 6 }
 0x32c   : > { %v3536_v31 = vadd.f32 %v3504_v21, %v3433_v14  ;;  %v2906_v25 = vadd.f32 %v2874_v42, %v2730_v22  ;;  %v2427_v54 = vadd.f32 %v2395_v23, %v2123_v45  ;;  %v2763_v6 = vmul.f32 %v2516_v1, %v2459_v11  ;;  %v16282_v1 = vld [vmem:[#allocation100_spill] sm:$0xff] }
 0x32d   : > { %v3226_v3 = vmul.f32 %v11957_v15, %v11809_v0  ;;  %v3290_v9 = vmul.f32 %v11957_v15, %v11783_v28  ;;  %v2211_v59 = vsel %vm2160_vm8, %v2203_v24, %v2204_v39  ;;  %v2307_v63 = vsel %vm2160_vm8, %v2299_v58, %v2300_v60 }
 0x32e   : > { %v3728_v21 = vmul.f32 %v11866_v43, %v3536_v31  ;;  %v11973_v38 = vadd.f32 %v3050_v17, %v2906_v25  ;;  %v2603_v45 = vrot.slane %v2427_v54, 4  ;;  %v2875_v18 = vmul.f32 %v2763_v6, %v2730_v22  ;;  %v16283_v31 = vld [vmem:[#allocation102_spill] sm:$0xff] }
 0x32f   : > { %v3402_v4 = vmul.f32 %v3290_v9, %v11660_v35  ;;  %v3466_v42 = vmul.f32 %v3290_v9, %v11620_v46  ;;  %v11977_v0 = vmul.f32 %v2763_v6, %v2762_v20  ;;  %v2396_v28 = vmul.f32 %v2307_v63, %v16280_v13 }
 0x330   : > { %v11981_v53 = vadd.f32 %v8064_v34, %v3728_v21  ;;  %v3258_v24 = vadd.f32 %v3226_v3, %v11973_v38  ;;  %v2612_v43 = vsel %vm2464_vm14, %v2602_v61, %v2603_v45  ;;  %v2460_v58 = vmul.f32 %v2211_v59, %v16280_v13  ;;  %v16284_v13 = vld [vmem:[#allocation106_spill] sm:$0xff]  ;;  %v3693_v34 = vpop.f32.mrf.mxu2 }
 0x331   : > { %v3505_v14 = vmul.f32 %v11514_v8, %v3466_v42  ;;  %v2699_v22 = vmul.f32 %v2612_v43, %v2459_v11  ;;  %v3051_v35 = vmul.f32 %v11977_v0, %v2905_v44  ;;  %v11991_v46 = vmul.f32 %v11977_v0, %v11899_v57 }
 0x332   : > { %16281 = vst [vmem:[#allocation126_spill] sm:$0xff] %v11981_v53  ;;  %v3434_v20 = vadd.f32 %v3402_v4, %v3258_v24  ;;  %v2428_v23 = vadd.f32 %v2396_v28, %v11950_v41  ;;  %v2508_v17 = vrot.slane %v2460_v58, 4  ;;  %v2093_v3 = vmul.f32 %v16283_v31, %v16282_v1  ;;  %v16285_v41 = vld [vmem:[#allocation91_spill] sm:$0xff] }
 0x333   : > { %v2731_v9 = vadd.f32 %v2699_v22, %v2427_v54  ;;  %v3227_v61 = vmul.f32 %v11991_v46, %v11848_v51  ;;  %v3291_v11 = vmul.f32 %v11991_v46, %v11836_v33  ;;  %v2205_v44 = vrot.slane %v16284_v13, 6 }
 0x334   : > { %v3537_v59 = vadd.f32 %v3505_v14, %v3434_v20  ;;  %v2515_v57 = vsel %vm2464_vm14, %v2507_v30, %v2508_v17  ;;  %v2604_v63 = vrot.slane %v2428_v23, 4  ;;  %v2125_v21 = vadd.f32 %v2093_v3, %v16285_v41 }
 0x335   : > { %v2907_v4 = vadd.f32 %v2875_v18, %v2731_v9  ;;  %v3403_v42 = vmul.f32 %v3291_v11, %v11686_v52  ;;  %v3467_v54 = vmul.f32 %v3291_v11, %v11645_v50  ;;  %v2764_v28 = vmul.f32 %v2515_v57, %v2460_v58  ;;  %v8065_v52 = vld [vmem:[%s8772_s4 + $0xd0] sm:$0xff] }
 0x336   : > { %v3729_v51 = vmul.f32 %v11916_v56, %v3537_v59  ;;  %v2611_v33 = vsel %vm2464_vm14, %v2603_v45, %v2604_v63  ;;  %v2210_v24 = vsel %vm2160_vm8, %v2204_v39, %v2205_v44  ;;  %v2301_v30 = vrot.slane %v2125_v21, 6 }
 0x337   : > { %v12011_v43 = vadd.f32 %v3051_v35, %v2907_v4  ;;  %v3506_v14 = vmul.f32 %v11514_v8, %v3467_v54  ;;  %v2700_v18 = vmul.f32 %v2611_v33, %v2460_v58  ;;  %v2876_v22 = vmul.f32 %v2764_v28, %v2731_v9  ;;  %v16287_v35 = vld [vmem:[#allocation112_spill] sm:$0xff] }
 0x338   : > { %v12015_v20 = vadd.f32 %v8065_v52, %v3729_v51  ;;  %v2940_v50 = vmul.f32 %v2764_v28, %v2763_v6  ;;  %v2306_v56 = vsel %vm2160_vm8, %v2300_v60, %v2301_v30  ;;  %v2461_v45 = vmul.f32 %v2210_v24, %v16284_v13  ;;  %v16289_v6 = vld [vmem:[#allocation110_spill] sm:$0xff] }
 0x339   : > { %v3259_v1 = vadd.f32 %v3227_v61, %v12011_v43  ;;  %v2732_v31 = vadd.f32 %v2700_v18, %v2428_v23  ;;  %v2397_v39 = vmul.f32 %v2306_v56, %v16284_v13  ;;  %v16288_v3 = vrot.slane %v16287_v35, 6 }
 0x33a   : > { %16286 = vst [vmem:[#allocation35_spill] sm:$0xff] %v12015_v20  ;;  %v3052_v9 = vmul.f32 %v2940_v50, %v2906_v25  ;;  %v3116_v11 = vmul.f32 %v2940_v50, %v11945_v27  ;;  %v2509_v59 = vrot.slane %v2461_v45, 4  ;;  %v16290_v57 = vrot.slane %v16289_v6, 6 }
 0x33b   : > { %v2209_v58 = vsel %vm2160_vm8, %v2205_v44, %v16288_v3  ;;  %v3435_v41 = vadd.f32 %v3403_v42, %v3259_v1  ;;  %v2908_v54 = vadd.f32 %v2876_v22, %v2732_v31  ;;  %v2429_v61 = vadd.f32 %v2397_v39, %v2125_v21  ;;  %v3695_v39 = vpop.f32.mrf.mxu2 }
 0x33c   : > { %v2305_v60 = vsel %vm2160_vm8, %v2301_v30, %v16290_v57  ;;  %v3228_v13 = vmul.f32 %v3116_v11, %v11893_v37  ;;  %v3292_v51 = vmul.f32 %v3116_v11, %v11879_v12  ;;  %v2514_v25 = vsel %vm2464_vm14, %v2508_v17, %v2509_v59 }
 0x33d   : > { %v2398_v23 = vmul.f32 %v2305_v60, %v16287_v35  ;;  %v2462_v27 = vmul.f32 %v2209_v58, %v16287_v35  ;;  %v3538_v44 = vadd.f32 %v3506_v14, %v3435_v41  ;;  %v3084_v33 = vadd.f32 %v3052_v9, %v2908_v54  ;;  %v8066_v35 = vld [vmem:[%s8772_s4 + $0xd8] sm:$0xff] }
 0x33e   : > { %v2605_v24 = vrot.slane %v2429_v61, 4  ;;  %v2765_v18 = vmul.f32 %v2514_v25, %v2461_v45  ;;  %v3404_v42 = vmul.f32 %v3292_v51, %v11735_v19  ;;  %v3468_v21 = vmul.f32 %v3292_v51, %v11700_v40  ;;  %v16294_v60 = vld [vmem:[#allocation120_spill] sm:$0xff] }
 0x33f   : > { %v2430_v30 = vadd.f32 %v2398_v23, %v16289_v6  ;;  %v2510_v22 = vrot.slane %v2462_v27, 4  ;;  %v3730_v37 = vmul.f32 %v11962_v62, %v3538_v44  ;;  %v3260_v12 = vadd.f32 %v3228_v13, %v3084_v33 }
 0x340   : > { %v2610_v17 = vsel %vm2464_vm14, %v2604_v63, %v2605_v24  ;;  %v2877_v52 = vmul.f32 %v2765_v18, %v2732_v31  ;;  %v3507_v14 = vmul.f32 %v11514_v8, %v3468_v21  ;;  %v2941_v1 = vmul.f32 %v2765_v18, %v2764_v28  ;;  %v16292_v63 = vld [vmem:[#allocation118_spill] sm:$0xff] }
 0x341   : > { %v2701_v56 = vmul.f32 %v2610_v17, %v2461_v45  ;;  %v2513_v19 = vsel %vm2464_vm14, %v2509_v59, %v2510_v22  ;;  %v12047_v40 = vadd.f32 %v8066_v35, %v3730_v37  ;;  %v3436_v3 = vadd.f32 %v3404_v42, %v3260_v12 }
 0x342   : > { %v2606_v58 = vrot.slane %v2430_v30, 4  ;;  %v2766_v9 = vmul.f32 %v2513_v19, %v2462_v27  ;;  %v3053_v11 = vmul.f32 %v2941_v1, %v2907_v4  ;;  %v3117_v6 = vmul.f32 %v2941_v1, %v11977_v0 }
 0x343   : > { %16291 = vst [vmem:[#allocation121_spill] sm:$0xff] %v12047_v40  ;;  %v2733_v62 = vadd.f32 %v2701_v56, %v2429_v61  ;;  %v16293_v31 = vrot.slane %v16292_v63, 4  ;;  %v3539_v28 = vadd.f32 %v3507_v14, %v3436_v3  ;;  %v16295_v41 = vrot.slane %v16294_v60, 4 }
 0x344   : > { %v2609_v59 = vsel %vm2464_vm14, %v2605_v24, %v2606_v58  ;;  %v2942_v57 = vmul.f32 %v2766_v9, %v2765_v18  ;;  %v3229_v4 = vmul.f32 %v3117_v6, %v11933_v7  ;;  %v3293_v0 = vmul.f32 %v3117_v6, %v11912_v10 }
 0x345   : > { %v2512_v45 = vsel %vm2464_vm14, %v2510_v22, %v16293_v31  ;;  %v2608_v23 = vsel %vm2464_vm14, %v2606_v58, %v16295_v41  ;;  %v2909_v61 = vadd.f32 %v2877_v52, %v2733_v62  ;;  %v2702_v13 = vmul.f32 %v2609_v59, %v2462_v27  ;;  %v8067_v22 = vld [vmem:[%s8772_s4 + $0xe0] sm:$0xff]  ;;  %v8068_v31 = vld [vmem:[%s8772_s4 + $0xe8] sm:$0xff]  ;;  %v8069_v41 = vld [vmem:[%s8772_s4 + $0xf0] sm:$0xff] }
 0x346   : > { %v3731_v51 = vmul.f32 %v3693_v34, %v3539_v28  ;;  %v2878_v25 = vmul.f32 %v2766_v9, %v2733_v62  ;;  %v3054_v44 = vmul.f32 %v2942_v57, %v2908_v54  ;;  %v3118_v33 = vmul.f32 %v2942_v57, %v2940_v50 }
 0x347   : > { %v3085_v42 = vadd.f32 %v3053_v11, %v2909_v61  ;;  %v3405_v21 = vmul.f32 %v3293_v0, %v11773_v29  ;;  %v3469_v24 = vmul.f32 %v3293_v0, %v11754_v16  ;;  %v2734_v18 = vadd.f32 %v2702_v13, %v2430_v30  ;;  %v8070_v0 = vld [vmem:[%s8772_s4 + $0xf8] sm:$0xff] }
 0x348   : > { %v12065_v37 = vadd.f32 %v8067_v22, %v3731_v51  ;;  %v3230_v12 = vmul.f32 %v3118_v33, %v11973_v38  ;;  %v3294_v7 = vmul.f32 %v3118_v33, %v11957_v15  ;;  %v2703_v10 = vmul.f32 %v2608_v23, %v16292_v63  ;;  %v3698_v38 = vpop.f32.mrf.mxu2 }
 0x349   : > { %v3261_v27 = vadd.f32 %v3229_v4, %v3085_v42  ;;  %v2910_v34 = vadd.f32 %v2878_v25, %v2734_v18  ;;  %v2767_v54 = vmul.f32 %v2512_v45, %v16292_v63  ;;  %v3508_v50 = vmul.f32 %v11514_v8, %v3469_v24 }
 0x34a   : > { %16296 = vst [vmem:[#allocation115_spill] sm:$0xff] %v12065_v37  ;;  %v3406_v29 = vmul.f32 %v3294_v7, %v11824_v48  ;;  %v3470_v16 = vmul.f32 %v3294_v7, %v11797_v36  ;;  %v2735_v30 = vadd.f32 %v2703_v10, %v16294_v60 }
 0x34b   : > { %v3437_v17 = vadd.f32 %v3405_v21, %v3261_v27  ;;  %v3086_v52 = vadd.f32 %v3054_v44, %v2910_v34  ;;  %v2879_v14 = vmul.f32 %v2767_v54, %v2734_v18  ;;  %v2943_v15 = vmul.f32 %v2767_v54, %v2766_v9 }
 0x34c   : > { %v3509_v48 = vmul.f32 %v11514_v8, %v3470_v16 }
 0x34d   : > { %v3540_v56 = vadd.f32 %v3508_v50, %v3437_v17  ;;  %v3262_v19 = vadd.f32 %v3230_v12, %v3086_v52  ;;  %v2911_v35 = vadd.f32 %v2879_v14, %v2735_v30  ;;  %v3055_v3 = vmul.f32 %v2943_v15, %v2909_v61 }
 0x34e   : > { %v3119_v58 = vmul.f32 %v2943_v15, %v2941_v1 }
 0x34f   : > { %v3732_v62 = vmul.f32 %v3695_v39, %v3540_v56  ;;  %v3438_v11 = vadd.f32 %v3406_v29, %v3262_v19  ;;  %v3087_v6 = vadd.f32 %v3055_v3, %v2911_v35 }
 0x350   : > { %v3231_v36 = vmul.f32 %v3119_v58, %v12011_v43  ;;  %v3295_v63 = vmul.f32 %v3119_v58, %v11991_v46  ;;  %v3700_v43 = vpop.f32.mrf.mxu2 }
 0x351   : > { %v12079_v45 = vadd.f32 %v8068_v31, %v3732_v62  ;;  %v3541_v9 = vadd.f32 %v3509_v48, %v3438_v11 }
 0x352   : > { %v3263_v28 = vadd.f32 %v3231_v36, %v3087_v6  ;;  %v3407_v59 = vmul.f32 %v3295_v63, %v11862_v49  ;;  %v3471_v1 = vmul.f32 %v3295_v63, %v11846_v5 }
 0x353   : > { %16297 = vst [vmem:[#allocation80_spill] sm:$0xff] %v12079_v45  ;;  %v3733_v57 = vmul.f32 %v3698_v38, %v3541_v9 }
 0x354   : > { %v3439_v39 = vadd.f32 %v3407_v59, %v3263_v28  ;;  %v3510_v60 = vmul.f32 %v11514_v8, %v3471_v1 }
 0x355   : > { %v12085_v23 = vadd.f32 %v8069_v41, %v3733_v57 }
 0x356   : > { %v3542_v61 = vadd.f32 %v3510_v60, %v3439_v39 }
 0x357   : > { %16298 = vst [vmem:[#allocation59_spill] sm:$0xff] %v12085_v23 }
 0x358   : > { %v3545_v46 = vrot.slane %v3542_v61, 7  ;;  %v3734_v4 = vmul.f32 %v3700_v43, %v3542_v61  ;;  %3770 = sbr.rel (%p7450_p8) target bundleno = 865 (0x361), region = 60 }
 0x35a   : > { %3549 = vst [vmem:[#allocation2 + $0x1] sm:$0x1] %v3545_v46  ;;  %v12088_v13 = vadd.f32 %v8070_v0, %v3734_v4 }
 0x35c   : > { %16299 = vst [vmem:[#allocation123_spill] sm:$0xff] %v12088_v13 }
 0x35d   : > { %v16300_v5 = vld [vmem:[#allocation77_spill] sm:$0xff]  ;;  %3773 = vst [vmem:[%s8783_s10 - $0x7] sm:$0x80] %v11555_v26 }
 0x35e   : > { %3771 = vst [vmem:[%s8781_s12 - $0x7] sm:$0x80] %v16300_v5  ;;  %v16301_v8 = vld [vmem:[#allocation113_spill] sm:$0xff] }
 0x35f   : > { %3772 = vst [vmem:[%s8781_s12 - $0x5] sm:$0x80] %v16301_v8 }
 0x360   : > { %3774 = vst [vmem:[%s8783_s10 - $0x5] sm:$0x80] %v3542_v61 }
 0x361 PF: > { %v16302_v49 = vld [vmem:[#allocation52_spill] sm:$0xff]  ;;  %v16303_v25 = vld [vmem:[#allocation58_spill] sm:$0xff]  ;;  %v16304_v33 = vld [vmem:[#allocation63_spill] sm:$0xff]  ;;  %v3782_v7 = vmul.f32 %v11292_v47, %v11292_v47 }
 0x362   : > { %v3777_v51 = vmul.f32 %v16302_v49, %v16302_v49  ;;  %v3775_v44 = vmul.f32 %v16303_v25, %v16303_v25  ;;  %v3779_v42 = vmul.f32 %v16304_v33, %v16304_v33  ;;  %v16305_v21 = vld [vmem:[#allocation83_spill] sm:$0xff]  ;;  %v16306_v18 = vld [vmem:[#allocation66_spill] sm:$0xff]  ;;  %v16307_v22 = vld [vmem:[#allocation36_spill] sm:$0xff] }
 0x363   : > { %v3778_v24 = vmul.f32 %v16305_v21, %v16305_v21  ;;  %v3776_v26 = vmul.f32 %v16306_v18, %v16306_v18  ;;  %v3780_v12 = vmul.f32 %v16307_v22, %v16307_v22  ;;  %v16308_v10 = vld [vmem:[#allocation85_spill] sm:$0xff]  ;;  %v16310_v50 = vld [vmem:[#allocation88_spill] sm:$0xff]  ;;  %v16311_v16 = vld [vmem:[#allocation75_spill] sm:$0xff] }
 0x364   : > { %3811 = vadd.xlane.f32.xlu1 %v3777_v51  ;;  %3807 = vadd.xlane.f32.xlu0 %v3775_v44  ;;  %v3781_v27 = vmul.f32 %v16308_v10, %v16308_v10  ;;  %v16309_v34 = vld [vmem:[#allocation37_spill] sm:$0xff]  ;;  %v3784_v29 = vmul.f32 %v16310_v50, %v16310_v50  ;;  %v3785_v30 = vmul.f32 %v16311_v16, %v16311_v16  ;;  %v16312_v17 = vld [vmem:[#allocation90_spill] sm:$0xff]  ;;  %v16314_v15 = vld [vmem:[#allocation104_spill] sm:$0xff] }
 0x365   : > { %3815 = vadd.xlane.f32.xlu2 %v3779_v42  ;;  %v3783_v54 = vmul.f32 %v16309_v34, %v16309_v34  ;;  %v3786_v52 = vmul.f32 %v16312_v17, %v16312_v17  ;;  %v16313_v38 = vld [vmem:[#allocation94_spill] sm:$0xff]  ;;  %v3787_v56 = vmul.f32 %v16314_v15, %v16314_v15  ;;  %v16315_v19 = vld [vmem:[#allocation125_spill] sm:$0xff]  ;;  %v16316_v3 = vld [vmem:[#allocation111_spill] sm:$0xff] }
 0x366   : > { %v3788_v14 = vmul.f32 %v16313_v38, %v16313_v38  ;;  %v3789_v35 = vmul.f32 %v16315_v19, %v16315_v19  ;;  %v3790_v58 = vmul.f32 %v16316_v3, %v16316_v3  ;;  %v7509_v62 = vld [vmem:[#allocation8 + $0xf0] sm:$0xf]  ;;  %v7633_v11 = vld [vmem:[#allocation8 + $0xf4] sm:$0xf0]  ;;  %v7632_v48 = vld [vmem:[#allocation8 + $0xf4] sm:$0xf] }
 0x367   : > { %v7510_v6 = vor.u32 %v7633_v11, %v7509_v62  ;;  %v7511_v36 = vld [vmem:[#allocation8 + $0xf8] sm:$0xf0]  ;;  %v16317_v9 = vld [vmem:[#allocation105_spill] sm:$0xff]  ;;  %v7631_v39 = vld [vmem:[#allocation8 + $0xe4] sm:$0xf0] }
 0x368   : > { %v7641_v63 = vld [vmem:[#allocation6 + $0x78] sm:$0xff]  ;;  %v7514_v31 = vor.u32 %v7632_v48, %v7511_v36  ;;  %v3792_v28 = vmul.f32 %v16317_v9, %v16317_v9  ;;  %v16318_v59 = vld [vmem:[#allocation109_spill] sm:$0xff]  ;;  %v7503_v43 = vld [vmem:[#allocation8 + $0xe8] sm:$0xf0] }
 0x369   : > { %4403 = vmatpush.bf16.msrb.mxu3 %v7510_v6  ;;  %6837 = vmatpush.bf16.msrb.mxu1 %v7641_v63  ;;  %v3791_v1 = vmul.f32 %v16318_v59, %v16318_v59  ;;  %v7501_v57 = vld [vmem:[#allocation8 + $0xe0] sm:$0xf]  ;;  %v7630_v60 = vld [vmem:[#allocation8 + $0xe4] sm:$0xf]  ;;  %v7640_v61 = vld [vmem:[#allocation6 + $0x70] sm:$0xff] }
 0x36a   : > { %4492 = vmatpush.bf16.msrb.mxu0 %v7514_v31  ;;  %v7502_v41 = vor.u32 %v7631_v39, %v7501_v57  ;;  %v7506_v46 = vor.u32 %v7630_v60, %v7503_v43  ;;  %v7493_v4 = vld [vmem:[#allocation8 + $0xd0] sm:$0xf]  ;;  %v7629_v0 = vld [vmem:[#allocation8 + $0xd4] sm:$0xf0]  ;;  %v7628_v5 = vld [vmem:[#allocation8 + $0xd4] sm:$0xf] }
 0x36b   : > { %v7494_v8 = vor.u32 %v7629_v0, %v7493_v4  ;;  %v7495_v51 = vld [vmem:[#allocation8 + $0xd8] sm:$0xf0]  ;;  %v7639_v44 = vld [vmem:[#allocation6 + $0x68] sm:$0xff]  ;;  %v7469_v63 = vld [vmem:[#allocation8 + $0xa0] sm:$0xf] }
 0x36c   : > { %3813 = vadd.xlane.f32.xlu1 %v3778_v24  ;;  %3809 = vadd.xlane.f32.xlu0 %v3776_v26  ;;  %v7498_v42 = vor.u32 %v7628_v5, %v7495_v51  ;;  %v7485_v24 = vld [vmem:[#allocation8 + $0xc0] sm:$0xf]  ;;  %v7627_v26 = vld [vmem:[#allocation8 + $0xc4] sm:$0xf0]  ;;  %v16319_v11 = vld [vmem:[#allocation116_spill] sm:$0xff] }
 0x36d   : > { %3817 = vadd.xlane.f32.xlu2 %v3780_v12  ;;  %4404 = vmatpush.bf16.msrb.mxu3 %v7502_v41  ;;  %v7626_v12 = vld [vmem:[#allocation8 + $0xc4] sm:$0xf]  ;;  %v3794_v48 = vmul.f32 %v16319_v11, %v16319_v11  ;;  %v16320_v6 = vld [vmem:[#allocation98_spill] sm:$0xff]  ;;  %v7636_v39 = vld [vmem:[#allocation6 + $0x50] sm:$0xff] }
 0x36e   : > { %6838 = vmatpush.bf16.msrb.mxu1 %v7640_v61  ;;  %4493 = vmatpush.bf16.msrb.mxu0 %v7506_v46  ;;  %v3793_v36 = vmul.f32 %v16320_v6, %v16320_v6  ;;  %v7623_v31 = vld [vmem:[#allocation8 + $0xa4] sm:$0xf0]  ;;  %v7471_v57 = vld [vmem:[#allocation8 + $0xa8] sm:$0xf0]  ;;  %v7461_v41 = vld [vmem:[#allocation8 + $0x90] sm:$0xf] }
 0x36f   : > { %v7621_v43 = vld [vmem:[#allocation8 + $0x94] sm:$0xf0]  ;;  %v7620_v61 = vld [vmem:[#allocation8 + $0x94] sm:$0xf]  ;;  %v7463_v4 = vld [vmem:[#allocation8 + $0x98] sm:$0xf0] }
 0x370   : > { %v7462_v46 = vor.u32 %v7621_v43, %v7461_v41  ;;  %v7635_v0 = vld [vmem:[#allocation6 + $0x48] sm:$0xff]  ;;  %v7466_v5 = vor.u32 %v7620_v61, %v7463_v4 }
 0x371   : > { %4405 = vmatpush.bf16.msrb.mxu3 %v7494_v8  ;;  %v7453_v8 = vld [vmem:[#allocation8 + $0x80] sm:$0xf]  ;;  %v7619_v51 = vld [vmem:[#allocation8 + $0x84] sm:$0xf0] }
 0x372   : > { %6839 = vmatpush.bf16.msrb.mxu1 %v7639_v44  ;;  %4494 = vmatpush.bf16.msrb.mxu0 %v7498_v42  ;;  %v7618_v44 = vld [vmem:[#allocation8 + $0x84] sm:$0xf]  ;;  %v7454_v42 = vor.u32 %v7619_v51, %v7453_v8  ;;  %v4223_v51 = vld [vmem:[#allocation3 + $0x1] sm:$0x1] }
 0x374   : > { %3821 = vadd.xlane.f32.xlu1 %v3782_v7  ;;  %3819 = vadd.xlane.f32.xlu0 %v3781_v27  ;;  %v7486_v7 = vor.u32 %v7627_v26, %v7485_v24  ;;  %v7487_v27 = vld [vmem:[#allocation8 + $0xc8] sm:$0xf0]  ;;  %v7634_v26 = vld [vmem:[#allocation6 + $0x40] sm:$0xff] }
 0x375   : > { %3823 = vadd.xlane.f32.xlu2 %v3783_v54  ;;  %v7638_v54 = vld [vmem:[#allocation6 + $0x60] sm:$0xff]  ;;  %v7455_v24 = vld [vmem:[#allocation8 + $0x88] sm:$0xf0] }
 0x376   : > { %4406 = vmatpush.bf16.msrb.mxu3 %v7486_v7  ;;  %6840 = vmatpush.bf16.msrb.mxu1 %v7638_v54 }
 0x37c   : > { %3825 = vadd.xlane.f32.xlu0 %v3784_v29  ;;  %3827 = vadd.xlane.f32.xlu1 %v3785_v30  ;;  %v7490_v29 = vor.u32 %v7626_v12, %v7487_v27  ;;  %v7477_v30 = vld [vmem:[#allocation8 + $0xb0] sm:$0xf]  ;;  %v7458_v12 = vor.u32 %v7618_v44, %v7455_v24 }
 0x37d   : > { %3829 = vadd.xlane.f32.xlu2 %v3786_v52  ;;  %v7625_v52 = vld [vmem:[#allocation8 + $0xb4] sm:$0xf0] }
 0x37e   : > { %4495 = vmatpush.bf16.msrb.mxu0 %v7490_v29  ;;  %v16321_v29 = vld [vmem:[#allocation40_spill] sm:$0xff] }
 0x384   : > { %3833 = vadd.xlane.f32.xlu1 %v3788_v14  ;;  %3831 = vadd.xlane.f32.xlu0 %v3787_v56  ;;  %v7624_v14 = vld [vmem:[#allocation8 + $0xb4] sm:$0xf]  ;;  %v7478_v56 = vor.u32 %v7625_v52, %v7477_v30  ;;  %v3795_v30 = vmul.f32 %v16321_v29, %v16321_v29  ;;  %v16322_v52 = vld [vmem:[#allocation114_spill] sm:$0xff] }
 0x385   : > { %3835 = vadd.xlane.f32.xlu2 %v3789_v35  ;;  %v7479_v35 = vld [vmem:[#allocation8 + $0xb8] sm:$0xf0] }
 0x386   : > { %v7482_v62 = vor.u32 %v7624_v14, %v7479_v35  ;;  %4407 = vmatpush.bf16.msrb.mxu3 %v7478_v56  ;;  %v3796_v14 = vmul.f32 %v16322_v52, %v16322_v52 }
 0x388   : > { %4496 = vmatpush.bf16.msrb.mxu0 %v7482_v62 }
 0x38c   : > { %3837 = vadd.xlane.f32.xlu0 %v3790_v58  ;;  %3839 = vadd.xlane.f32.xlu1 %v3791_v1  ;;  %v7637_v58 = vld [vmem:[#allocation6 + $0x58] sm:$0xff]  ;;  %v7470_v1 = vor.u32 %v7623_v31, %v7469_v63 }
 0x38d   : > { %3841 = vadd.xlane.f32.xlu2 %v3792_v28  ;;  %6841 = vmatpush.bf16.msrb.mxu1 %v7637_v58  ;;  %v7622_v28 = vld [vmem:[#allocation8 + $0xa4] sm:$0xf] }
 0x38e   : > { %v7474_v60 = vor.u32 %v7622_v28, %v7471_v57  ;;  %4408 = vmatpush.bf16.msrb.mxu3 %v7470_v1 }
 0x390   : > { %4497 = vmatpush.bf16.msrb.mxu0 %v7474_v60 }
 0x391   : > { %6842 = vmatpush.bf16.msrb.mxu1 %v7636_v39 }
 0x392   : > { %4409 = vmatpush.bf16.msrb.mxu3 %v7462_v46 }
 0x394   : > { %3845 = vadd.xlane.f32.xlu1 %v3794_v48  ;;  %3843 = vadd.xlane.f32.xlu0 %v3793_v36 }
 0x395   : > { %6843 = vmatpush.bf16.msrb.mxu1 %v7635_v0  ;;  %4498 = vmatpush.bf16.msrb.mxu0 %v7466_v5 }
 0x396   : > { %4410 = vmatpush.bf16.msrb.mxu3 %v7454_v42  ;;  %3847 = vadd.xlane.f32.xlu2 %v3795_v30 }
 0x399   : > { %6844 = vmatpush.bf16.msrb.mxu1 %v7634_v26  ;;  %4499 = vmatpush.bf16.msrb.mxu0 %v7458_v12  ;;  %v3798_v26 = vmul.f32 %v11904_v32, %v11904_v32  ;;  %v16323_v12 = vld [vmem:[#allocation108_spill] sm:$0xff] }
 0x39c   : > { %3849 = vadd.xlane.f32.xlu0 %v3796_v14 }
 0x39e   : > { %3853 = vadd.xlane.f32.xlu2 %v3798_v26 }
 0x3d7   : > { %v3812_v7 = vpop.xlane.xlu1 %3811  ;;  %v3808_v27 = vpop.xlane.xlu0 %3807 }
 0x3d8   : > { %v3871_v54 = vmax.f32 %v3808_v27, 1e-24  ;;  %v12144_v56 = vmax.f32 %v3812_v7, 1e-24  ;;  %v3816_v36 = vpop.xlane.xlu2 %3815  ;;  %v3797_v7 = vmul.f32 %v16323_v12, %v16323_v12  ;;  %v4224_v27 = vmul.f32 11.313708, %v4223_v51 }
 0x3d9   : > { %v12156_v4 = vmax.f32 %v3816_v36, 1e-24 }
 0x3da   : > { %8071 = vrsqrt.f32 %v3871_v54  ;;  %vm3909_vm15 = vweird.f32 %v3871_v54  ;;  %3851 = vadd.xlane.f32.xlu1 %v3797_v7  ;;  %vm3929_vm6 = vweird.f32 %v12144_v56 }
 0x3db   : > { %8073 = vrsqrt.f32 %v12144_v56  ;;  %vm3949_vm12 = vweird.f32 %v12156_v4 }
 0x3df   : > { %v3814_v35 = vpop.xlane.xlu1 %3813  ;;  %v3810_v58 = vpop.xlane.xlu0 %3809 }
 0x3e0   : > { %v12146_v62 = vmax.f32 %v3814_v35, 1e-24  ;;  %v3872_v48 = vmax.f32 %v3810_v58, 1e-24  ;;  %v8072_v63 = vpop.eup %8071  ;;  %v3818_v46 = vpop.xlane.xlu2 %3817 }
 0x3e1   : > { %v3904_v31 = vmul.f32 %v8072_v63, %v3871_v54  ;;  %v12150_v57 = vpop.eup %8073  ;;  %vm3910_vm13 = vweird.f32 %v8072_v63  ;;  %v12160_v44 = vmax.f32 %v3818_v46, 1e-24 }
 0x3e2   : > { %8075 = vrsqrt.f32 %v12146_v62  ;;  %v3924_v0 = vmul.f32 %v12150_v57, %v12144_v56  ;;  %vm3911_vm2 = vmor %vm3909_vm15, %vm3910_vm13  ;;  %vm3919_vm3 = vweird.f32 %v3872_v48  ;;  %vm3939_vm4 = vweird.f32 %v12146_v62 }
 0x3e3   : > { %8077 = vrsqrt.f32 %v3872_v48  ;;  %v3905_v28 = vmul.f32 %v8072_v63, %v3904_v31  ;;  %v12171_v31 = vperm.slane %v4224_v27, 0  ;;  %vm3930_vm11 = vweird.f32 %v12150_v57 }
 0x3e4   : > { %8079 = vrsqrt.f32 %v12156_v4  ;;  %v3925_v30 = vmul.f32 %v12150_v57, %v3924_v0  ;;  %v3800_v56 = vmul.f32 %v11981_v53, %v11981_v53  ;;  %v3799_v27 = vmul.f32 %v11942_v55, %v11942_v55  ;;  %vm3931_vm10 = vmor %vm3929_vm6, %vm3930_vm11 }
 0x3e5   : > { %v3906_v1 = vmul.f32 0.5, %v3905_v28  ;;  %8081 = vrsqrt.f32 %v12160_v44  ;;  %vm3959_vm15 = vweird.f32 %v12160_v44 }
 0x3e6   : > { %v3926_v28 = vmul.f32 0.5, %v3925_v30  ;;  %3857 = vadd.xlane.f32.xlu1 %v3800_v56  ;;  %3855 = vadd.xlane.f32.xlu0 %v3799_v27  ;;  %v3801_v56 = vmul.f32 %v12015_v20, %v12015_v20  ;;  %v3802_v27 = vmul.f32 %v12047_v40, %v12047_v40 }
 0x3e7   : > { %v3907_v60 = vsub.f32 1.5, %v3906_v1 }
 0x3e8   : > { %v12152_v39 = vpop.eup %8075  ;;  %3859 = vadd.xlane.f32.xlu2 %v3801_v56  ;;  %v3804_v56 = vmul.f32 %v12079_v45, %v12079_v45 }
 0x3e9   : > { %v8078_v41 = vpop.eup %8077  ;;  %v3934_v43 = vmul.f32 %v12152_v39, %v12146_v62  ;;  %v3908_v5 = vmul.f32 %v8072_v63, %v3907_v60  ;;  %vm3940_vm5 = vweird.f32 %v12152_v39 }
 0x3ea   : > { %v3914_v61 = vmul.f32 %v8078_v41, %v3872_v48  ;;  %vm3920_vm0 = vweird.f32 %v8078_v41  ;;  %v12173_v60 = vpop.eup %8079  ;;  %vm12189_vm9 = vmor %vm3939_vm4, %vm3940_vm5 }
 0x3eb   : > { %v3935_v42 = vmul.f32 %v12152_v39, %v3934_v43  ;;  %v3912_v54 = vsel %vm3911_vm2, %v8072_v63, %v3908_v5  ;;  %vm3921_vm1 = vmor %vm3919_vm3, %vm3920_vm0  ;;  %v12176_v63 = vpop.eup %8081  ;;  %v3927_v5 = vsub.f32 1.5, %v3926_v28  ;;  %v3944_v48 = vmul.f32 %v12173_v60, %v12156_v4 }
 0x3ec   : > { %v3915_v8 = vmul.f32 %v8078_v41, %v3914_v61  ;;  %v4225_v36 = vmul.f32 %v3912_v54, %v16303_v25  ;;  %vm3950_vm13 = vweird.f32 %v12173_v60  ;;  %vm3960_vm2 = vweird.f32 %v12176_v63 }
 0x3ed   : > { %v3936_v35 = vmul.f32 0.5, %v3935_v42  ;;  %v3954_v42 = vmul.f32 %v12176_v63, %v12160_v44  ;;  %v3928_v62 = vmul.f32 %v12150_v57, %v3927_v5  ;;  %v3945_v30 = vmul.f32 %v12173_v60, %v3944_v48  ;;  %vm12223_vm0 = vmor %vm3949_vm12, %vm3950_vm13 }
 0x3ee   : > { %v3916_v24 = vmul.f32 0.5, %v3915_v8  ;;  %v4258_v46 = vmul.f32 %v12171_v31, %v4225_v36  ;;  %v3822_v8 = vpop.xlane.xlu1 %3821  ;;  %vm12232_vm3 = vmor %vm3959_vm15, %vm3960_vm2  ;;  %3861 = vadd.xlane.f32.xlu0 %v3802_v27  ;;  %v3803_v27 = vmul.f32 %v12065_v37, %v12065_v37 }
 0x3ef   : > { %v3937_v61 = vsub.f32 1.5, %v3936_v35  ;;  %v12194_v7 = vmax.f32 %v3822_v8, 1e-24  ;;  %v3955_v54 = vmul.f32 %v12176_v63, %v3954_v42  ;;  %v3946_v36 = vmul.f32 0.5, %v3945_v30  ;;  %v3824_v8 = vpop.xlane.xlu2 %3823 }
 0x3f0   : > { %v3917_v14 = vsub.f32 1.5, %v3916_v24  ;;  %v3820_v24 = vpop.xlane.xlu0 %3819  ;;  %3865 = vadd.xlane.f32.xlu2 %v3804_v56  ;;  %3863 = vadd.xlane.f32.xlu1 %v3803_v27  ;;  %v3806_v56 = vmul.f32 %v12088_v13, %v12088_v13  ;;  %v3805_v27 = vmul.f32 %v12085_v23, %v12085_v23 }
 0x3f1   : > { %v3938_v51 = vmul.f32 %v12152_v39, %v3937_v61  ;;  %8083 = vrsqrt.f32 %v12194_v7  ;;  %v3947_v61 = vsub.f32 1.5, %v3946_v36 }
 0x3f2   : > { %v3918_v58 = vmul.f32 %v8078_v41, %v3917_v14  ;;  %v12201_v14 = vmax.f32 %v3820_v24, 1e-24 }
 0x3f3   : > { %v3942_v35 = vsel %vm12189_vm9, %v12152_v39, %v3938_v51  ;;  %v3948_v48 = vmul.f32 %v12173_v60, %v3947_v61 }
 0x3f4   : > { %v3922_v1 = vsel %vm3921_vm1, %v8078_v41, %v3918_v58  ;;  %v3932_v58 = vsel %vm3931_vm10, %v12150_v57, %v3928_v62  ;;  %8085 = vrsqrt.f32 %v12201_v14  ;;  %v4228_v28 = vmul.f32 %v3942_v35, %v16305_v21 }
 0x3f5   : > { %v4226_v43 = vmul.f32 %v3922_v1, %v16306_v18  ;;  %v3956_v1 = vmul.f32 0.5, %v3955_v54  ;;  %v12236_v62 = vmax.f32 %v3824_v8, 1e-24  ;;  %v3952_v54 = vsel %vm12223_vm0, %v12173_v60, %v3948_v48 }
 0x3f6   : > { %vm3979_vm1 = vweird.f32 %v12194_v7  ;;  %vm3969_vm5 = vweird.f32 %v12201_v14  ;;  %3867 = vadd.xlane.f32.xlu0 %v3805_v27 }
 0x3f7   : > { %v4259_v0 = vmul.f32 %v12171_v31, %v4226_v43  ;;  %v4227_v43 = vmul.f32 %v3932_v58, %v16302_v49  ;;  %v3957_v39 = vsub.f32 1.5, %v3956_v1  ;;  %8087 = vrsqrt.f32 %v12236_v62  ;;  %v3830_v51 = vpop.xlane.xlu2 %3829 }
 0x3f8   : > { %v3826_v26 = vpop.xlane.xlu0 %3825  ;;  %v12280_v44 = vmax.f32 %v3830_v51, 1e-24  ;;  %vm3989_vm10 = vweird.f32 %v12236_v62  ;;  %3869 = vadd.xlane.f32.xlu1 %v3806_v56 }
 0x3f9   : > { %v4290_v41 = vpack.c.bf16 %v4259_v0, %v4258_v46  ;;  %v4261_v46 = vmul.f32 %v12171_v31, %v4228_v28  ;;  %v12213_v0 = vpop.eup %8083  ;;  %v4260_v57 = vmul.f32 %v12171_v31, %v4227_v43  ;;  %v3958_v42 = vmul.f32 %v12176_v63, %v3957_v39 }
 0x3fa   : > { %v12215_v5 = vpop.eup %8085  ;;  %v3974_v4 = vmul.f32 %v12213_v0, %v12194_v7  ;;  %v12242_v30 = vmax.f32 %v3826_v26, 1e-24  ;;  %v4229_v28 = vmul.f32 %v3952_v54, %v16304_v33  ;;  %vm3980_vm4 = vweird.f32 %v12213_v0  ;;  %v3828_v26 = vpop.xlane.xlu1 %3827 }
 0x3fb   : > { %4411 = vmatmul.bf16.vlgmr.msrb.gmra.mxu3 %v4290_v41  ;;  %4500 = vmatmul.bf16.vlgmr.msrb.gmra.mxu0 %v4290_v41  ;;  %v3964_v24 = vmul.f32 %v12215_v5, %v12201_v14  ;;  %v3962_v36 = vsel %vm12232_vm3, %v12176_v63, %v3958_v42  ;;  %vm3970_vm6 = vweird.f32 %v12215_v5  ;;  %vm12269_vm11 = vmor %vm3979_vm1, %vm3980_vm4  ;;  %vm4019_vm3 = vweird.f32 %v12280_v44 }
 0x3fc   : > { %6845 = vmatmul.bf16.vlgmr.msrb.gmra.mxu1 %v4290_v41  ;;  %v4291_v41 = vpack.c.bf16 %v4261_v46, %v4260_v57  ;;  %v3975_v35 = vmul.f32 %v12213_v0, %v3974_v4  ;;  %8089 = vrsqrt.f32 %v12242_v30  ;;  %v4230_v1 = vmul.f32 %v3962_v36, %v16307_v22  ;;  %vm12276_vm9 = vmor %vm3969_vm5, %vm3970_vm6 }
 0x3fd   : > { %v3965_v58 = vmul.f32 %v12215_v5, %v3964_v24  ;;  %v4262_v61 = vmul.f32 %v12171_v31, %v4229_v28  ;;  %v12258_v39 = vpop.eup %8087  ;;  %8091 = vrsqrt.f32 %v12280_v44  ;;  %vm3999_vm13 = vweird.f32 %v12242_v30 }
 0x3fe   : > { %v3976_v43 = vmul.f32 0.5, %v3975_v35  ;;  %v4263_v46 = vmul.f32 %v12171_v31, %v4230_v1  ;;  %v12287_v35 = vmax.f32 %v3828_v26, 1e-24  ;;  %vm3990_vm12 = vweird.f32 %v12258_v39 }
 0x3ff   : > { %v3966_v60 = vmul.f32 0.5, %v3965_v58  ;;  %vm12311_vm2 = vmor %vm3989_vm10, %vm3990_vm12 }
 0x400   : > { %v3977_v57 = vsub.f32 1.5, %v3976_v43  ;;  %v4292_v8 = vpack.c.bf16 %v4263_v46, %v4262_v61  ;;  %8093 = vrsqrt.f32 %v12287_v35  ;;  %v3832_v26 = vpop.xlane.xlu0 %3831  ;;  %vm4009_vm4 = vweird.f32 %v12287_v35 }
 0x401   : > { %v3967_v63 = vsub.f32 1.5, %v3966_v60 }
 0x402   : > { %v12260_v48 = vpop.eup %8089  ;;  %v3978_v42 = vmul.f32 %v12213_v0, %v3977_v57 }
 0x403   : > { %v3968_v24 = vmul.f32 %v12215_v5, %v3967_v63  ;;  %v3994_v7 = vmul.f32 %v12260_v48, %v12242_v30  ;;  %v12302_v63 = vpop.eup %8091  ;;  %vm4000_vm15 = vweird.f32 %v12260_v48 }
 0x404   : > { %v3982_v28 = vsel %vm12269_vm11, %v12213_v0, %v3978_v42  ;;  %v3834_v42 = vpop.xlane.xlu1 %3833  ;;  %vm12320_vm0 = vmor %vm3999_vm13, %vm4000_vm15  ;;  %vm4020_vm1 = vweird.f32 %v12302_v63 }
 0x405   : > { %v3995_v58 = vmul.f32 %v12260_v48, %v3994_v7  ;;  %v3972_v36 = vsel %vm12276_vm9, %v12215_v5, %v3968_v24  ;;  %v4232_v60 = vmul.f32 %v3982_v28, %v11292_v47  ;;  %v4014_v7 = vmul.f32 %v12302_v63, %v12280_v44  ;;  %vm12353_vm6 = vmor %vm4019_vm3, %vm4020_vm1 }
 0x406   : > { %v4231_v43 = vmul.f32 %v3972_v36, %v16308_v10  ;;  %v12324_v14 = vmax.f32 %v3834_v42, 1e-24  ;;  %v3836_v42 = vpop.xlane.xlu2 %3835 }
 0x407   : > { %v3996_v61 = vmul.f32 0.5, %v3995_v58  ;;  %v4265_v5 = vmul.f32 %v12171_v31, %v4232_v60  ;;  %v4015_v36 = vmul.f32 %v12302_v63, %v4014_v7 }
 0x408   : > { %v4264_v57 = vmul.f32 %v12171_v31, %v4231_v43  ;;  %8095 = vrsqrt.f32 %v12324_v14  ;;  %vm4039_vm9 = vweird.f32 %v12324_v14 }
 0x409   : > { %v3997_v0 = vsub.f32 1.5, %v3996_v61  ;;  %v4016_v61 = vmul.f32 0.5, %v4015_v36 }
 0x40a   : > { %v4293_v51 = vpack.c.bf16 %v4265_v5, %v4264_v57 }
 0x40b   : > { %4416 = vmatmul.bf16.gmra.mxu3 %v4291_v41  ;;  %4505 = vmatmul.bf16.gmra.mxu0 %v4291_v41  ;;  %v3998_v24 = vmul.f32 %v12260_v48, %v3997_v0  ;;  %v4017_v0 = vsub.f32 1.5, %v4016_v61 }
 0x40c   : > { %6850 = vmatmul.bf16.gmra.mxu1 %v4291_v41  ;;  %v3984_v41 = vmul.f32 %v12258_v39, %v12236_v62 }
 0x40d   : > { %v4018_v4 = vmul.f32 %v12302_v63, %v4017_v0 }
 0x40e   : > { %v3985_v54 = vmul.f32 %v12258_v39, %v3984_v41  ;;  %v12304_v41 = vpop.eup %8093 }
 0x40f   : > { %v4004_v62 = vmul.f32 %v12304_v41, %v12287_v35  ;;  %v12346_v5 = vpop.eup %8095  ;;  %vm4010_vm5 = vweird.f32 %v12304_v41  ;;  %v3885_v35 = vmax.f32 %v3836_v42, 1e-24  ;;  %v4022_v36 = vsel %vm12353_vm6, %v12302_v63, %v4018_v4 }
 0x410   : > { %v3986_v1 = vmul.f32 0.5, %v3985_v54  ;;  %v12330_v54 = vmax.f32 %v3832_v26, 1e-24  ;;  %v3838_v26 = vpop.xlane.xlu0 %3837  ;;  %vm4011_vm11 = vmor %vm4009_vm4, %vm4010_vm5  ;;  %vm4040_vm10 = vweird.f32 %v12346_v5 }
 0x411   : > { %v4005_v28 = vmul.f32 %v12304_v41, %v4004_v62  ;;  %v4034_v62 = vmul.f32 %v12346_v5, %v12324_v14  ;;  %v12361_v30 = vmax.f32 %v3838_v26, 1e-24  ;;  %vm12382_vm15 = vmor %vm4039_vm9, %vm4040_vm10  ;;  %v3840_v14 = vpop.xlane.xlu1 %3839 }
 0x412   : > { %v3987_v46 = vsub.f32 1.5, %v3986_v1  ;;  %v4002_v1 = vsel %vm12320_vm0, %v12260_v48, %v3998_v24  ;;  %8097 = vrsqrt.f32 %v12330_v54  ;;  %vm4029_vm12 = vweird.f32 %v12330_v54 }
 0x413   : > { %v4234_v60 = vmul.f32 %v4002_v1, %v16310_v50  ;;  %v4035_v56 = vmul.f32 %v12346_v5, %v4034_v62  ;;  %8099 = vrsqrt.f32 %v3885_v35  ;;  %v4236_v1 = vmul.f32 %v4022_v36, %v16312_v17 }
 0x414   : > { %8101 = vrsqrt.f32 %v12361_v30  ;;  %vm4049_vm0 = vweird.f32 %v3885_v35  ;;  %vm4059_vm1 = vweird.f32 %v12361_v30 }
 0x415   : > { %v4267_v57 = vmul.f32 %v12171_v31, %v4234_v60 }
 0x41b   : > { %4421 = vmatmul.bf16.gmra.mxu3 %v4292_v8  ;;  %4510 = vmatmul.bf16.gmra.mxu0 %v4292_v8 }
 0x41c   : > { %6855 = vmatmul.bf16.gmra.mxu1 %v4292_v8  ;;  %v3988_v8 = vmul.f32 %v12258_v39, %v3987_v46 }
 0x41e   : > { %v3992_v58 = vsel %vm12311_vm2, %v12258_v39, %v3988_v8  ;;  %v4006_v39 = vmul.f32 0.5, %v4005_v28  ;;  %v8098_v8 = vpop.eup %8097 }
 0x41f   : > { %v4233_v43 = vmul.f32 %v3992_v58, %v16309_v34  ;;  %v4024_v44 = vmul.f32 %v8098_v8, %v12330_v54  ;;  %vm4030_vm13 = vweird.f32 %v8098_v8 }
 0x420   : > { %v4007_v48 = vsub.f32 1.5, %v4006_v39  ;;  %v4269_v39 = vmul.f32 %v12171_v31, %v4236_v1  ;;  %vm4031_vm2 = vmor %vm4029_vm12, %vm4030_vm13 }
 0x421   : > { %v4266_v46 = vmul.f32 %v12171_v31, %v4233_v43  ;;  %v4025_v27 = vmul.f32 %v8098_v8, %v4024_v44  ;;  %v4036_v43 = vmul.f32 0.5, %v4035_v56  ;;  %v12391_v44 = vmax.f32 %v3840_v14, 1e-24 }
 0x422   : > { %v4008_v7 = vmul.f32 %v12304_v41, %v4007_v48 }
 0x423   : > { %v4026_v60 = vmul.f32 0.5, %v4025_v27  ;;  %vm4069_vm10 = vweird.f32 %v12391_v44 }
 0x424   : > { %v4012_v58 = vsel %vm4011_vm11, %v12304_v41, %v4008_v7  ;;  %v4037_v41 = vsub.f32 1.5, %v4036_v43 }
 0x425   : > { %v4235_v28 = vmul.f32 %v4012_v58, %v16311_v16 }
 0x426   : > { %v4038_v42 = vmul.f32 %v12346_v5, %v4037_v41 }
 0x427   : > { %v4268_v61 = vmul.f32 %v12171_v31, %v4235_v28 }
 0x428   : > { %v4042_v27 = vsel %vm12382_vm15, %v12346_v5, %v4038_v42  ;;  %v3844_v5 = vpop.xlane.xlu0 %3843 }
 0x429   : > { %v4295_v48 = vpack.c.bf16 %v4269_v39, %v4268_v61  ;;  %v4238_v28 = vmul.f32 %v4042_v27, %v16313_v38 }
 0x42b   : > { %4426 = vmatmul.bf16.gmra.mxu3 %v4293_v51  ;;  %4515 = vmatmul.bf16.gmra.mxu0 %v4293_v51  ;;  %v4271_v61 = vmul.f32 %v12171_v31, %v4238_v28 }
 0x42c   : > { %6860 = vmatmul.bf16.gmra.mxu1 %v4293_v51  ;;  %v4294_v51 = vpack.c.bf16 %v4267_v57, %v4266_v46  ;;  %v12373_v46 = vpop.eup %8099  ;;  %v4027_v57 = vsub.f32 1.5, %v4026_v60 }
 0x42d   : > { %v12375_v0 = vpop.eup %8101  ;;  %v4044_v63 = vmul.f32 %v12373_v46, %v3885_v35  ;;  %vm4050_vm3 = vweird.f32 %v12373_v46 }
 0x42e   : > { %v4028_v24 = vmul.f32 %v8098_v8, %v4027_v57  ;;  %v4054_v7 = vmul.f32 %v12375_v0, %v12361_v30  ;;  %vm4060_vm4 = vweird.f32 %v12375_v0  ;;  %v3846_v57 = vpop.xlane.xlu1 %3845  ;;  %vm12411_vm5 = vmor %vm4049_vm0, %vm4050_vm3 }
 0x42f   : > { %v4045_v62 = vmul.f32 %v12373_v46, %v4044_v63  ;;  %vm4061_vm6 = vmor %vm4059_vm1, %vm4060_vm4  ;;  %v12422_v30 = vmax.f32 %v3846_v57, 1e-24 }
 0x430   : > { %v4055_v26 = vmul.f32 %v12375_v0, %v4054_v7  ;;  %v4032_v56 = vsel %vm4031_vm2, %v8098_v8, %v4028_v24  ;;  %v12420_v24 = vmax.f32 %v3844_v5, 1e-24  ;;  %v3850_v27 = vpop.xlane.xlu0 %3849 }
 0x431   : > { %v4046_v58 = vmul.f32 0.5, %v4045_v62  ;;  %v4237_v36 = vmul.f32 %v4032_v56, %v16314_v15  ;;  %vm4099_vm3 = vweird.f32 %v12422_v30 }
 0x432   : > { %v4056_v1 = vmul.f32 0.5, %v4055_v26  ;;  %vm4089_vm2 = vweird.f32 %v12420_v24 }
 0x433   : > { %v4047_v43 = vsub.f32 1.5, %v4046_v58  ;;  %v4270_v60 = vmul.f32 %v12171_v31, %v4237_v36 }
 0x434   : > { %v4057_v39 = vsub.f32 1.5, %v4056_v1 }
 0x435   : > { %v4048_v63 = vmul.f32 %v12373_v46, %v4047_v43 }
 0x436   : > { %v4058_v42 = vmul.f32 %v12375_v0, %v4057_v39 }
 0x437   : > { %v4052_v7 = vsel %vm12411_vm5, %v12373_v46, %v4048_v63  ;;  %v12436_v46 = vmax.f32 %v3850_v27, 1e-24 }
 0x438   : > { %v4062_v26 = vsel %vm4061_vm6, %v12375_v0, %v4058_v42  ;;  %v4239_v58 = vmul.f32 %v4052_v7, %v16315_v19 }
 0x439   : > { %v4240_v36 = vmul.f32 %v4062_v26, %v16316_v3 }
 0x43a   : > { %v4272_v0 = vmul.f32 %v12171_v31, %v4239_v58 }
 0x43b   : > { %4431 = vmatmul.bf16.gmra.mxu3 %v4294_v51  ;;  %4520 = vmatmul.bf16.gmra.mxu0 %v4294_v51  ;;  %v4273_v39 = vmul.f32 %v12171_v31, %v4240_v36 }
 0x43c   : > { %6865 = vmatmul.bf16.gmra.mxu1 %v4294_v51  ;;  %v3842_v51 = vpop.xlane.xlu2 %3841 }
 0x43d   : > { %v12388_v54 = vmax.f32 %v3842_v51, 1e-24  ;;  %v4297_v51 = vpack.c.bf16 %v4273_v39, %v4272_v0 }
 0x43f   : > { %8103 = vrsqrt.f32 %v12388_v54  ;;  %vm4079_vm11 = vweird.f32 %v12388_v54 }
 0x440   : > { %8105 = vrsqrt.f32 %v12391_v44 }
 0x441   : > { %8107 = vrsqrt.f32 %v12420_v24 }
 0x442   : > { %8109 = vrsqrt.f32 %v12422_v30 }
 0x444   : > { %v3848_v56 = vpop.xlane.xlu2 %3847 }
 0x445   : > { %v12403_v8 = vpop.eup %8103  ;;  %v12434_v43 = vmax.f32 %v3848_v56, 1e-24 }
 0x446   : > { %v12405_v41 = vpop.eup %8105  ;;  %v4074_v35 = vmul.f32 %v12403_v8, %v12388_v54  ;;  %vm4080_vm9 = vweird.f32 %v12403_v8 }
 0x447   : > { %v4064_v4 = vmul.f32 %v12405_v41, %v12391_v44  ;;  %8111 = vrsqrt.f32 %v12434_v43  ;;  %vm4070_vm12 = vweird.f32 %v12405_v41  ;;  %vm12455_vm13 = vmor %vm4079_vm11, %vm4080_vm9  ;;  %vm4109_vm6 = vweird.f32 %v12434_v43 }
 0x448   : > { %v4075_v14 = vmul.f32 %v12403_v8, %v4074_v35  ;;  %8113 = vrsqrt.f32 %v12436_v46  ;;  %vm12460_vm15 = vmor %vm4069_vm10, %vm4070_vm12  ;;  %vm4119_vm9 = vweird.f32 %v12436_v46 }
 0x449   : > { %v4065_v62 = vmul.f32 %v12405_v41, %v4064_v4 }
 0x44a   : > { %v4076_v28 = vmul.f32 0.5, %v4075_v14 }
 0x44b   : > { %4436 = vmatmul.bf16.gmra.mxu3 %v4295_v48  ;;  %4525 = vmatmul.bf16.gmra.mxu0 %v4295_v48  ;;  %v4066_v1 = vmul.f32 0.5, %v4065_v62 }
 0x44c   : > { %6870 = vmatmul.bf16.gmra.mxu1 %v4295_v48  ;;  %v4296_v48 = vpack.c.bf16 %v4271_v61, %v4270_v60  ;;  %v12438_v60 = vpop.eup %8107  ;;  %v4077_v5 = vsub.f32 1.5, %v4076_v28  ;;  %v3854_v26 = vpop.xlane.xlu2 %3853 }
 0x44d   : > { %v12440_v61 = vpop.eup %8109  ;;  %v4067_v57 = vsub.f32 1.5, %v4066_v1  ;;  %v4084_v63 = vmul.f32 %v12438_v60, %v12420_v24  ;;  %v3852_v7 = vpop.xlane.xlu1 %3851  ;;  %v12478_v1 = vmax.f32 %v3854_v26, 1e-24  ;;  %vm4090_vm0 = vweird.f32 %v12438_v60 }
 0x44e   : > { %v4078_v42 = vmul.f32 %v12403_v8, %v4077_v5  ;;  %v12465_v14 = vpop.eup %8111  ;;  %v12476_v36 = vmax.f32 %v3852_v7, 1e-24  ;;  %vm4100_vm1 = vweird.f32 %v12440_v61  ;;  %vm12500_vm4 = vmor %vm4089_vm2, %vm4090_vm0 }
 0x44f   : > { %v4068_v54 = vmul.f32 %v12405_v41, %v4067_v57  ;;  %v4085_v44 = vmul.f32 %v12438_v60, %v4084_v63  ;;  %v12468_v56 = vpop.eup %8113  ;;  %v4104_v39 = vmul.f32 %v12465_v14, %v12434_v43  ;;  %vm12508_vm5 = vmor %vm4099_vm3, %vm4100_vm1  ;;  %vm4110_vm11 = vweird.f32 %v12465_v14 }
 0x450   : > { %v4082_v58 = vsel %vm12455_vm13, %v12403_v8, %v4078_v42  ;;  %v4114_v5 = vmul.f32 %v12468_v56, %v12436_v46  ;;  %8115 = vrsqrt.f32 %v12476_v36  ;;  %vm4120_vm10 = vweird.f32 %v12468_v56  ;;  %vm12538_vm12 = vmor %vm4109_vm6, %vm4110_vm11 }
 0x451   : > { %v4072_v27 = vsel %vm12460_vm15, %v12405_v41, %v4068_v54  ;;  %v4086_v28 = vmul.f32 0.5, %v4085_v44  ;;  %v4242_v41 = vmul.f32 %v4082_v58, %v16317_v9  ;;  %8117 = vrsqrt.f32 %v12478_v1  ;;  %vm12544_vm13 = vmor %vm4119_vm9, %vm4120_vm10 }
 0x452   : > { %v4241_v57 = vmul.f32 %v4072_v27, %v16318_v59  ;;  %vm4129_vm15 = vweird.f32 %v12476_v36  ;;  %vm4139_vm0 = vweird.f32 %v12478_v1 }
 0x453   : > { %v4087_v63 = vsub.f32 1.5, %v4086_v28  ;;  %v4275_v35 = vmul.f32 %v12171_v31, %v4242_v41 }
 0x454   : > { %v4274_v42 = vmul.f32 %v12171_v31, %v4241_v57 }
 0x455   : > { %v4088_v54 = vmul.f32 %v12438_v60, %v4087_v63 }
 0x456   : > { %v12497_v44 = vpop.eup %8115 }
 0x457   : > { %v12506_v28 = vpop.eup %8117  ;;  %v4092_v57 = vsel %vm12500_vm4, %v12438_v60, %v4088_v54  ;;  %vm4130_vm2 = vweird.f32 %v12497_v44 }
 0x458   : > { %vm4140_vm3 = vweird.f32 %v12506_v28  ;;  %vm12584_vm1 = vmor %vm4129_vm15, %vm4130_vm2 }
 0x459   : > { %v3858_v4 = vpop.xlane.xlu1 %3857  ;;  %v3856_v58 = vpop.xlane.xlu0 %3855  ;;  %vm12590_vm4 = vmor %vm4139_vm0, %vm4140_vm3 }
 0x45a   : > { %v12519_v41 = vmax.f32 %v3856_v58, 1e-24 }
 0x45b   : > { %4441 = vmatmul.bf16.gmra.mxu3 %v4296_v48  ;;  %4530 = vmatmul.bf16.gmra.mxu0 %v4296_v48 }
 0x45c   : > { %6875 = vmatmul.bf16.gmra.mxu1 %v4296_v48  ;;  %v4094_v48 = vmul.f32 %v12440_v61, %v12422_v30  ;;  %vm4149_vm11 = vweird.f32 %v12519_v41 }
 0x45e   : > { %v4095_v62 = vmul.f32 %v12440_v61, %v4094_v48  ;;  %v4105_v48 = vmul.f32 %v12465_v14, %v4104_v39  ;;  %v12512_v39 = vmax.f32 %v3858_v4, 1e-24 }
 0x460   : > { %v4096_v0 = vmul.f32 0.5, %v4095_v62  ;;  %v4106_v24 = vmul.f32 0.5, %v4105_v48  ;;  %v4134_v48 = vmul.f32 %v12506_v28, %v12478_v1  ;;  %8119 = vrsqrt.f32 %v12512_v39 }
 0x461   : > { %8121 = vrsqrt.f32 %v12519_v41 }
 0x462   : > { %v4097_v8 = vsub.f32 1.5, %v4096_v0  ;;  %v4298_v0 = vpack.c.bf16 %v4275_v35, %v4274_v42  ;;  %v4107_v63 = vsub.f32 1.5, %v4106_v24  ;;  %v4243_v35 = vmul.f32 %v4092_v57, %v16320_v6 }
 0x464   : > { %v4098_v7 = vmul.f32 %v12440_v61, %v4097_v8  ;;  %v4108_v43 = vmul.f32 %v12465_v14, %v4107_v63  ;;  %v4276_v58 = vmul.f32 %v12171_v31, %v4243_v35  ;;  %v3862_v35 = vpop.xlane.xlu0 %3861 }
 0x465   : > { %v12573_v62 = vmax.f32 %v3862_v35, 1e-24 }
 0x466   : > { %v4112_v63 = vsel %vm12538_vm12, %v12465_v14, %v4108_v43 }
 0x46b   : > { %4446 = vmatmul.bf16.gmra.mxu3 %v4297_v51  ;;  %4535 = vmatmul.bf16.gmra.mxu0 %v4297_v51 }
 0x46c   : > { %6880 = vmatmul.bf16.gmra.mxu1 %v4297_v51  ;;  %v4115_v51 = vmul.f32 %v12468_v56, %v4114_v5  ;;  %v4124_v5 = vmul.f32 %v12497_v44, %v12476_v36 }
 0x46e   : > { %v4116_v26 = vmul.f32 0.5, %v4115_v51  ;;  %v4102_v51 = vsel %vm12508_vm5, %v12440_v61, %v4098_v7  ;;  %v4125_v42 = vmul.f32 %v12497_v44, %v4124_v5  ;;  %v4135_v7 = vmul.f32 %v12506_v28, %v4134_v48  ;;  %v12550_v5 = vpop.eup %8119 }
 0x46f   : > { %v4244_v54 = vmul.f32 %v4102_v51, %v16319_v11  ;;  %v12558_v48 = vpop.eup %8121  ;;  %vm4159_vm5 = vweird.f32 %v12512_v39  ;;  %vm4160_vm6 = vweird.f32 %v12550_v5 }
 0x470   : > { %v4117_v8 = vsub.f32 1.5, %v4116_v26  ;;  %v4126_v26 = vmul.f32 0.5, %v4125_v42  ;;  %v4136_v57 = vmul.f32 0.5, %v4135_v7  ;;  %v4144_v43 = vmul.f32 %v12558_v48, %v12519_v41 }
 0x471   : > { %v4277_v30 = vmul.f32 %v12171_v31, %v4244_v54  ;;  %vm4150_vm9 = vweird.f32 %v12558_v48 }
 0x472   : > { %v4118_v46 = vmul.f32 %v12468_v56, %v4117_v8  ;;  %v4127_v54 = vsub.f32 1.5, %v4126_v26  ;;  %v4137_v3 = vsub.f32 1.5, %v4136_v57  ;;  %v4145_v57 = vmul.f32 %v12558_v48, %v4144_v43  ;;  %vm12663_vm2 = vmor %vm4149_vm11, %vm4150_vm9 }
 0x474   : > { %v4122_v8 = vsel %vm12544_vm13, %v12468_v56, %v4118_v46  ;;  %v4154_v56 = vmul.f32 %v12550_v5, %v12512_v39  ;;  %vm12650_vm13 = vmor %vm4159_vm5, %vm4160_vm6 }
 0x475   : > { %v4246_v7 = vmul.f32 %v4122_v8, %v16322_v52 }
 0x476   : > { %v4155_v1 = vmul.f32 %v12550_v5, %v4154_v56 }
 0x477   : > { %v4279_v35 = vmul.f32 %v12171_v31, %v4246_v7 }
 0x478   : > { %v12504_v27 = vpop.f32.mrf.mxu0  ;;  %v4156_v43 = vmul.f32 0.5, %v4155_v1 }
 0x47b   : > { %4451 = vmatmul.bf16.gmra.mxu3 %v4298_v0  ;;  %4540 = vmatmul.bf16.gmra.mxu0 %v4298_v0 }
 0x47c   : > { %6885 = vmatmul.bf16.gmra.mxu1 %v4298_v0  ;;  %v3860_v0 = vpop.xlane.xlu2 %3859 }
 0x47d   : > { %v12560_v51 = vmax.f32 %v3860_v0, 1e-24  ;;  %v7515_v0 = vmul.f32 -1.442695, %v12504_v27 }
 0x47e   : > { %v12530_v60 = vpop.f32.mrf.mxu3 }
 0x47f   : > { %16352 = vst [vmem:[#allocation73_spill] sm:$0xff] %v12530_v60 }
 0x480   : > { %v4503_v4 = vpop.f32.mrf.mxu0 }
 0x481   : > { %v7516_v24 = vmul.f32 -1.442695, %v4503_v4  ;;  %v4299_v4 = vpack.c.bf16 %v4277_v30, %v4276_v58  ;;  %v4128_v58 = vmul.f32 %v12497_v44, %v4127_v54  ;;  %v4138_v30 = vmul.f32 %v12506_v28, %v4137_v3 }
 0x483   : > { %8123 = vpow2.f32 %v7516_v24  ;;  %v4245_v24 = vmul.f32 %v4112_v63, %v16321_v29 }
 0x484   : > { %8125 = vrsqrt.f32 %v12560_v51 }
 0x485   : > { %v4278_v8 = vmul.f32 %v12171_v31, %v4245_v24  ;;  %v4142_v24 = vsel %vm12590_vm4, %v12506_v28, %v4138_v30  ;;  %v15710_v30 = vrot.slane %v12530_v60, 7 }
 0x486   : > { %v12562_v42 = vpop.f32.mrf.mxu3  ;;  %v4248_v63 = vmul.f32 %v4142_v24, %v11904_v32 }
 0x487   : > { %v5286_v54 = vrot.slane %v12562_v42, 7  ;;  %v4300_v38 = vpack.c.bf16 %v4279_v35, %v4278_v8  ;;  %v4157_v8 = vsub.f32 1.5, %v4156_v43 }
 0x488   : > { %v4506_v14 = vpop.f32.mrf.mxu0 }
 0x489   : > { %v8124_v61 = vpop.eup %8123  ;;  %v7517_v46 = vmul.f32 -1.442695, %v4506_v14  ;;  %v4132_v14 = vsel %vm12584_vm1, %v12497_v44, %v4128_v58  ;;  %v5347_v17 = vsel %vm1856_vm7, %v15710_v30, %v5286_v54  ;;  %v4158_v16 = vmul.f32 %v12550_v5, %v4157_v8 }
 0x48a   : > { %v12575_v26 = vadd.f32 1.0, %v8124_v61  ;;  %v12599_v36 = vpop.eup %8125  ;;  %v4146_v61 = vmul.f32 0.5, %v4145_v57  ;;  %v4247_v1 = vmul.f32 %v4132_v14, %v16323_v12 }
 0x48b   : > { %8127 = vpow2.f32 %v7517_v46  ;;  %4456 = vmatmul.bf16.gmra.mxu3 %v4299_v4  ;;  %4545 = vmatmul.bf16.gmra.mxu0 %v4299_v4  ;;  %v4164_v58 = vmul.f32 %v12599_v36, %v12560_v51  ;;  %v4162_v50 = vsel %vm12650_vm13, %v12550_v5, %v4158_v16 }
 0x48c   : > { %8129 = vrcp.f32 %v12575_v26  ;;  %6890 = vmatmul.bf16.gmra.mxu1 %v4299_v4  ;;  %v4147_v27 = vsub.f32 1.5, %v4146_v61  ;;  %v4735_v14 = vand.u32 2147483648, %v12575_v26  ;;  %v4280_v61 = vmul.f32 %v12171_v31, %v4247_v1 }
 0x48d   : > { %8131 = vrsqrt.f32 %v12573_v62  ;;  %v4165_v24 = vmul.f32 %v12599_v36, %v4164_v58  ;;  %vm4729_vm12 = vweird.f32 %v12575_v26 }
 0x48e   : > { %v12597_v3 = vpop.f32.mrf.mxu3  ;;  %v4148_v1 = vmul.f32 %v12558_v48, %v4147_v27  ;;  %v4736_v27 = vor.u32 1.1754944e-38, %v4735_v14 }
 0x48f   : > { %v15706_v4 = vrot.slane %v12597_v3, 7 }
 0x490   : > { %v4508_v56 = vpop.f32.mrf.mxu0 }
 0x491   : > { %v8128_v7 = vpop.eup %8127  ;;  %v12613_v46 = vsel %vm1856_vm7, %v5286_v54, %v15706_v4  ;;  %v7518_v19 = vmul.f32 -1.442695, %v4508_v56  ;;  %v4733_v56 = vand.u32 2147483647, %v12575_v26  ;;  %v3866_v4 = vpop.xlane.xlu2 %3865 }
 0x492   : > { %v8130_v15 = vpop.eup %8129  ;;  %v12616_v44 = vadd.f32 1.0, %v8128_v7  ;;  %v12667_v8 = vmax.f32 %v3866_v4, 1e-24  ;;  %v3864_v4 = vpop.xlane.xlu1 %3863 }
 0x493   : > { %v12621_v28 = vpop.eup %8131  ;;  %v4725_v57 = vmul.f32 %v8130_v15, %v12575_v26  ;;  %8133 = vpow2.f32 %v7518_v19  ;;  %vm4730_vm10 = vweird.f32 %v8130_v15  ;;  %vm12655_vm15 = vcmp.eq.f32.partialorder %v4733_v56, 8.507059e+37 }
 0x494   : > { %8135 = vrcp.f32 %v12616_v44  ;;  %v4174_v43 = vmul.f32 %v12621_v28, %v12573_v62  ;;  %vm4731_vm0 = vmor %vm4729_vm12, %vm4730_vm10  ;;  %v12672_v56 = vmul.f32 0.5, %v4165_v24  ;;  %v4748_v10 = vand.u32 2147483647, %v12616_v44 }
 0x495   : > { %v4726_v35 = vsub.f32 1.0, %v4725_v57  ;;  %v4281_v57 = vmul.f32 %v12171_v31, %v4248_v63  ;;  %v4750_v14 = vand.u32 2147483648, %v12616_v44  ;;  %vm4744_vm1 = vweird.f32 %v12616_v44 }
 0x496   : > { %v12633_v19 = vpop.f32.mrf.mxu3  ;;  %v4175_v34 = vmul.f32 %v12621_v28, %v4174_v43  ;;  %vm12704_vm4 = vcmp.eq.f32.partialorder %v4748_v10, 8.507059e+37 }
 0x497   : > { %v4727_v7 = vmul.f32 %v8130_v15, %v4726_v35  ;;  %v5288_v58 = vrot.slane %v12633_v19, 7 }
 0x498   : > { %v4511_v63 = vpop.f32.mrf.mxu0 }
 0x499   : > { %v8134_v35 = vpop.eup %8133  ;;  %v4728_v26 = vadd.f32 %v8130_v15, %v4727_v7  ;;  %v7519_v39 = vmul.f32 -1.442695, %v4511_v63 }
 0x49a   : > { %v8136_v30 = vpop.eup %8135  ;;  %v12670_v7 = vadd.f32 1.0, %v8134_v35  ;;  %v12693_v35 = vpack.c.bf16 %v4281_v57, %v4280_v61  ;;  %v4751_v57 = vor.u32 1.1754944e-38, %v4750_v14 }
 0x49b   : > { %v4732_v47 = vsel %vm4731_vm0, %v8130_v15, %v4728_v26  ;;  %v4740_v41 = vmul.f32 %v8136_v30, %v12616_v44  ;;  %8137 = vpow2.f32 %v7519_v39  ;;  %4461 = vmatmul.bf16.gmra.mxu3 %v4300_v38  ;;  %4550 = vmatmul.bf16.gmra.mxu0 %v4300_v38  ;;  %v4152_v15 = vsel %vm12663_vm2, %v12558_v48, %v4148_v1 }
 0x49c   : > { %v12679_v63 = vsel %vm12655_vm15, %v4736_v27, %v4732_v47  ;;  %8139 = vrcp.f32 %v12670_v7  ;;  %6895 = vmatmul.bf16.gmra.mxu1 %v4300_v38  ;;  %v12691_v47 = vmul.f32 0.5, %v4175_v34  ;;  %v12695_v26 = vmax.f32 %v3864_v4, 1e-24 }
 0x49d   : > { %16367 = vst [vmem:[#allocation119_spill] sm:$0xff] %v12679_v63  ;;  %v5382_v24 = vmul.f32 %v5347_v17, %v12679_v63  ;;  %v4741_v43 = vsub.f32 1.0, %v4740_v41  ;;  %8141 = vrsqrt.f32 %v12667_v8  ;;  %vm4745_vm3 = vweird.f32 %v8136_v30 }
 0x49e   : > { %8143 = vpow2.f32 %v7515_v0  ;;  %v12700_v17 = vpop.f32.mrf.mxu3  ;;  %v4249_v5 = vmul.f32 %v4152_v15, %v11942_v55  ;;  %v4250_v0 = vmul.f32 %v4162_v50, %v11981_v53  ;;  %v15717_v27 = vrot.slane %v12679_v63, 7  ;;  %vm4746_vm5 = vmor %vm4744_vm1, %vm4745_vm3 }
 0x49f   : > { %v12698_v38 = vadd.f32 %v5382_v24, %v12562_v42  ;;  %v4742_v48 = vmul.f32 %v8136_v30, %v4741_v43  ;;  %v4763_v10 = vand.u32 2147483647, %v12670_v7  ;;  %8145 = vrsqrt.f32 %v12695_v26 }
 0x4a0   : > { %v4513_v34 = vpop.f32.mrf.mxu0  ;;  %v4765_v14 = vand.u32 2147483648, %v12670_v7  ;;  %v4282_v50 = vmul.f32 %v12171_v31, %v4249_v5  ;;  %vm4759_vm6 = vweird.f32 %v12670_v7 }
 0x4a1   : > { %16368 = vst [vmem:[#allocation124_spill] sm:$0xff] %v12698_v38  ;;  %v8138_v61 = vpop.eup %8137  ;;  %v4743_v42 = vadd.f32 %v8136_v30, %v4742_v48  ;;  %v7520_v54 = vmul.f32 -1.442695, %v4513_v34  ;;  %v4283_v48 = vmul.f32 %v12171_v31, %v4250_v0  ;;  %vm12747_vm9 = vcmp.eq.f32.partialorder %v4763_v10, 8.507059e+37 }
 0x4a2   : > { %v8140_v39 = vpop.eup %8139  ;;  %v12714_v44 = vadd.f32 1.0, %v8138_v61  ;;  %v15719_v21 = vrot.slane %v12698_v38, 6 }
 0x4a3   : > { %v12717_v41 = vpop.eup %8141  ;;  %v4747_v4 = vsel %vm4746_vm5, %v8136_v30, %v4743_v42  ;;  %v4755_v15 = vmul.f32 %v8140_v39, %v12670_v7  ;;  %8147 = vpow2.f32 %v7520_v54  ;;  %v16371_v54 = vrot.slane %v12597_v3, 7 }
 0x4a4   : > { %v12721_v24 = vpop.eup %8143  ;;  %v4752_v43 = vsel %vm12704_vm4, %v4751_v57, %v4747_v4  ;;  %8149 = vrcp.f32 %v12714_v44  ;;  %v4194_v5 = vmul.f32 %v12717_v41, %v12667_v8  ;;  %vm4760_vm11 = vweird.f32 %v8140_v39 }
 0x4a5   : > { %v5191_v34 = vrot.slane %v4752_v43, 7  ;;  %v5383_v61 = vmul.f32 %v12613_v46, %v4752_v43  ;;  %v4756_v30 = vsub.f32 1.0, %v4755_v15  ;;  %v5345_v16 = vsel %vm1856_vm7, %v16371_v54, %v5288_v58  ;;  %v12743_v15 = vpop.eup %8145  ;;  %vm4761_vm10 = vmor %vm4759_vm6, %vm4760_vm11 }
 0x4a6   : > { %v4766_v57 = vor.u32 1.1754944e-38, %v4765_v14  ;;  %v12751_v22 = vpack.c.bf16 %v4283_v48, %v4282_v50  ;;  %v4778_v14 = vand.u32 2147483647, %v12714_v44  ;;  %vm4774_vm12 = vweird.f32 %v12714_v44 }
 0x4a7   : > { %v5250_v46 = vsel %vm1856_vm7, %v15717_v27, %v5191_v34  ;;  %v5415_v0 = vadd.f32 %v5383_v61, %v12597_v3  ;;  %v4757_v4 = vmul.f32 %v8140_v39, %v4756_v30  ;;  %v16375_v3 = vrot.slane %v12700_v17, 7 }
 0x4a8   : > { %v12745_v1 = vmul.f32 %v5250_v46, %v4752_v43  ;;  %v4516_v42 = vpop.f32.mrf.mxu0  ;;  %v12758_v43 = vpop.f32.mrf.mxu3  ;;  %v4195_v30 = vmul.f32 %v12717_v41, %v4194_v5  ;;  %vm12788_vm15 = vcmp.eq.f32.partialorder %v4778_v14, 8.507059e+37 }
 0x4a9   : > { %v8148_v33 = vpop.eup %8147  ;;  %v5575_v27 = vrot.slane %v5415_v0, 6  ;;  %v4758_v49 = vadd.f32 %v8140_v39, %v4757_v4  ;;  %v5344_v61 = vsel %vm1856_vm7, %v5288_v58, %v16375_v3  ;;  %v7521_v48 = vmul.f32 -1.442695, %v4516_v42 }
 0x4aa   : > { %16372 = vst [vmem:[#allocation127_spill] sm:$0xff] %v12745_v1  ;;  %v8150_v10 = vpop.eup %8149  ;;  %v12763_v50 = vadd.f32 1.0, %v8148_v33  ;;  %v4780_v3 = vand.u32 2147483648, %v12714_v44  ;;  %v5290_v18 = vrot.slane %v12758_v43, 7 }
 0x4ab   : > { %v5634_v46 = vsel %vm2160_vm8, %v15719_v21, %v5575_v27  ;;  %v4762_v4 = vsel %vm4761_vm10, %v8140_v39, %v4758_v49  ;;  %v4770_v58 = vmul.f32 %v8150_v10, %v12714_v44  ;;  %4466 = vmatmul.bf16.gmra.mxu3 %v12693_v35  ;;  %4555 = vmatmul.bf16.gmra.mxu0 %v12693_v35  ;;  %vm4775_vm13 = vweird.f32 %v8150_v10 }
 0x4ac   : > { %v5671_v33 = vmul.f32 %v5634_v46, %v12745_v1  ;;  %v4767_v7 = vsel %vm12747_vm9, %v4766_v57, %v4762_v4  ;;  %8151 = vrcp.f32 %v12763_v50  ;;  %6900 = vmatmul.bf16.gmra.mxu1 %v12693_v35  ;;  %v4184_v49 = vmul.f32 %v12743_v15, %v12695_v26  ;;  %vm4776_vm2 = vmor %vm4774_vm12, %vm4775_vm13 }
 0x4ad   : > { %v5192_v39 = vrot.slane %v4767_v7, 7  ;;  %v5384_v42 = vmul.f32 %v5345_v16, %v4767_v7  ;;  %v4771_v5 = vsub.f32 1.0, %v4770_v58  ;;  %8153 = vpow2.f32 %v7521_v48 }
 0x4ae   : > { %v12782_v21 = vadd.f32 %v5671_v33, %v5415_v0  ;;  %v4196_v46 = vmul.f32 0.5, %v4195_v30  ;;  %v4781_v16 = vor.u32 1.1754944e-38, %v4780_v3  ;;  %v4185_v0 = vmul.f32 %v12743_v15, %v4184_v49 }
 0x4af   : > { %v5249_v57 = vsel %vm1856_vm7, %v5191_v34, %v5192_v39  ;;  %v5416_v54 = vadd.f32 %v5384_v42, %v12633_v19  ;;  %v4772_v35 = vmul.f32 %v8150_v10, %v4771_v5  ;;  %v15733_v33 = vrot.slane %v12745_v1, 6  ;;  %v12794_v34 = vpop.f32.mrf.mxu1 }
 0x4b0   : > { %16376 = vst [vmem:[#allocation42_spill] sm:$0xff] %v12782_v21  ;;  %v5448_v4 = vmul.f32 %v5249_v57, %v4767_v7  ;;  %v4518_v58 = vpop.f32.mrf.mxu0  ;;  %v4793_v14 = vand.u32 2147483647, %v12763_v50  ;;  %v16380_v7 = vrot.slane %v12700_v17, 7  ;;  %v4197_v49 = vsub.f32 1.5, %v4196_v46 }
 0x4b1   : > { %v5576_v48 = vrot.slane %v5416_v54, 6  ;;  %v4773_v30 = vadd.f32 %v8150_v10, %v4772_v35  ;;  %v7522_v38 = vmul.f32 -1.442695, %v4518_v58  ;;  %16379 = vst [vmem:[#allocation86_spill] sm:$0xff] %v12794_v34  ;;  %v4795_v35 = vand.u32 2147483648, %v12763_v50  ;;  %v12807_v58 = vpop.f32.mrf.mxu3 }
 0x4b2   : > { %v8152_v60 = vpop.eup %8151  ;;  %v5480_v19 = vrot.slane %v5448_v4, 6  ;;  %v5343_v3 = vsel %vm1856_vm7, %v16380_v7, %v5290_v18  ;;  %v15734_v53 = vrot.slane %v12782_v21, 4  ;;  %v15736_v1 = vrot.slane %v12807_v58, 7 }
 0x4b3   : > { %v5633_v42 = vsel %vm2160_vm8, %v5575_v27, %v5576_v48  ;;  %v4777_v5 = vsel %vm4776_vm2, %v8150_v10, %v4773_v30  ;;  %v4785_v57 = vmul.f32 %v8152_v60, %v12763_v50  ;;  %v8154_v44 = vpop.eup %8153  ;;  %8155 = vpow2.f32 %v7522_v38 }
 0x4b4   : > { %v5537_v34 = vsel %vm2160_vm8, %v15733_v33, %v5480_v19  ;;  %v5672_v63 = vmul.f32 %v5633_v42, %v5448_v4  ;;  %v4782_v46 = vsel %vm12788_vm15, %v4781_v16, %v4777_v5  ;;  %v12818_v32 = vadd.f32 1.0, %v8154_v44 }
 0x4b5   : > { %v12815_v7 = vmul.f32 %v5537_v34, %v5448_v4  ;;  %v5193_v27 = vrot.slane %v4782_v46, 7  ;;  %v5385_v10 = vmul.f32 %v5344_v61, %v4782_v46  ;;  %v4786_v30 = vsub.f32 1.0, %v4785_v57 }
 0x4b6   : > { %v5704_v55 = vadd.f32 %v5672_v63, %v5416_v54  ;;  %vm4790_vm0 = vweird.f32 %v8152_v60  ;;  %8157 = vrcp.f32 %v12818_v32  ;;  %v12825_v61 = vmul.f32 0.5, %v4185_v0 }
 0x4b7   : > { %16381 = vst [vmem:[#allocation70_spill] sm:$0xff] %v12815_v7  ;;  %v5248_v33 = vsel %vm1856_vm7, %v5192_v39, %v5193_v27  ;;  %v5417_v42 = vadd.f32 %v5385_v10, %v12700_v17  ;;  %v4787_v25 = vmul.f32 %v8152_v60, %v4786_v30  ;;  %vm4789_vm3 = vweird.f32 %v12763_v50  ;;  %v12846_v57 = vpop.f32.mrf.mxu1 }
 0x4b8   : > { %v5864_v38 = vrot.slane %v5704_v55, 4  ;;  %v5449_v4 = vmul.f32 %v5248_v33, %v4782_v46  ;;  %v12829_v63 = vmul.f32 %v12717_v41, %v4197_v49  ;;  %vm4791_vm1 = vmor %vm4789_vm3, %vm4790_vm0  ;;  %v4796_v33 = vor.u32 1.1754944e-38, %v4795_v35  ;;  %16382 = vst [vmem:[#allocation107_spill] sm:$0xff] %v12846_v57  ;;  %v4521_v30 = vpop.f32.mrf.mxu0 }
 0x4b9   : > { %v5577_v16 = vrot.slane %v5417_v42, 6  ;;  %v4788_v34 = vadd.f32 %v8152_v60, %v4787_v25  ;;  %v8156_v54 = vpop.eup %8155  ;;  %v12839_v0 = vsel %vm1856_vm7, %v5290_v18, %v15736_v1  ;;  %vm4794_vm4 = vcmp.eq.f32.partialorder %v4793_v14, 8.507059e+37 }
 0x4ba   : > { %v5921_v17 = vsel %vm2464_vm14, %v15734_v53, %v5864_v38  ;;  %v5481_v39 = vrot.slane %v5449_v4, 6  ;;  %vm4804_vm5 = vweird.f32 %v12818_v32  ;;  %vm4199_vm10 = vweird.f32 %v12667_v8 }
 0x4bb   : > { %v5960_v50 = vmul.f32 %v5921_v17, %v12815_v7  ;;  %v5632_v49 = vsel %vm2160_vm8, %v5576_v48, %v5577_v16  ;;  %v4792_v5 = vsel %vm4791_vm1, %v8152_v60, %v4788_v34  ;;  %4471 = vmatmul.bf16.gmra.mxu3 %v12751_v22  ;;  %4560 = vmatmul.bf16.gmra.mxu0 %v12751_v22  ;;  %v15735_v17 = vrot.slane %v12815_v7, 4 }
 0x4bc   : > { %v5536_v35 = vsel %vm2160_vm8, %v5480_v19, %v5481_v39  ;;  %v5673_v44 = vmul.f32 %v5632_v49, %v5449_v4  ;;  %v12850_v46 = vsel %vm4794_vm4, %v4796_v33, %v4792_v5  ;;  %6905 = vmatmul.bf16.gmra.mxu1 %v12751_v22  ;;  %v8158_v25 = vpop.eup %8157  ;;  %v4808_v19 = vand.u32 2147483647, %v12818_v32 }
 0x4bd   : > { %v12854_v10 = vadd.f32 %v5960_v50, %v5704_v55  ;;  %v5737_v60 = vmul.f32 %v5536_v35, %v5449_v4  ;;  %v5194_v48 = vrot.slane %v12850_v46, 7  ;;  %v5386_v14 = vmul.f32 %v5343_v3, %v12850_v46 }
 0x4be   : > { %v5705_v34 = vadd.f32 %v5673_v44, %v5417_v42  ;;  %v12860_v33 = vadd.f32 1.0, %v8156_v54  ;;  %v4800_v3 = vmul.f32 %v8158_v25, %v12818_v32  ;;  %v4810_v50 = vand.u32 2147483648, %v12818_v32 }
 0x4bf   : > { %16383 = vst [vmem:[#allocation38_spill] sm:$0xff] %v12854_v10  ;;  %v5769_v49 = vrot.slane %v5737_v60, 4  ;;  %v5247_v55 = vsel %vm1856_vm7, %v5193_v27, %v5194_v48  ;;  %v12867_v22 = vadd.f32 %v5386_v14, %v12758_v43  ;;  %vm12886_vm6 = vcmp.eq.f32.partialorder %v4808_v19, 8.507059e+37 }
 0x4c0   : > { %v5865_v4 = vrot.slane %v5705_v34, 4  ;;  %v12871_v42 = vmul.f32 %v5247_v55, %v12850_v46  ;;  %8159 = vrcp.f32 %v12860_v33  ;;  %v4801_v5 = vsub.f32 1.0, %v4800_v3  ;;  %v12890_v55 = vpop.f32.mrf.mxu3 }
 0x4c1   : > { %v5824_v54 = vsel %vm2464_vm14, %v15735_v17, %v5769_v49  ;;  %v15737_v27 = vrot.slane %v12867_v22, 6  ;;  %vm4805_vm11 = vweird.f32 %v8158_v25  ;;  %v4811_v18 = vor.u32 1.1754944e-38, %v4810_v50 }
 0x4c2   : > { %v5920_v43 = vsel %vm2464_vm14, %v5864_v38, %v5865_v4  ;;  %v12883_v35 = vmul.f32 %v5824_v54, %v5737_v60  ;;  %v15738_v44 = vrot.slane %v12871_v42, 6  ;;  %v4802_v17 = vmul.f32 %v8158_v25, %v4801_v5  ;;  %vm4806_vm9 = vmor %vm4804_vm5, %vm4805_vm11 }
 0x4c3   : > { %v5961_v53 = vmul.f32 %v5920_v43, %v5737_v60  ;;  %v5631_v3 = vsel %vm2160_vm8, %v5577_v16, %v15737_v27  ;;  %vm4200_vm12 = vweird.f32 %v12717_v41  ;;  %vm4819_vm13 = vweird.f32 %v12860_v33 }
 0x4c4   : > { %16384 = vst [vmem:[#allocation122_spill] sm:$0xff] %v12883_v35  ;;  %v6121_v38 = vmul.f32 %v12883_v35, %v12854_v10  ;;  %v5535_v19 = vsel %vm2160_vm8, %v5481_v39, %v15738_v44  ;;  %v5674_v54 = vmul.f32 %v5631_v3, %v12871_v42  ;;  %v4803_v43 = vadd.f32 %v8158_v25, %v4802_v17  ;;  %vm12989_vm3 = vmor %vm4199_vm10, %vm4200_vm12 }
 0x4c5   : > { %v5993_v1 = vadd.f32 %v5961_v53, %v5705_v34  ;;  %v12904_v60 = vmul.f32 %v5535_v19, %v12871_v42  ;;  %v4823_v53 = vand.u32 2147483647, %v12860_v33  ;;  %v7523_v39 = vmul.f32 -1.442695, %v4521_v30  ;;  %v4523_v19 = vpop.f32.mrf.mxu0 }
 0x4c6   : > { %v8160_v5 = vpop.eup %8159  ;;  %v12908_v27 = vadd.f32 %v5674_v54, %v12867_v22  ;;  %v4807_v50 = vsel %vm4806_vm9, %v8158_v25, %v4803_v43  ;;  %v4825_v44 = vand.u32 2147483648, %v12860_v33  ;;  %vm4169_vm1 = vweird.f32 %v12560_v51 }
 0x4c7   : > { %v12916_v34 = vadd.f32 %v6121_v38, %v5993_v1  ;;  %v15739_v17 = vrot.slane %v12904_v60, 4  ;;  %v4815_v3 = vmul.f32 %v8160_v5, %v12860_v33  ;;  %v4812_v54 = vsel %vm12886_vm6, %v4811_v18, %v4807_v50 }
 0x4c8   : > { %v15740_v32 = vrot.slane %v12908_v27, 4  ;;  %8161 = vpow2.f32 %v7523_v39  ;;  %v5195_v38 = vrot.slane %v4812_v54, 7  ;;  %v5387_v16 = vmul.f32 %v12839_v0, %v4812_v54  ;;  %v3870_v39 = vpop.xlane.xlu1 %3869 }
 0x4c9   : > { %16387 = vst [vmem:[#allocation46_spill] sm:$0xff] %v12916_v34  ;;  %v5823_v30 = vsel %vm2464_vm14, %v5769_v49, %v15739_v17  ;;  %v4816_v25 = vsub.f32 1.0, %v4815_v3  ;;  %vm4820_vm15 = vweird.f32 %v8160_v5  ;;  %v7524_v18 = vmul.f32 -1.442695, %v4523_v19  ;;  %v12949_v19 = vpop.f32.mrf.mxu3 }
 0x4ca   : > { %v5919_v43 = vsel %vm2464_vm14, %v5865_v4, %v15740_v32  ;;  %v12934_v14 = vmul.f32 %v5823_v30, %v12904_v60  ;;  %v5246_v49 = vsel %vm1856_vm7, %v5194_v48, %v5195_v38  ;;  %v5419_v0 = vadd.f32 %v5387_v16, %v12807_v58  ;;  %vm4821_vm2 = vmor %vm4819_vm13, %vm4820_vm15 }
 0x4cb   : > { %v5962_v50 = vmul.f32 %v5919_v43, %v12904_v60  ;;  %v4817_v3 = vmul.f32 %v8160_v5, %v4816_v25  ;;  %v12947_v30 = vmul.f32 %v5246_v49, %v4812_v54  ;;  %8163 = vpow2.f32 %v7524_v18 }
 0x4cc   : > { %v6122_v17 = vmul.f32 %v12934_v14, %v5993_v1  ;;  %v12945_v4 = vmul.f32 %v12934_v14, %v12883_v35  ;;  %v5579_v46 = vrot.slane %v5419_v0, 6  ;;  %v12952_v57 = vmax.f32 %v3870_v39, 1e-24 }
 0x4cd   : > { %v5994_v43 = vadd.f32 %v5962_v50, %v12908_v27  ;;  %v4818_v32 = vadd.f32 %v8160_v5, %v4817_v3  ;;  %v5483_v16 = vrot.slane %v12947_v30, 6  ;;  %vm4824_vm0 = vcmp.eq.f32.partialorder %v4823_v53, 8.507059e+37  ;;  %v12964_v50 = vpop.f32.mrf.mxu1 }
 0x4ce   : > { %16388 = vst [vmem:[#allocation47_spill] sm:$0xff] %v12945_v4  ;;  %v8162_v48 = vpop.eup %8161  ;;  %v4826_v1 = vor.u32 1.1754944e-38, %v4825_v44  ;;  %v16389_v54 = vrot.slane %v12890_v55, 7  ;;  %v16390_v25 = vrot.slane %v12807_v58, 7  ;;  %v16393_v49 = vrot.slane %v12867_v22, 6  ;;  %v3868_v44 = vpop.xlane.xlu0 %3867 }
 0x4cf   : > { %16391 = vst [vmem:[#allocation43_spill] sm:$0xff] %v12964_v50  ;;  %v12966_v39 = vadd.f32 %v6122_v17, %v5994_v43  ;;  %v4822_v33 = vsel %vm4821_vm2, %v8160_v5, %v4818_v32  ;;  %v12972_v10 = vadd.f32 1.0, %v8162_v48  ;;  %v16394_v53 = vrot.slane %v12871_v42, 6  ;;  %v4526_v50 = vpop.f32.mrf.mxu0 }
 0x4d0   : > { %v5341_v18 = vsel %vm1856_vm7, %v16390_v25, %v16389_v54  ;;  %v5630_v3 = vsel %vm2160_vm8, %v16393_v49, %v5579_v46  ;;  %v12979_v25 = vsel %vm4824_vm0, %v4826_v1, %v4822_v33  ;;  %8165 = vrsqrt.f32 %v12952_v57 }
 0x4d1   : > { %16392 = vst [vmem:[#allocation49_spill] sm:$0xff] %v12966_v39  ;;  %v5534_v58 = vsel %vm2160_vm8, %v16394_v53, %v5483_v16  ;;  %v5675_v54 = vmul.f32 %v5630_v3, %v12947_v30  ;;  %v15742_v42 = vrot.slane %v12979_v25, 7  ;;  %v5388_v17 = vmul.f32 %v5341_v18, %v12979_v25  ;;  %v8164_v32 = vpop.eup %8163 }
 0x4d2   : > { %v12983_v22 = vmul.f32 %v5534_v58, %v12947_v30  ;;  %8167 = vrcp.f32 %v12972_v10  ;;  %v16397_v48 = vsub.f32 1.5, %v12672_v56  ;;  %v13002_v8 = vmax.f32 %v3868_v44, 1e-24 }
 0x4d3   : > { %v5707_v1 = vadd.f32 %v5675_v54, %v5419_v0  ;;  %v5245_v18 = vsel %vm1856_vm7, %v5195_v38, %v15742_v42  ;;  %v13010_v33 = vadd.f32 %v5388_v17, %v12890_v55  ;;  %v13012_v53 = vadd.f32 1.0, %v8164_v32 }
 0x4d4   : > { %v12999_v30 = vmul.f32 %v12599_v36, %v16397_v48  ;;  %v5771_v3 = vrot.slane %v12983_v22, 4  ;;  %v16398_v56 = vsub.f32 1.5, %v12691_v47  ;;  %v13024_v54 = vmul.f32 %v5245_v18, %v12979_v25 }
 0x4d5   : > { %v5867_v58 = vrot.slane %v5707_v1, 4  ;;  %v16399_v38 = vrot.slane %v12904_v60, 4  ;;  %v16400_v32 = vsub.f32 1.5, %v12825_v61  ;;  %v15743_v48 = vrot.slane %v13010_v33, 6  ;;  %v13046_v61 = vpop.f32.mrf.mxu3 }
 0x4d6   : > { %v13017_v0 = vmul.f32 %v12621_v28, %v16398_v56  ;;  %8169 = vrcp.f32 %v13012_v53  ;;  %v13037_v56 = vpop.eup %8165  ;;  %v16401_v44 = vrot.slane %v12908_v27, 4  ;;  %v16402_v27 = vrot.slane %v12949_v19, 7 }
 0x4d7   : > { %v5822_v17 = vsel %vm2464_vm14, %v16399_v38, %v5771_v3  ;;  %v13033_v47 = vmul.f32 %v12743_v15, %v16400_v32  ;;  %8171 = vrsqrt.f32 %v13002_v8  ;;  %v5629_v49 = vsel %vm2160_vm8, %v5579_v46, %v15743_v48 }
 0x4d8   : > { %v5918_v18 = vsel %vm2464_vm14, %v16401_v44, %v5867_v58  ;;  %v6027_v60 = vmul.f32 %v5822_v17, %v12983_v22  ;;  %v8168_v32 = vpop.eup %8167  ;;  %v16403_v44 = vrot.slane %v12890_v55, 7  ;;  %v4214_v38 = vmul.f32 %v13037_v56, %v12952_v57 }
 0x4d9   : > { %v5963_v42 = vmul.f32 %v5918_v18, %v12983_v22  ;;  %vm4170_vm4 = vweird.f32 %v12599_v36  ;;  %v16405_v46 = vrot.slane %v13024_v54, 6  ;;  %v5676_v48 = vmul.f32 %v5629_v49, %v13024_v54 }
 0x4da   : > { %v5340_v17 = vsel %vm1856_vm7, %v16403_v44, %v16402_v27  ;;  %v6123_v22 = vmul.f32 %v6027_v60, %v5994_v43  ;;  %v13064_v18 = vmul.f32 %v6027_v60, %v12934_v14  ;;  %v13071_v27 = vpop.f32.mrf.mxu1  ;;  %vm4179_vm5 = vweird.f32 %v12573_v62  ;;  %vm13142_vm15 = vmor %vm4169_vm1, %vm4170_vm4 }
 0x4db   : > { %v5533_v55 = vsel %vm2160_vm8, %v5483_v16, %v16405_v46  ;;  %16406 = vst [vmem:[#allocation50_spill] sm:$0xff] %v13071_v27  ;;  %vm4180_vm6 = vweird.f32 %v12621_v28  ;;  %v5995_v44 = vadd.f32 %v5963_v42, %v5707_v1  ;;  %v4830_v14 = vmul.f32 %v8168_v32, %v12972_v10 }
 0x4dc   : > { %16404 = vst [vmem:[#allocation39_spill] sm:$0xff] %v13064_v18  ;;  %v13076_v21 = vmul.f32 %v5533_v55, %v13024_v54  ;;  %v6283_v35 = vmul.f32 %v13064_v18, %v12916_v34  ;;  %v13083_v16 = vadd.f32 %v5676_v48, %v13010_v33  ;;  %v4840_v49 = vand.u32 2147483648, %v12972_v10  ;;  %v13086_v27 = vpop.eup %8169  ;;  %vm13154_vm0 = vmor %vm4179_vm5, %vm4180_vm6 }
 0x4dd   : > { %v7525_v46 = vmul.f32 -1.442695, %v4526_v50  ;;  %v13088_v7 = vadd.f32 %v6123_v22, %v5995_v44  ;;  %v4831_v1 = vsub.f32 1.0, %v4830_v14  ;;  %v4215_v55 = vmul.f32 %v13037_v56, %v4214_v38  ;;  %v13092_v12 = vpop.eup %8171 }
 0x4de   : > { %v15756_v42 = vrot.slane %v13076_v21, 4  ;;  %v15757_v43 = vrot.slane %v13083_v16, 4  ;;  %vm4835_vm11 = vweird.f32 %v8168_v32  ;;  %v4838_v48 = vand.u32 2147483647, %v12972_v10 }
 0x4df   : > { %v4845_v34 = vmul.f32 %v13086_v27, %v13012_v53  ;;  %v13099_v50 = vadd.f32 %v6283_v35, %v13088_v7  ;;  %v4832_v14 = vmul.f32 %v8168_v32, %v4831_v1  ;;  %v4204_v38 = vmul.f32 %v13092_v12, %v13002_v8 }
 0x4e0   : > { %v5821_v22 = vsel %vm2464_vm14, %v5771_v3, %v15756_v42  ;;  %v5917_v52 = vsel %vm2464_vm14, %v5867_v58, %v15757_v43  ;;  %vm4834_vm9 = vweird.f32 %v12972_v10  ;;  %v4841_v9 = vor.u32 1.1754944e-38, %v4840_v49  ;;  %v13123_v43 = vpop.f32.mrf.mxu3 }
 0x4e1   : > { %16407 = vst [vmem:[#allocation44_spill] sm:$0xff] %v13099_v50  ;;  %v13112_v29 = vmul.f32 %v5821_v22, %v13076_v21  ;;  %v4846_v35 = vsub.f32 1.0, %v4845_v34  ;;  %v5964_v11 = vmul.f32 %v5917_v52, %v13076_v21  ;;  %v4833_v6 = vadd.f32 %v8168_v32, %v4832_v14  ;;  %vm4836_vm10 = vmor %vm4834_vm9, %vm4835_vm11 }
 0x4e2   : > { %v4216_v3 = vmul.f32 0.5, %v4215_v55  ;;  %v4205_v58 = vmul.f32 %v13092_v12, %v4204_v38  ;;  %vm4839_vm12 = vcmp.eq.f32.partialorder %v4838_v48, 8.507059e+37  ;;  %vm4850_vm13 = vweird.f32 %v13086_v27  ;;  %v13136_v55 = vpop.f32.mrf.mxu1 }
 0x4e3   : > { %v6124_v1 = vmul.f32 %v13112_v29, %v5995_v44  ;;  %v13118_v42 = vmul.f32 %v13112_v29, %v6027_v60  ;;  %v4847_v22 = vmul.f32 %v13086_v27, %v4846_v35  ;;  %v13126_v10 = vadd.f32 %v5964_v11, %v13083_v16  ;;  %16409 = vst [vmem:[#allocation41_spill] sm:$0xff] %v13136_v55 }
 0x4e4   : > { %v4837_v52 = vsel %vm4836_vm10, %v8168_v32, %v4833_v6  ;;  %v4853_v49 = vand.u32 2147483647, %v13012_v53  ;;  %vm4849_vm2 = vweird.f32 %v13012_v53  ;;  %v4217_v51 = vsub.f32 1.5, %v4216_v3 }
 0x4e5   : > { %v6284_v34 = vmul.f32 %v13118_v42, %v12966_v39  ;;  %v13133_v60 = vmul.f32 %v13118_v42, %v12945_v4  ;;  %v4842_v44 = vsel %vm4839_vm12, %v4841_v9, %v4837_v52  ;;  %v13147_v6 = vadd.f32 %v6124_v1, %v13126_v10  ;;  %v4528_v1 = vpop.f32.mrf.mxu0  ;;  %vm4851_vm5 = vmor %vm4849_vm2, %vm4850_vm13 }
 0x4e6   : > { %v5197_v32 = vrot.slane %v4842_v44, 7  ;;  %v5389_v48 = vmul.f32 %v5340_v17, %v4842_v44  ;;  %v13158_v14 = vmul.f32 0.5, %v4205_v58  ;;  %v4848_v38 = vadd.f32 %v13086_v27, %v4847_v22 }
 0x4e7   : > { %16408 = vst [vmem:[#allocation51_spill] sm:$0xff] %v13133_v60  ;;  %v4855_v35 = vand.u32 2147483648, %v13012_v53  ;;  %v13163_v17 = vadd.f32 %v6284_v34, %v13147_v6  ;;  %v16415_v52 = vrot.slane %v12979_v25, 7  ;;  %vm4219_vm1 = vweird.f32 %v12952_v57 }
 0x4e8   : > { %v5421_v55 = vadd.f32 %v5389_v48, %v12949_v19  ;;  %vm4220_vm4 = vweird.f32 %v13037_v56  ;;  %v16416_v53 = vrot.slane %v13046_v61, 7  ;;  %v16417_v3 = vrot.slane %v12949_v19, 7 }
 0x4e9   : > { %16414 = vst [vmem:[#allocation54_spill] sm:$0xff] %v13163_v17  ;;  %v5244_v62 = vsel %vm1856_vm7, %v16415_v52, %v5197_v32  ;;  %v4852_v22 = vsel %vm4851_vm5, %v13086_v27, %v4848_v38  ;;  %vm4854_vm6 = vcmp.eq.f32.partialorder %v4853_v49, 8.507059e+37  ;;  %v4856_v34 = vor.u32 1.1754944e-38, %v4855_v35  ;;  %vm13259_vm10 = vmor %vm4219_vm1, %vm4220_vm4 }
 0x4ea   : > { %v5339_v58 = vsel %vm1856_vm7, %v16417_v3, %v16416_v53  ;;  %v5453_v25 = vmul.f32 %v5244_v62, %v4842_v44  ;;  %v5581_v48 = vrot.slane %v5421_v55, 6  ;;  %8173 = vpow2.f32 %v7525_v46 }
 0x4eb   : > { %v4172_v52 = vsel %vm13142_vm15, %v12599_v36, %v12999_v30  ;;  %v4182_v19 = vsel %vm13154_vm0, %v12621_v28, %v13017_v0  ;;  %vm4189_vm11 = vweird.f32 %v12695_v26  ;;  %vm4190_vm9 = vweird.f32 %v12743_v15 }
 0x4ec   : > { %v5485_v44 = vrot.slane %v5453_v25, 6  ;;  %v13192_v27 = vmul.f32 %v13037_v56, %v4217_v51  ;;  %v13194_v49 = vsel %vm4854_vm6, %v4856_v34, %v4852_v22  ;;  %v4251_v46 = vmul.f32 %v4172_v52, %v12015_v20  ;;  %vm13287_vm15 = vmor %vm4189_vm11, %vm4190_vm9 }
 0x4ed   : > { %v16418_v11 = vrot.slane %v13010_v33, 6  ;;  %v4207_v30 = vsub.f32 1.5, %v13158_v14  ;;  %v15762_v28 = vrot.slane %v13194_v49, 7  ;;  %v5390_v0 = vmul.f32 %v5339_v58, %v13194_v49  ;;  %v13210_v33 = vpop.f32.mrf.mxu3 }
 0x4ee   : > { %v16419_v9 = vrot.slane %v13024_v54, 6  ;;  %v4252_v35 = vmul.f32 %v4182_v19, %v12047_v40  ;;  %v4284_v62 = vmul.f32 %v12171_v31, %v4251_v46  ;;  %v5295_v54 = vrot.slane %v13123_v43, 7  ;;  %v4531_v19 = vpop.f32.mrf.mxu0 }
 0x4ef   : > { %v5628_v36 = vsel %vm2160_vm8, %v16418_v11, %v5581_v48  ;;  %v5243_v14 = vsel %vm1856_vm7, %v5197_v32, %v15762_v28  ;;  %v13217_v3 = vadd.f32 %v5390_v0, %v13046_v61  ;;  %v7526_v52 = vmul.f32 -1.442695, %v4528_v1 }
 0x4f0   : > { %v5532_v51 = vsel %vm2160_vm8, %v16419_v9, %v5485_v44  ;;  %v5677_v38 = vmul.f32 %v5628_v36, %v5453_v25  ;;  %v13221_v22 = vmul.f32 %v5243_v14, %v13194_v49  ;;  %v4285_v34 = vmul.f32 %v12171_v31, %v4252_v35  ;;  %v8174_v46 = vpop.eup %8173 }
 0x4f1   : > { %v5741_v53 = vmul.f32 %v5532_v51, %v5453_v25  ;;  %v13224_v25 = vpop.f32.mrf.mxu1  ;;  %v15761_v36 = vrot.slane %v13217_v3, 6  ;;  %v16421_v32 = vrot.slane %v13046_v61, 7  ;;  %v16422_v35 = vrot.slane %v13076_v21, 4 }
 0x4f2   : > { %v5709_v58 = vadd.f32 %v5677_v38, %v5421_v55  ;;  %16420 = vst [vmem:[#allocation56_spill] sm:$0xff] %v13224_v25  ;;  %v5296_v55 = vrot.slane %v13210_v33, 7  ;;  %v15760_v51 = vrot.slane %v13221_v22, 6  ;;  %v13235_v38 = vadd.f32 1.0, %v8174_v46 }
 0x4f3   : > { %v5773_v11 = vrot.slane %v5741_v53, 4  ;;  %v13231_v0 = vsel %vm1856_vm7, %v16421_v32, %v5295_v54  ;;  %v4303_v1 = vpack.c.bf16 %v4285_v34, %v4284_v62  ;;  %v5627_v61 = vsel %vm2160_vm8, %v5581_v48, %v15761_v36 }
 0x4f4   : > { %v5869_v9 = vrot.slane %v5709_v58, 4  ;;  %8175 = vpow2.f32 %v7526_v52  ;;  %v13249_v32 = vsel %vm1856_vm7, %v5295_v54, %v5296_v55  ;;  %v16423_v46 = vrot.slane %v13083_v16, 4 }
 0x4f5   : > { %v5820_v14 = vsel %vm2464_vm14, %v16422_v35, %v5773_v11  ;;  %v5531_v48 = vsel %vm2160_vm8, %v5485_v44, %v15760_v51  ;;  %v5678_v54 = vmul.f32 %v5627_v61, %v13221_v22  ;;  %4476 = vmatmul.bf16.gmra.mxu3 %v4303_v1  ;;  %vm4209_vm12 = vweird.f32 %v13002_v8  ;;  %4565 = vmatmul.bf16.gmra.mxu0 %v4303_v1 }
 0x4f6   : > { %v5916_v21 = vsel %vm2464_vm14, %v16423_v46, %v5869_v9  ;;  %v6029_v62 = vmul.f32 %v5820_v14, %v5741_v53  ;;  %v13270_v52 = vmul.f32 %v5531_v48, %v13221_v22  ;;  %8177 = vrcp.f32 %v13235_v38  ;;  %6910 = vmatmul.bf16.gmra.mxu1 %v4303_v1 }
 0x4f7   : > { %v5965_v16 = vmul.f32 %v5916_v21, %v5741_v53  ;;  %vm4210_vm13 = vweird.f32 %v13092_v12  ;;  %v13279_v44 = vadd.f32 %v5678_v54, %v13217_v3  ;;  %v13281_v53 = vpop.f32.mrf.mxu3  ;;  %v7527_v61 = vmul.f32 -1.442695, %v4531_v19 }
 0x4f8   : > { %v6125_v57 = vmul.f32 %v6029_v62, %v13126_v10  ;;  %v13275_v35 = vmul.f32 %v6029_v62, %v13112_v29  ;;  %v4222_v29 = vsel %vm13259_vm10, %v13037_v56, %v13192_v27  ;;  %v15759_v10 = vrot.slane %v13270_v52, 4  ;;  %vm13316_vm2 = vmor %vm4209_vm12, %vm4210_vm13 }
 0x4f9   : > { %v5997_v1 = vadd.f32 %v5965_v16, %v5709_v58  ;;  %v4208_v26 = vmul.f32 %v13092_v12, %v4207_v30  ;;  %v15758_v48 = vrot.slane %v13279_v44, 4  ;;  %v4533_v58 = vpop.f32.mrf.mxu0  ;;  %v16429_v56 = vsel %vm12989_vm3, %v12717_v41, %v12829_v63  ;;  %v13337_v16 = vpop.f32.mrf.mxu1 }
 0x4fa   : > { %v6285_v46 = vmul.f32 %v13275_v35, %v13088_v7  ;;  %v13300_v21 = vmul.f32 %v13275_v35, %v13064_v18  ;;  %v8176_v54 = vpop.eup %8175  ;;  %v4254_v27 = vmul.f32 %v16429_v56, %v12079_v45  ;;  %v5819_v30 = vsel %vm2464_vm14, %v5773_v11, %v15759_v10  ;;  %16432 = vst [vmem:[#allocation55_spill] sm:$0xff] %v13337_v16 }
 0x4fb   : > { %v13310_v19 = vadd.f32 %v6125_v57, %v5997_v1  ;;  %8179 = vpow2.f32 %v7527_v61  ;;  %v5915_v41 = vsel %vm2464_vm14, %v5869_v9, %v15758_v48  ;;  %v13329_v63 = vmul.f32 %v5819_v30, %v13270_v52 }
 0x4fc   : > { %16428 = vst [vmem:[#allocation45_spill] sm:$0xff] %v13300_v21  ;;  %v13331_v5 = vadd.f32 1.0, %v8176_v54  ;;  %v4192_v8 = vsel %vm13287_vm15, %v12743_v15, %v13033_v47  ;;  %v8178_v34 = vpop.eup %8177  ;;  %v13343_v57 = vmul.f32 %v4222_v29, %v12088_v13  ;;  %v5966_v9 = vmul.f32 %v5915_v41, %v13270_v52 }
 0x4fd   : > { %v13340_v11 = vadd.f32 %v6285_v46, %v13310_v19  ;;  %v4253_v61 = vmul.f32 %v4192_v8, %v12065_v37  ;;  %v4212_v54 = vsel %vm13316_vm2, %v13092_v12, %v4208_v26  ;;  %v6126_v14 = vmul.f32 %v13329_v63, %v5997_v1 }
 0x4fe   : > { %v13352_v15 = vmul.f32 %v13329_v63, %v6029_v62  ;;  %v4860_v47 = vmul.f32 %v8178_v34, %v13235_v38  ;;  %v13356_v46 = vadd.f32 %v5966_v9, %v13279_v44  ;;  %v4868_v29 = vand.u32 2147483647, %v13235_v38 }
 0x4ff   : > { %16433 = vst [vmem:[#allocation61_spill] sm:$0xff] %v13340_v11  ;;  %v4870_v56 = vand.u32 2147483648, %v13235_v38  ;;  %8181 = vrcp.f32 %v13331_v5  ;;  %v4287_v1 = vmul.f32 %v12171_v31, %v4254_v27  ;;  %v13368_v26 = vpop.f32.mrf.mxu3  ;;  %vm4865_vm3 = vweird.f32 %v8178_v34 }
 0x500   : > { %v6286_v7 = vmul.f32 %v13352_v15, %v13147_v6  ;;  %v13365_v12 = vmul.f32 %v13352_v15, %v13118_v42  ;;  %v4861_v62 = vsub.f32 1.0, %v4860_v47  ;;  %v13371_v41 = vadd.f32 %v6126_v14, %v13356_v46 }
 0x501   : > { %v8180_v30 = vpop.eup %8179  ;;  %v4286_v8 = vmul.f32 %v12171_v31, %v4253_v61  ;;  %v5297_v9 = vrot.slane %v13281_v53, 7  ;;  %v4883_v6 = vand.u32 2147483647, %v13331_v5  ;;  %v7528_v42 = vmul.f32 -1.442695, %v4533_v58  ;;  %v4536_v47 = vpop.f32.mrf.mxu0 }
 0x502   : > { %16434 = vst [vmem:[#allocation57_spill] sm:$0xff] %v13365_v12  ;;  %v4862_v48 = vmul.f32 %v8178_v34, %v4861_v62  ;;  %v13376_v10 = vadd.f32 1.0, %v8180_v30  ;;  %v13379_v27 = vadd.f32 %v6286_v7, %v13371_v41  ;;  %v4885_v51 = vand.u32 2147483648, %v13331_v5 }
 0x503   : > { %v13386_v14 = vsel %vm1856_vm7, %v5296_v55, %v5297_v9  ;;  %v5298_v61 = vrot.slane %v13368_v26, 7  ;;  %vm4864_vm0 = vweird.f32 %v13235_v38  ;;  %v4304_v58 = vpack.c.bf16 %v4287_v1, %v4286_v8  ;;  %v13398_v38 = vpop.f32.mrf.mxu1 }
 0x504   : > { %16435 = vst [vmem:[#allocation65_spill] sm:$0xff] %v13379_v27  ;;  %v4863_v62 = vadd.f32 %v8178_v34, %v4862_v48  ;;  %8183 = vrcp.f32 %v13376_v10  ;;  %vm4866_vm1 = vmor %vm4864_vm0, %vm4865_vm3  ;;  %v4871_v7 = vor.u32 1.1754944e-38, %v4870_v56  ;;  %v7529_v28 = vmul.f32 -1.442695, %v4536_v47 }
 0x505   : > { %v8182_v30 = vpop.eup %8181  ;;  %8185 = vpow2.f32 %v7528_v42  ;;  %v13394_v36 = vsel %vm1856_vm7, %v5297_v9, %v5298_v61  ;;  %v4255_v55 = vmul.f32 %v4212_v54, %v12085_v23  ;;  %vm4869_vm4 = vcmp.eq.f32.partialorder %v4868_v29, 8.507059e+37  ;;  %4481 = vmatmul.bf16.gmra.mxu3 %v4304_v58  ;;  %16436 = vst [vmem:[#allocation48_spill] sm:$0xff] %v13398_v38  ;;  %4570 = vmatmul.bf16.gmra.mxu0 %v4304_v58 }
 0x506   : > { %v4867_v13 = vsel %vm4866_vm1, %v8178_v34, %v4863_v62  ;;  %v4875_v48 = vmul.f32 %v8182_v30, %v13331_v5  ;;  %vm4879_vm5 = vweird.f32 %v13331_v5  ;;  %vm13401_vm6 = vcmp.eq.f32.partialorder %v4883_v6, 8.507059e+37  ;;  %6915 = vmatmul.bf16.gmra.mxu1 %v4304_v58 }
 0x507   : > { %v4872_v1 = vsel %vm4869_vm4, %v4871_v7, %v4867_v13  ;;  %v4886_v8 = vor.u32 1.1754944e-38, %v4885_v51  ;;  %8187 = vpow2.f32 %v7529_v28  ;;  %v13406_v29 = vpop.f32.mrf.mxu3  ;;  %vm4894_vm11 = vweird.f32 %v13376_v10 }
 0x508   : > { %v5199_v9 = vrot.slane %v4872_v1, 7  ;;  %v5391_v54 = vmul.f32 %v13231_v0, %v4872_v1  ;;  %v4876_v34 = vsub.f32 1.0, %v4875_v48  ;;  %v4898_v13 = vand.u32 2147483647, %v13376_v10 }
 0x509   : > { %v4900_v42 = vand.u32 2147483648, %v13376_v10  ;;  %v15765_v6 = vrot.slane %v13406_v29, 7  ;;  %v16439_v51 = vrot.slane %v13194_v49, 7  ;;  %vm4880_vm9 = vweird.f32 %v8182_v30 }
 0x50a   : > { %v8184_v47 = vpop.eup %8183  ;;  %v5423_v0 = vadd.f32 %v5391_v54, %v13123_v43  ;;  %v4877_v58 = vmul.f32 %v8182_v30, %v4876_v34  ;;  %v4288_v38 = vmul.f32 %v12171_v31, %v4255_v55  ;;  %v4289_v43 = vmul.f32 %v12171_v31, %v13343_v57  ;;  %vm4881_vm10 = vmor %vm4879_vm5, %vm4880_vm9  ;;  %v4538_v31 = vpop.f32.mrf.mxu0 }
 0x50b   : > { %v5242_v62 = vsel %vm1856_vm7, %v16439_v51, %v5199_v9  ;;  %v8186_v28 = vpop.eup %8185  ;;  %v4890_v48 = vmul.f32 %v8184_v47, %v13376_v10  ;;  %v13423_v16 = vsel %vm1856_vm7, %v5298_v61, %v15765_v6  ;;  %vm13431_vm12 = vcmp.eq.f32.partialorder %v4898_v13, 8.507059e+37 }
 0x50c   : > { %v5455_v7 = vmul.f32 %v5242_v62, %v4872_v1  ;;  %v5583_v49 = vrot.slane %v5423_v0, 6  ;;  %v4878_v25 = vadd.f32 %v8182_v30, %v4877_v58  ;;  %v13425_v18 = vadd.f32 1.0, %v8186_v28 }
 0x50d   : > { %v4891_v1 = vsub.f32 1.0, %v4890_v48  ;;  %v4901_v34 = vor.u32 1.1754944e-38, %v4900_v42  ;;  %v8188_v51 = vpop.eup %8187  ;;  %v16442_v61 = vrot.slane %v13217_v3, 6  ;;  %vm4895_vm13 = vweird.f32 %v8184_v47 }
 0x50e   : > { %v5487_v54 = vrot.slane %v5455_v7, 6  ;;  %v4882_v58 = vsel %vm4881_vm10, %v8182_v30, %v4878_v25  ;;  %8189 = vrcp.f32 %v13425_v18  ;;  %v16443_v5 = vrot.slane %v13221_v22, 6  ;;  %v13447_v25 = vpop.f32.mrf.mxu1  ;;  %vm4896_vm15 = vmor %vm4894_vm11, %vm4895_vm13 }
 0x50f   : > { %v5626_v62 = vsel %vm2160_vm8, %v16442_v61, %v5583_v49  ;;  %v4887_v42 = vsel %vm13401_vm6, %v4886_v8, %v4882_v58  ;;  %v4892_v28 = vmul.f32 %v8184_v47, %v4891_v1  ;;  %v4305_v61 = vpack.c.bf16 %v4289_v43, %v4288_v38  ;;  %16444 = vst [vmem:[#allocation69_spill] sm:$0xff] %v13447_v25 }
 0x510   : > { %v5530_v57 = vsel %vm2160_vm8, %v16443_v5, %v5487_v54  ;;  %v5679_v13 = vmul.f32 %v5626_v62, %v5455_v7  ;;  %v5200_v3 = vrot.slane %v4887_v42, 7  ;;  %v5392_v6 = vmul.f32 %v13249_v32, %v4887_v42 }
 0x511   : > { %v5743_v48 = vmul.f32 %v5530_v57, %v5455_v7  ;;  %v4893_v39 = vadd.f32 %v8184_v47, %v4892_v28  ;;  %v13449_v4 = vadd.f32 1.0, %v8188_v51  ;;  %v13451_v22 = vmul.f32 -1.442695, %v4538_v31 }
 0x512   : > { %v5711_v30 = vadd.f32 %v5679_v13, %v5423_v0  ;;  %v5241_v62 = vsel %vm1856_vm7, %v5199_v9, %v5200_v3  ;;  %v5424_v56 = vadd.f32 %v5392_v6, %v13210_v33  ;;  %v4913_v32 = vand.u32 2147483647, %v13425_v18 }
 0x513   : > { %v5775_v23 = vrot.slane %v5743_v48, 4  ;;  %v5456_v8 = vmul.f32 %v5241_v62, %v4887_v42  ;;  %v4897_v0 = vsel %vm4896_vm15, %v8184_v47, %v4893_v39  ;;  %v4915_v7 = vand.u32 2147483648, %v13425_v18 }
 0x514   : > { %v5871_v38 = vrot.slane %v5711_v30, 4  ;;  %v13461_v43 = vpop.eup %8189  ;;  %v16445_v1 = vrot.slane %v13270_v52, 4  ;;  %v5584_v51 = vrot.slane %v5424_v56, 6  ;;  %v13469_v33 = vsel %vm13431_vm12, %v4901_v34, %v4897_v0 }
 0x515   : > { %8191 = vrcp.f32 %v13449_v4  ;;  %v16446_v10 = vrot.slane %v13279_v44, 4  ;;  %v5488_v47 = vrot.slane %v5456_v8, 6  ;;  %v5201_v58 = vrot.slane %v13469_v33, 7  ;;  %4486 = vmatmul.bf16.gmra.mxu3 %v4305_v61  ;;  %4575 = vmatmul.bf16.gmra.mxu0 %v4305_v61 }
 0x516   : > { %v5818_v9 = vsel %vm2464_vm14, %v16445_v1, %v5775_v23  ;;  %v5625_v31 = vsel %vm2160_vm8, %v5583_v49, %v5584_v51  ;;  %v5393_v55 = vmul.f32 %v13386_v14, %v13469_v33  ;;  %v4905_v34 = vmul.f32 %v13461_v43, %v13425_v18  ;;  %6920 = vmatmul.bf16.gmra.mxu1 %v4305_v61  ;;  %v13513_v0 = vpop.f32.mrf.mxu1 }
 0x517   : > { %v5914_v39 = vsel %vm2464_vm14, %v16446_v10, %v5871_v38  ;;  %v6031_v6 = vmul.f32 %v5818_v9, %v5743_v48  ;;  %vm4909_vm2 = vweird.f32 %v13425_v18  ;;  %v5529_v57 = vsel %vm2160_vm8, %v5487_v54, %v5488_v47  ;;  %16450 = vst [vmem:[#allocation53_spill] sm:$0xff] %v13513_v0 }
 0x518   : > { %v5967_v52 = vmul.f32 %v5914_v39, %v5743_v48  ;;  %v5680_v13 = vmul.f32 %v5625_v31, %v5456_v8  ;;  %v5744_v42 = vmul.f32 %v5529_v57, %v5456_v8  ;;  %v5240_v14 = vsel %vm1856_vm7, %v5200_v3, %v5201_v58  ;;  %v13528_v39 = vpop.f32.mrf.mxu3 }
 0x519   : > { %v6127_v44 = vmul.f32 %v6031_v6, %v13356_v46  ;;  %v13486_v5 = vmul.f32 %v6031_v6, %v13329_v63  ;;  %v13495_v28 = vadd.f32 %v5393_v55, %v13281_v53  ;;  %vm13497_vm3 = vcmp.eq.f32.partialorder %v4913_v32, 8.507059e+37 }
 0x51a   : > { %v5999_v49 = vadd.f32 %v5967_v52, %v5711_v30  ;;  %v5712_v48 = vadd.f32 %v5680_v13, %v5424_v56  ;;  %v13508_v30 = vmul.f32 %v5240_v14, %v13469_v33  ;;  %v5776_v62 = vrot.slane %v5744_v42, 4 }
 0x51b   : > { %v6287_v63 = vmul.f32 %v13486_v5, %v13310_v19  ;;  %v13505_v54 = vmul.f32 %v13486_v5, %v13275_v35  ;;  %v13510_v3 = vpop.eup %8191  ;;  %v5585_v32 = vrot.slane %v13495_v28, 6  ;;  %v4906_v8 = vsub.f32 1.0, %v4905_v34  ;;  %v13537_v34 = vpop.f32.mrf.mxu0 }
 0x51c   : > { %v6159_v53 = vadd.f32 %v6127_v44, %v5999_v49  ;;  %v5872_v61 = vrot.slane %v5712_v48, 4  ;;  %v5489_v35 = vrot.slane %v13508_v30, 6  ;;  %vm4910_vm0 = vweird.f32 %v13461_v43 }
 0x51d   : > { %16449 = vst [vmem:[#allocation62_spill] sm:$0xff] %v13505_v54  ;;  %v6447_v19 = vmul.f32 %v13505_v54, %v13099_v50  ;;  %v5817_v1 = vsel %vm2464_vm14, %v5775_v23, %v5776_v62  ;;  %v5624_v9 = vsel %vm2160_vm8, %v5584_v51, %v5585_v32  ;;  %v4907_v10 = vmul.f32 %v13461_v43, %v4906_v8  ;;  %vm4911_vm1 = vmor %vm4909_vm2, %vm4910_vm0 }
 0x51e   : > { %v13519_v56 = vadd.f32 %v6287_v63, %v6159_v53  ;;  %v5913_v52 = vsel %vm2464_vm14, %v5871_v38, %v5872_v61  ;;  %v6032_v31 = vmul.f32 %v5817_v1, %v5744_v42  ;;  %v5528_v55 = vsel %vm2160_vm8, %v5488_v47, %v5489_v35 }
 0x51f   : > { %v5681_v23 = vmul.f32 %v5624_v9, %v13508_v30  ;;  %v5968_v51 = vmul.f32 %v5913_v52, %v5744_v42  ;;  %v13543_v57 = vmul.f32 %v5528_v55, %v13508_v30  ;;  %v4908_v13 = vadd.f32 %v13461_v43, %v4907_v10 }
 0x520   : > { %v13540_v44 = vadd.f32 %v6447_v19, %v13519_v56  ;;  %v6128_v38 = vmul.f32 %v6032_v31, %v5999_v49  ;;  %v13546_v14 = vmul.f32 %v6032_v31, %v6031_v6  ;;  %v4916_v47 = vor.u32 1.1754944e-38, %v4915_v7 }
 0x521   : > { %v13549_v63 = vadd.f32 %v5681_v23, %v13495_v28  ;;  %v6000_v8 = vadd.f32 %v5968_v51, %v5712_v48  ;;  %v5777_v42 = vrot.slane %v13543_v57, 4  ;;  %v4912_v19 = vsel %vm4911_vm1, %v13461_v43, %v4908_v13  ;;  %v13598_v51 = vpop.f32.mrf.mxu1 }
 0x522   : > { %16451 = vst [vmem:[#allocation71_spill] sm:$0xff] %v13540_v44  ;;  %v4920_v1 = vmul.f32 %v13510_v3, %v13449_v4  ;;  %v6288_v6 = vmul.f32 %v13546_v14, %v13371_v41  ;;  %v13563_v49 = vmul.f32 %v13546_v14, %v13352_v15  ;;  %v13568_v18 = vsel %vm13497_vm3, %v4916_v47, %v4912_v19 }
 0x523   : > { %v5873_v9 = vrot.slane %v13549_v63, 4  ;;  %v13570_v7 = vadd.f32 %v6128_v38, %v6000_v8  ;;  %v5816_v43 = vsel %vm2464_vm14, %v5776_v62, %v5777_v42  ;;  %v5202_v48 = vrot.slane %v13568_v18, 7  ;;  %16453 = vst [vmem:[#allocation81_spill] sm:$0xff] %v13598_v51  ;;  %v13786_v51 = vld [vmem:[#allocation2 + $0x2] sm:$0x3] }
 0x524   : > { %v5394_v41 = vmul.f32 %v13394_v36, %v13568_v18  ;;  %vm4924_vm4 = vweird.f32 %v13449_v4  ;;  %v6448_v15 = vmul.f32 %v13563_v49, %v13163_v17  ;;  %v13582_v46 = vmul.f32 %v13563_v49, %v13133_v60 }
 0x525   : > { %v5912_v10 = vsel %vm2464_vm14, %v5872_v61, %v5873_v9  ;;  %v6033_v52 = vmul.f32 %v5816_v43, %v13543_v57  ;;  %v13588_v62 = vadd.f32 %v6288_v6, %v13570_v7  ;;  %v5239_v36 = vsel %vm1856_vm7, %v5201_v58, %v5202_v48  ;;  %v4543_v6 = vpop.f32.mrf.mxu0 }
 0x526   : > { %16452 = vst [vmem:[#allocation72_spill] sm:$0xff] %v13582_v46  ;;  %v5969_v55 = vmul.f32 %v5912_v10, %v13543_v57  ;;  %v13596_v23 = vadd.f32 %v5394_v41, %v13368_v26  ;;  %v13603_v61 = vmul.f32 %v5239_v36, %v13568_v18  ;;  %v4921_v47 = vsub.f32 1.0, %v4920_v1  ;;  %v13611_v26 = vpop.f32.mrf.mxu3 }
 0x527   : > { %v6129_v13 = vmul.f32 %v6033_v52, %v6000_v8  ;;  %v13600_v38 = vmul.f32 %v6033_v52, %v6032_v31  ;;  %v13606_v19 = vadd.f32 %v6448_v15, %v13588_v62  ;;  %vm4925_vm5 = vweird.f32 %v13510_v3 }
 0x528   : > { %v6001_v33 = vadd.f32 %v5969_v55, %v13549_v63  ;;  %v5586_v57 = vrot.slane %v13596_v23, 6  ;;  %v5490_v8 = vrot.slane %v13603_v61, 6  ;;  %v4922_v1 = vmul.f32 %v13510_v3, %v4921_v47  ;;  %vm4926_vm11 = vmor %vm4924_vm4, %vm4925_vm5 }
 0x529   : > { %16454 = vst [vmem:[#allocation60_spill] sm:$0xff] %v13606_v19  ;;  %v6289_v58 = vmul.f32 %v13600_v38, %v6159_v53  ;;  %v6353_v31 = vmul.f32 %v13600_v38, %v13486_v5  ;;  %v4928_v43 = vand.u32 2147483647, %v13449_v4  ;;  %v4930_v53 = vand.u32 2147483648, %v13449_v4 }
 0x52a   : > { %v13618_v18 = vadd.f32 %v6129_v13, %v6001_v33  ;;  %v5623_v63 = vsel %vm2160_vm8, %v5585_v32, %v5586_v57  ;;  %v5527_v15 = vsel %vm2160_vm8, %v5489_v35, %v5490_v8  ;;  %v4923_v55 = vadd.f32 %v13510_v3, %v4922_v1 }
 0x52b   : > { %v6449_v5 = vmul.f32 %v6353_v31, %v13340_v11  ;;  %v13630_v41 = vmul.f32 %v6353_v31, %v13300_v21  ;;  %v5682_v28 = vmul.f32 %v5623_v63, %v13603_v61  ;;  %v13641_v10 = vmul.f32 %v5527_v15, %v13603_v61 }
 0x52c   : > { %v6321_v32 = vadd.f32 %v6289_v58, %v13618_v18  ;;  %vm4929_vm6 = vcmp.eq.f32.partialorder %v4928_v43, 8.507059e+37  ;;  %v4931_v30 = vor.u32 1.1754944e-38, %v4930_v53  ;;  %8193 = vpow2.f32 %v13451_v22 }
 0x52d   : > { %16455 = vst [vmem:[#allocation74_spill] sm:$0xff] %v13630_v41  ;;  %v13645_v36 = vadd.f32 %v5682_v28, %v13596_v23  ;;  %v5300_v35 = vrot.slane %v13528_v39, 7  ;;  %v5778_v47 = vrot.slane %v13641_v10, 4  ;;  %v4927_v58 = vsel %vm4926_vm11, %v13510_v3, %v4923_v55 }
 0x52e   : > { %v13653_v13 = vadd.f32 %v6449_v5, %v6321_v32  ;;  %v7531_v31 = vmul.f32 -1.442695, %v13537_v34  ;;  %v13659_v63 = vsel %vm4929_vm6, %v4931_v30, %v4927_v58  ;;  %v16457_v4 = vrot.slane %v13406_v29, 7  ;;  %v13673_v34 = vpop.f32.mrf.mxu1  ;;  %v13688_v58 = vpop.f32.mrf.mxu3 }
 0x52f   : > { %v5874_v1 = vrot.slane %v13645_v36, 4  ;;  %v5301_v22 = vrot.slane %v13611_v26, 7  ;;  %v5815_v53 = vsel %vm2464_vm14, %v5777_v42, %v5778_v47  ;;  %v15772_v5 = vrot.slane %v13659_v63, 7  ;;  %16458 = vst [vmem:[#allocation84_spill] sm:$0xff] %v13673_v34 }
 0x530   : > { %16456 = vst [vmem:[#allocation78_spill] sm:$0xff] %v13653_v13  ;;  %v13665_v43 = vsel %vm1856_vm7, %v16457_v4, %v5300_v35  ;;  %v5395_v3 = vmul.f32 %v13423_v16, %v13659_v63  ;;  %8195 = vpow2.f32 %v7531_v31  ;;  %v6034_v28 = vmul.f32 %v5815_v53, %v13641_v10 }
 0x531   : > { %v5911_v15 = vsel %vm2464_vm14, %v5873_v9, %v5874_v1  ;;  %v5332_v32 = vsel %vm1856_vm7, %v5300_v35, %v5301_v22  ;;  %v7532_v55 = vmul.f32 -1.442695, %v4543_v6  ;;  %v5238_v42 = vsel %vm1856_vm7, %v5202_v48, %v15772_v5  ;;  %v4546_v6 = vpop.f32.mrf.mxu0 }
 0x532   : > { %v5970_v30 = vmul.f32 %v5911_v15, %v13641_v10  ;;  %v13686_v16 = vadd.f32 %v5395_v3, %v13406_v29  ;;  %v8194_v31 = vpop.eup %8193  ;;  %v6130_v9 = vmul.f32 %v6034_v28, %v6001_v33  ;;  %v13690_v4 = vmul.f32 %v6034_v28, %v6033_v52 }
 0x533   : > { %v13693_v53 = vmul.f32 %v5238_v42, %v13659_v63  ;;  %8197 = vpow2.f32 %v7532_v55  ;;  %v13696_v10 = vadd.f32 1.0, %v12721_v24  ;;  %v13700_v29 = vadd.f32 1.0, %v8194_v31 }
 0x534   : > { %v6002_v35 = vadd.f32 %v5970_v30, %v13645_v36  ;;  %v15771_v48 = vrot.slane %v13686_v16, 6  ;;  %v6290_v3 = vmul.f32 %v13690_v4, %v13570_v7  ;;  %v6354_v52 = vmul.f32 %v13690_v4, %v13546_v14 }
 0x535   : > { %16459 = vst [vmem:[#allocation64_spill] sm:$0xff] %v13696_v10  ;;  %v15770_v33 = vrot.slane %v13693_v53, 6  ;;  %v15774_v15 = vrot.slane %v13688_v58, 7  ;;  %8199 = vrcp.f32 %v13700_v29  ;;  %v7533_v7 = vmul.f32 -1.442695, %v4546_v6 }
 0x536   : > { %v8196_v55 = vpop.eup %8195  ;;  %v13708_v42 = vadd.f32 %v6130_v9, %v6002_v35  ;;  %v5622_v24 = vsel %vm2160_vm8, %v5586_v57, %v15771_v48  ;;  %v6450_v36 = vmul.f32 %v6354_v52, %v13379_v27  ;;  %v13719_v14 = vmul.f32 %v6354_v52, %v13365_v12 }
 0x537   : > { %v5526_v30 = vsel %vm2160_vm8, %v5490_v8, %v15770_v33  ;;  %v5683_v23 = vmul.f32 %v5622_v24, %v13693_v53  ;;  %8201 = vrcp.f32 %v13696_v10  ;;  %v13736_v52 = vadd.f32 1.0, %v8196_v55 }
 0x538   : > { %16460 = vst [vmem:[#allocation79_spill] sm:$0xff] %v13719_v14  ;;  %v6322_v31 = vadd.f32 %v6290_v3, %v13708_v42  ;;  %v13730_v57 = vmul.f32 %v5526_v30, %v13693_v53  ;;  %v13742_v61 = vsel %vm1856_vm7, %v5301_v22, %v15774_v15  ;;  %v4943_v24 = vand.u32 2147483647, %v13700_v29  ;;  %v13748_v30 = vpop.f32.mrf.mxu1 }
 0x539   : > { %v8198_v9 = vpop.eup %8197  ;;  %v13734_v6 = vadd.f32 %v5683_v23, %v13686_v16  ;;  %8203 = vpow2.f32 %v7533_v7  ;;  %16462 = vst [vmem:[#allocation87_spill] sm:$0xff] %v13748_v30  ;;  %v4945_v55 = vand.u32 2147483648, %v13700_v29  ;;  %vm4939_vm9 = vweird.f32 %v13700_v29  ;;  %v4548_v14 = vpop.f32.mrf.mxu0 }
 0x53a   : > { %v13744_v8 = vadd.f32 %v6450_v36, %v6322_v31  ;;  %v15773_v3 = vrot.slane %v13730_v57, 4  ;;  %8205 = vrcp.f32 %v13736_v52  ;;  %v13760_v36 = vsel %vm1856_vm7, 0.0, %v5332_v32  ;;  %v13764_v31 = vpop.f32.mrf.mxu3 }
 0x53b   : > { %v15775_v23 = vrot.slane %v13734_v6, 4  ;;  %v8200_v33 = vpop.eup %8199  ;;  %v13762_v7 = vadd.f32 1.0, %v8198_v9  ;;  %vm13776_vm10 = vcmp.eq.f32.partialorder %v4943_v24, 8.507059e+37  ;;  %v4958_v9 = vand.u32 2147483647, %v13736_v52 }
 0x53c   : > { %16461 = vst [vmem:[#allocation92_spill] sm:$0xff] %v13744_v8  ;;  %v5814_v22 = vsel %vm2464_vm14, %v5778_v47, %v15773_v3  ;;  %v4935_v47 = vmul.f32 %v8200_v33, %v13700_v29  ;;  %v4960_v3 = vand.u32 2147483648, %v13736_v52  ;;  %v4946_v34 = vor.u32 1.1754944e-38, %v4945_v55 }
 0x53d   : > { %v5910_v48 = vsel %vm2464_vm14, %v5874_v1, %v15775_v23  ;;  %v13771_v5 = vmul.f32 %v5814_v22, %v13730_v57  ;;  %8207 = vrcp.f32 %v13762_v7  ;;  %v13782_v30 = vpop.eup %8201  ;;  %vm4940_vm12 = vweird.f32 %v8200_v33 }
 0x53e   : > { %v5971_v15 = vmul.f32 %v5910_v48, %v13730_v57  ;;  %16465 = vst [vmem:[#allocation68_spill] sm:$0xff] %v13782_v30  ;;  %v4936_v23 = vsub.f32 1.0, %v4935_v47  ;;  %vm4954_vm13 = vweird.f32 %v13736_v52  ;;  %v5303_v24 = vrot.slane %v13764_v31, 7  ;;  %vm4941_vm3 = vmor %vm4939_vm9, %vm4940_vm12 }
 0x53f   : > { %v6131_v1 = vmul.f32 %v13771_v5, %v6002_v35  ;;  %v6195_v22 = vmul.f32 %v13771_v5, %v6034_v28  ;;  %v8204_v0 = vpop.eup %8203  ;;  %v4961_v28 = vor.u32 1.1754944e-38, %v4960_v3  ;;  %vm13797_vm15 = vcmp.eq.f32.partialorder %v4958_v9, 8.507059e+37 }
 0x540   : > { %v13789_v48 = vadd.f32 %v5971_v15, %v13734_v6  ;;  %v8206_v25 = vpop.eup %8205  ;;  %v4937_v13 = vmul.f32 %v8200_v33, %v4936_v23  ;;  %v4973_v44 = vand.u32 2147483647, %v13762_v7  ;;  %vm4969_vm2 = vweird.f32 %v13762_v7 }
 0x541   : > { %v6291_v8 = vmul.f32 %v6195_v22, %v13618_v18  ;;  %v6355_v35 = vmul.f32 %v6195_v22, %v13600_v38  ;;  %v4950_v47 = vmul.f32 %v8206_v25, %v13736_v52  ;;  %v4975_v3 = vand.u32 2147483648, %v13762_v7 }
 0x542   : > { %v6163_v55 = vadd.f32 %v6131_v1, %v13789_v48  ;;  %v4938_v38 = vadd.f32 %v8200_v33, %v4937_v13  ;;  %v13812_v22 = vadd.f32 1.0, %v8204_v0  ;;  %v16469_v15 = vrot.slane %v13688_v58, 7  ;;  %v13820_v13 = vpop.f32.mrf.mxu1 }
 0x543   : > { %v6451_v41 = vmul.f32 %v6355_v35, %v13519_v56  ;;  %v13805_v18 = vmul.f32 %v6355_v35, %v13505_v54  ;;  %v8208_v23 = vpop.eup %8207  ;;  %v4951_v1 = vsub.f32 1.0, %v4950_v47  ;;  %16470 = vst [vmem:[#allocation95_spill] sm:$0xff] %v13820_v13  ;;  %vm4955_vm0 = vweird.f32 %v8206_v25  ;;  %v13830_v47 = vpop.f32.mrf.mxu3 }
 0x544   : > { %v6323_v9 = vadd.f32 %v6291_v8, %v6163_v55  ;;  %v13818_v56 = vsel %vm1856_vm7, %v16469_v15, %v5303_v24  ;;  %v4942_v35 = vsel %vm4941_vm3, %v8200_v33, %v4938_v38  ;;  %v7534_v8 = vmul.f32 -1.442695, %v4548_v14  ;;  %vm4956_vm5 = vmor %vm4954_vm13, %vm4955_vm0 }
 0x545   : > { %16468 = vst [vmem:[#allocation93_spill] sm:$0xff] %v13805_v18  ;;  %v4965_v18 = vmul.f32 %v8208_v23, %v13762_v7  ;;  %v13827_v29 = vsel %vm13776_vm10, %v4946_v34, %v4942_v35  ;;  %v4952_v0 = vmul.f32 %v8206_v25, %v4951_v1  ;;  %8209 = vrcp.f32 %v13812_v22 }
 0x546   : > { %v13823_v55 = vadd.f32 %v6451_v41, %v6323_v9  ;;  %16472 = vst [vmem:[#allocation96_spill] sm:$0xff] %v13827_v29  ;;  %v5204_v15 = vrot.slane %v13827_v29, 7  ;;  %v5396_v33 = vmul.f32 %v13665_v43, %v13827_v29  ;;  %vm13835_vm1 = vcmp.eq.f32.partialorder %v4973_v44, 8.507059e+37 }
 0x547   : > { %v4966_v38 = vsub.f32 1.0, %v4965_v18  ;;  %v4953_v41 = vadd.f32 %v8206_v25, %v4952_v0  ;;  %vm4970_vm4 = vweird.f32 %v8208_v23  ;;  %v4990_v34 = vand.u32 2147483648, %v13812_v22 }
 0x548   : > { %16471 = vst [vmem:[#allocation89_spill] sm:$0xff] %v13823_v55  ;;  %8211 = vpow2.f32 %v7534_v8  ;;  %v16475_v14 = vrot.slane %v13659_v63, 7  ;;  %v5428_v9 = vadd.f32 %v5396_v33, %v13528_v39  ;;  %v15779_v43 = vrot.slane %v13830_v47, 7  ;;  %vm4971_vm6 = vmor %vm4969_vm2, %vm4970_vm4 }
 0x549   : > { %v4967_v44 = vmul.f32 %v8208_v23, %v4966_v38  ;;  %v4957_v1 = vsel %vm4956_vm5, %v8206_v25, %v4953_v41  ;;  %v4976_v35 = vor.u32 1.1754944e-38, %v4975_v3  ;;  %v4988_v8 = vand.u32 2147483647, %v13812_v22 }
 0x54a   : > { %v5237_v32 = vsel %vm1856_vm7, %v16475_v14, %v5204_v15  ;;  %v5588_v0 = vrot.slane %v5428_v9, 6  ;;  %v4962_v63 = vsel %vm13797_vm15, %v4961_v28, %v4957_v1  ;;  %v13857_v39 = vsel %vm1856_vm7, %v5303_v24, %v15779_v43  ;;  %v13881_v1 = vpop.f32.mrf.mxu1 }
 0x54b   : > { %v5460_v18 = vmul.f32 %v5237_v32, %v13827_v29  ;;  %v4968_v14 = vadd.f32 %v8208_v23, %v4967_v44  ;;  %v13859_v52 = vpop.eup %8209  ;;  %v5205_v38 = vrot.slane %v4962_v63, 7  ;;  %v5397_v25 = vmul.f32 %v13760_v36, %v4962_v63  ;;  %16478 = vst [vmem:[#allocation76_spill] sm:$0xff] %v13881_v1 }
 0x54c   : > { %v13865_v3 = vor.u32 1.1754944e-38, %v4990_v34  ;;  %v16476_v19 = vrot.slane %v13686_v16, 6  ;;  %v4980_v24 = vmul.f32 %v13859_v52, %v13812_v22  ;;  %vm4985_vm11 = vweird.f32 %v13859_v52 }
 0x54d   : > { %v5492_v33 = vrot.slane %v5460_v18, 6  ;;  %v4972_v41 = vsel %vm4971_vm6, %v8208_v23, %v4968_v14  ;;  %v16477_v36 = vrot.slane %v13693_v53, 6  ;;  %v5236_v34 = vsel %vm1856_vm7, %v5204_v15, %v5205_v38 }
 0x54e   : > { %v5621_v28 = vsel %vm2160_vm8, %v16476_v19, %v5588_v0  ;;  %v8212_v32 = vpop.eup %8211  ;;  %v5429_v16 = vadd.f32 %v5397_v25, %v13611_v26  ;;  %v5269_v14 = vsel %vm1856_vm7, 1.0, %v5236_v34  ;;  %v13887_v19 = vsel %vm13835_vm1, %v4976_v35, %v4972_v41 }
 0x54f   : > { %v5525_v7 = vsel %vm2160_vm8, %v16477_v36, %v5492_v33  ;;  %v5684_v44 = vmul.f32 %v5621_v28, %v5460_v18  ;;  %v4981_v53 = vsub.f32 1.0, %v4980_v24  ;;  %vm4984_vm9 = vweird.f32 %v13812_v22 }
 0x550   : > { %v5748_v23 = vmul.f32 %v5525_v7, %v5460_v18  ;;  %v5461_v28 = vmul.f32 %v5269_v14, %v4962_v63  ;;  %v5589_v43 = vrot.slane %v5429_v16, 6  ;;  %v5206_v15 = vrot.slane %v13887_v19, 7  ;;  %vm13945_vm12 = vmor %vm4984_vm9, %vm4985_vm11 }
 0x551   : > { %v5716_v36 = vadd.f32 %v5684_v44, %v5428_v9  ;;  %v5398_v26 = vmul.f32 %v13742_v61, %v13887_v19  ;;  %v4982_v18 = vmul.f32 %v13859_v52, %v4981_v53  ;;  %v13894_v25 = vadd.f32 1.0, %v8212_v32  ;;  %v4551_v53 = vpop.f32.mrf.mxu0 }
 0x552   : > { %v5780_v29 = vrot.slane %v5748_v23, 4  ;;  %v5493_v13 = vrot.slane %v5461_v28, 6  ;;  %v5620_v35 = vsel %vm2160_vm8, %v5588_v0, %v5589_v43  ;;  %v5235_v9 = vsel %vm1856_vm7, %v5205_v38, %v5206_v15 }
 0x553   : > { %v5876_v7 = vrot.slane %v5716_v36, 4  ;;  %v16479_v63 = vrot.slane %v13730_v57, 4  ;;  %v5653_v61 = vsel %vm2160_vm8, 0.0, %v5620_v35  ;;  %v13909_v24 = vadd.f32 %v5398_v26, %v13688_v58 }
 0x554   : > { %v13912_v32 = vmul.f32 %v5235_v9, %v13887_v19  ;;  %vm13914_vm10 = vcmp.eq.f32.partialorder %v4988_v8, 8.507059e+37  ;;  %v16482_v38 = vrot.slane %v13734_v6, 4  ;;  %v5524_v34 = vsel %vm2160_vm8, %v5492_v33, %v5493_v13 }
 0x555   : > { %v5813_v41 = vsel %vm2464_vm14, %v16479_v63, %v5780_v29  ;;  %v5685_v14 = vmul.f32 %v5653_v61, %v5461_v28  ;;  %v5557_v26 = vsel %vm2160_vm8, 1.0, %v5524_v34  ;;  %v5590_v35 = vrot.slane %v13909_v24, 6 }
 0x556   : > { %v5909_v57 = vsel %vm2464_vm14, %v16482_v38, %v5876_v7  ;;  %v6036_v44 = vmul.f32 %v5813_v41, %v5748_v23  ;;  %v5494_v8 = vrot.slane %v13912_v32, 6  ;;  %v5749_v38 = vmul.f32 %v5557_v26, %v5461_v28  ;;  %v13949_v28 = vpop.f32.mrf.mxu1 }
 0x557   : > { %v5972_v58 = vmul.f32 %v5909_v57, %v5748_v23  ;;  %v5717_v63 = vadd.f32 %v5685_v14, %v5429_v16  ;;  %v5619_v23 = vsel %vm2160_vm8, %v5589_v43, %v5590_v35  ;;  %v4983_v61 = vadd.f32 %v13859_v52, %v4982_v18  ;;  %v13937_v57 = vpop.f32.mrf.mxu3  ;;  %16485 = vst [vmem:[#allocation97_spill] sm:$0xff] %v13949_v28 }
 0x558   : > { %v6132_v9 = vmul.f32 %v6036_v44, %v13789_v48  ;;  %v6196_v6 = vmul.f32 %v6036_v44, %v13771_v5  ;;  %v5523_v33 = vsel %vm2160_vm8, %v5493_v13, %v5494_v8  ;;  %v5781_v5 = vrot.slane %v5749_v38, 4 }
 0x559   : > { %v6004_v41 = vadd.f32 %v5972_v58, %v5716_v36  ;;  %v5877_v16 = vrot.slane %v5717_v63, 4  ;;  %v5686_v18 = vmul.f32 %v5619_v23, %v13912_v32  ;;  %v13953_v13 = vmul.f32 %v5523_v33, %v13912_v32  ;;  %v4553_v0 = vpop.f32.mrf.mxu0 }
 0x55a   : > { %v6292_v34 = vmul.f32 %v6196_v6, %v13708_v42  ;;  %v6356_v48 = vmul.f32 %v6196_v6, %v13690_v4  ;;  %v4987_v4 = vsel %vm13945_vm12, %v13859_v52, %v4983_v61  ;;  %v5812_v44 = vsel %vm2464_vm14, %v5780_v29, %v5781_v5 }
 0x55b   : > { %v6164_v43 = vadd.f32 %v6132_v9, %v6004_v41  ;;  %v5908_v14 = vsel %vm2464_vm14, %v5876_v7, %v5877_v16  ;;  %v5845_v26 = vsel %vm2464_vm14, 1.0, %v5812_v44  ;;  %v13971_v52 = vadd.f32 %v5686_v18, %v13909_v24 }
 0x55c   : > { %v6452_v42 = vmul.f32 %v6356_v48, %v13588_v62  ;;  %v13960_v22 = vmul.f32 %v6356_v48, %v13563_v49  ;;  %v5941_v9 = vsel %vm2464_vm14, 0.0, %v5908_v14  ;;  %v13973_v6 = vmul.f32 %v5845_v26, %v5749_v38 }
 0x55d   : > { %v6324_v58 = vadd.f32 %v6292_v34, %v6164_v43  ;;  %v5973_v62 = vmul.f32 %v5941_v9, %v5749_v38  ;;  %v5782_v49 = vrot.slane %v13953_v13, 4  ;;  %v13979_v29 = vsel %vm13914_vm10, %v13865_v3, %v4987_v4 }
 0x55e   : > { %16486 = vst [vmem:[#allocation101_spill] sm:$0xff] %v13960_v22  ;;  %v5878_v41 = vrot.slane %v13971_v52, 4  ;;  %v15783_v33 = vrot.slane %v13979_v29, 7  ;;  %v5399_v24 = vmul.f32 %v13818_v56, %v13979_v29  ;;  %v6133_v38 = vmul.f32 0.0, %v13973_v6  ;;  %v6886_v14 = vpop.f32.mrf.mxu1 }
 0x55f   : > { %v13981_v7 = vadd.f32 %v6452_v42, %v6324_v58  ;;  %v6005_v23 = vadd.f32 %v5973_v62, %v5717_v63  ;;  %v16488_v61 = vrot.slane %v13786_v51, 1  ;;  %v5811_v3 = vsel %vm2464_vm14, %v5781_v5, %v5782_v49 }
 0x560   : > { %v5907_v48 = vsel %vm2464_vm14, %v5877_v16, %v5878_v41  ;;  %v6038_v36 = vmul.f32 %v5811_v3, %v13953_v13  ;;  %v5234_v56 = vsel %vm1856_vm7, %v5206_v15, %v15783_v33  ;;  %v14004_v51 = vadd.f32 %v5399_v24, %v13764_v31  ;;  %v14017_v15 = vpop.f32.mrf.mxu3 }
 0x561   : > { %16487 = vst [vmem:[#allocation82_spill] sm:$0xff] %v13981_v7  ;;  %v13990_v34 = vperm.slane %v16488_v61, 0  ;;  %v14006_v63 = vadd.f32 %v6133_v38, %v6005_v23  ;;  %v5974_v5 = vmul.f32 %v5907_v48, %v13953_v13  ;;  %v14010_v43 = vmul.f32 %v5234_v56, %v13979_v29 }
 0x562   : > { %8213 = vrcp.f32 %v13894_v25  ;;  %v6134_v16 = vmul.f32 %v6038_v36, %v6005_v23  ;;  %v14014_v18 = vmul.f32 %v6038_v36, %v13973_v6  ;;  %v15782_v19 = vrot.slane %v14004_v51, 6 }
 0x563   : > { %16489 = vst [vmem:[#allocation99_spill] sm:$0xff] %v13990_v34  ;;  %v7535_v4 = vmul.f32 -1.442695, %v4551_v53  ;;  %v14020_v31 = vadd.f32 %v14006_v63, %v6133_v38  ;;  %v6717_v13 = vmul.f32 %v13990_v34, %v13973_v6  ;;  %v6006_v42 = vadd.f32 %v5974_v5, %v13971_v52 }
 0x564   : > { %v15781_v44 = vrot.slane %v14010_v43, 6  ;;  %v6294_v58 = vmul.f32 0.0, %v14014_v18  ;;  %v5618_v53 = vsel %vm2160_vm8, %v5590_v35, %v15782_v19  ;;  %v5003_v26 = vand.u32 2147483647, %v13894_v25  ;;  %v4556_v19 = vpop.f32.mrf.mxu0 }
 0x565   : > { %v5005_v9 = vand.u32 2147483648, %v13894_v25  ;;  %v14034_v62 = vadd.f32 %v14020_v31, %v6133_v38  ;;  %v14036_v24 = vadd.f32 %v6134_v16, %v6006_v42  ;;  %v5687_v23 = vmul.f32 %v5618_v53, %v14010_v43 }
 0x566   : > { %v5522_v52 = vsel %vm2160_vm8, %v5494_v8, %v15781_v44  ;;  %v6718_v35 = vmul.f32 %v13990_v34, %v14014_v18  ;;  %vm4999_vm13 = vweird.f32 %v13894_v25  ;;  %8215 = vpow2.f32 %v7535_v4 }
 0x567   : > { %v14048_v61 = vmul.f32 %v5522_v52, %v14010_v43  ;;  %v5006_v3 = vor.u32 1.1754944e-38, %v5005_v9  ;;  %v6645_v56 = vadd.f32 %v14034_v62, %v6133_v38  ;;  %v14053_v32 = vadd.f32 %v6294_v58, %v14036_v24 }
 0x568   : > { %v8214_v48 = vpop.eup %8213  ;;  %v14056_v8 = vadd.f32 %v5687_v23, %v14004_v51  ;;  %v5305_v5 = vrot.slane %v13937_v57, 7  ;;  %v7536_v52 = vmul.f32 -1.442695, %v4553_v0  ;;  %v16490_v9 = vrot.slane %v13830_v47, 7 }
 0x569   : > { %v15788_v16 = vrot.slane %v14048_v61, 4  ;;  %v4995_v53 = vmul.f32 %v8214_v48, %v13894_v25  ;;  %vm5000_vm15 = vweird.f32 %v8214_v48  ;;  %v6749_v44 = vadd.f32 %v6717_v13, %v6645_v56 }
 0x56a   : > { %v14062_v4 = vadd.f32 %v14053_v32, %v6294_v58  ;;  %v15785_v38 = vrot.slane %v14056_v8, 4  ;;  %v14069_v23 = vsel %vm1856_vm7, %v16490_v9, %v5305_v5  ;;  %8217 = vpow2.f32 %v7536_v52  ;;  %v6888_v52 = vpop.f32.mrf.mxu1  ;;  %vm5001_vm2 = vmor %vm4999_vm13, %vm5000_vm15 }
 0x56b   : > { %v5810_v33 = vsel %vm2464_vm14, %v5782_v49, %v15788_v16  ;;  %v4996_v28 = vsub.f32 1.0, %v4995_v53  ;;  %v5306_v0 = vrot.slane %v14017_v15, 7  ;;  %v6942_v13 = vmul.f32 %v6886_v14, %v6749_v44  ;;  %v14089_v44 = vpop.f32.mrf.mxu3 }
 0x56c   : > { %v6646_v56 = vadd.f32 %v14062_v4, %v6294_v58  ;;  %v5906_v1 = vsel %vm2464_vm14, %v5878_v41, %v15785_v38  ;;  %v14082_v9 = vmul.f32 %v5810_v33, %v14048_v61  ;;  %v8216_v7 = vpop.eup %8215  ;;  %v7537_v53 = vmul.f32 -1.442695, %v4556_v19 }
 0x56d   : > { %v5975_v55 = vmul.f32 %v5906_v1, %v14048_v61  ;;  %v4997_v22 = vmul.f32 %v8214_v48, %v4996_v28  ;;  %v14087_v49 = vsel %vm1856_vm7, %v5305_v5, %v5306_v0  ;;  %v14092_v14 = vadd.f32 %v6942_v13, %v16318_v59 }
 0x56e   : > { %v6750_v58 = vadd.f32 %v6718_v35, %v6646_v56  ;;  %v6135_v41 = vmul.f32 %v14082_v9, %v6006_v42  ;;  %v14096_v33 = vmul.f32 %v14082_v9, %v6038_v36  ;;  %v14101_v38 = vadd.f32 1.0, %v8216_v7  ;;  %v16492_v42 = vld [vmem:[#allocation105_spill] sm:$0xff] }
 0x56f   : > { %16491 = vst [vmem:[#allocation100_spill] sm:$0xff] %v14092_v14  ;;  %v14099_v1 = vadd.f32 %v5975_v55, %v14056_v8  ;;  %v4998_v28 = vadd.f32 %v8214_v48, %v4997_v22  ;;  %8219 = vpow2.f32 %v7537_v53  ;;  %v15786_v36 = vrot.slane %v14089_v44, 7 }
 0x570   : > { %v6943_v19 = vmul.f32 %v6888_v52, %v6750_v58  ;;  %v6295_v5 = vmul.f32 %v14096_v33, %v14006_v63  ;;  %v14107_v59 = vmul.f32 %v14096_v33, %v13973_v6  ;;  %v8218_v55 = vpop.eup %8217  ;;  %vm5004_vm3 = vcmp.eq.f32.partialorder %v5003_v26, 8.507059e+37 }
 0x571   : > { %v14114_v22 = vadd.f32 %v6135_v41, %v14099_v1  ;;  %v5002_v7 = vsel %vm5001_vm2, %v8214_v48, %v4998_v28  ;;  %8221 = vrcp.f32 %v14101_v38  ;;  %v5018_v48 = vand.u32 2147483647, %v14101_v38 }
 0x572   : > { %v14118_v63 = vadd.f32 %v6943_v19, %v16492_v42  ;;  %v6455_v35 = vmul.f32 0.0, %v14107_v59  ;;  %v14121_v13 = vsel %vm5004_vm3, %v5006_v3, %v5002_v7  ;;  %v14130_v26 = vadd.f32 1.0, %v8218_v55  ;;  %v4558_v3 = vpop.f32.mrf.mxu0  ;;  %v6891_v14 = vpop.f32.mrf.mxu1 }
 0x573   : > { %v14124_v25 = vadd.f32 %v6295_v5, %v14114_v22  ;;  %v15787_v56 = vrot.slane %v14121_v13, 7  ;;  %v5400_v53 = vmul.f32 %v13857_v39, %v14121_v13  ;;  %v14136_v58 = vsel %vm1856_vm7, %v5306_v0, %v15786_v36 }
 0x574   : > { %16493 = vst [vmem:[#allocation102_spill] sm:$0xff] %v14118_v63  ;;  %v14140_v52 = vmul.f32 %v13782_v30, %v13696_v10  ;;  %v16494_v39 = vrot.slane %v13979_v29, 7  ;;  %v6719_v0 = vmul.f32 %v13990_v34, %v14107_v59  ;;  %vm5014_vm0 = vweird.f32 %v14101_v38 }
 0x575   : > { %v8220_v41 = vpop.eup %8219  ;;  %v14143_v28 = vadd.f32 %v6455_v35, %v14124_v25  ;;  %v14152_v5 = vadd.f32 %v5400_v53, %v13830_v47  ;;  %8223 = vrcp.f32 %v14130_v26  ;;  %v7538_v36 = vmul.f32 -1.442695, %v4558_v3 }
 0x576   : > { %v5233_v19 = vsel %vm1856_vm7, %v16494_v39, %v15787_v56  ;;  %v5020_v39 = vand.u32 2147483648, %v14101_v38  ;;  %vm14166_vm1 = vcmp.eq.f32.partialorder %v5018_v48, 8.507059e+37  ;;  %v5033_v3 = vand.u32 2147483647, %v14130_v26 }
 0x577   : > { %v14157_v55 = vmul.f32 %v5233_v19, %v14121_v13  ;;  %v8222_v7 = vpop.eup %8221  ;;  %v6647_v42 = vadd.f32 %v14143_v28, %v6455_v35  ;;  %v15790_v29 = vrot.slane %v14152_v5, 6  ;;  %v14170_v19 = vadd.f32 1.0, %v8220_v41 }
 0x578   : > { %v5010_v53 = vmul.f32 %v8222_v7, %v14101_v38  ;;  %v16497_v35 = vrot.slane %v14004_v51, 6  ;;  %v5035_v47 = vand.u32 2147483648, %v14130_v26  ;;  %v16499_v46 = vrot.slane %v14010_v43, 6 }
 0x579   : > { %v6751_v16 = vadd.f32 %v6719_v0, %v6647_v42  ;;  %v16498_v48 = vrot.slane %v14157_v55, 6  ;;  %8225 = vrcp.f32 %v14170_v19  ;;  %vm5029_vm4 = vweird.f32 %v14130_v26 }
 0x57a   : > { %v5617_v63 = vsel %vm2160_vm8, %v16497_v35, %v15790_v29  ;;  %v5011_v42 = vsub.f32 1.0, %v5010_v53  ;;  %v5021_v29 = vor.u32 1.1754944e-38, %v5020_v39  ;;  %vm5015_vm5 = vweird.f32 %v8222_v7 }
 0x57b   : > { %v5521_v41 = vsel %vm2160_vm8, %v16499_v46, %v16498_v48  ;;  %v5688_v0 = vmul.f32 %v5617_v63, %v14157_v55  ;;  %v6944_v51 = vmul.f32 %v6891_v14, %v6751_v16  ;;  %v8224_v54 = vpop.eup %8223  ;;  %v5050_v46 = vand.u32 2147483648, %v14170_v19  ;;  %v16500_v48 = vld [vmem:[#allocation98_spill] sm:$0xff]  ;;  %vm5016_vm11 = vmor %vm5014_vm0, %vm5015_vm5 }
 0x57c   : > { %v14189_v35 = vmul.f32 %v5521_v41, %v14157_v55  ;;  %v5012_v43 = vmul.f32 %v8222_v7, %v5011_v42  ;;  %v5025_v16 = vmul.f32 %v8224_v54, %v14130_v26  ;;  %vm14201_vm6 = vcmp.eq.f32.partialorder %v5033_v3, 8.507059e+37  ;;  %v14205_v41 = vpop.f32.mrf.mxu3 }
 0x57d   : > { %v14193_v27 = vadd.f32 %v5688_v0, %v14152_v5  ;;  %v14197_v63 = vadd.f32 %v6944_v51, %v16500_v48  ;;  %v5036_v39 = vor.u32 1.1754944e-38, %v5035_v47  ;;  %v5048_v11 = vand.u32 2147483647, %v14170_v19 }
 0x57e   : > { %v15795_v53 = vrot.slane %v14189_v35, 4  ;;  %v5013_v42 = vadd.f32 %v8222_v7, %v5012_v43  ;;  %8227 = vpow2.f32 %v7538_v36  ;;  %v16504_v51 = vrot.slane %v14048_v61, 4 }
 0x57f   : > { %16501 = vst [vmem:[#allocation106_spill] sm:$0xff] %v14197_v63  ;;  %v15796_v0 = vrot.slane %v14193_v27, 4  ;;  %v5026_v3 = vsub.f32 1.0, %v5025_v16  ;;  %vm5030_vm9 = vweird.f32 %v8224_v54  ;;  %v5051_v47 = vor.u32 1.1754944e-38, %v5050_v46  ;;  %v8226_v63 = vpop.eup %8225 }
 0x580   : > { %v5809_v48 = vsel %vm2464_vm14, %v16504_v51, %v15795_v53  ;;  %v16505_v43 = vrot.slane %v14056_v8, 4  ;;  %v5017_v61 = vsel %vm5016_vm11, %v8222_v7, %v5013_v42  ;;  %vm5044_vm10 = vweird.f32 %v14170_v19  ;;  %vm5031_vm15 = vmor %vm5029_vm4, %vm5030_vm9 }
 0x581   : > { %v14224_v17 = vmul.f32 %v5809_v48, %v14189_v35  ;;  %v5022_v46 = vsel %vm14166_vm1, %v5021_v29, %v5017_v61  ;;  %v5027_v51 = vmul.f32 %v8224_v54, %v5026_v3  ;;  %v5040_v53 = vmul.f32 %v8226_v63, %v14170_v19 }
 0x582   : > { %v5905_v36 = vsel %vm2464_vm14, %v16505_v43, %v15796_v0  ;;  %v5209_v7 = vrot.slane %v5022_v46, 7  ;;  %v5401_v42 = vmul.f32 %v14069_v23, %v5022_v46  ;;  %vm14239_vm12 = vcmp.eq.f32.partialorder %v5048_v11, 8.507059e+37  ;;  %v4561_v0 = vpop.f32.mrf.mxu0 }
 0x583   : > { %v5976_v16 = vmul.f32 %v5905_v36, %v14189_v35  ;;  %v6136_v8 = vmul.f32 %v14224_v17, %v14099_v1  ;;  %v14236_v48 = vmul.f32 %v14224_v17, %v14082_v9  ;;  %v5028_v29 = vadd.f32 %v8224_v54, %v5027_v51 }
 0x584   : > { %v5041_v3 = vsub.f32 1.0, %v5040_v53  ;;  %vm5045_vm13 = vweird.f32 %v8226_v63  ;;  %v8228_v36 = vpop.eup %8227  ;;  %v16509_v23 = vrot.slane %v14121_v13, 7  ;;  %v5433_v61 = vadd.f32 %v5401_v42, %v13937_v57 }
 0x585   : > { %v14244_v56 = vadd.f32 %v5976_v16, %v14193_v27  ;;  %v6296_v1 = vmul.f32 %v14236_v48, %v14036_v24  ;;  %v14250_v9 = vmul.f32 %v14236_v48, %v14014_v18  ;;  %v5032_v24 = vsel %vm5031_vm15, %v8224_v54, %v5028_v29  ;;  %vm5046_vm2 = vmor %vm5044_vm10, %vm5045_vm13 }
 0x586   : > { %v5232_v11 = vsel %vm1856_vm7, %v16509_v23, %v5209_v7  ;;  %v5042_v51 = vmul.f32 %v8226_v63, %v5041_v3  ;;  %v5593_v50 = vrot.slane %v5433_v61, 6  ;;  %v5037_v57 = vsel %vm14201_vm6, %v5036_v39, %v5032_v24 }
 0x587   : > { %16508 = vst [vmem:[#allocation91_spill] sm:$0xff] %v14250_v9  ;;  %v14261_v53 = vadd.f32 %v6136_v8, %v14244_v56  ;;  %v5465_v16 = vmul.f32 %v5232_v11, %v5022_v46  ;;  %v6456_v38 = vmul.f32 0.0, %v14250_v9  ;;  %v6720_v13 = vmul.f32 %v13990_v34, %v14250_v9 }
 0x588   : > { %v5210_v23 = vrot.slane %v5037_v57, 7  ;;  %v5402_v8 = vmul.f32 %v14087_v49, %v5037_v57  ;;  %v16510_v54 = vrot.slane %v14152_v5, 6  ;;  %v5043_v29 = vadd.f32 %v8226_v63, %v5042_v51 }
 0x589   : > { %v14269_v42 = vadd.f32 %v6296_v1, %v14261_v53  ;;  %v5497_v26 = vrot.slane %v5465_v16, 6  ;;  %v14276_v3 = vadd.f32 1.0, %v8228_v36  ;;  %v16511_v11 = vrot.slane %v14205_v41, 7 }
 0x58a   : > { %v5616_v46 = vsel %vm2160_vm8, %v16510_v54, %v5593_v50  ;;  %v16512_v14 = vrot.slane %v14089_v44, 7  ;;  %v16514_v49 = vrot.slane %v14157_v55, 6  ;;  %v5231_v36 = vsel %vm1856_vm7, %v5209_v7, %v5210_v23 }
 0x58b   : > { %v14287_v1 = vadd.f32 %v6456_v38, %v14269_v42  ;;  %v5689_v24 = vmul.f32 %v5616_v46, %v5465_v16  ;;  %v5434_v54 = vadd.f32 %v5402_v8, %v14017_v15  ;;  %8229 = vrcp.f32 %v14276_v3  ;;  %v6893_v46 = vpop.f32.mrf.mxu1 }
 0x58c   : > { %v14284_v39 = vsel %vm1856_vm7, %v16512_v14, %v16511_v11  ;;  %v5520_v5 = vsel %vm2160_vm8, %v16514_v49, %v5497_v26  ;;  %v5466_v11 = vmul.f32 %v5231_v36, %v5037_v57  ;;  %v5047_v14 = vsel %vm5046_vm2, %v8226_v63, %v5043_v29 }
 0x58d   : > { %16513 = vst [vmem:[#allocation112_spill] sm:$0xff] %v14287_v1  ;;  %v5753_v51 = vmul.f32 %v5520_v5, %v5465_v16  ;;  %v6648_v60 = vadd.f32 %v14287_v1, %v6456_v38  ;;  %v5721_v12 = vadd.f32 %v5689_v24, %v5433_v61  ;;  %v14302_v55 = vsel %vm14239_vm12, %v5051_v47, %v5047_v14  ;;  %v14306_v16 = vpop.f32.mrf.mxu3  ;;  %v14328_v5 = vpop.f32.mrf.mxu0 }
 0x58e   : > { %v5498_v49 = vrot.slane %v5466_v11, 6  ;;  %v5594_v21 = vrot.slane %v5434_v54, 6  ;;  %v15808_v19 = vrot.slane %v14302_v55, 7  ;;  %v5403_v63 = vmul.f32 %v14136_v58, %v14302_v55 }
 0x58f   : > { %v5785_v7 = vrot.slane %v5753_v51, 4  ;;  %v6752_v15 = vadd.f32 %v6720_v13, %v6648_v60  ;;  %v5881_v57 = vrot.slane %v5721_v12, 4  ;;  %v14310_v38 = vmul.f32 -1.442695, %v4561_v0 }
 0x590   : > { %v16515_v47 = vrot.slane %v14189_v35, 4  ;;  %v5519_v61 = vsel %vm2160_vm8, %v5497_v26, %v5498_v49  ;;  %v5615_v8 = vsel %vm2160_vm8, %v5593_v50, %v5594_v21  ;;  %v5230_v60 = vsel %vm1856_vm7, %v5210_v23, %v15808_v19  ;;  %v16517_v23 = vld [vmem:[#allocation116_spill] sm:$0xff] }
 0x591   : > { %v6945_v13 = vmul.f32 %v6893_v46, %v6752_v15  ;;  %v16516_v58 = vrot.slane %v14193_v27, 4  ;;  %v5690_v29 = vmul.f32 %v5615_v8, %v5466_v11  ;;  %v5754_v26 = vmul.f32 %v5519_v61, %v5466_v11  ;;  %v14336_v14 = vpop.eup %8229 }
 0x592   : > { %v5808_v43 = vsel %vm2464_vm14, %v16515_v47, %v5785_v7  ;;  %v14331_v36 = vadd.f32 %v5403_v63, %v14089_v44  ;;  %v14334_v50 = vmul.f32 %v5230_v60, %v14302_v55  ;;  %vm5059_vm3 = vweird.f32 %v14276_v3 }
 0x593   : > { %v5904_v35 = vsel %vm2464_vm14, %v16516_v58, %v5881_v57  ;;  %v6041_v0 = vmul.f32 %v5808_v43, %v5753_v51  ;;  %v14339_v46 = vadd.f32 %v6945_v13, %v16517_v23  ;;  %v5722_v47 = vadd.f32 %v5690_v29, %v5434_v54  ;;  %v6896_v58 = vpop.f32.mrf.mxu1 }
 0x594   : > { %v5977_v24 = vmul.f32 %v5904_v35, %v5753_v51  ;;  %v5786_v51 = vrot.slane %v5754_v26, 4  ;;  %v15806_v11 = vrot.slane %v14334_v50, 6  ;;  %v15804_v44 = vrot.slane %v14331_v36, 6 }
 0x595   : > { %16518 = vst [vmem:[#allocation110_spill] sm:$0xff] %v14339_v46  ;;  %v6137_v27 = vmul.f32 %v6041_v0, %v14244_v56  ;;  %v14343_v15 = vmul.f32 %v6041_v0, %v14224_v17  ;;  %v5882_v8 = vrot.slane %v5722_v47, 4  ;;  %v5055_v56 = vmul.f32 %v14336_v14, %v14276_v3 }
 0x596   : > { %v6009_v43 = vadd.f32 %v5977_v24, %v5721_v12  ;;  %v5807_v12 = vsel %vm2464_vm14, %v5785_v7, %v5786_v51  ;;  %v5518_v54 = vsel %vm2160_vm8, %v5498_v49, %v15806_v11  ;;  %vm5060_vm0 = vweird.f32 %v14336_v14 }
 0x597   : > { %v6297_v63 = vmul.f32 %v14343_v15, %v14114_v22  ;;  %v14351_v61 = vmul.f32 %v14343_v15, %v14096_v33  ;;  %v5614_v22 = vsel %vm2160_vm8, %v5594_v21, %v15804_v44  ;;  %v5903_v7 = vsel %vm2464_vm14, %v5881_v57, %v5882_v8  ;;  %v14379_v21 = vpop.f32.mrf.mxu3  ;;  %vm5061_vm1 = vmor %vm5059_vm3, %vm5060_vm0 }
 0x598   : > { %v6169_v17 = vadd.f32 %v6137_v27, %v6009_v43  ;;  %v6042_v13 = vmul.f32 %v5807_v12, %v5754_v26  ;;  %v5978_v49 = vmul.f32 %v5903_v7, %v5754_v26  ;;  %v5691_v29 = vmul.f32 %v5614_v22, %v14334_v50  ;;  %v4566_v7 = vpop.f32.mrf.mxu0 }
 0x599   : > { %v6457_v33 = vmul.f32 %v14351_v61, %v14020_v31  ;;  %v14369_v60 = vmul.f32 %v14351_v61, %v13973_v6  ;;  %v14377_v24 = vmul.f32 %v5518_v54, %v14334_v50  ;;  %v5063_v11 = vand.u32 2147483647, %v14276_v3 }
 0x59a   : > { %v14373_v35 = vadd.f32 %v6297_v63, %v6169_v17  ;;  %v6138_v23 = vmul.f32 %v6042_v13, %v6009_v43  ;;  %v14382_v27 = vmul.f32 %v6042_v13, %v6041_v0  ;;  %v6010_v63 = vadd.f32 %v5978_v49, %v5722_v47 }
 0x59b   : > { %16519 = vst [vmem:[#allocation118_spill] sm:$0xff] %v14369_v60  ;;  %v6617_v31 = vmul.f32 0.0, %v14369_v60  ;;  %v14389_v26 = vadd.f32 %v5691_v29, %v14331_v36  ;;  %v15805_v12 = vrot.slane %v14377_v24, 4  ;;  %v6721_v54 = vmul.f32 %v13990_v34, %v14369_v60 }
 0x59c   : > { %v14386_v57 = vadd.f32 %v6457_v33, %v14373_v35  ;;  %v6298_v22 = vmul.f32 %v14382_v27, %v14261_v53  ;;  %v14398_v0 = vmul.f32 %v14382_v27, %v14236_v48  ;;  %v5056_v43 = vsub.f32 1.0, %v5055_v56 }
 0x59d   : > { %v14401_v47 = vadd.f32 %v6138_v23, %v6010_v63  ;;  %v5806_v49 = vsel %vm2464_vm14, %v5786_v51, %v15805_v12  ;;  %v15807_v29 = vrot.slane %v14389_v26, 4  ;;  %8231 = vpow2.f32 %v14310_v38 }
 0x59e   : > { %16520 = vst [vmem:[#allocation120_spill] sm:$0xff] %v14386_v57  ;;  %v6649_v33 = vadd.f32 %v6617_v31, %v14386_v57  ;;  %v6458_v53 = vmul.f32 %v14398_v0, %v14053_v32  ;;  %v14412_v48 = vmul.f32 %v14398_v0, %v14014_v18  ;;  %v14415_v56 = vmul.f32 %v5806_v49, %v14377_v24 }
 0x59f   : > { %v5057_v31 = vmul.f32 %v14336_v14, %v5056_v43  ;;  %v14419_v44 = vadd.f32 %v6298_v22, %v14401_v47  ;;  %v5902_v51 = vsel %vm2464_vm14, %v5882_v8, %v15807_v29  ;;  %vm5064_vm4 = vcmp.eq.f32.partialorder %v5063_v11, 8.507059e+37 }
 0x5a0   : > { %16521 = vst [vmem:[#allocation77_spill] sm:$0xff] %v14412_v48  ;;  %v6753_v23 = vadd.f32 %v6721_v54, %v6649_v33  ;;  %v6618_v32 = vmul.f32 0.0, %v14412_v48  ;;  %v5979_v12 = vmul.f32 %v5902_v51, %v14377_v24  ;;  %v6139_v49 = vmul.f32 %v14415_v56, %v6010_v63  ;;  %v16523_v63 = vld [vmem:[#allocation40_spill] sm:$0xff] }
 0x5a1   : > { %v14431_v54 = vadd.f32 %v6458_v53, %v14419_v44  ;;  %v14434_v22 = vmul.f32 %v14415_v56, %v6042_v13  ;;  %v5058_v33 = vadd.f32 %v14336_v14, %v5057_v31  ;;  %v6722_v8 = vmul.f32 %v13990_v34, %v14412_v48  ;;  %v6898_v53 = vpop.f32.mrf.mxu1 }
 0x5a2   : > { %v6946_v43 = vmul.f32 %v6896_v58, %v6753_v23  ;;  %v14440_v29 = vadd.f32 %v5979_v12, %v14389_v26  ;;  %v5065_v51 = vand.u32 2147483648, %v14276_v3  ;;  %v14457_v12 = vpop.f32.mrf.mxu3  ;;  %v7540_v3 = vmul.f32 -1.442695, %v14328_v5 }
 0x5a3   : > { %16522 = vst [vmem:[#allocation113_spill] sm:$0xff] %v14431_v54  ;;  %v6650_v23 = vadd.f32 %v6618_v32, %v14431_v54  ;;  %v6299_v13 = vmul.f32 %v14434_v22, %v6169_v17  ;;  %v14451_v31 = vmul.f32 %v14434_v22, %v14343_v15 }
 0x5a4   : > { %v14445_v58 = vadd.f32 %v6946_v43, %v16523_v63  ;;  %v14460_v38 = vadd.f32 %v6139_v49, %v14440_v29  ;;  %v5062_v43 = vsel %vm5061_vm1, %v14336_v14, %v5058_v33  ;;  %v5066_v32 = vor.u32 1.1754944e-38, %v5065_v51  ;;  %v4568_v49 = vpop.f32.mrf.mxu0  ;;  %v8232_v33 = vpop.eup %8231  ;;  %v16527_v51 = vld [vmem:[#allocation114_spill] sm:$0xff] }
 0x5a5   : > { %v6754_v63 = vadd.f32 %v6722_v8, %v6650_v23  ;;  %v6459_v17 = vmul.f32 %v14451_v31, %v14124_v25  ;;  %v14467_v15 = vmul.f32 %v14451_v31, %v14107_v59  ;;  %v4711_v25 = vsub.f32 1.0, %v14140_v52 }
 0x5a6   : > { %16524 = vst [vmem:[#allocation109_spill] sm:$0xff] %v14445_v58  ;;  %v14471_v19 = vadd.f32 %v6299_v13, %v14460_v38  ;;  %v14473_v58 = vsel %vm5064_vm4, %v5066_v32, %v5062_v43  ;;  %8233 = vpow2.f32 %v7540_v3  ;;  %v14492_v43 = vadd.f32 1.0, %v8232_v33 }
 0x5a7   : > { %16525 = vst [vmem:[#allocation105_spill] sm:$0xff] %v14467_v15  ;;  %v6947_v46 = vmul.f32 %v6898_v53, %v6754_v63  ;;  %v6619_v14 = vmul.f32 0.0, %v14467_v15  ;;  %v15809_v11 = vrot.slane %v14473_v58, 7  ;;  %v5404_v5 = vmul.f32 %v14284_v39, %v14473_v58 }
 0x5a8   : > { %v14479_v8 = vadd.f32 %v6459_v17, %v14471_v19  ;;  %v16529_v53 = vrot.slane %v14302_v55, 7  ;;  %v7541_v52 = vmul.f32 -1.442695, %v4566_v7  ;;  %v6723_v63 = vmul.f32 %v13990_v34, %v14467_v15 }
 0x5a9   : > { %v14484_v23 = vadd.f32 %v6947_v46, %v16527_v51  ;;  %v14498_v39 = vadd.f32 %v5404_v5, %v14205_v41  ;;  %8235 = vrcp.f32 %v14492_v43  ;;  %v5309_v55 = vrot.slane %v14306_v16, 7  ;;  %v6901_v33 = vpop.f32.mrf.mxu1 }
 0x5aa   : > { %16526 = vst [vmem:[#allocation98_spill] sm:$0xff] %v14479_v8  ;;  %v5229_v13 = vsel %vm1856_vm7, %v16529_v53, %v15809_v11  ;;  %v6651_v32 = vadd.f32 %v6619_v14, %v14479_v8  ;;  %v5310_v17 = vrot.slane %v14379_v21, 7  ;;  %8237 = vpow2.f32 %v7541_v52 }
 0x5ab   : > { %16528 = vst [vmem:[#allocation116_spill] sm:$0xff] %v14484_v23  ;;  %v14501_v46 = vmul.f32 %v5229_v13, %v14473_v58  ;;  %v15813_v14 = vrot.slane %v14498_v39, 6  ;;  %v5078_v51 = vand.u32 2147483647, %v14492_v43  ;;  %v5311_v5 = vrot.slane %v14457_v12, 7  ;;  %v14510_v13 = vpop.f32.mrf.mxu3 }
 0x5ac   : > { %v6755_v3 = vadd.f32 %v6723_v63, %v6651_v32  ;;  %v7542_v53 = vmul.f32 -1.442695, %v4568_v49  ;;  %v14513_v11 = vmul.f32 %v13782_v30, %v4711_v25  ;;  %v8234_v23 = vpop.eup %8233  ;;  %v16531_v32 = vrot.slane %v14334_v50, 6  ;;  %v16533_v50 = vld [vmem:[#allocation108_spill] sm:$0xff] }
 0x5ad   : > { %v15814_v7 = vrot.slane %v14501_v46, 6  ;;  %v16532_v63 = vrot.slane %v14331_v36, 6  ;;  %v5080_v15 = vand.u32 2147483648, %v14492_v43  ;;  %vm5074_vm5 = vweird.f32 %v14492_v43 }
 0x5ae   : > { %16530 = vst [vmem:[#allocation40_spill] sm:$0xff] %v14513_v11  ;;  %v6948_v45 = vmul.f32 %v6901_v33, %v6755_v3  ;;  %v14532_v33 = vadd.f32 1.0, %v8234_v23  ;;  %8239 = vpow2.f32 %v7542_v53  ;;  %vm14553_vm6 = vcmp.eq.f32.partialorder %v5078_v51, 8.507059e+37 }
 0x5af   : > { %v5517_v52 = vsel %vm2160_vm8, %v16531_v32, %v15814_v7  ;;  %v5613_v49 = vsel %vm2160_vm8, %v16532_v63, %v15813_v14  ;;  %v16535_v32 = vrot.slane %v14205_v41, 7  ;;  %v14543_v63 = vsel %vm1856_vm7, %v5309_v55, %v5310_v17  ;;  %v4571_v14 = vpop.f32.mrf.mxu0 }
 0x5b0   : > { %v5692_v25 = vmul.f32 %v5613_v49, %v14501_v46  ;;  %v14530_v3 = vmul.f32 %v5517_v52, %v14501_v46  ;;  %v14535_v8 = vadd.f32 %v6948_v45, %v16533_v50  ;;  %v8236_v52 = vpop.eup %8235  ;;  %8241 = vrcp.f32 %v14532_v33 }
 0x5b1   : > { %v5324_v36 = vsel %vm1856_vm7, %v16535_v32, %v5309_v55  ;;  %v8238_v45 = vpop.eup %8237  ;;  %v5070_v41 = vmul.f32 %v8236_v52, %v14492_v43  ;;  %v5081_v55 = vor.u32 1.1754944e-38, %v5080_v15  ;;  %v14559_v32 = vsel %vm1856_vm7, %v5310_v17, %v5311_v5 }
 0x5b2   : > { %16534 = vst [vmem:[#allocation114_spill] sm:$0xff] %v14535_v8  ;;  %v14547_v23 = vadd.f32 %v5692_v25, %v14498_v39  ;;  %v15817_v53 = vrot.slane %v14530_v3, 4  ;;  %v16538_v25 = vrot.slane %v14377_v24, 4  ;;  %v14568_v8 = vadd.f32 1.0, %v8238_v45 }
 0x5b3   : > { %v7543_v51 = vmul.f32 -1.442695, %v4571_v14  ;;  %v5071_v15 = vsub.f32 1.0, %v5070_v41  ;;  %vm5075_vm11 = vweird.f32 %v8236_v52  ;;  %v16539_v17 = vrot.slane %v14510_v13, 7 }
 0x5b4   : > { %v5805_v7 = vsel %vm2464_vm14, %v16538_v25, %v15817_v53  ;;  %v15818_v49 = vrot.slane %v14547_v23, 4  ;;  %v8240_v24 = vpop.eup %8239  ;;  %v16540_v25 = vrot.slane %v14389_v26, 4  ;;  %v5093_v14 = vand.u32 2147483647, %v14532_v33  ;;  %vm5076_vm10 = vmor %vm5074_vm5, %vm5075_vm11 }
 0x5b5   : > { %v14571_v48 = vmul.f32 %v5805_v7, %v14530_v3  ;;  %v14577_v54 = vsel %vm1856_vm7, %v5311_v5, %v16539_v17  ;;  %v5095_v7 = vand.u32 2147483648, %v14532_v33  ;;  %8243 = vrcp.f32 %v14568_v8 }
 0x5b6   : > { %v5901_v45 = vsel %vm2464_vm14, %v16540_v25, %v15818_v49  ;;  %v5072_v53 = vmul.f32 %v8236_v52, %v5071_v15  ;;  %v8242_v26 = vpop.eup %8241  ;;  %vm5089_vm9 = vweird.f32 %v14532_v33  ;;  %v5110_v25 = vand.u32 2147483648, %v14568_v8 }
 0x5b7   : > { %v5980_v41 = vmul.f32 %v5901_v45, %v14530_v3  ;;  %v6140_v5 = vmul.f32 %v14571_v48, %v14440_v29  ;;  %v14593_v17 = vmul.f32 %v14571_v48, %v14415_v56  ;;  %v14597_v49 = vadd.f32 1.0, %v8240_v24 }
 0x5b8   : > { %8245 = vpow2.f32 %v7543_v51  ;;  %v5073_v56 = vadd.f32 %v8236_v52, %v5072_v53  ;;  %v5085_v15 = vmul.f32 %v8242_v26, %v14532_v33  ;;  %vm14612_vm12 = vcmp.eq.f32.partialorder %v5093_v14, 8.507059e+37 }
 0x5b9   : > { %v14600_v37 = vadd.f32 %v5980_v41, %v14547_v23  ;;  %v6300_v45 = vmul.f32 %v14593_v17, %v14401_v47  ;;  %v14606_v29 = vmul.f32 %v14593_v17, %v14382_v27  ;;  %v5096_v51 = vor.u32 1.1754944e-38, %v5095_v7 }
 0x5ba   : > { %8247 = vrcp.f32 %v14597_v49  ;;  %v5077_v43 = vsel %vm5076_vm10, %v8236_v52, %v5073_v56  ;;  %v5086_v60 = vsub.f32 1.0, %v5085_v15  ;;  %vm5090_vm13 = vweird.f32 %v8242_v26 }
 0x5bb   : > { %16541 = vst [vmem:[#allocation108_spill] sm:$0xff] %v14606_v29  ;;  %v14618_v47 = vadd.f32 %v6140_v5, %v14600_v37  ;;  %v6460_v27 = vmul.f32 %v14606_v29, %v14269_v42  ;;  %v14624_v53 = vmul.f32 %v14606_v29, %v14250_v9  ;;  %v14626_v41 = vpop.eup %8243  ;;  %v5082_v14 = vsel %vm14553_vm6, %v5081_v55, %v5077_v43  ;;  %vm5091_vm0 = vmor %vm5089_vm9, %vm5090_vm13 }
 0x5bc   : > { %v5108_v7 = vand.u32 2147483647, %v14568_v8  ;;  %v5213_v42 = vrot.slane %v5082_v14, 7  ;;  %v5111_v40 = vor.u32 1.1754944e-38, %v5110_v25  ;;  %v5405_v11 = vmul.f32 %v5324_v36, %v5082_v14 }
 0x5bd   : > { %16544 = vst [vmem:[#allocation128_spill] sm:$0xff] %v14624_v53  ;;  %v14632_v5 = vadd.f32 %v6300_v45, %v14618_v47  ;;  %v6620_v57 = vmul.f32 0.0, %v14624_v53  ;;  %v5087_v30 = vmul.f32 %v8242_v26, %v5086_v60  ;;  %v5100_v52 = vmul.f32 %v14626_v41, %v14568_v8 }
 0x5be   : > { %v8246_v10 = vpop.eup %8245  ;;  %vm5104_vm15 = vweird.f32 %v14568_v8  ;;  %v5123_v50 = vand.u32 2147483647, %v14597_v49  ;;  %v6724_v45 = vmul.f32 %v13990_v34, %v14624_v53  ;;  %v16546_v56 = vrot.slane %v14473_v58, 7 }
 0x5bf   : > { %v14640_v55 = vadd.f32 %v6460_v27, %v14632_v5  ;;  %vm5105_vm2 = vweird.f32 %v14626_v41  ;;  %v5437_v36 = vadd.f32 %v5405_v11, %v14306_v16  ;;  %v5088_v43 = vadd.f32 %v8242_v26, %v5087_v30 }
 0x5c0   : > { %v5228_v25 = vsel %vm1856_vm7, %v16546_v56, %v5213_v42  ;;  %v14649_v60 = vpop.eup %8247  ;;  %v5101_v9 = vsub.f32 1.0, %v5100_v52  ;;  %vm14652_vm3 = vcmp.eq.f32.partialorder %v5108_v7, 8.507059e+37  ;;  %vm5119_vm1 = vweird.f32 %v14597_v49  ;;  %vm5106_vm6 = vmor %vm5104_vm15, %vm5105_vm2 }
 0x5c1   : > { %16545 = vst [vmem:[#allocation129_spill] sm:$0xff] %v14640_v55  ;;  %v5469_v15 = vmul.f32 %v5228_v25, %v5082_v14  ;;  %v6652_v53 = vadd.f32 %v6620_v57, %v14640_v55  ;;  %v5115_v58 = vmul.f32 %v14649_v60, %v14597_v49  ;;  %vm5120_vm4 = vweird.f32 %v14649_v60  ;;  %v6903_v25 = vpop.f32.mrf.mxu1 }
 0x5c2   : > { %v5125_v30 = vand.u32 2147483648, %v14597_v49  ;;  %v5597_v11 = vrot.slane %v5437_v36, 6  ;;  %v5092_v14 = vsel %vm5091_vm0, %v8242_v26, %v5088_v43  ;;  %v5102_v7 = vmul.f32 %v14626_v41, %v5101_v9  ;;  %vm5121_vm11 = vmor %vm5119_vm1, %vm5120_vm4 }
 0x5c3   : > { %v5501_v16 = vrot.slane %v5469_v15, 6  ;;  %v6756_v52 = vadd.f32 %v6724_v45, %v6652_v53  ;;  %v5097_v57 = vsel %vm14612_vm12, %v5096_v51, %v5092_v14  ;;  %v5116_v33 = vsub.f32 1.0, %v5115_v58  ;;  %v16553_v58 = vld [vmem:[#allocation117_spill] sm:$0xff] }
 0x5c4   : > { %v14668_v56 = vadd.f32 1.0, %v8246_v10  ;;  %v16549_v55 = vrot.slane %v14501_v46, 6  ;;  %v16550_v20 = vrot.slane %v14498_v39, 6  ;;  %v5214_v43 = vrot.slane %v5097_v57, 7 }
 0x5c5   : > { %v5406_v9 = vmul.f32 %v14543_v63, %v5097_v57  ;;  %vm14679_vm5 = vcmp.eq.f32.partialorder %v5123_v50, 8.507059e+37  ;;  %v6949_v10 = vmul.f32 %v6903_v25, %v6756_v52  ;;  %v5103_v46 = vadd.f32 %v14626_v41, %v5102_v7 }
 0x5c6   : > { %v5516_v1 = vsel %vm2160_vm8, %v16549_v55, %v5501_v16  ;;  %v5612_v26 = vsel %vm2160_vm8, %v16550_v20, %v5597_v11  ;;  %v5227_v55 = vsel %vm1856_vm7, %v5213_v42, %v5214_v43  ;;  %v5117_v45 = vmul.f32 %v14649_v60, %v5116_v33 }
 0x5c7   : > { %v5693_v51 = vmul.f32 %v5612_v26, %v5469_v15  ;;  %v5757_v53 = vmul.f32 %v5516_v1, %v5469_v15  ;;  %v5438_v39 = vadd.f32 %v5406_v9, %v14379_v21  ;;  %v5126_v20 = vor.u32 1.1754944e-38, %v5125_v30 }
 0x5c8   : > { %v14689_v14 = vadd.f32 %v6949_v10, %v16553_v58  ;;  %v5470_v29 = vmul.f32 %v5227_v55, %v5097_v57  ;;  %v5107_v15 = vsel %vm5106_vm6, %v14626_v41, %v5103_v46  ;;  %v5118_v42 = vadd.f32 %v14649_v60, %v5117_v45 }
 0x5c9   : > { %v5725_v63 = vadd.f32 %v5693_v51, %v5437_v36  ;;  %v5789_v50 = vrot.slane %v5757_v53, 4  ;;  %v5598_v1 = vrot.slane %v5438_v39, 6  ;;  %8249 = vrcp.f32 %v14668_v56 }
 0x5ca   : > { %16554 = vst [vmem:[#allocation117_spill] sm:$0xff] %v14689_v14  ;;  %v16555_v21 = vrot.slane %v14530_v3, 4  ;;  %v5502_v7 = vrot.slane %v5470_v29, 6  ;;  %v5112_v52 = vsel %vm14652_vm3, %v5111_v40, %v5107_v15  ;;  %v16556_v3 = vrot.slane %v14547_v23, 4  ;;  %v16630_v14 = vld [vmem:[#allocation92_spill] sm:$0xff] }
 0x5cb   : > { %v5885_v36 = vrot.slane %v5725_v63, 4  ;;  %v5611_v8 = vsel %vm2160_vm8, %v5597_v11, %v5598_v1  ;;  %v5215_v33 = vrot.slane %v5112_v52, 7  ;;  %v5407_v41 = vmul.f32 %v14559_v32, %v5112_v52 }
 0x5cc   : > { %v5804_v30 = vsel %vm2464_vm14, %v16555_v21, %v5789_v50  ;;  %v5515_v40 = vsel %vm2160_vm8, %v5501_v16, %v5502_v7  ;;  %v5694_v27 = vmul.f32 %v5611_v8, %v5470_v29  ;;  %v5122_v26 = vsel %vm5121_vm11, %v14649_v60, %v5118_v42 }
 0x5cd   : > { %v6045_v57 = vmul.f32 %v5804_v30, %v5757_v53  ;;  %v5900_v25 = vsel %vm2464_vm14, %v16556_v3, %v5885_v36  ;;  %v5758_v10 = vmul.f32 %v5515_v40, %v5470_v29  ;;  %v5226_v23 = vsel %vm1856_vm7, %v5214_v43, %v5215_v33  ;;  %v6906_v30 = vpop.f32.mrf.mxu1 }
 0x5ce   : > { %v5981_v11 = vmul.f32 %v5900_v25, %v5757_v53  ;;  %v5726_v49 = vadd.f32 %v5694_v27, %v5438_v39  ;;  %v14725_v51 = vadd.f32 %v5407_v41, %v14457_v12  ;;  %v14729_v16 = vsel %vm14679_vm5, %v5126_v20, %v5122_v26  ;;  %v14774_v25 = vpop.f32.mrf.mxu0 }
 0x5cf   : > { %v6141_v9 = vmul.f32 %v6045_v57, %v14600_v37  ;;  %v14720_v32 = vmul.f32 %v6045_v57, %v14571_v48  ;;  %v14731_v46 = vpop.eup %8249  ;;  %v5790_v29 = vrot.slane %v5758_v10, 4  ;;  %v5471_v43 = vmul.f32 %v5226_v23, %v5112_v52 }
 0x5d0   : > { %v6013_v60 = vadd.f32 %v5981_v11, %v5725_v63  ;;  %v5886_v53 = vrot.slane %v5726_v49, 4  ;;  %v5599_v12 = vrot.slane %v14725_v51, 6  ;;  %v5216_v55 = vrot.slane %v14729_v16, 7 }
 0x5d1   : > { %v6301_v37 = vmul.f32 %v14720_v32, %v14460_v38  ;;  %v14737_v48 = vmul.f32 %v14720_v32, %v14434_v22  ;;  %v5803_v38 = vsel %vm2464_vm14, %v5789_v50, %v5790_v29  ;;  %v5503_v58 = vrot.slane %v5471_v43, 6 }
 0x5d2   : > { %v6173_v24 = vadd.f32 %v6141_v9, %v6013_v60  ;;  %v5899_v22 = vsel %vm2464_vm14, %v5885_v36, %v5886_v53  ;;  %v6046_v20 = vmul.f32 %v5803_v38, %v5758_v10  ;;  %v5610_v63 = vsel %vm2160_vm8, %v5598_v1, %v5599_v12 }
 0x5d3   : > { %v6461_v39 = vmul.f32 %v14737_v48, %v14373_v35  ;;  %v6525_v45 = vmul.f32 %v14737_v48, %v14351_v61  ;;  %v5982_v21 = vmul.f32 %v5899_v22, %v5758_v10  ;;  %v5514_v50 = vsel %vm2160_vm8, %v5502_v7, %v5503_v58 }
 0x5d4   : > { %v14751_v15 = vadd.f32 %v6301_v37, %v6173_v24  ;;  %v6142_v61 = vmul.f32 %v6046_v20, %v6013_v60  ;;  %v14755_v52 = vmul.f32 %v6046_v20, %v6045_v57  ;;  %v5695_v36 = vmul.f32 %v5610_v63, %v5471_v43 }
 0x5d5   : > { %v6621_v42 = vmul.f32 %v6525_v45, %v14034_v62  ;;  %v6685_v35 = vmul.f32 %v6525_v45, %v13973_v6  ;;  %v6014_v1 = vadd.f32 %v5982_v21, %v5726_v49  ;;  %v5759_v3 = vmul.f32 %v5514_v50, %v5471_v43  ;;  %v6908_v21 = vpop.f32.mrf.mxu1 }
 0x5d6   : > { %v6493_v8 = vadd.f32 %v6461_v39, %v14751_v15  ;;  %v6302_v62 = vmul.f32 %v14755_v52, %v14618_v47  ;;  %v14765_v6 = vmul.f32 %v14755_v52, %v14593_v17  ;;  %v14768_v57 = vadd.f32 %v5695_v36, %v14725_v51 }
 0x5d7   : > { %v6725_v41 = vmul.f32 %v13990_v34, %v6685_v35  ;;  %v5225_v7 = vsel %vm1856_vm7, %v5215_v33, %v5216_v55  ;;  %v14776_v27 = vadd.f32 %v6142_v61, %v6014_v1  ;;  %v5791_v26 = vrot.slane %v5759_v3, 4 }
 0x5d8   : > { %v6653_v40 = vadd.f32 %v6621_v42, %v6493_v8  ;;  %v5408_v47 = vmul.f32 %v14577_v54, %v14729_v16  ;;  %v6462_v17 = vmul.f32 %v14765_v6, %v14419_v44  ;;  %v6526_v11 = vmul.f32 %v14765_v6, %v14398_v0 }
 0x5d9   : > { %v5887_v9 = vrot.slane %v14768_v57, 4  ;;  %v14786_v10 = vmul.f32 %v5225_v7, %v14729_v16  ;;  %v14789_v49 = vadd.f32 %v6302_v62, %v14776_v27  ;;  %v5802_v23 = vsel %vm2464_vm14, %v5790_v29, %v5791_v26 }
 0x5da   : > { %v6757_v33 = vadd.f32 %v6725_v41, %v6653_v40  ;;  %v14794_v54 = vadd.f32 %v5408_v47, %v14510_v13  ;;  %v6622_v44 = vmul.f32 %v6526_v11, %v14062_v4  ;;  %v6686_v51 = vmul.f32 %v6526_v11, %v14014_v18  ;;  %v16557_v4 = vld [vmem:[#allocation103_spill] sm:$0xff]  ;;  %v16559_v47 = vld [vmem:[#allocation126_spill] sm:$0xff] }
 0x5db   : > { %v5898_v0 = vsel %vm2464_vm14, %v5886_v53, %v5887_v9  ;;  %v6047_v60 = vmul.f32 %v5802_v23, %v5759_v3  ;;  %v6494_v43 = vadd.f32 %v6462_v17, %v14789_v49  ;;  %v5504_v45 = vrot.slane %v14786_v10, 6 }
 0x5dc   : > { %v6950_v37 = vmul.f32 %v6906_v30, %v6757_v33  ;;  %v5983_v39 = vmul.f32 %v5898_v0, %v5759_v3  ;;  %v6726_v38 = vmul.f32 %v13990_v34, %v6686_v51  ;;  %v5600_v63 = vrot.slane %v14794_v54, 6 }
 0x5dd   : > { %v6143_v29 = vmul.f32 %v6047_v60, %v6014_v1  ;;  %v14803_v22 = vmul.f32 %v6047_v60, %v6046_v20  ;;  %v6654_v18 = vadd.f32 %v6622_v44, %v6494_v43  ;;  %v5513_v35 = vsel %vm2160_vm8, %v5503_v58, %v5504_v45 }
 0x5de   : > { %v14807_v42 = vadd.f32 %v6950_v37, %v16557_v4  ;;  %v6015_v53 = vadd.f32 %v5983_v39, %v14768_v57  ;;  %v5609_v61 = vsel %vm2160_vm8, %v5599_v12, %v5600_v63  ;;  %v14824_v50 = vmul.f32 %v5513_v35, %v14786_v10  ;;  %v4576_v12 = vpop.f32.mrf.mxu0 }
 0x5df   : > { %v6303_v30 = vmul.f32 %v14803_v22, %v6173_v24  ;;  %v14817_v20 = vmul.f32 %v14803_v22, %v14720_v32  ;;  %v6758_v36 = vadd.f32 %v6726_v38, %v6654_v18  ;;  %v5696_v58 = vmul.f32 %v5609_v61, %v14786_v10 }
 0x5e0   : > { %16558 = vst [vmem:[#allocation103_spill] sm:$0xff] %v14807_v42  ;;  %v14826_v8 = vadd.f32 %v6143_v29, %v6015_v53  ;;  %v5130_v24 = vmul.f32 %v14731_v46, %v14668_v56  ;;  %v5792_v1 = vrot.slane %v14824_v50, 4  ;;  %vm5134_vm9 = vweird.f32 %v14668_v56 }
 0x5e1   : > { %v6463_v32 = vmul.f32 %v14817_v20, %v14471_v19  ;;  %v6527_v41 = vmul.f32 %v14817_v20, %v14451_v31  ;;  %v6951_v3 = vmul.f32 %v6908_v21, %v6758_v36  ;;  %v14841_v57 = vadd.f32 %v5696_v58, %v14794_v54  ;;  %v16562_v58 = vld [vmem:[#allocation108_spill] sm:$0xff] }
 0x5e2   : > { %v14838_v62 = vadd.f32 %v6303_v30, %v14826_v8  ;;  %v5131_v7 = vsub.f32 1.0, %v5130_v24  ;;  %v5801_v31 = vsel %vm2464_vm14, %v5791_v26, %v5792_v1  ;;  %vm5135_vm10 = vweird.f32 %v14731_v46 }
 0x5e3   : > { %v6623_v40 = vmul.f32 %v6527_v41, %v14143_v28  ;;  %v6687_v19 = vmul.f32 %v6527_v41, %v14107_v59  ;;  %v14851_v17 = vadd.f32 %v6951_v3, %v16559_v47  ;;  %v5888_v33 = vrot.slane %v14841_v57, 4  ;;  %v14858_v28 = vpop.f32.mrf.mxu3  ;;  %vm5136_vm12 = vmor %vm5134_vm9, %vm5135_vm10  ;;  %v16563_v3 = vld [vmem:[#allocation35_spill] sm:$0xff]  ;;  %v16567_v47 = vld [vmem:[#allocation68_spill] sm:$0xff] }
 0x5e4   : > { %v6495_v11 = vadd.f32 %v6463_v32, %v14838_v62  ;;  %v14856_v23 = vmul.f32 %v5801_v31, %v14824_v50  ;;  %v5132_v44 = vmul.f32 %v14731_v46, %v5131_v7  ;;  %v5138_v26 = vand.u32 2147483647, %v14668_v56 }
 0x5e5   : > { %16560 = vst [vmem:[#allocation126_spill] sm:$0xff] %v14851_v17  ;;  %v6727_v59 = vmul.f32 %v13990_v34, %v6687_v19  ;;  %v5140_v51 = vand.u32 2147483648, %v14668_v56  ;;  %v5897_v37 = vsel %vm2464_vm14, %v5887_v9, %v5888_v33  ;;  %v5313_v18 = vrot.slane %v14858_v28, 7  ;;  %v16629_v17 = vld [vmem:[#allocation78_spill] sm:$0xff] }
 0x5e6   : > { %v6655_v0 = vadd.f32 %v6623_v40, %v6495_v11  ;;  %v6144_v43 = vmul.f32 %v14856_v23, %v6015_v53  ;;  %v14870_v39 = vmul.f32 %v14856_v23, %v6047_v60  ;;  %v5984_v38 = vmul.f32 %v5897_v37, %v14824_v50  ;;  %v6911_v60 = vpop.f32.mrf.mxu1  ;;  %v16565_v40 = vld [vmem:[#allocation112_spill] sm:$0xff] }
 0x5e7   : > { %v5133_v29 = vadd.f32 %v14731_v46, %v5132_v44  ;;  %v5141_v4 = vor.u32 1.1754944e-38, %v5140_v51  ;;  %v7544_v9 = vmul.f32 -1.442695, %v14774_v25  ;;  %vm5139_vm13 = vcmp.eq.f32.partialorder %v5138_v26, 8.507059e+37 }
 0x5e8   : > { %v6759_v35 = vadd.f32 %v6727_v59, %v6655_v0  ;;  %v6304_v21 = vmul.f32 %v14870_v39, %v14776_v27  ;;  %v14879_v30 = vmul.f32 %v14870_v39, %v14755_v52  ;;  %v14887_v53 = vadd.f32 %v5984_v38, %v14841_v57 }
 0x5e9   : > { %v5137_v61 = vsel %vm5136_vm12, %v14731_v46, %v5133_v29  ;;  %v16561_v27 = vrot.slane %v14510_v13, 7  ;;  %8251 = vpow2.f32 %v7544_v9  ;;  %v4578_v13 = vpop.f32.mrf.mxu0  ;;  %vm4715_vm15 = vweird.f32 %v16567_v47 }
 0x5ea   : > { %v6952_v36 = vmul.f32 %v6911_v60, %v6759_v35  ;;  %v6464_v56 = vmul.f32 %v14879_v30, %v14632_v5  ;;  %v6528_v25 = vmul.f32 %v14879_v30, %v16562_v58  ;;  %v14900_v24 = vsel %vm5139_vm13, %v5141_v4, %v5137_v61  ;;  %v16566_v5 = vld [vmem:[#allocation91_spill] sm:$0xff] }
 0x5eb   : > { %v5320_v52 = vsel %vm1856_vm7, %v16561_v27, %v5313_v18  ;;  %v14903_v32 = vadd.f32 %v6144_v43, %v14887_v53  ;;  %v5217_v46 = vrot.slane %v14900_v24, 7  ;;  %v7545_v26 = vmul.f32 -1.442695, %v4576_v12  ;;  %v16568_v43 = vld [vmem:[#allocation40_spill] sm:$0xff]  ;;  %v14933_v4 = vpop.f32.mrf.mxu3 }
 0x5ec   : > { %v5409_v41 = vmul.f32 %v5320_v52, %v14900_v24  ;;  %v14908_v7 = vadd.f32 %v6952_v36, %v16563_v3  ;;  %v6624_v19 = vmul.f32 %v6528_v25, %v16565_v40  ;;  %v6688_v31 = vmul.f32 %v6528_v25, %v16566_v5 }
 0x5ed   : > { %v14914_v11 = vadd.f32 %v6304_v21, %v14903_v32  ;;  %v5224_v59 = vsel %vm1856_vm7, %v5216_v55, %v5217_v46  ;;  %v7546_v37 = vmul.f32 -1.442695, %v4578_v13  ;;  %v4713_v38 = vadd.f32 %v16567_v47, %v16568_v43  ;;  %v16569_v55 = vld [vmem:[#allocation64_spill] sm:$0xff] }
 0x5ee   : > { %16564 = vst [vmem:[#allocation108_spill] sm:$0xff] %v14908_v7  ;;  %v14923_v44 = vadd.f32 %v5409_v41, %v14858_v28  ;;  %v6728_v51 = vmul.f32 %v13990_v34, %v6688_v31  ;;  %v14927_v0 = vmul.f32 %v5224_v59, %v14900_v24  ;;  %8253 = vpow2.f32 %v7545_v26  ;;  %v6913_v41 = vpop.f32.mrf.mxu1 }
 0x5ef   : > { %v6496_v29 = vadd.f32 %v6464_v56, %v14914_v11  ;;  %v4720_v35 = vand.u32 2147483648, %v16569_v55  ;;  %8255 = vpow2.f32 %v7546_v37  ;;  %vm4714_vm2 = vweird.f32 %v16569_v55  ;;  %v8252_v9 = vpop.eup %8251 }
 0x5f0   : > { %v5601_v16 = vrot.slane %v14923_v44, 6  ;;  %v5505_v12 = vrot.slane %v14927_v0, 6  ;;  %v4718_v21 = vand.u32 2147483647, %v16569_v55  ;;  %vm14947_vm3 = vmor %vm4714_vm2, %vm4715_vm15  ;;  %v14958_v56 = vadd.f32 1.0, %v8252_v9 }
 0x5f1   : > { %v6656_v60 = vadd.f32 %v6624_v19, %v6496_v29  ;;  %v4717_v54 = vsel %vm14947_vm3, %v16567_v47, %v4713_v38  ;;  %v4721_v25 = vor.u32 1.1754944e-38, %v4720_v35  ;;  %v16572_v47 = vld [vmem:[#allocation121_spill] sm:$0xff] }
 0x5f2   : > { %v5608_v61 = vsel %vm2160_vm8, %v5600_v63, %v5601_v16  ;;  %v5512_v52 = vsel %vm2160_vm8, %v5504_v45, %v5505_v12  ;;  %8257 = vrcp.f32 %v14958_v56  ;;  %vm4719_vm0 = vcmp.eq.f32.partialorder %v4718_v21, 8.507059e+37  ;;  %v16574_v21 = vld [vmem:[#allocation119_spill] sm:$0xff] }
 0x5f3   : > { %v5697_v36 = vmul.f32 %v5608_v61, %v14927_v0  ;;  %v6760_v63 = vadd.f32 %v6728_v51, %v6656_v60  ;;  %v14964_v58 = vmul.f32 %v5512_v52, %v14927_v0  ;;  %v14971_v40 = vsel %vm4719_vm0, %v4721_v25, %v4717_v54  ;;  %v15000_v29 = vpop.f32.mrf.mxu3 }
 0x5f4   : > { %v8254_v10 = vpop.eup %8253  ;;  %v5314_v51 = vrot.slane %v14933_v4, 7  ;;  %v15833_v50 = vrot.slane %v14971_v40, 7  ;;  %v5153_v35 = vand.u32 2147483647, %v14958_v56  ;;  %v16575_v9 = vrot.slane %v16574_v21, 7 }
 0x5f5   : > { %v14967_v13 = vadd.f32 %v5697_v36, %v14923_v44  ;;  %v6953_v45 = vmul.f32 %v6913_v41, %v6760_v63  ;;  %v15835_v3 = vrot.slane %v14964_v58, 4  ;;  %v8256_v19 = vpop.eup %8255  ;;  %v14974_v31 = vadd.f32 1.0, %v8254_v10 }
 0x5f6   : > { %v14986_v37 = vadd.f32 1.0, %v8256_v19  ;;  %v5251_v60 = vsel %vm1856_vm7, %v15833_v50, %v16575_v9  ;;  %v5315_v36 = vrot.slane %v15000_v29, 7  ;;  %vm5149_vm1 = vweird.f32 %v14958_v56 }
 0x5f7   : > { %v15834_v5 = vrot.slane %v14967_v13, 4  ;;  %v14977_v59 = vadd.f32 %v6953_v45, %v16572_v47  ;;  %v5800_v26 = vsel %vm2464_vm14, %v5792_v1, %v15835_v3  ;;  %8259 = vrcp.f32 %v14974_v31 }
 0x5f8   : > { %v14995_v38 = vmul.f32 %v5800_v26, %v14964_v58  ;;  %8261 = vrcp.f32 %v14986_v37  ;;  %v8258_v55 = vpop.eup %8257  ;;  %v15032_v54 = vmul.f32 %v5251_v60, %v16574_v21  ;;  %v5155_v28 = vand.u32 2147483648, %v14958_v56 }
 0x5f9   : > { %16573 = vst [vmem:[#allocation35_spill] sm:$0xff] %v14977_v59  ;;  %v5896_v43 = vsel %vm2464_vm14, %v5888_v33, %v15834_v5  ;;  %v5145_v27 = vmul.f32 %v8258_v55, %v14958_v56  ;;  %vm15041_vm4 = vcmp.eq.f32.partialorder %v5153_v35, 8.507059e+37  ;;  %vm5150_vm5 = vweird.f32 %v8258_v55  ;;  %v16580_v35 = vld [vmem:[#allocation127_spill] sm:$0xff]  ;;  %v16628_v59 = vld [vmem:[#allocation60_spill] sm:$0xff] }
 0x5fa   : > { %v5985_v1 = vmul.f32 %v5896_v43, %v14964_v58  ;;  %v6145_v57 = vmul.f32 %v14995_v38, %v14887_v53  ;;  %v15007_v33 = vmul.f32 %v14995_v38, %v14856_v23  ;;  %v5319_v23 = vsel %vm1856_vm7, %v5313_v18, %v5314_v51  ;;  %v16578_v43 = vld [vmem:[#allocation120_spill] sm:$0xff]  ;;  %vm5151_vm6 = vmor %vm5149_vm1, %vm5150_vm5 }
 0x5fb   : > { %v5146_v25 = vsub.f32 1.0, %v5145_v27  ;;  %v5478_v10 = vrot.slane %v15032_v54, 6  ;;  %v16581_v21 = vrot.slane %v16580_v35, 6  ;;  %vm5164_vm9 = vweird.f32 %v14974_v31 }
 0x5fc   : > { %v15017_v61 = vadd.f32 %v5985_v1, %v14967_v13  ;;  %v6305_v53 = vmul.f32 %v15007_v33, %v14826_v8  ;;  %v6369_v52 = vmul.f32 %v15007_v33, %v14803_v22  ;;  %vm5179_vm13 = vweird.f32 %v14986_v37 }
 0x5fd   : > { %v8260_v18 = vpop.eup %8259  ;;  %v5147_v47 = vmul.f32 %v8258_v55, %v5146_v25  ;;  %v5538_v9 = vsel %vm2160_vm8, %v5478_v10, %v16581_v21 }
 0x5fe   : > { %v15035_v63 = vadd.f32 %v6145_v57, %v15017_v61  ;;  %v6465_v41 = vmul.f32 %v6369_v52, %v14751_v15  ;;  %v6529_v8 = vmul.f32 %v6369_v52, %v14737_v48  ;;  %v15046_v45 = vpop.eup %8261  ;;  %v5160_v26 = vmul.f32 %v8260_v18, %v14974_v31  ;;  %v16579_v57 = vld [vmem:[#allocation118_spill] sm:$0xff] }
 0x5ff   : > { %v5175_v48 = vmul.f32 %v15046_v45, %v14986_v37  ;;  %v5148_v27 = vadd.f32 %v8258_v55, %v5147_v47  ;;  %v15061_v52 = vmul.f32 %v5538_v9, %v16580_v35  ;;  %vm5165_vm11 = vweird.f32 %v8260_v18  ;;  %v6916_v35 = vpop.f32.mrf.mxu1 }
 0x600   : > { %v6337_v19 = vadd.f32 %v6305_v53, %v15035_v63  ;;  %v6625_v1 = vmul.f32 %v6529_v8, %v16578_v43  ;;  %v6689_v15 = vmul.f32 %v6529_v8, %v16579_v57  ;;  %v5161_v53 = vsub.f32 1.0, %v5160_v26  ;;  %vm5166_vm10 = vmor %vm5164_vm9, %vm5165_vm11 }
 0x601   : > { %v5156_v8 = vor.u32 1.1754944e-38, %v5155_v28  ;;  %v5168_v43 = vand.u32 2147483647, %v14974_v31  ;;  %v5170_v57 = vand.u32 2147483648, %v14974_v31  ;;  %v5152_v5 = vsel %vm5151_vm6, %v8258_v55, %v5148_v27  ;;  %v16582_v55 = vld [vmem:[#allocation70_spill] sm:$0xff] }
 0x602   : > { %v6497_v60 = vadd.f32 %v6465_v41, %v6337_v19  ;;  %v6729_v25 = vmul.f32 %v13990_v34, %v6689_v15  ;;  %v5162_v3 = vmul.f32 %v8260_v18, %v5161_v53  ;;  %v5176_v19 = vsub.f32 1.0, %v5175_v48 }
 0x603   : > { %v5157_v41 = vsel %vm15041_vm4, %v5156_v8, %v5152_v5  ;;  %v5767_v47 = vrot.slane %v15061_v52, 4  ;;  %vm5169_vm12 = vcmp.eq.f32.partialorder %v5168_v43, 8.507059e+37  ;;  %v5171_v21 = vor.u32 1.1754944e-38, %v5170_v57 }
 0x604   : > { %v6657_v50 = vadd.f32 %v6625_v1, %v6497_v60  ;;  %v5218_v56 = vrot.slane %v5157_v41, 7  ;;  %v5410_v15 = vmul.f32 %v5319_v23, %v5157_v41  ;;  %v5163_v28 = vadd.f32 %v8260_v18, %v5162_v3  ;;  %v16584_v60 = vld [vmem:[#allocation115_spill] sm:$0xff] }
 0x605   : > { %v5318_v5 = vsel %vm1856_vm7, %v5314_v51, %v5315_v36  ;;  %v16583_v31 = vrot.slane %v16582_v55, 4  ;;  %v5177_v51 = vmul.f32 %v15046_v45, %v5176_v19  ;;  %vm5180_vm15 = vweird.f32 %v15046_v45 }
 0x606   : > { %v6761_v26 = vadd.f32 %v6729_v25, %v6657_v50  ;;  %v5223_v3 = vsel %vm1856_vm7, %v5217_v46, %v5218_v56  ;;  %v5442_v22 = vadd.f32 %v5410_v15, %v14933_v4  ;;  %v5167_v1 = vsel %vm5166_vm10, %v8260_v18, %v5163_v28  ;;  %vm15106_vm2 = vmor %vm5179_vm13, %vm5180_vm15 }
 0x607   : > { %v5825_v50 = vsel %vm2464_vm14, %v5767_v47, %v16583_v31  ;;  %v5474_v48 = vmul.f32 %v5223_v3, %v5157_v41  ;;  %v5172_v9 = vsel %vm5169_vm12, %v5171_v21, %v5167_v1  ;;  %v5178_v24 = vadd.f32 %v15046_v45, %v5177_v51  ;;  %v4489_v41 = vpop.f32.mrf.mxu3 }
 0x608   : > { %v6954_v23 = vmul.f32 %v6916_v35, %v6761_v26  ;;  %v5602_v53 = vrot.slane %v5442_v22, 6  ;;  %v5219_v25 = vrot.slane %v5172_v9, 7  ;;  %v5411_v8 = vmul.f32 %v5318_v5, %v5172_v9 }
 0x609   : > { %v5506_v43 = vrot.slane %v5474_v48, 6  ;;  %v5183_v46 = vand.u32 2147483647, %v14986_v37  ;;  %v5185_v26 = vand.u32 2147483648, %v14986_v37  ;;  %v5316_v31 = vrot.slane %v4489_v41, 7 }
 0x60a   : > { %v15092_v27 = vadd.f32 %v6954_v23, %v16584_v60  ;;  %v5607_v4 = vsel %vm2160_vm8, %v5601_v16, %v5602_v53  ;;  %v5222_v18 = vsel %vm1856_vm7, %v5218_v56, %v5219_v25  ;;  %v15104_v57 = vadd.f32 %v5411_v8, %v15000_v29  ;;  %v16590_v60 = vld [vmem:[#allocation73_spill] sm:$0xff] }
 0x60b   : > { %v5511_v44 = vsel %vm2160_vm8, %v5505_v12, %v5506_v43  ;;  %v5698_v15 = vmul.f32 %v5607_v4, %v5474_v48  ;;  %v15115_v16 = vmul.f32 %v5222_v18, %v5172_v9  ;;  %v5182_v56 = vsel %vm15106_vm2, %v15046_v45, %v5178_v24 }
 0x60c   : > { %16585 = vst [vmem:[#allocation112_spill] sm:$0xff] %v15092_v27  ;;  %v5762_v28 = vmul.f32 %v5511_v44, %v5474_v48  ;;  %v5603_v35 = vrot.slane %v15104_v57, 6  ;;  %vm5184_vm3 = vcmp.eq.f32.partialorder %v5183_v46, 8.507059e+37  ;;  %v5186_v21 = vor.u32 1.1754944e-38, %v5185_v26 }
 0x60d   : > { %v5730_v5 = vadd.f32 %v5698_v15, %v5442_v22  ;;  %v5507_v37 = vrot.slane %v15115_v16, 6  ;;  %v15123_v0 = vmul.f32 %v5825_v50, %v16582_v55  ;;  %v16589_v9 = vrot.slane %v14964_v58, 4 }
 0x60e   : > { %v5794_v12 = vrot.slane %v5762_v28, 4  ;;  %v5606_v23 = vsel %vm2160_vm8, %v5602_v53, %v5603_v35  ;;  %v15129_v3 = vsel %vm5184_vm3, %v5186_v21, %v5182_v56  ;;  %v5317_v51 = vsel %vm1856_vm7, %v5315_v36, %v5316_v31 }
 0x60f   : > { %16588 = vst [vmem:[#allocation91_spill] sm:$0xff] %v15129_v3  ;;  %v5890_v45 = vrot.slane %v5730_v5, 4  ;;  %v5510_v1 = vsel %vm2160_vm8, %v5506_v43, %v5507_v37  ;;  %v5699_v22 = vmul.f32 %v5606_v23, %v15115_v16  ;;  %v5220_v48 = vrot.slane %v15129_v3, 7 }
 0x610   : > { %v5799_v55 = vsel %vm2464_vm14, %v16589_v9, %v5794_v12  ;;  %v15140_v50 = vmul.f32 %v5510_v1, %v15115_v16  ;;  %v16591_v53 = vrot.slane %v16590_v60, 7  ;;  %v16592_v43 = vrot.slane %v14967_v13, 4 }
 0x611   : > { %v6050_v24 = vmul.f32 %v5799_v55, %v5762_v28  ;;  %v15155_v46 = vadd.f32 %v5699_v22, %v15104_v57  ;;  %v5221_v29 = vsel %vm1856_vm7, %v5219_v25, %v5220_v48  ;;  %v16593_v18 = vrot.slane %v14971_v40, 7 }
 0x612   : > { %v5348_v8 = vsel %vm1856_vm7, %v5316_v31, %v16591_v53  ;;  %v5895_v58 = vsel %vm2464_vm14, %v16592_v43, %v5890_v45  ;;  %v5795_v36 = vrot.slane %v15140_v50, 4  ;;  %v5412_v21 = vmul.f32 %v5317_v51, %v15129_v3  ;;  %v16595_v43 = vld [vmem:[#allocation77_spill] sm:$0xff] }
 0x613   : > { %v5986_v4 = vmul.f32 %v5895_v58, %v5762_v28  ;;  %v5252_v19 = vsel %vm1856_vm7, %v5220_v48, %v16593_v18  ;;  %v5349_v13 = vsel %vm1856_vm7, 0.0, %v5348_v8  ;;  %v6146_v26 = vmul.f32 %v6050_v24, %v15017_v61  ;;  %v6918_v8 = vpop.f32.mrf.mxu1 }
 0x614   : > { %v15168_v44 = vmul.f32 %v6050_v24, %v14995_v38  ;;  %v5891_v15 = vrot.slane %v15155_v46, 4  ;;  %v5253_v25 = vsel %vm1856_vm7, 1.0, %v5252_v19  ;;  %v5798_v56 = vsel %vm2464_vm14, %v5794_v12, %v5795_v36 }
 0x615   : > { %v6018_v16 = vadd.f32 %v5986_v4, %v5730_v5  ;;  %v5381_v28 = vmul.f32 %v5349_v13, %v14971_v40  ;;  %v15188_v31 = vmul.f32 %v5798_v56, %v15140_v50  ;;  %v5444_v22 = vadd.f32 %v5412_v21, %v4489_v41  ;;  %v16597_v21 = vld [vmem:[#allocation105_spill] sm:$0xff] }
 0x616   : > { %v6306_v61 = vmul.f32 %v15168_v44, %v14903_v32  ;;  %v6370_v38 = vmul.f32 %v15168_v44, %v14870_v39  ;;  %v5894_v5 = vsel %vm2464_vm14, %v5890_v45, %v5891_v15  ;;  %v5445_v51 = vmul.f32 %v5253_v25, %v14971_v40 }
 0x617   : > { %v15190_v23 = vadd.f32 %v6146_v26, %v6018_v16  ;;  %v5987_v12 = vmul.f32 %v5894_v5, %v15140_v50  ;;  %v5413_v1 = vadd.f32 %v5381_v28, %v16590_v60  ;;  %v6147_v39 = vmul.f32 %v15188_v31, %v6018_v16  ;;  %v16594_v60 = vld [vmem:[#allocation113_spill] sm:$0xff] }
 0x618   : > { %v6466_v32 = vmul.f32 %v6370_v38, %v14789_v49  ;;  %v6530_v48 = vmul.f32 %v6370_v38, %v14765_v6  ;;  %v6211_v9 = vmul.f32 %v15188_v31, %v6050_v24  ;;  %v5476_v53 = vmul.f32 %v5221_v29, %v15129_v3 }
 0x619   : > { %v6338_v45 = vadd.f32 %v6306_v61, %v15190_v23  ;;  %v15200_v55 = vadd.f32 %v5987_v12, %v15155_v46  ;;  %v5477_v18 = vrot.slane %v5445_v51, 6  ;;  %v5573_v26 = vrot.slane %v5413_v1, 6 }
 0x61a   : > { %v6626_v41 = vmul.f32 %v6530_v48, %v16594_v60  ;;  %v6690_v49 = vmul.f32 %v6530_v48, %v16595_v43  ;;  %v6307_v6 = vmul.f32 %v6211_v9, %v15035_v63  ;;  %v6371_v58 = vmul.f32 %v6211_v9, %v15007_v33  ;;  %v16596_v63 = vld [vmem:[#allocation98_spill] sm:$0xff] }
 0x61b   : > { %v6498_v4 = vadd.f32 %v6466_v32, %v6338_v45  ;;  %v6179_v24 = vadd.f32 %v6147_v39, %v15200_v55  ;;  %v5508_v19 = vrot.slane %v5476_v53, 6  ;;  %v5539_v33 = vsel %vm2160_vm8, %v5477_v18, %v5478_v10  ;;  %v16598_v32 = vld [vmem:[#allocation124_spill] sm:$0xff] }
 0x61c   : > { %v6730_v13 = vmul.f32 %v13990_v34, %v6690_v49  ;;  %v6467_v40 = vmul.f32 %v6371_v58, %v14838_v62  ;;  %v6531_v29 = vmul.f32 %v6371_v58, %v14817_v20  ;;  %v5604_v38 = vrot.slane %v5444_v22, 6 }
 0x61d   : > { %v6658_v25 = vadd.f32 %v6626_v41, %v6498_v4  ;;  %v6339_v16 = vadd.f32 %v6307_v6, %v6179_v24  ;;  %v5509_v56 = vsel %vm2160_vm8, %v5507_v37, %v5508_v19  ;;  %v5540_v62 = vsel %vm2160_vm8, %v5508_v19, %v5477_v18  ;;  %v16600_v24 = vld [vmem:[#allocation80_spill] sm:$0xff] }
 0x61e   : > { %v6627_v28 = vmul.f32 %v6531_v29, %v16596_v63  ;;  %v6691_v61 = vmul.f32 %v6531_v29, %v16597_v21  ;;  %v5541_v12 = vsel %vm2160_vm8, 1.0, %v5540_v62  ;;  %v16599_v37 = vrot.slane %v16598_v32, 6  ;;  %v16602_v21 = vld [vmem:[#allocation122_spill] sm:$0xff] }
 0x61f   : > { %v6762_v20 = vadd.f32 %v6730_v13, %v6658_v25  ;;  %v6499_v5 = vadd.f32 %v6467_v40, %v6339_v16  ;;  %v5605_v39 = vsel %vm2160_vm8, %v5603_v35, %v5604_v38  ;;  %v5636_v9 = vsel %vm2160_vm8, %v5604_v38, %v5573_v26  ;;  %v6921_v40 = vpop.f32.mrf.mxu1 }
 0x620   : > { %v5635_v48 = vsel %vm2160_vm8, %v5573_v26, %v16599_v37  ;;  %v6731_v10 = vmul.f32 %v13990_v34, %v6691_v61  ;;  %v5637_v43 = vsel %vm2160_vm8, 0.0, %v5636_v9  ;;  %v5700_v49 = vmul.f32 %v5605_v39, %v5476_v53  ;;  %v16631_v34 = vld [vmem:[#allocation89_spill] sm:$0xff] }
 0x621   : > { %v5670_v45 = vmul.f32 %v5635_v48, %v15032_v54  ;;  %v6955_v60 = vmul.f32 %v6918_v8, %v6762_v20  ;;  %v6659_v41 = vadd.f32 %v6627_v28, %v6499_v5  ;;  %v5669_v6 = vmul.f32 %v5637_v43, %v5445_v51 }
 0x622   : > { %v5733_v4 = vmul.f32 %v5541_v12, %v5445_v51  ;;  %v5734_v57 = vmul.f32 %v5539_v33, %v15032_v54  ;;  %v5732_v19 = vadd.f32 %v5700_v49, %v5444_v22  ;;  %v5764_v13 = vmul.f32 %v5509_v56, %v5476_v53  ;;  %v16603_v53 = vld [vmem:[#allocation42_spill] sm:$0xff]  ;;  %v16605_v33 = vld [vmem:[#allocation59_spill] sm:$0xff] }
 0x623   : > { %v5702_v58 = vadd.f32 %v5670_v45, %v16598_v32  ;;  %v15241_v18 = vadd.f32 %v6955_v60, %v16600_v24  ;;  %v6763_v35 = vadd.f32 %v6731_v10, %v6659_v41  ;;  %v5701_v29 = vadd.f32 %v5669_v6, %v5413_v1 }
 0x624   : > { %v5765_v8 = vrot.slane %v5733_v4, 4  ;;  %v5766_v26 = vrot.slane %v5734_v57, 4  ;;  %v5796_v63 = vrot.slane %v5764_v13, 4  ;;  %v5892_v28 = vrot.slane %v5732_v19, 4 }
 0x625   : > { %16601 = vst [vmem:[#allocation68_spill] sm:$0xff] %v15241_v18  ;;  %v5862_v25 = vrot.slane %v5702_v58, 4  ;;  %v6956_v16 = vmul.f32 %v6921_v40, %v6763_v35  ;;  %v6185_v61 = vmul.f32 %v16602_v21, %v15123_v0  ;;  %v5861_v51 = vrot.slane %v5701_v29, 4  ;;  %v16627_v18 = vld [vmem:[#allocation71_spill] sm:$0xff] }
 0x626   : > { %v5826_v54 = vsel %vm2464_vm14, %v5766_v26, %v5767_v47  ;;  %v5827_v22 = vsel %vm2464_vm14, %v5765_v8, %v5766_v26  ;;  %v16604_v1 = vrot.slane %v16603_v53, 4  ;;  %v5797_v38 = vsel %vm2464_vm14, %v5795_v36, %v5796_v63 }
 0x627   : > { %v15256_v62 = vadd.f32 %v6956_v16, %v16605_v33  ;;  %v5828_v47 = vsel %vm2464_vm14, %v5796_v63, %v5765_v8  ;;  %v5893_v20 = vsel %vm2464_vm14, %v5891_v15, %v5892_v28  ;;  %v5923_v12 = vsel %vm2464_vm14, %v5861_v51, %v5862_v25 }
 0x628   : > { %v5922_v56 = vsel %vm2464_vm14, %v5862_v25, %v16604_v1  ;;  %v5829_v5 = vsel %vm2464_vm14, 1.0, %v5828_v47  ;;  %v5924_v50 = vsel %vm2464_vm14, %v5892_v28, %v5861_v51  ;;  %v5958_v37 = vmul.f32 %v5923_v12, %v5734_v57 }
 0x629   : > { %16606 = vst [vmem:[#allocation40_spill] sm:$0xff] %v15256_v62  ;;  %v5959_v32 = vmul.f32 %v5922_v56, %v15061_v52  ;;  %v5925_v36 = vsel %vm2464_vm14, 0.0, %v5924_v50  ;;  %v5988_v48 = vmul.f32 %v5893_v20, %v5764_v13  ;;  %v15277_v46 = vmul.f32 %v5829_v5, %v5733_v4  ;;  %v16612_v5 = vld [vmem:[#allocation39_spill] sm:$0xff] }
 0x62a   : > { %v5957_v10 = vmul.f32 %v5925_v36, %v5733_v4  ;;  %v6022_v39 = vmul.f32 %v5827_v22, %v5734_v57  ;;  %v6023_v9 = vmul.f32 %v5826_v54, %v15061_v52  ;;  %v5990_v45 = vadd.f32 %v5958_v37, %v5702_v58 }
 0x62b   : > { %v5991_v15 = vadd.f32 %v5959_v32, %v16603_v53  ;;  %v6020_v60 = vadd.f32 %v5988_v48, %v5732_v19  ;;  %v6052_v41 = vmul.f32 %v5797_v38, %v5764_v13  ;;  %v15282_v43 = vmul.f32 0.0, %v15277_v46  ;;  %v16608_v13 = vld [vmem:[#allocation38_spill] sm:$0xff] }
 0x62c   : > { %v5989_v49 = vadd.f32 %v5957_v10, %v5701_v29  ;;  %v15286_v6 = vmul.f32 %v6022_v39, %v15277_v46  ;;  %v6183_v24 = vmul.f32 %v6023_v9, %v6022_v39  ;;  %v6119_v35 = vmul.f32 %v6023_v9, %v5990_v45  ;;  %v16611_v38 = vld [vmem:[#allocation46_spill] sm:$0xff] }
 0x62d   : > { %16607 = vst [vmem:[#allocation64_spill] sm:$0xff] %v15282_v43  ;;  %v6120_v2 = vmul.f32 %v15123_v0, %v5991_v15  ;;  %v6148_v4 = vmul.f32 %v6052_v41, %v15200_v55  ;;  %v6184_v57 = vmul.f32 %v15123_v0, %v6023_v9  ;;  %v6212_v52 = vmul.f32 %v6052_v41, %v15188_v31  ;;  %v16609_v0 = vld [vmem:[#allocation47_spill] sm:$0xff] }
 0x62e   : > { %v6118_v58 = vmul.f32 %v6022_v39, %v5989_v49  ;;  %v6149_v19 = vadd.f32 %v15282_v43, %v5989_v49  ;;  %v15294_v29 = vmul.f32 0.0, %v15286_v6  ;;  %v6151_v8 = vadd.f32 %v6119_v35, %v5991_v15  ;;  %v16613_v39 = vld [vmem:[#allocation45_spill] sm:$0xff]  ;;  %v16615_v41 = vld [vmem:[#allocation51_spill] sm:$0xff] }
 0x62f   : > { %v6152_v40 = vadd.f32 %v6120_v2, %v16608_v13  ;;  %v6180_v26 = vadd.f32 %v6148_v4, %v6020_v60  ;;  %v6308_v25 = vmul.f32 %v6212_v52, %v15190_v23  ;;  %v15298_v16 = vmul.f32 %v6183_v24, %v15277_v46  ;;  %v16610_v23 = vld [vmem:[#allocation49_spill] sm:$0xff] }
 0x630   : > { %v6150_v55 = vadd.f32 %v6118_v58, %v5990_v45  ;;  %v6279_v63 = vmul.f32 %v6183_v24, %v6149_v19  ;;  %v6309_v31 = vadd.f32 %v6149_v19, %v15282_v43  ;;  %v6281_v21 = vmul.f32 %v6185_v61, %v6151_v8  ;;  %v16614_v45 = vld [vmem:[#allocation57_spill] sm:$0xff]  ;;  %v16617_v19 = vld [vmem:[#allocation54_spill] sm:$0xff] }
 0x631   : > { %v6282_v28 = vmul.f32 %v16609_v0, %v6152_v40  ;;  %v6340_v54 = vadd.f32 %v6308_v25, %v6180_v26  ;;  %v15303_v22 = vmul.f32 %v6184_v57, %v15286_v6  ;;  %v6345_v51 = vmul.f32 %v6185_v61, %v6183_v24  ;;  %v16619_v26 = vld [vmem:[#allocation65_spill] sm:$0xff] }
 0x632   : > { %v6280_v53 = vmul.f32 %v6184_v57, %v6150_v55  ;;  %v6310_v1 = vadd.f32 %v15294_v29, %v6150_v55  ;;  %v6311_v56 = vadd.f32 %v6279_v63, %v6151_v8  ;;  %v6313_v47 = vadd.f32 %v6281_v21, %v16611_v38  ;;  %v16620_v21 = vld [vmem:[#allocation62_spill] sm:$0xff] }
 0x633   : > { %v6314_v33 = vadd.f32 %v6282_v28, %v16610_v23  ;;  %v6346_v20 = vmul.f32 %v16609_v0, %v6184_v57  ;;  %v6347_v12 = vmul.f32 %v16612_v5, %v6185_v61  ;;  %v6372_v50 = vmul.f32 %v6212_v52, %v15168_v44  ;;  %v16616_v52 = vld [vmem:[#allocation44_spill] sm:$0xff] }
 0x634   : > { %v6312_v32 = vadd.f32 %v6280_v53, %v6152_v40  ;;  %v6439_v36 = vmul.f32 0.0, %v15298_v16  ;;  %v6440_v37 = vmul.f32 0.0, %v15303_v22  ;;  %v6441_v48 = vmul.f32 %v6345_v51, %v6309_v31  ;;  %v16618_v40 = vld [vmem:[#allocation61_spill] sm:$0xff] }
 0x635   : > { %v6442_v10 = vmul.f32 %v6346_v20, %v6310_v1  ;;  %v6443_v15 = vmul.f32 %v6347_v12, %v6311_v56  ;;  %v6445_v9 = vmul.f32 %v16613_v39, %v6313_v47  ;;  %v6446_v60 = vmul.f32 %v16614_v45, %v6314_v33 }
 0x636   : > { %v6444_v49 = vmul.f32 %v16615_v41, %v6312_v32  ;;  %v6468_v2 = vmul.f32 %v6372_v50, %v14914_v11  ;;  %v6469_v61 = vadd.f32 %v6309_v31, %v15282_v43  ;;  %v6470_v44 = vadd.f32 %v6310_v1, %v15294_v29  ;;  %v16632_v43 = vld [vmem:[#allocation82_spill] sm:$0xff] }
 0x637   : > { %v6471_v24 = vadd.f32 %v6439_v36, %v6311_v56  ;;  %v6472_v35 = vadd.f32 %v6440_v37, %v6312_v32  ;;  %v6473_v4 = vadd.f32 %v6441_v48, %v6313_v47  ;;  %v6474_v57 = vadd.f32 %v6442_v10, %v6314_v33  ;;  %v16621_v48 = vld [vmem:[#allocation72_spill] sm:$0xff] }
 0x638   : > { %v6475_v58 = vadd.f32 %v6443_v15, %v16616_v52  ;;  %v6476_v13 = vadd.f32 %v6444_v49, %v16617_v19  ;;  %v6477_v8 = vadd.f32 %v6445_v9, %v16618_v40  ;;  %v6478_v25 = vadd.f32 %v6446_v60, %v16619_v26  ;;  %v16622_v15 = vld [vmem:[#allocation74_spill] sm:$0xff]  ;;  %v16623_v60 = vld [vmem:[#allocation79_spill] sm:$0xff] }
 0x639   : > { %v6505_v55 = vmul.f32 %v6345_v51, %v15277_v46  ;;  %v6506_v11 = vmul.f32 %v6346_v20, %v15286_v6  ;;  %v6507_v63 = vmul.f32 %v6347_v12, %v15298_v16  ;;  %v6508_v0 = vmul.f32 %v16615_v41, %v15303_v22 }
 0x63a   : > { %v6509_v28 = vmul.f32 %v16613_v39, %v6345_v51  ;;  %v6510_v31 = vmul.f32 %v16614_v45, %v6346_v20  ;;  %v6511_v53 = vmul.f32 %v16620_v21, %v6347_v12  ;;  %v6500_v1 = vadd.f32 %v6468_v2, %v6340_v54  ;;  %v16624_v51 = vld [vmem:[#allocation93_spill] sm:$0xff] }
 0x63b   : > { %v6532_v56 = vmul.f32 %v6372_v50, %v14879_v30  ;;  %v6601_v23 = vmul.f32 0.0, %v6505_v55  ;;  %v6602_v33 = vmul.f32 0.0, %v6506_v11  ;;  %v6603_v38 = vmul.f32 0.0, %v6507_v63  ;;  %v16625_v45 = vld [vmem:[#allocation101_spill] sm:$0xff] }
 0x63c   : > { %v6605_v47 = vmul.f32 %v6509_v28, %v6469_v61  ;;  %v6606_v5 = vmul.f32 %v6510_v31, %v6470_v44  ;;  %v6607_v32 = vmul.f32 %v6511_v53, %v6471_v24  ;;  %v6608_v10 = vmul.f32 %v16621_v48, %v6472_v35  ;;  %v16626_v54 = vld [vmem:[#allocation129_spill] sm:$0xff] }
 0x63d   : > { %v6609_v9 = vmul.f32 %v16622_v15, %v6473_v4  ;;  %v6610_v41 = vmul.f32 %v16623_v60, %v6474_v57  ;;  %v6611_v39 = vmul.f32 %v16624_v51, %v6475_v58  ;;  %v6604_v20 = vmul.f32 0.0, %v6508_v0 }
 0x63e   : > { %v6612_v12 = vmul.f32 %v16625_v45, %v6476_v13  ;;  %v6628_v49 = vmul.f32 %v6532_v56, %v16626_v54  ;;  %v6630_v30 = vadd.f32 %v6470_v44, %v15294_v29  ;;  %v6631_v50 = vadd.f32 %v6471_v24, %v6439_v36 }
 0x63f   : > { %v6632_v2 = vadd.f32 %v6472_v35, %v6440_v37  ;;  %v6633_v52 = vadd.f32 %v6601_v23, %v6473_v4  ;;  %v6634_v19 = vadd.f32 %v6602_v33, %v6474_v57  ;;  %v6635_v40 = vadd.f32 %v6603_v38, %v6475_v58  ;;  %v16633_v35 = vld [vmem:[#allocation128_spill] sm:$0xff] }
 0x640   : > { %v6636_v26 = vadd.f32 %v6604_v20, %v6476_v13  ;;  %v6637_v21 = vadd.f32 %v6605_v47, %v6477_v8  ;;  %v6638_v62 = vadd.f32 %v6606_v5, %v6478_v25  ;;  %v6639_v27 = vadd.f32 %v6607_v32, %v16627_v18  ;;  %v8263_v4 = vld [vmem:[#allocation2 + $0x2] sm:$0x3]  ;;  %v16635_v8 = vld [vmem:[#allocation99_spill] sm:$0xff] }
 0x641   : > { %v6640_v7 = vadd.f32 %v6608_v10, %v16628_v59  ;;  %v6641_v42 = vadd.f32 %v6609_v9, %v16629_v17  ;;  %v6642_v3 = vadd.f32 %v6610_v41, %v16630_v14  ;;  %v6643_v54 = vadd.f32 %v6611_v39, %v16631_v34  ;;  %v16634_v58 = vld [vmem:[#allocation64_spill] sm:$0xff] }
 0x642   : > { %v6644_v29 = vadd.f32 %v6612_v12, %v16632_v43  ;;  %v6660_v36 = vadd.f32 %v6628_v49, %v6500_v1  ;;  %v6669_v37 = vmul.f32 %v6509_v28, %v15277_v46  ;;  %v6670_v44 = vmul.f32 %v6510_v31, %v15286_v6 }
 0x643   : > { %v6671_v24 = vmul.f32 %v6511_v53, %v15298_v16  ;;  %v6672_v18 = vmul.f32 %v16621_v48, %v15303_v22  ;;  %v6673_v59 = vmul.f32 %v16622_v15, %v6505_v55  ;;  %v6674_v17 = vmul.f32 %v16623_v60, %v6506_v11 }
 0x644   : > { %v6675_v14 = vmul.f32 %v16624_v51, %v6507_v63  ;;  %v6676_v34 = vmul.f32 %v16625_v45, %v6508_v0  ;;  %v6692_v43 = vmul.f32 %v6532_v56, %v16633_v35  ;;  %v6697_v57 = vperm.slane %v8263_v4, 0 }
 0x645   : > { %v6629_v13 = vadd.f32 %v6469_v61, %v16634_v58 }
 0x646   : > { %v6732_v25 = vmul.f32 %v16635_v8, %v6692_v43  ;;  %v6701_v28 = vmul.f32 %v6697_v57, %v15277_v46  ;;  %v6702_v31 = vmul.f32 %v6697_v57, %v15286_v6  ;;  %v6703_v53 = vmul.f32 %v6697_v57, %v15298_v16  ;;  %v16647_v43 = vld [vmem:[#allocation84_spill] sm:$0xff] }
 0x647   : > { %v6704_v1 = vmul.f32 %v6697_v57, %v15303_v22  ;;  %v6705_v23 = vmul.f32 %v6697_v57, %v6505_v55  ;;  %v6706_v33 = vmul.f32 %v6697_v57, %v6506_v11  ;;  %v6707_v38 = vmul.f32 %v6697_v57, %v6507_v63 }
 0x648   : > { %v6708_v47 = vmul.f32 %v6697_v57, %v6508_v0  ;;  %v6709_v5 = vmul.f32 %v6697_v57, %v6669_v37  ;;  %v6710_v56 = vmul.f32 %v6697_v57, %v6670_v44  ;;  %v6711_v32 = vmul.f32 %v6697_v57, %v6671_v24  ;;  %v16636_v44 = vld [vmem:[#allocation86_spill] sm:$0xff] }
 0x649   : > { %v6712_v48 = vmul.f32 %v6697_v57, %v6672_v18  ;;  %v6713_v10 = vmul.f32 %v6697_v57, %v6673_v59  ;;  %v6714_v61 = vmul.f32 %v6697_v57, %v6674_v17  ;;  %v6715_v15 = vmul.f32 %v6697_v57, %v6675_v14  ;;  %v16637_v18 = vld [vmem:[#allocation107_spill] sm:$0xff]  ;;  %v6923_v14 = vpop.f32.mrf.mxu1 }
 0x64a   : > { %v6716_v9 = vmul.f32 %v6697_v57, %v6676_v34  ;;  %v6733_v60 = vadd.f32 %v6701_v28, %v6629_v13  ;;  %v6734_v46 = vadd.f32 %v6702_v31, %v6630_v30  ;;  %v6735_v41 = vadd.f32 %v6703_v53, %v6631_v50  ;;  %v16638_v30 = vld [vmem:[#allocation43_spill] sm:$0xff]  ;;  %v16646_v34 = vld [vmem:[#allocation81_spill] sm:$0xff] }
 0x64b   : > { %v6736_v6 = vadd.f32 %v6704_v1, %v6632_v2  ;;  %v6737_v51 = vadd.f32 %v6705_v23, %v6633_v52  ;;  %v6738_v16 = vadd.f32 %v6706_v33, %v6634_v19  ;;  %v6739_v39 = vadd.f32 %v6707_v38, %v6635_v40  ;;  %v16639_v2 = vld [vmem:[#allocation50_spill] sm:$0xff]  ;;  %v16640_v19 = vld [vmem:[#allocation41_spill] sm:$0xff]  ;;  %v16648_v57 = vld [vmem:[#allocation87_spill] sm:$0xff] }
 0x64c   : > { %v6740_v22 = vadd.f32 %v6708_v47, %v6636_v26  ;;  %v6741_v55 = vadd.f32 %v6709_v5, %v6637_v21  ;;  %v6742_v11 = vadd.f32 %v6710_v56, %v6638_v62  ;;  %v6743_v63 = vadd.f32 %v6711_v32, %v6639_v27  ;;  %v16641_v26 = vld [vmem:[#allocation56_spill] sm:$0xff]  ;;  %v16642_v27 = vld [vmem:[#allocation55_spill] sm:$0xff]  ;;  %v16651_v31 = vld [vmem:[#allocation97_spill] sm:$0xff] }
 0x64d   : > { %v6744_v0 = vadd.f32 %v6712_v48, %v6640_v7  ;;  %v6745_v20 = vadd.f32 %v6713_v10, %v6641_v42  ;;  %v6746_v45 = vadd.f32 %v6714_v61, %v6642_v3  ;;  %v6747_v12 = vadd.f32 %v6715_v15, %v6643_v54  ;;  %v16643_v3 = vld [vmem:[#allocation48_spill] sm:$0xff]  ;;  %v16644_v54 = vld [vmem:[#allocation69_spill] sm:$0xff]  ;;  %v16649_v13 = vld [vmem:[#allocation95_spill] sm:$0xff] }
 0x64e   : > { %v6748_v49 = vadd.f32 %v6716_v9, %v6644_v29  ;;  %v6764_v37 = vadd.f32 %v6732_v25, %v6660_v36  ;;  %v6926_v24 = vmul.f32 %v16636_v44, %v6733_v60  ;;  %v6927_v59 = vmul.f32 %v16637_v18, %v6734_v46  ;;  %v16645_v36 = vld [vmem:[#allocation53_spill] sm:$0xff]  ;;  %v16650_v25 = vld [vmem:[#allocation76_spill] sm:$0xff]  ;;  %v16652_v23 = vld [vmem:[#allocation58_spill] sm:$0xff] }
 0x64f   : > { %v6928_v50 = vmul.f32 %v16638_v30, %v6735_v41  ;;  %v6929_v52 = vmul.f32 %v16639_v2, %v6736_v6  ;;  %v6930_v40 = vmul.f32 %v16640_v19, %v6737_v51  ;;  %v6931_v62 = vmul.f32 %v16641_v26, %v6738_v16  ;;  %v16653_v38 = vld [vmem:[#allocation66_spill] sm:$0xff]  ;;  %v16654_v5 = vld [vmem:[#allocation52_spill] sm:$0xff]  ;;  %v16655_v32 = vld [vmem:[#allocation83_spill] sm:$0xff] }
 0x650   : > { %6770 = vst [vmem:[#allocation2 - $0x5] sm:$0x80] %v6748_v49  ;;  %v6932_v7 = vmul.f32 %v16642_v27, %v6739_v39  ;;  %v6767_v42 = vrot.slane %v6764_v37, 7  ;;  %v6933_v21 = vmul.f32 %v16643_v3, %v6740_v22  ;;  %v6934_v29 = vmul.f32 %v16644_v54, %v6741_v55  ;;  %v16656_v10 = vld [vmem:[#allocation63_spill] sm:$0xff]  ;;  %v16657_v15 = vld [vmem:[#allocation36_spill] sm:$0xff]  ;;  %v16658_v60 = vld [vmem:[#allocation85_spill] sm:$0xff] }
 0x651   : > { %v6935_v17 = vmul.f32 %v16645_v36, %v6742_v11  ;;  %v6936_v35 = vmul.f32 %v16646_v34, %v6743_v63  ;;  %v6937_v4 = vmul.f32 %v16647_v43, %v6744_v0  ;;  %v6938_v58 = vmul.f32 %v16648_v57, %v6745_v20  ;;  %v16659_v41 = vld [vmem:[#allocation67_spill] sm:$0xff]  ;;  %v16660_v51 = vld [vmem:[#allocation37_spill] sm:$0xff]  ;;  %v16661_v39 = vld [vmem:[#allocation88_spill] sm:$0xff] }
 0x652   : > { %v6939_v8 = vmul.f32 %v16649_v13, %v6746_v45  ;;  %6771 = vst [vmem:[#allocation2 + $0x3] sm:$0x1] %v6767_v42  ;;  %v6940_v28 = vmul.f32 %v16650_v25, %v6747_v12  ;;  %v6941_v53 = vmul.f32 %v16651_v31, %v6748_v49  ;;  %v6957_v1 = vmul.f32 %v6923_v14, %v6764_v37  ;;  %v16662_v55 = vld [vmem:[#allocation75_spill] sm:$0xff]  ;;  %v16663_v63 = vld [vmem:[#allocation90_spill] sm:$0xff]  ;;  %v16664_v20 = vld [vmem:[#allocation104_spill] sm:$0xff] }
 0x653   : > { %v6958_v33 = vadd.f32 %v6926_v24, %v16652_v23  ;;  %v6959_v47 = vadd.f32 %v6927_v59, %v16653_v38  ;;  %v6960_v56 = vadd.f32 %v6928_v50, %v16654_v5  ;;  %v6961_v48 = vadd.f32 %v6929_v52, %v16655_v32  ;;  %v16665_v12 = vld [vmem:[#allocation94_spill] sm:$0xff]  ;;  %v16666_v24 = vld [vmem:[#allocation125_spill] sm:$0xff]  ;;  %v16667_v59 = vld [vmem:[#allocation111_spill] sm:$0xff]  ;;  %6992 = sbr.rel (%p7450_p8) target bundleno = 1628 (0x65c), region = 64 }
 0x654   : > { %v6962_v61 = vadd.f32 %v6930_v40, %v16656_v10  ;;  %v6963_v9 = vadd.f32 %v6931_v62, %v16657_v15  ;;  %v6964_v46 = vadd.f32 %v6932_v7, %v16658_v60  ;;  %v6965_v6 = vadd.f32 %v6933_v21, %v16659_v41  ;;  %v16668_v50 = vld [vmem:[#allocation123_spill] sm:$0xff] }
 0x655   : > { %v6966_v16 = vadd.f32 %v6934_v29, %v16660_v51  ;;  %v6967_v22 = vadd.f32 %v6935_v17, %v16661_v39  ;;  %v6968_v11 = vadd.f32 %v6936_v35, %v16662_v55  ;;  %v6969_v0 = vadd.f32 %v6937_v4, %v16663_v63 }
 0x656   : > { %v6970_v45 = vadd.f32 %v6938_v58, %v16664_v20  ;;  %v6971_v44 = vadd.f32 %v6939_v8, %v16665_v12  ;;  %v6972_v18 = vadd.f32 %v6940_v28, %v16666_v24  ;;  %v6973_v30 = vadd.f32 %v6941_v53, %v16667_v59 }
 0x657   : > { %v6989_v2 = vadd.f32 %v6957_v1, %v16668_v50 }
 0x658   : > { %v16669_v52 = vld [vmem:[#allocation96_spill] sm:$0xff]  ;;  %v16670_v19 = vld [vmem:[#allocation91_spill] sm:$0xff]  ;;  %6995 = vst [vmem:[%s8783_s10 - $0x6] sm:$0x80] %v6748_v49 }
 0x659   : > { %6993 = vst [vmem:[%s8781_s12 - $0x6] sm:$0x80] %v16669_v52 }
 0x65a   : > { %6994 = vst [vmem:[%s8781_s12 - $0x4] sm:$0x80] %v16670_v19 }
 0x65b   : > { %6996 = vst [vmem:[%s8783_s10 - $0x4] sm:$0x80] %v6764_v37 }
 0x65c PF: > { %6997 = vst [vmem:[%s8779_s18] sm:$0xff] %v6958_v33  ;;  %s7034_s15 = sand.u32 1, %s8632_s8   ;;  %v16671_v49 = vld [vmem:[#allocation100_spill] sm:$0xff]  ;;  %v16672_v37 = vld [vmem:[#allocation102_spill] sm:$0xff]  ;;  %v16675_v62 = vld [vmem:[#allocation109_spill] sm:$0xff]  ;;  %s7030_s21 = scalar_lea.sflag [#allocation5], %s8768_s14 }
 0x65d   : > { %6998 = vst [vmem:[%s8779_s18 + $0x8] sm:$0xff] %v6959_v47  ;;  %v16673_v40 = vld [vmem:[#allocation106_spill] sm:$0xff]  ;;  %v16676_v27 = vld [vmem:[#allocation116_spill] sm:$0xff]  ;;  %v16678_v42 = vld [vmem:[#allocation117_spill] sm:$0xff]  ;;  %s15453_s23 = scalar_lea.sflag [#allocation13], %s7034_s15 }
 0x65e   : > { %6999 = vst [vmem:[%s8779_s18 + $0x10] sm:$0xff] %v6960_v56  ;;  %v16674_v26 = vld [vmem:[#allocation110_spill] sm:$0xff]  ;;  %v16679_v3 = vld [vmem:[#allocation103_spill] sm:$0xff]  ;;  %v16681_v54 = vld [vmem:[#allocation108_spill] sm:$0xff] }
 0x65f   : > { %7000 = vst [vmem:[%s8779_s18 + $0x18] sm:$0xff] %v6961_v48  ;;  %v16677_v7 = vld [vmem:[#allocation114_spill] sm:$0xff]  ;;  %v16682_v29 = vld [vmem:[#allocation35_spill] sm:$0xff]  ;;  %v16683_v36 = vld [vmem:[#allocation112_spill] sm:$0xff] }
 0x660   : > { %7001 = vst [vmem:[%s8779_s18 + $0x20] sm:$0xff] %v6962_v61  ;;  %v16680_v21 = vld [vmem:[#allocation126_spill] sm:$0xff]  ;;  %v16684_v17 = vld [vmem:[#allocation68_spill] sm:$0xff] }
 0x661   : > { %7002 = vst [vmem:[%s8779_s18 + $0x28] sm:$0xff] %v6963_v9  ;;  %v16685_v14 = vld [vmem:[#allocation40_spill] sm:$0xff] }
 0x662   : > { %7003 = vst [vmem:[%s8779_s18 + $0x30] sm:$0xff] %v6964_v46 }
 0x663   : > { %7004 = vst [vmem:[%s8779_s18 + $0x38] sm:$0xff] %v6965_v6 }
 0x664   : > { %7005 = vst [vmem:[%s8779_s18 + $0x40] sm:$0xff] %v6966_v16 }
 0x665   : > { %7006 = vst [vmem:[%s8779_s18 + $0x48] sm:$0xff] %v6967_v22 }
 0x666   : > { %7007 = vst [vmem:[%s8779_s18 + $0x50] sm:$0xff] %v6968_v11 }
 0x667   : > { %7008 = vst [vmem:[%s8779_s18 + $0x58] sm:$0xff] %v6969_v0 }
 0x668   : > { %7009 = vst [vmem:[%s8779_s18 + $0x60] sm:$0xff] %v6970_v45 }
 0x669   : > { %7010 = vst [vmem:[%s8779_s18 + $0x68] sm:$0xff] %v6971_v44 }
 0x66a   : > { %7011 = vst [vmem:[%s8779_s18 + $0x70] sm:$0xff] %v6972_v18 }
 0x66b   : > { %7012 = vst [vmem:[%s8779_s18 + $0x78] sm:$0xff] %v6973_v30 }
 0x66c   : > { %7013 = vst [vmem:[%s8779_s18 + $0x80] sm:$0xff] %v16671_v49 }
 0x66d   : > { %7014 = vst [vmem:[%s8779_s18 + $0x88] sm:$0xff] %v16672_v37 }
 0x66e   : > { %7015 = vst [vmem:[%s8779_s18 + $0x90] sm:$0xff] %v16673_v40 }
 0x66f   : > { %7016 = vst [vmem:[%s8779_s18 + $0x98] sm:$0xff] %v16674_v26 }
 0x670   : > { %7017 = vst [vmem:[%s8779_s18 + $0xa0] sm:$0xff] %v16675_v62 }
 0x671   : > { %7018 = vst [vmem:[%s8779_s18 + $0xa8] sm:$0xff] %v16676_v27 }
 0x672   : > { %7019 = vst [vmem:[%s8779_s18 + $0xb0] sm:$0xff] %v16677_v7 }
 0x673   : > { %7020 = vst [vmem:[%s8779_s18 + $0xb8] sm:$0xff] %v16678_v42 }
 0x674   : > { %7021 = vst [vmem:[%s8779_s18 + $0xc0] sm:$0xff] %v16679_v3 }
 0x675   : > { %7022 = vst [vmem:[%s8779_s18 + $0xc8] sm:$0xff] %v16680_v21 }
 0x676   : > { %7023 = vst [vmem:[%s8779_s18 + $0xd0] sm:$0xff] %v16681_v54 }
 0x677   : > { %7024 = vst [vmem:[%s8779_s18 + $0xd8] sm:$0xff] %v16682_v29 }
 0x678   : > { %7025 = vst [vmem:[%s8779_s18 + $0xe0] sm:$0xff] %v16683_v36 }
 0x679   : > { %7026 = vst [vmem:[%s8779_s18 + $0xe8] sm:$0xff] %v16684_v17 }
 0x67a   : > { %7027 = vst [vmem:[%s8779_s18 + $0xf0] sm:$0xff] %v16685_v14 }
 0x67b   : > { %7028 = vst [vmem:[%s8779_s18 + $0xf8] sm:$0xff] %v6989_v2 }
 0x67c   : > { %s7584_s11 = sshll.u32 %s8500_s27, 4  ;;  %s7642_s1 = sshll.u32 %s8504_s28, 6 }
 0x67d   : > { %s7052_s9 = sadd.s32 %s7642_s1, %s7584_s11  ;;  %s7065_s20 = sshll.u32 %s8779_s18, 4  ;;  %s7066_s20 = int_to_ptr.vmem [resolvable:$true] %s7065_s20 }
 0x67e   : > { %s7586_s13 = sshll.u32 %s7052_s9, 3  ;;  %s16687_s8 = sld [smem:[#allocation131_spill]] }
 0x67f   : > { %s8532_s4 = smov 2048   ;;  %s8533_s16 = smov 4096  }
 0x680   : > { %7682 = sst [smem:[#allocation18]] (%p8664_p9), %s8532_s4  ;;  %s8534_s27 = smov 16  }
 0x681   : > { %7683 = sst [smem:[#allocation18 + $0x1]] (%p8664_p9), %s8533_s16  ;;  %s8535_s19 = smov 128  }
 0x682   : > { %7684 = sst [smem:[#allocation18 + $0x2]] (%p8664_p9), %s8534_s27  ;;  %s8536_s18 = smov 8  }
 0x683   : > { %7685 = sst [smem:[#allocation18 + $0x3]] (%p8664_p9), %s8535_s19  ;;  %s8537_s15 = smov [#allocation17]  }
 0x684   : > { %s7054_s17 = scalar_lea.hbm %s16687_s8, %s7586_s13  ;;  %7686 = sst [smem:[#allocation18 + $0x4]] (%p8664_p9), %s8535_s19 }
 0x685   : > { %s7067_s6 = sshll.u32 %s7054_s17, 4  ;;  %7687 = sst [smem:[#allocation18 + $0x5]] (%p8664_p9), %s8536_s18  ;;  %s7068_s6 = int_to_ptr.hbm [resolvable:$true] %s7067_s6 }
 0x686   : > { %s8538_s11 = smov 0   ;;  %s7643_s9 = sshll.u32 %s8504_s28, 2 }
 0x687   : > { %7688 = dma.general (%p8664_p9), %s7066_s20, 4096, %s7068_s6, %s7030_s21, %s8537_s15, [#allocation18], %s8538_s11, 0  }
 0x688   : > { %s7095_s13 = sshll.u32 %s8781_s12, 4  ;;  %s16689_s8 = sld [smem:[#allocation132_spill]]  ;;  %s7096_s13 = int_to_ptr.vmem [resolvable:$true] %s7095_s13 }
 0x68e   : > { %s7094_s17 = scalar_lea.hbm %s16689_s8, %s7643_s9  ;;  %s8374_s20 = scalar_lea.hbm %s16689_s8, 8 }
 0x68f   : > { %s7097_s4 = sshll.u32 %s7094_s17, 4  ;;  %s7098_s4 = int_to_ptr.hbm [resolvable:$true] %s7097_s4 }
 0x690   : > { %s8368_s16 = sshra.s32 %s7098_s4, 4  ;;  %s8369_s16 = int_to_ptr.hbm [resolvable:$true] %s8368_s16 }
 0x691   : > { %s8370_s27 = scalar_lea.hbm %s8369_s16, 4  ;;  %p8375_p9 = scmp.lt.s32.totalorder %s8369_s16, %s16689_s8 }
 0x692   : > { %p8371_p13 = scmp.ne.s32.totalorder %s8369_s16, %s8370_s27  ;;  %p8376_p10 = scmp.lt.s32.totalorder %s8374_s20, %s8370_s27 }
 0x694   : > { %p8372_p7 = pnand %p8371_p13, %p8693_p1  ;;  %p8377_p6 = por %p8376_p10, %p8375_p9 }
 0x696   : > { %p8373_p11 = pneg %p8372_p7 }
 0x698   : > { %p8378_p12 = pnand %p8377_p6, %p8373_p11 }
 0x69a   : > { %8381 = shalt.err (!%p8378_p12)
}
 0x69b   : > { %s8539_s6 = smov 32   ;;  %s8540_s19 = smov 2  }
 0x69c   : > { %7689 = dma.vmem_to_hbm [thread:$0]  (%p8693_p1), %s7096_s13, 64, %s7098_s4, %s15453_s23, %s8539_s6, %s8539_s6, %s8540_s19  }
 0x69d   : > { %s16690_s11 = sld [smem:[#allocation133_spill]]  ;;  %s7112_s14 = sshll.u32 %s8783_s10, 4  ;;  %s7113_s14 = int_to_ptr.vmem [resolvable:$true] %s7112_s14 }
 0x6a3   : > { %s7111_s5 = scalar_lea.hbm %s16690_s11, %s7643_s9  ;;  %s8402_s20 = scalar_lea.hbm %s16690_s11, 8 }
 0x6a4   : > { %s7114_s17 = sshll.u32 %s7111_s5, 4  ;;  %s7115_s17 = int_to_ptr.hbm [resolvable:$true] %s7114_s17 }
 0x6a5   : > { %s8396_s16 = sshra.s32 %s7115_s17, 4  ;;  %s8397_s16 = int_to_ptr.hbm [resolvable:$true] %s8396_s16 }
 0x6a6   : > { %s8398_s27 = scalar_lea.hbm %s8397_s16, 4  ;;  %p8403_p3 = scmp.lt.s32.totalorder %s8397_s16, %s16690_s11 }
 0x6a7   : > { %p8399_p0 = scmp.ne.s32.totalorder %s8397_s16, %s8398_s27  ;;  %p8404_p8 = scmp.lt.s32.totalorder %s8402_s20, %s8398_s27 }
 0x6a9   : > { %p8400_p2 = pnand %p8399_p0, %p8693_p1  ;;  %p8405_p13 = por %p8404_p8, %p8403_p3 }
 0x6ab   : > { %p8401_p4 = pneg %p8400_p2 }
 0x6ad   : > { %p8406_p7 = pnand %p8405_p13, %p8401_p4 }
 0x6af   : > { %8409 = shalt.err (!%p8406_p7)
}
 0x6b0   : > { %7690 = dma.vmem_to_hbm [thread:$0]  (%p8693_p1), %s7113_s14, 64, %s7115_s17, %s15453_s23, %s8539_s6, %s8539_s6, %s8540_s19  }
 0x6b1 PF: > { %s16691_s10 = sld [smem:[#allocation26_spill]]  ;;  %p7720_p11 = scmp.ge.s32.totalorder %s8516_s7, 2 }
 0x6b2   : > { %s16692_s9 = sld [smem:[#allocation30_spill]] }
 0x6b7   : > { %s7129_s28 = sand.u32 1, %s16691_s10  }
 0x6b8   : > { %p16693_p9 = scmp.ne.s32.totalorder %s16692_s9, 0  ;;  %s7130_s12 = scalar_lea.sflag [#allocation5], %s7129_s28 }
 0x6ba   : > { %p7705_p10 = pnand %p7720_p11, %p16693_p9 }
 0x6bc   : > { %p7706_p6 = pneg %p7705_p10 }
 0x6be   : > { %8467 = dma.done.wait (%p7706_p6), %s7130_s12, 4096  }
 0x6bf   : > { %8469 = vsyncadd (%p7706_p6), %s7130_s12, 4294963200  ;;  %s16694_s18 = sadd.s32 4294967294, %s8516_s7   ;;  %p7708_p12 = pnand %p7720_p11, %p8703_p5 }
 0x6c0   : > { %s7139_s5 = sand.u32 1, %s16694_s18  }
 0x6c1   : > { %p7709_p0 = pneg %p7708_p12  ;;  %s7140_s23 = scalar_lea.sflag [#allocation13], %s7139_s5 }
 0x6c3   : > { %8471 = dma.done.wait (%p7709_p0), %s7140_s23, 128  }
 0x6c4   : > { %8473 = vsyncadd (%p7709_p0), %s7140_s23, 4294967168  ;;  %s28_s7 = sadd.s32 1, %s8516_s7   ;;  %s16696_s1 = sld [smem:[#allocation25_spill]] }
 0x6c5   : > { %p25_p1 = scmp.ge.s32.totalorder %s28_s7, 6   ;;  %s16697_s23 = sld [smem:[#allocation32_spill]] }
 0x6c6   : > { %s16698_s6 = sld [smem:[#allocation31_spill]]  ;;  %s16701_s21 = smov %s8480_s22 }
 0x6c7   : > { %s16699_s19 = sld [smem:[#allocation27_spill]]  ;;  %s16703_s24 = smov %s8492_s25 }
 0x6c8   : > { %s16700_s14 = sld [smem:[#allocation28_spill]]  ;;  %s16704_s25 = smov %s8496_s26 }
 0x6c9   : > { %s16706_s27 = smov %s8508_s29  ;;  %s16707_s28 = smov %s8512_s30 }
 0x6ca   : > { %s16702_s22 = smov %s16696_s1  ;;  %27 = sbr.rel (!%p25_p1) target bundleno = 18 (0x12), region = 151 }
 0x6cc   : > { %s16705_s26 = smov %s16698_s6 }
 0x6cd   : > { %s16708_s29 = smov %s16699_s19 }
 0x6ce   : > { %s16709_s30 = smov %s16700_s14 }
 0x6cf   :  { %7156 = vsyncpa [#allocation4], 1 }
 0x6d0   :  { %7158 = vsyncpa [#allocation4 + $0x1], 1 }
 0x6d1   :  { %7159 = vsyncpa [#allocation7], 1 }
 0x6d2   :  { %7160 = vsyncpa [#allocation10], 1 }
 0x6d3   :  { %7162 = vsyncpa [#allocation10 + $0x1], 1 }
 0x6d4   :  { %7163 = vsyncpa [#allocation5], 1 }
 0x6d5   :  { %7165 = vsyncpa [#allocation5 + $0x1], 1 }
 0x6d6   :  { %7166 = vsyncpa [#allocation13], 1 }
 0x6d7   :  { %7168 = vsyncpa [#allocation13 + $0x1], 1 }

</bundles_post_ra>
